<compile_context>
chip_gen: v7x
topology: tpu7x:2x2x1
jax: 0.10.0
libtpu: 0.0.40
codegen_flags: <defaults>
</compile_context>

<pallas_src>
import functools

import jax
import jax.numpy as jnp
from jax.experimental import pallas as pl
from jax.experimental.pallas import tpu as pltpu

F32 = jnp.float32
BF16 = jnp.bfloat16
NEG_INF = -1e9
LN_EPS = 1e-5
VMEM_LIMIT = 64 * 1024 * 1024   # <= v7x physical VMEM; plenty of headroom on v5e/v6e


# --------------------------- fused attention kernels ---------------------------

def _self_attn_layer_kernel(x_ref, wq_ref, wk_ref, wv_ref, bq_ref, bk_ref, bv_ref,
                            rel_ref, wo_ref, bo_ref, g_ref, be_ref,
                            o_ref, acc_ref, *, k_clip, scale):
    """One (batch, head) step: QKV proj + causal attn + Wo accum (+ LN at last head)."""
    h_idx = pl.program_id(1)

    @pl.when(h_idx == 0)
    def _():
        acc_ref[...] = jnp.zeros_like(acc_ref)

    x = x_ref[0]                                        # [S, D] f32 (also the residual)
    xb = x.astype(BF16)
    S = x.shape[0]

    q = (jnp.dot(xb, wq_ref[0], preferred_element_type=jnp.float32) + bq_ref[0]) * scale
    k = jnp.dot(xb, wk_ref[0], preferred_element_type=jnp.float32) + bk_ref[0]
    v = (jnp.dot(xb, wv_ref[0], preferred_element_type=jnp.float32) + bv_ref[0]).astype(BF16)
    qb = q.astype(BF16)
    kb = k.astype(BF16)

    # QK^T and q @ rel_k^T via dot_general contracting the dh axes (no transposes).
    scores = jax.lax.dot_general(qb, kb, (((1,), (1,)), ((), ())),
                                 preferred_element_type=jnp.float32)          # [S, S]
    qr = jax.lax.dot_general(qb, rel_ref[...], (((1,), (1,)), ((), ())),
                             preferred_element_type=jnp.float32)              # [S, R]

    i_idx = jax.lax.broadcasted_iota(jnp.int32, (S, S), 0)
    j_idx = jax.lax.broadcasted_iota(jnp.int32, (S, S), 1)
    rel_idx = jnp.clip(j_idx - i_idx, -k_clip, k_clip) + k_clip
    # Causal: only r <= k_clip can ever be unmasked, so build half the bias.
    # TODO(synk): strided pltpu.roll skew trick for large k_clip (XLU slot).
    for r in range(k_clip + 1):
        scores = scores + jnp.where(rel_idx == r, qr[:, r:r + 1], 0.0)
    scores = jnp.where(j_idx > i_idx, NEG_INF, scores)

    m = jnp.max(scores, axis=-1, keepdims=True)
    e = jnp.exp(scores - m)
    p = e * pl.reciprocal(jnp.sum(e, axis=-1, keepdims=True), approx=True)

    ctx = jnp.dot(p.astype(BF16), v, preferred_element_type=jnp.float32)      # [S, dh]
    acc_ref[...] += jnp.dot(ctx.astype(BF16), wo_ref[0],
                            preferred_element_type=jnp.float32)               # [S, D]

    @pl.when(h_idx == pl.num_programs(1) - 1)
    def _():
        y = acc_ref[...] + bo_ref[...] + x
        mean = jnp.mean(y, axis=-1, keepdims=True)
        var = jnp.mean(jnp.square(y - mean), axis=-1, keepdims=True)
        o_ref[0] = (y - mean) * jax.lax.rsqrt(var + LN_EPS) * g_ref[...] + be_ref[...]


def _cross_attn_layer_kernel(x_ref, c_ref, wq_ref, wk_ref, wv_ref, bq_ref, bk_ref,
                             bv_ref, rel_ref, mb_ref, wo_ref, bo_ref, g_ref, be_ref,
                             o_ref, *rest, k_clip, scale, return_weights):
    """One (batch, head) step of cross-attention; optionally streams out attn probs."""
    if return_weights:
        w_ref, acc_ref = rest
    else:
        (acc_ref,) = rest
    h_idx = pl.program_id(1)

    @pl.when(h_idx == 0)
    def _():
        acc_ref[...] = jnp.zeros_like(acc_ref)

    x = x_ref[0]                                        # [S, D] f32 (residual source)
    xb = x.astype(BF16)
    cb = c_ref[0].astype(BF16)                          # [Skv, D]
    S = x.shape[0]
    Skv = cb.shape[0]
    R = 2 * k_clip + 1

    q = (jnp.dot(xb, wq_ref[0], preferred_element_type=jnp.float32) + bq_ref[0]) * scale
    k = jnp.dot(cb, wk_ref[0], preferred_element_type=jnp.float32) + bk_ref[0]
    v = (jnp.dot(cb, wv_ref[0], preferred_element_type=jnp.float32) + bv_ref[0]).astype(BF16)
    qb = q.astype(BF16)
    kb = k.astype(BF16)

    scores = jax.lax.dot_general(qb, kb, (((1,), (1,)), ((), ())),
                                 preferred_element_type=jnp.float32)          # [S, Skv]
    qr = jax.lax.dot_general(qb, rel_ref[...], (((1,), (1,)), ((), ())),
                             preferred_element_type=jnp.float32)              # [S, R]

    i_idx = jax.lax.broadcasted_iota(jnp.int32, (S, Skv), 0)
    j_idx = jax.lax.broadcasted_iota(jnp.int32, (S, Skv), 1)
    rel_idx = jnp.clip(j_idx - i_idx, -k_clip, k_clip) + k_clip
    # TODO(synk): strided pltpu.roll skew trick for large k_clip (XLU slot).
    for r in range(R):
        scores = scores + jnp.where(rel_idx == r, qr[:, r:r + 1], 0.0)
    scores = scores + mb_ref[0]                         # [1, Skv] additive padding bias

    m = jnp.max(scores, axis=-1, keepdims=True)
    e = jnp.exp(scores - m)
    l = jnp.sum(e, axis=-1, keepdims=True)
    if return_weights:
        p = e / l                                       # exact: exposed as module output
        w_ref[0, 0] = p
    else:
        p = e * pl.reciprocal(l, approx=True)

    ctx = jnp.dot(p.astype(BF16), v, preferred_element_type=jnp.float32)      # [S, dh]
    acc_ref[...] += jnp.dot(ctx.astype(BF16), wo_ref[0],
                            preferred_element_type=jnp.float32)               # [S, D]

    @pl.when(h_idx == pl.num_programs(1) - 1)
    def _():
        y = acc_ref[...] + bo_ref[...] + x
        mean = jnp.mean(y, axis=-1, keepdims=True)
        var = jnp.mean(jnp.square(y - mean), axis=-1, keepdims=True)
        o_ref[0] = (y - mean) * jax.lax.rsqrt(var + LN_EPS) * g_ref[...] + be_ref[...]


# ------------------------------- fused FFN kernel -------------------------------

def _ffn_res_ln_kernel(x_ref, w1_ref, b1_ref, w2_ref, b2_ref, g_ref, be_ref,
                       o_ref, acc_ref):
    """dff-K-looped FFN: relu(x@W1_blk+b1_blk)@W2_blk accumulated, then +res, LN."""
    kf = pl.program_id(1)

    @pl.when(kf == 0)
    def _():
        acc_ref[...] = jnp.zeros_like(acc_ref)

    xb = x_ref[...].astype(BF16)
    h = jnp.maximum(
        jnp.dot(xb, w1_ref[...], preferred_element_type=jnp.float32) + b1_ref[...],
        0.0)
    acc_ref[...] += jnp.dot(h.astype(BF16), w2_ref[...],
                            preferred_element_type=jnp.float32)

    @pl.when(kf == pl.num_programs(1) - 1)
    def _():
        y = acc_ref[...] + b2_ref[...] + x_ref[...]
        mean = jnp.mean(y, axis=-1, keepdims=True)
        var = jnp.mean(jnp.square(y - mean), axis=-1, keepdims=True)
        o_ref[...] = (y - mean) * jax.lax.rsqrt(var + LN_EPS) * g_ref[...] + be_ref[...]


# --------------------------------- sub-layer wrappers ---------------------------------

def self_attn_layer(x, p, *, num_heads, k_clip):
    B, S, D = x.shape
    dh = D // num_heads
    R = 2 * k_clip + 1
    scale = 1.0 / (dh ** 0.5)
    kern = functools.partial(_self_attn_layer_kernel, k_clip=k_clip, scale=scale)
    bmap = lambda b, h: (b, 0, 0)
    hmap = lambda b, h: (h, 0, 0)
    c2 = lambda b, h: (0, 0)
    return pl.pallas_call(
        kern,
        out_shape=jax.ShapeDtypeStruct((B, S, D), F32),
        grid=(B, num_heads),
        in_specs=[pl.BlockSpec((1, S, D), bmap),       # x (residual + q/k/v source)
                  pl.BlockSpec((1, D, dh), hmap),      # Wq per head (bf16)
                  pl.BlockSpec((1, D, dh), hmap),      # Wk per head
                  pl.BlockSpec((1, D, dh), hmap),      # Wv per head
                  pl.BlockSpec((1, 1, dh), hmap),      # bq per head
                  pl.BlockSpec((1, 1, dh), hmap),      # bk per head
                  pl.BlockSpec((1, 1, dh), hmap),      # bv per head
                  pl.BlockSpec((R, dh), c2),           # relative-key table (bf16)
                  pl.BlockSpec((1, dh, D), hmap),      # Wo rows for this head (bf16)
                  pl.BlockSpec((1, D), c2),            # bo
                  pl.BlockSpec((1, D), c2),            # LN gamma
                  pl.BlockSpec((1, D), c2)],           # LN beta
        out_specs=pl.BlockSpec((1, S, D), bmap),
        scratch_shapes=[pltpu.VMEM((S, D), F32)],
        compiler_params=pltpu.CompilerParams(
            dimension_semantics=("parallel", "arbitrary"),
            vmem_limit_bytes=VMEM_LIMIT),
    )(x, p['wq'], p['wk'], p['wv'], p['bq'], p['bk'], p['bv'],
      p['rel_k'], p['wo'], p['bo'], p['ln_g'], p['ln_b'])


def cross_attn_layer(x, context, p, mask_bias, *, num_heads, k_clip, return_weights):
    B, S, D = x.shape
    Skv = context.shape[1]
    dh = D // num_heads
    R = 2 * k_clip + 1
    scale = 1.0 / (dh ** 0.5)
    kern = functools.partial(_cross_attn_layer_kernel, k_clip=k_clip, scale=scale,
                             return_weights=return_weights)
    bmap = lambda b, h: (b, 0, 0)
    hmap = lambda b, h: (h, 0, 0)
    c2 = lambda b, h: (0, 0)
    in_specs = [pl.BlockSpec((1, S, D), bmap),         # x (residual + q source)
                pl.BlockSpec((1, Skv, D), bmap),       # encoder context (k/v source)
                pl.BlockSpec((1, D, dh), hmap),        # Wq
                pl.BlockSpec((1, D, dh), hmap),        # Wk
                pl.BlockSpec((1, D, dh), hmap),        # Wv
                pl.BlockSpec((1, 1, dh), hmap),        # bq
                pl.BlockSpec((1, 1, dh), hmap),        # bk
                pl.BlockSpec((1, 1, dh), hmap),        # bv
                pl.BlockSpec((R, dh), c2),             # relative-key table
                pl.BlockSpec((1, 1, Skv), bmap),       # additive padding-mask bias
                pl.BlockSpec((1, dh, D), hmap),        # Wo rows for this head
                pl.BlockSpec((1, D), c2),              # bo
                pl.BlockSpec((1, D), c2),              # LN gamma
                pl.BlockSpec((1, D), c2)]              # LN beta
    args = (x, context, p['wq'], p['wk'], p['wv'], p['bq'], p['bk'], p['bv'],
            p['rel_k'], mask_bias, p['wo'], p['bo'], p['ln_g'], p['ln_b'])
    cp = pltpu.CompilerParams(dimension_semantics=("parallel", "arbitrary"),
                              vmem_limit_bytes=VMEM_LIMIT)
    scratch = [pltpu.VMEM((S, D), F32)]
    if return_weights:
        y, w = pl.pallas_call(
            kern,
            out_shape=(jax.ShapeDtypeStruct((B, S, D), F32),
                       jax.ShapeDtypeStruct((B, num_heads, S, Skv), F32)),
            grid=(B, num_heads),
            in_specs=in_specs,
            out_specs=(pl.BlockSpec((1, S, D), bmap),
                       pl.BlockSpec((1, 1, S, Skv), lambda b, h: (b, h, 0, 0))),
            scratch_shapes=scratch,
            compiler_params=cp,
        )(*args)
        return y, w
    y = pl.pallas_call(
        kern,
        out_shape=jax.ShapeDtypeStruct((B, S, D), F32),
        grid=(B, num_heads),
        in_specs=in_specs,
        out_specs=pl.BlockSpec((1, S, D), bmap),
        scratch_shapes=scratch,
        compiler_params=cp,
    )(*args)
    return y, None


def ffn_layer(x, p):
    B, S, D = x.shape
    M = B * S
    dff = p['w1'].shape[1]
    tm = M if M <= 512 else 512
    tkf = dff if dff <= 512 else 512
    out = pl.pallas_call(
        _ffn_res_ln_kernel,
        out_shape=jax.ShapeDtypeStruct((M, D), F32),
        grid=(pl.cdiv(M, tm), pl.cdiv(dff, tkf)),
        in_specs=[pl.BlockSpec((tm, D), lambda i, kf: (i, 0)),
                  pl.BlockSpec((D, tkf), lambda i, kf: (0, kf)),
                  pl.BlockSpec((1, tkf), lambda i, kf: (0, kf)),
                  pl.BlockSpec((tkf, D), lambda i, kf: (kf, 0)),
                  pl.BlockSpec((1, D), lambda i, kf: (0, 0)),
                  pl.BlockSpec((1, D), lambda i, kf: (0, 0)),
                  pl.BlockSpec((1, D), lambda i, kf: (0, 0))],
        out_specs=pl.BlockSpec((tm, D), lambda i, kf: (i, 0)),
        scratch_shapes=[pltpu.VMEM((tm, D), F32)],
        compiler_params=pltpu.CompilerParams(
            dimension_semantics=("parallel", "arbitrary"),
            vmem_limit_bytes=VMEM_LIMIT),
    )(x.reshape(M, D), p['w1'], p['b1'], p['w2'], p['b2'], p['ln_g'], p['ln_b'])
    return out.reshape(B, S, D)


# ------------------------------- model forward -------------------------------

def decoder_stacks_forward(params, x_ids, context, mask=None, *, num_heads, k_clip):
    # TODO(synk): embedding gather left to XLA (data-dependent HBM gather).
    x = params['embedding'][x_ids]                    # [B,S,D]; dropout p=0 -> identity
    B, Skv, _ = context.shape
    if mask is None:
        mask_bias = jnp.zeros((B, 1, Skv), F32)
    else:
        # TODO(synk): reference mask axis convention ([B, seq]) is ambiguous for
        # cross-attention; here it masks key (padding) positions of the context.
        mask_bias = jnp.where(mask == 0, NEG_INF, 0.0).astype(F32).reshape(B, 1, Skv)
    n_layers = len(params['layers'])
    attn_w = None
    for li, lp in enumerate(params['layers']):
        x = self_attn_layer(x, lp['self'], num_heads=num_heads, k_clip=k_clip)
        x, w = cross_attn_layer(x, context, lp['cross'], mask_bias,
                                num_heads=num_heads, k_clip=k_clip,
                                return_weights=(li == n_layers - 1))
        if w is not None:
            attn_w = w
        x = ffn_layer(x, lp['ffn'])
    return x, attn_w                                  # attn_w = last-layer cross-attn probs


# --------------------------------- param init ---------------------------------

def init_params(key, *, vocab_size, d_model, num_heads, k_clip, dff, N, padding_idx=0):
    H = num_heads
    dh = d_model // H
    R = 2 * k_clip + 1
    keys = jax.random.split(key, 1 + N)

    emb = jax.random.normal(keys[0], (vocab_size, d_model), F32) * 0.02
    emb = emb.at[padding_idx].set(0.0)

    def attn_params(kk):
        ks = jax.random.split(kk, 5)

        def head_w(k_):
            return (jax.random.normal(k_, (H, d_model, dh), F32) * 0.02).astype(BF16)

        return dict(
            wq=head_w(ks[0]), wk=head_w(ks[1]), wv=head_w(ks[2]),
            bq=jnp.zeros((H, 1, dh), F32), bk=jnp.zeros((H, 1, dh), F32),
            bv=jnp.zeros((H, 1, dh), F32),
            wo=(jax.random.normal(ks[3], (H, dh, d_model), F32) * 0.02).astype(BF16),
            bo=jnp.zeros((1, d_model), F32),
            rel_k=(jax.random.normal(ks[4], (R, dh), F32) * 0.02).astype(BF16),
            ln_g=jnp.ones((1, d_model), F32), ln_b=jnp.zeros((1, d_model), F32))

    def ffn_params(kk):
        ks = jax.random.split(kk, 2)
        return dict(
            w1=(jax.random.normal(ks[0], (d_model, dff), F32) * 0.02).astype(BF16),
            b1=jnp.zeros((1, dff), F32),
            w2=(jax.random.normal(ks[1], (dff, d_model), F32) * 0.02).astype(BF16),
            b2=jnp.zeros((1, d_model), F32),
            ln_g=jnp.ones((1, d_model), F32), ln_b=jnp.zeros((1, d_model), F32))

    layers = []
    for n in range(N):
        ks = jax.random.split(keys[1 + n], 3)
        layers.append(dict(self=attn_params(ks[0]),
                           cross=attn_params(ks[1]),
                           ffn=ffn_params(ks[2])))
    return dict(embedding=emb, layers=layers)


# --------------------------------- main ---------------------------------

if __name__ == "__main__":
    B, S, SKV = 2, 8, 8
    D_MODEL, NUM_HEADS, K_CLIP, DFF, N_LAYERS, VOCAB = 32, 4, 4, 64, 2, 50

    key = jax.random.PRNGKey(0)
    kp, kx, kc = jax.random.split(key, 3)

    params = init_params(kp, vocab_size=VOCAB, d_model=D_MODEL,
                         num_heads=NUM_HEADS, k_clip=K_CLIP, dff=DFF,
                         N=N_LAYERS, padding_idx=0)
    x_ids = jax.random.randint(kx, (B, S), 1, VOCAB)          # [batch, seq]
    context = jax.random.normal(kc, (B, SKV, D_MODEL), F32)   # [batch, ctx, d_model]

    fwd = jax.jit(functools.partial(decoder_stacks_forward,
                                    num_heads=NUM_HEADS, k_clip=K_CLIP))
    out, attn_w = fwd(params, x_ids, context, None)
    out = jax.block_until_ready(out)
    attn_w = jax.block_until_ready(attn_w)

    assert out.shape == (B, S, D_MODEL)
    assert attn_w.shape == (B, NUM_HEADS, S, SKV)
    assert bool(jnp.all(jnp.isfinite(out)))
    assert bool(jnp.all(jnp.isfinite(attn_w)))
    print("KERNEL_OK")
</pallas_src>

<mosaic_0001>
module attributes {stable_mosaic.version = 11 : i64} {
  func.func @_self_attn_layer_kernel(%arg0: i32, %arg1: i32, %arg2: memref<1x8x32xf32, #tpu.memory_space<vmem>>, %arg3: memref<1x32x8xbf16, #tpu.memory_space<vmem>>, %arg4: memref<1x32x8xbf16, #tpu.memory_space<vmem>>, %arg5: memref<1x32x8xbf16, #tpu.memory_space<vmem>>, %arg6: memref<1x1x8xf32, #tpu.memory_space<vmem>>, %arg7: memref<1x1x8xf32, #tpu.memory_space<vmem>>, %arg8: memref<1x1x8xf32, #tpu.memory_space<vmem>>, %arg9: memref<9x8xbf16, #tpu.memory_space<vmem>>, %arg10: memref<1x8x32xbf16, #tpu.memory_space<vmem>>, %arg11: memref<1x32xf32, #tpu.memory_space<vmem>>, %arg12: memref<1x32xf32, #tpu.memory_space<vmem>>, %arg13: memref<1x32xf32, #tpu.memory_space<vmem>>, %arg14: memref<1x8x32xf32, #tpu.memory_space<vmem>>, %arg15: memref<8x32xf32, #tpu.memory_space<vmem>>) attributes {dimension_semantics = [#tpu.dimension_semantics<parallel>, #tpu.dimension_semantics<arbitrary>], iteration_bounds = array<i64: 2, 4>, scalar_prefetch = 0 : i64, scratch_operands = 1 : i64, tpu.core_type = #tpu.core_type<tc>, window_params = [{transform_indices = @transform_0, window_bounds = array<i64: 1, 8, 32>}, {transform_indices = @transform_1, window_bounds = array<i64: 1, 32, 8>}, {transform_indices = @transform_2, window_bounds = array<i64: 1, 32, 8>}, {transform_indices = @transform_3, window_bounds = array<i64: 1, 32, 8>}, {transform_indices = @transform_4, window_bounds = array<i64: 1, 1, 8>}, {transform_indices = @transform_5, window_bounds = array<i64: 1, 1, 8>}, {transform_indices = @transform_6, window_bounds = array<i64: 1, 1, 8>}, {pipeline_mode = #tpu.pipeline_mode<synchronous>, transform_indices = @transform_7, window_bounds = array<i64: 9, 8>}, {transform_indices = @transform_8, window_bounds = array<i64: 1, 8, 32>}, {pipeline_mode = #tpu.pipeline_mode<synchronous>, transform_indices = @transform_9, window_bounds = array<i64: 1, 32>}, {pipeline_mode = #tpu.pipeline_mode<synchronous>, transform_indices = @transform_10, window_bounds = array<i64: 1, 32>}, {pipeline_mode = #tpu.pipeline_mode<synchronous>, transform_indices = @transform_11, window_bounds = array<i64: 1, 32>}, {transform_indices = @transform_12, window_bounds = array<i64: 1, 8, 32>}]} {
    %c0_i32 = arith.constant 0 : i32
    %0 = arith.cmpi eq, %arg1, %c0_i32 : i32
    %1 = arith.extui %0 : i1 to i32
    %c0_i32_0 = arith.constant 0 : i32
    %2 = arith.cmpi ne, %1, %c0_i32_0 : i32
    scf.if %2 {
      %cst_50 = arith.constant 0.000000e+00 : f32
      %109 = vector.broadcast %cst_50 : f32 to vector<8x32xf32>
      %c0_51 = arith.constant 0 : index
      %c0_52 = arith.constant 0 : index
      %110 = vector.load %arg15[%c0_51, %c0_52] : memref<8x32xf32, #tpu.memory_space<vmem>>, vector<8x32xf32>
      tpu.vector_store %arg15[%c0_51, %c0_52], %109 {strides = array<i32>} : memref<8x32xf32, #tpu.memory_space<vmem>>, vector<8x32xf32>,
    } else {
    }
    %c0 = arith.constant 0 : index
    %c0_1 = arith.constant 0 : index
    %c0_2 = arith.constant 0 : index
    %3 = vector.load %arg2[%c0, %c0_1, %c0_2] : memref<1x8x32xf32, #tpu.memory_space<vmem>>, vector<1x8x32xf32>
    %4 = vector.shape_cast %3 : vector<1x8x32xf32> to vector<8x32xf32>
    %5 = arith.truncf %4 : vector<8x32xf32> to vector<8x32xbf16>
    %c0_3 = arith.constant 0 : index
    %c0_4 = arith.constant 0 : index
    %c0_5 = arith.constant 0 : index
    %6 = vector.load %arg3[%c0_3, %c0_4, %c0_5] : memref<1x32x8xbf16, #tpu.memory_space<vmem>>, vector<1x32x8xbf16>
    %7 = vector.shape_cast %6 : vector<1x32x8xbf16> to vector<32x8xbf16>
    %cst = arith.constant dense<0.000000e+00> : vector<8x8xf32>
    %8 = tpu.matmul %5, %7, %cst {dimension_numbers = #tpu.dot_dimension_numbers<[1], [0], [0], [1], [0, 0, 1, 1], [], []>} : vector<8x32xbf16>, vector<32x8xbf16>, vector<8x8xf32> -> vector<8x8xf32>
    %c0_6 = arith.constant 0 : index
    %c0_7 = arith.constant 0 : index
    %c0_8 = arith.constant 0 : index
    %9 = vector.load %arg6[%c0_6, %c0_7, %c0_8] : memref<1x1x8xf32, #tpu.memory_space<vmem>>, vector<1x1x8xf32>
    %10 = vector.shape_cast %9 : vector<1x1x8xf32> to vector<1x8xf32>
    %11 = vector.broadcast %10 : vector<1x8xf32> to vector<8x8xf32>
    %12 = arith.addf %8, %11 : vector<8x8xf32>
    %cst_9 = arith.constant 0.353553385 : f32
    %13 = vector.broadcast %cst_9 : f32 to vector<8x8xf32>
    %14 = arith.mulf %12, %13 : vector<8x8xf32>
    %c0_10 = arith.constant 0 : index
    %c0_11 = arith.constant 0 : index
    %c0_12 = arith.constant 0 : index
    %15 = vector.load %arg4[%c0_10, %c0_11, %c0_12] : memref<1x32x8xbf16, #tpu.memory_space<vmem>>, vector<1x32x8xbf16>
    %16 = vector.shape_cast %15 : vector<1x32x8xbf16> to vector<32x8xbf16>
    %cst_13 = arith.constant dense<0.000000e+00> : vector<8x8xf32>
    %17 = tpu.matmul %5, %16, %cst_13 {dimension_numbers = #tpu.dot_dimension_numbers<[1], [0], [0], [1], [0, 0, 1, 1], [], []>} : vector<8x32xbf16>, vector<32x8xbf16>, vector<8x8xf32> -> vector<8x8xf32>
    %c0_14 = arith.constant 0 : index
    %c0_15 = arith.constant 0 : index
    %c0_16 = arith.constant 0 : index
    %18 = vector.load %arg7[%c0_14, %c0_15, %c0_16] : memref<1x1x8xf32, #tpu.memory_space<vmem>>, vector<1x1x8xf32>
    %19 = vector.shape_cast %18 : vector<1x1x8xf32> to vector<1x8xf32>
    %20 = vector.broadcast %19 : vector<1x8xf32> to vector<8x8xf32>
    %21 = arith.addf %17, %20 : vector<8x8xf32>
    %c0_17 = arith.constant 0 : index
    %c0_18 = arith.constant 0 : index
    %c0_19 = arith.constant 0 : index
    %22 = vector.load %arg5[%c0_17, %c0_18, %c0_19] : memref<1x32x8xbf16, #tpu.memory_space<vmem>>, vector<1x32x8xbf16>
    %23 = vector.shape_cast %22 : vector<1x32x8xbf16> to vector<32x8xbf16>
    %cst_20 = arith.constant dense<0.000000e+00> : vector<8x8xf32>
    %24 = tpu.matmul %5, %23, %cst_20 {dimension_numbers = #tpu.dot_dimension_numbers<[1], [0], [0], [1], [0, 0, 1, 1], [], []>} : vector<8x32xbf16>, vector<32x8xbf16>, vector<8x8xf32> -> vector<8x8xf32>
    %c0_21 = arith.constant 0 : index
    %c0_22 = arith.constant 0 : index
    %c0_23 = arith.constant 0 : index
    %25 = vector.load %arg8[%c0_21, %c0_22, %c0_23] : memref<1x1x8xf32, #tpu.memory_space<vmem>>, vector<1x1x8xf32>
    %26 = vector.shape_cast %25 : vector<1x1x8xf32> to vector<1x8xf32>
    %27 = vector.broadcast %26 : vector<1x8xf32> to vector<8x8xf32>
    %28 = arith.addf %24, %27 : vector<8x8xf32>
    %29 = arith.truncf %28 : vector<8x8xf32> to vector<8x8xbf16>
    %30 = arith.truncf %14 : vector<8x8xf32> to vector<8x8xbf16>
    %31 = arith.truncf %21 : vector<8x8xf32> to vector<8x8xbf16>
    %cst_24 = arith.constant dense<0.000000e+00> : vector<8x8xf32>
    %32 = tpu.matmul %30, %31, %cst_24 {dimension_numbers = #tpu.dot_dimension_numbers<[1], [1], [0], [0], [0, 0, 1, 0], [], []>} : vector<8x8xbf16>, vector<8x8xbf16>, vector<8x8xf32> -> vector<8x8xf32>
    %c0_25 = arith.constant 0 : index
    %c0_26 = arith.constant 0 : index
    %33 = vector.load %arg9[%c0_25, %c0_26] : memref<9x8xbf16, #tpu.memory_space<vmem>>, vector<9x8xbf16>
    %cst_27 = arith.constant dense<0.000000e+00> : vector<8x9xf32>
    %34 = tpu.matmul %30, %33, %cst_27 {dimension_numbers = #tpu.dot_dimension_numbers<[1], [1], [0], [0], [0, 0, 1, 0], [], []>} : vector<8x8xbf16>, vector<9x8xbf16>, vector<8x9xf32> -> vector<8x9xf32>
    %35 = tpu.iota {dimensions = array<i32: 0>} : vector<8x8xi32>
    %36 = tpu.iota {dimensions = array<i32: 1>} : vector<8x8xi32>
    %37 = arith.subi %36, %35 : vector<8x8xi32>
    %c-4_i32 = arith.constant -4 : i32
    %c4_i32 = arith.constant 4 : i32
    %38 = vector.broadcast %c-4_i32 : i32 to vector<8x8xi32>
    %39 = arith.maxsi %38, %37 : vector<8x8xi32>
    %40 = vector.broadcast %c4_i32 : i32 to vector<8x8xi32>
    %41 = arith.minsi %40, %39 : vector<8x8xi32>
    %c4_i32_28 = arith.constant 4 : i32
    %42 = vector.broadcast %c4_i32_28 : i32 to vector<8x8xi32>
    %43 = arith.addi %41, %42 : vector<8x8xi32>
    %c0_i32_29 = arith.constant 0 : i32
    %44 = vector.broadcast %c0_i32_29 : i32 to vector<8x8xi32>
    %45 = arith.cmpi eq, %43, %44 : vector<8x8xi32>
    %46 = vector.extract_strided_slice %34 {offsets = [0, 0], sizes = [8, 1], strides = [1, 1]} : vector<8x9xf32> to vector<8x1xf32>
    %cst_30 = arith.constant 0.000000e+00 : f32
    %47 = vector.shape_cast %46 : vector<8x1xf32> to vector<8x1xf32>
    %48 = vector.broadcast %47 : vector<8x1xf32> to vector<8x8xf32>
    %49 = vector.broadcast %cst_30 : f32 to vector<8x8xf32>
    %50 = arith.select %45, %48, %49 : vector<8x8xi1>, vector<8x8xf32>
    %51 = arith.addf %32, %50 : vector<8x8xf32>
    %c1_i32 = arith.constant 1 : i32
    %52 = vector.broadcast %c1_i32 : i32 to vector<8x8xi32>
    %53 = arith.cmpi eq, %43, %52 : vector<8x8xi32>
    %54 = vector.extract_strided_slice %34 {offsets = [0, 1], sizes = [8, 1], strides = [1, 1]} : vector<8x9xf32> to vector<8x1xf32>
    %cst_31 = arith.constant 0.000000e+00 : f32
    %55 = vector.shape_cast %54 : vector<8x1xf32> to vector<8x1xf32>
    %56 = vector.broadcast %55 : vector<8x1xf32> to vector<8x8xf32>
    %57 = vector.broadcast %cst_31 : f32 to vector<8x8xf32>
    %58 = arith.select %53, %56, %57 : vector<8x8xi1>, vector<8x8xf32>
    %59 = arith.addf %51, %58 : vector<8x8xf32>
    %c2_i32 = arith.constant 2 : i32
    %60 = vector.broadcast %c2_i32 : i32 to vector<8x8xi32>
    %61 = arith.cmpi eq, %43, %60 : vector<8x8xi32>
    %62 = vector.extract_strided_slice %34 {offsets = [0, 2], sizes = [8, 1], strides = [1, 1]} : vector<8x9xf32> to vector<8x1xf32>
    %cst_32 = arith.constant 0.000000e+00 : f32
    %63 = vector.shape_cast %62 : vector<8x1xf32> to vector<8x1xf32>
    %64 = vector.broadcast %63 : vector<8x1xf32> to vector<8x8xf32>
    %65 = vector.broadcast %cst_32 : f32 to vector<8x8xf32>
    %66 = arith.select %61, %64, %65 : vector<8x8xi1>, vector<8x8xf32>
    %67 = arith.addf %59, %66 : vector<8x8xf32>
    %c3_i32 = arith.constant 3 : i32
    %68 = vector.broadcast %c3_i32 : i32 to vector<8x8xi32>
    %69 = arith.cmpi eq, %43, %68 : vector<8x8xi32>
    %70 = vector.extract_strided_slice %34 {offsets = [0, 3], sizes = [8, 1], strides = [1, 1]} : vector<8x9xf32> to vector<8x1xf32>
    %cst_33 = arith.constant 0.000000e+00 : f32
    %71 = vector.shape_cast %70 : vector<8x1xf32> to vector<8x1xf32>
    %72 = vector.broadcast %71 : vector<8x1xf32> to vector<8x8xf32>
    %73 = vector.broadcast %cst_33 : f32 to vector<8x8xf32>
    %74 = arith.select %69, %72, %73 : vector<8x8xi1>, vector<8x8xf32>
    %75 = arith.addf %67, %74 : vector<8x8xf32>
    %c4_i32_34 = arith.constant 4 : i32
    %76 = vector.broadcast %c4_i32_34 : i32 to vector<8x8xi32>
    %77 = arith.cmpi eq, %43, %76 : vector<8x8xi32>
    %78 = vector.extract_strided_slice %34 {offsets = [0, 4], sizes = [8, 1], strides = [1, 1]} : vector<8x9xf32> to vector<8x1xf32>
    %cst_35 = arith.constant 0.000000e+00 : f32
    %79 = vector.shape_cast %78 : vector<8x1xf32> to vector<8x1xf32>
    %80 = vector.broadcast %79 : vector<8x1xf32> to vector<8x8xf32>
    %81 = vector.broadcast %cst_35 : f32 to vector<8x8xf32>
    %82 = arith.select %77, %80, %81 : vector<8x8xi1>, vector<8x8xf32>
    %83 = arith.addf %75, %82 : vector<8x8xf32>
    %84 = arith.cmpi sgt, %36, %35 : vector<8x8xi32>
    %cst_36 = arith.constant -1.000000e+09 : f32
    %85 = vector.broadcast %cst_36 : f32 to vector<8x8xf32>
    %86 = arith.select %84, %85, %83 : vector<8x8xi1>, vector<8x8xf32>
    %cst_37 = arith.constant dense<0xFF800000> : vector<8xf32>
    %87 = vector.multi_reduction <maximumf>, %86, %cst_37 [1] : vector<8x8xf32> to vector<8xf32>
    %88 = vector.shape_cast %87 : vector<8xf32> to vector<8x1xf32>
    %89 = vector.broadcast %88 : vector<8x1xf32> to vector<8x8xf32>
    %90 = arith.subf %86, %89 : vector<8x8xf32>
    %91 = math.exp %90 : vector<8x8xf32>
    %cst_38 = arith.constant dense<0.000000e+00> : vector<8xf32>
    %92 = vector.multi_reduction <add>, %91, %cst_38 [1] : vector<8x8xf32> to vector<8xf32>
    %93 = vector.shape_cast %92 : vector<8xf32> to vector<8x1xf32>
    %94 = tpu.reciprocal %93 {approx = true} : vector<8x1xf32> -> vector<8x1xf32>
    %95 = vector.broadcast %94 : vector<8x1xf32> to vector<8x8xf32>
    %96 = arith.mulf %91, %95 : vector<8x8xf32>
    %97 = arith.truncf %96 : vector<8x8xf32> to vector<8x8xbf16>
    %cst_39 = arith.constant dense<0.000000e+00> : vector<8x8xf32>
    %98 = tpu.matmul %97, %29, %cst_39 {dimension_numbers = #tpu.dot_dimension_numbers<[1], [0], [0], [1], [0, 0, 1, 1], [], []>} : vector<8x8xbf16>, vector<8x8xbf16>, vector<8x8xf32> -> vector<8x8xf32>
    %c0_40 = arith.constant 0 : index
    %c0_41 = arith.constant 0 : index
    %99 = vector.load %arg15[%c0_40, %c0_41] : memref<8x32xf32, #tpu.memory_space<vmem>>, vector<8x32xf32>
    %100 = arith.truncf %98 : vector<8x8xf32> to vector<8x8xbf16>
    %c0_42 = arith.constant 0 : index
    %c0_43 = arith.constant 0 : index
    %c0_44 = arith.constant 0 : index
    %101 = vector.load %arg10[%c0_42, %c0_43, %c0_44] : memref<1x8x32xbf16, #tpu.memory_space<vmem>>, vector<1x8x32xbf16>
    %102 = vector.shape_cast %101 : vector<1x8x32xbf16> to vector<8x32xbf16>
    %cst_45 = arith.constant dense<0.000000e+00> : vector<8x32xf32>
    %103 = tpu.matmul %100, %102, %cst_45 {dimension_numbers = #tpu.dot_dimension_numbers<[1], [0], [0], [1], [0, 0, 1, 1], [], []>} : vector<8x8xbf16>, vector<8x32xbf16>, vector<8x32xf32> -> vector<8x32xf32>
    %104 = arith.addf %99, %103 : vector<8x32xf32>
    %c0_46 = arith.constant 0 : index
    %c0_47 = arith.constant 0 : index
    %105 = vector.load %arg15[%c0_46, %c0_47] : memref<8x32xf32, #tpu.memory_space<vmem>>, vector<8x32xf32>
    tpu.vector_store %arg15[%c0_46, %c0_47], %104 {strides = array<i32>} : memref<8x32xf32, #tpu.memory_space<vmem>>, vector<8x32xf32>,
    %c3_i32_48 = arith.constant 3 : i32
    %106 = arith.cmpi eq, %arg1, %c3_i32_48 : i32
    %107 = arith.extui %106 : i1 to i32
    %c0_i32_49 = arith.constant 0 : i32
    %108 = arith.cmpi ne, %107, %c0_i32_49 : i32
    scf.if %108 {
      %c0_50 = arith.constant 0 : index
      %c0_51 = arith.constant 0 : index
      %109 = vector.load %arg15[%c0_50, %c0_51] : memref<8x32xf32, #tpu.memory_space<vmem>>, vector<8x32xf32>
      %c0_52 = arith.constant 0 : index
      %c0_53 = arith.constant 0 : index
      %110 = vector.load %arg11[%c0_52, %c0_53] : memref<1x32xf32, #tpu.memory_space<vmem>>, vector<1x32xf32>
      %111 = vector.broadcast %110 : vector<1x32xf32> to vector<8x32xf32>
      %112 = arith.addf %109, %111 : vector<8x32xf32>
      %113 = arith.addf %112, %4 : vector<8x32xf32>
      %cst_54 = arith.constant dense<0.000000e+00> : vector<8xf32>
      %114 = vector.multi_reduction <add>, %113, %cst_54 [1] : vector<8x32xf32> to vector<8xf32>
      %115 = vector.shape_cast %114 : vector<8xf32> to vector<8x1xf32>
      %cst_55 = arith.constant 3.200000e+01 : f32
      %116 = vector.broadcast %cst_55 : f32 to vector<8x1xf32>
      %117 = arith.divf %115, %116 : vector<8x1xf32>
      %118 = vector.broadcast %117 : vector<8x1xf32> to vector<8x32xf32>
      %119 = arith.subf %113, %118 : vector<8x32xf32>
      %120 = arith.mulf %119, %119 : vector<8x32xf32>
      %cst_56 = arith.constant dense<0.000000e+00> : vector<8xf32>
      %121 = vector.multi_reduction <add>, %120, %cst_56 [1] : vector<8x32xf32> to vector<8xf32>
      %122 = vector.shape_cast %121 : vector<8xf32> to vector<8x1xf32>
      %cst_57 = arith.constant 3.200000e+01 : f32
      %123 = vector.broadcast %cst_57 : f32 to vector<8x1xf32>
      %124 = arith.divf %122, %123 : vector<8x1xf32>
      %125 = vector.broadcast %117 : vector<8x1xf32> to vector<8x32xf32>
      %126 = arith.subf %113, %125 : vector<8x32xf32>
      %cst_58 = arith.constant 9.99999974E-6 : f32
      %127 = vector.broadcast %cst_58 : f32 to vector<8x1xf32>
      %128 = arith.addf %124, %127 : vector<8x1xf32>
      %129 = math.rsqrt %128 : vector<8x1xf32>
      %130 = vector.broadcast %129 : vector<8x1xf32> to vector<8x32xf32>
      %131 = arith.mulf %126, %130 : vector<8x32xf32>
      %c0_59 = arith.constant 0 : index
      %c0_60 = arith.constant 0 : index
      %132 = vector.load %arg12[%c0_59, %c0_60] : memref<1x32xf32, #tpu.memory_space<vmem>>, vector<1x32xf32>
      %133 = vector.broadcast %132 : vector<1x32xf32> to vector<8x32xf32>
      %134 = arith.mulf %131, %133 : vector<8x32xf32>
      %c0_61 = arith.constant 0 : index
      %c0_62 = arith.constant 0 : index
      %135 = vector.load %arg13[%c0_61, %c0_62] : memref<1x32xf32, #tpu.memory_space<vmem>>, vector<1x32xf32>
      %136 = vector.broadcast %135 : vector<1x32xf32> to vector<8x32xf32>
      %137 = arith.addf %134, %136 : vector<8x32xf32>
      %c0_63 = arith.constant 0 : index
      %c0_64 = arith.constant 0 : index
      %c0_65 = arith.constant 0 : index
      %138 = vector.load %arg14[%c0_63, %c0_64, %c0_65] : memref<1x8x32xf32, #tpu.memory_space<vmem>>, vector<1x8x32xf32>
      %139 = vector.shape_cast %138 : vector<1x8x32xf32> to vector<8x32xf32>
      %140 = vector.shape_cast %137 : vector<8x32xf32> to vector<1x8x32xf32>
      tpu.vector_store %arg14[%c0_63, %c0_64, %c0_65], %140 {strides = array<i32>} : memref<1x8x32xf32, #tpu.memory_space<vmem>>, vector<1x8x32xf32>,
    } else {
    }
    return
  }
  func.func @transform_0(%arg0: i32, %arg1: i32) -> (i32, i32, i32) {
    %c0_i32 = arith.constant 0 : i32
    %c0_i32_0 = arith.constant 0 : i32
    %c0_i32_1 = arith.constant 0 : i32
    return %arg0, %c0_i32, %c0_i32_0 : i32, i32, i32
  }
  func.func @transform_1(%arg0: i32, %arg1: i32) -> (i32, i32, i32) {
    %c0_i32 = arith.constant 0 : i32
    %c0_i32_0 = arith.constant 0 : i32
    %c0_i32_1 = arith.constant 0 : i32
    return %arg1, %c0_i32, %c0_i32_0 : i32, i32, i32
  }
  func.func @transform_2(%arg0: i32, %arg1: i32) -> (i32, i32, i32) {
    %c0_i32 = arith.constant 0 : i32
    %c0_i32_0 = arith.constant 0 : i32
    %c0_i32_1 = arith.constant 0 : i32
    return %arg1, %c0_i32, %c0_i32_0 : i32, i32, i32
  }
  func.func @transform_3(%arg0: i32, %arg1: i32) -> (i32, i32, i32) {
    %c0_i32 = arith.constant 0 : i32
    %c0_i32_0 = arith.constant 0 : i32
    %c0_i32_1 = arith.constant 0 : i32
    return %arg1, %c0_i32, %c0_i32_0 : i32, i32, i32
  }
  func.func @transform_4(%arg0: i32, %arg1: i32) -> (i32, i32, i32) {
    %c0_i32 = arith.constant 0 : i32
    %c0_i32_0 = arith.constant 0 : i32
    %c0_i32_1 = arith.constant 0 : i32
    return %arg1, %c0_i32, %c0_i32_0 : i32, i32, i32
  }
  func.func @transform_5(%arg0: i32, %arg1: i32) -> (i32, i32, i32) {
    %c0_i32 = arith.constant 0 : i32
    %c0_i32_0 = arith.constant 0 : i32
    %c0_i32_1 = arith.constant 0 : i32
    return %arg1, %c0_i32, %c0_i32_0 : i32, i32, i32
  }
  func.func @transform_6(%arg0: i32, %arg1: i32) -> (i32, i32, i32) {
    %c0_i32 = arith.constant 0 : i32
    %c0_i32_0 = arith.constant 0 : i32
    %c0_i32_1 = arith.constant 0 : i32
    return %arg1, %c0_i32, %c0_i32_0 : i32, i32, i32
  }
  func.func @transform_7(%arg0: i32, %arg1: i32) -> (i32, i32) {
    %c0_i32 = arith.constant 0 : i32
    %c0_i32_0 = arith.constant 0 : i32
    %c0_i32_1 = arith.constant 0 : i32
    return %c0_i32, %c0_i32_0 : i32, i32
  }
  func.func @transform_8(%arg0: i32, %arg1: i32) -> (i32, i32, i32) {
    %c0_i32 = arith.constant 0 : i32
    %c0_i32_0 = arith.constant 0 : i32
    %c0_i32_1 = arith.constant 0 : i32
    return %arg1, %c0_i32, %c0_i32_0 : i32, i32, i32
  }
  func.func @transform_9(%arg0: i32, %arg1: i32) -> (i32, i32) {
    %c0_i32 = arith.constant 0 : i32
    %c0_i32_0 = arith.constant 0 : i32
    %c0_i32_1 = arith.constant 0 : i32
    return %c0_i32, %c0_i32_0 : i32, i32
  }
  func.func @transform_10(%arg0: i32, %arg1: i32) -> (i32, i32) {
    %c0_i32 = arith.constant 0 : i32
    %c0_i32_0 = arith.constant 0 : i32
    %c0_i32_1 = arith.constant 0 : i32
    return %c0_i32, %c0_i32_0 : i32, i32
  }
  func.func @transform_11(%arg0: i32, %arg1: i32) -> (i32, i32) {
    %c0_i32 = arith.constant 0 : i32
    %c0_i32_0 = arith.constant 0 : i32
    %c0_i32_1 = arith.constant 0 : i32
    return %c0_i32, %c0_i32_0 : i32, i32
  }
  func.func @transform_12(%arg0: i32, %arg1: i32) -> (i32, i32, i32) {
    %c0_i32 = arith.constant 0 : i32
    %c0_i32_0 = arith.constant 0 : i32
    %c0_i32_1 = arith.constant 0 : i32
    return %arg0, %c0_i32, %c0_i32_0 : i32, i32, i32
  }
}

module attributes {stable_mosaic.version = 11 : i64} {
  func.func @_cross_attn_layer_kernel(%arg0: i32, %arg1: i32, %arg2: memref<1x8x32xf32, #tpu.memory_space<vmem>>, %arg3: memref<1x8x32xf32, #tpu.memory_space<vmem>>, %arg4: memref<1x32x8xbf16, #tpu.memory_space<vmem>>, %arg5: memref<1x32x8xbf16, #tpu.memory_space<vmem>>, %arg6: memref<1x32x8xbf16, #tpu.memory_space<vmem>>, %arg7: memref<1x1x8xf32, #tpu.memory_space<vmem>>, %arg8: memref<1x1x8xf32, #tpu.memory_space<vmem>>, %arg9: memref<1x1x8xf32, #tpu.memory_space<vmem>>, %arg10: memref<9x8xbf16, #tpu.memory_space<vmem>>, %arg11: memref<1x1x8xf32, #tpu.memory_space<vmem>>, %arg12: memref<1x8x32xbf16, #tpu.memory_space<vmem>>, %arg13: memref<1x32xf32, #tpu.memory_space<vmem>>, %arg14: memref<1x32xf32, #tpu.memory_space<vmem>>, %arg15: memref<1x32xf32, #tpu.memory_space<vmem>>, %arg16: memref<1x8x32xf32, #tpu.memory_space<vmem>>, %arg17: memref<8x32xf32, #tpu.memory_space<vmem>>) attributes {dimension_semantics = [#tpu.dimension_semantics<parallel>, #tpu.dimension_semantics<arbitrary>], iteration_bounds = array<i64: 2, 4>, scalar_prefetch = 0 : i64, scratch_operands = 1 : i64, tpu.core_type = #tpu.core_type<tc>, window_params = [{transform_indices = @transform_0, window_bounds = array<i64: 1, 8, 32>}, {transform_indices = @transform_1, window_bounds = array<i64: 1, 8, 32>}, {transform_indices = @transform_2, window_bounds = array<i64: 1, 32, 8>}, {transform_indices = @transform_3, window_bounds = array<i64: 1, 32, 8>}, {transform_indices = @transform_4, window_bounds = array<i64: 1, 32, 8>}, {transform_indices = @transform_5, window_bounds = array<i64: 1, 1, 8>}, {transform_indices = @transform_6, window_bounds = array<i64: 1, 1, 8>}, {transform_indices = @transform_7, window_bounds = array<i64: 1, 1, 8>}, {pipeline_mode = #tpu.pipeline_mode<synchronous>, transform_indices = @transform_8, window_bounds = array<i64: 9, 8>}, {transform_indices = @transform_9, window_bounds = array<i64: 1, 1, 8>}, {transform_indices = @transform_10, window_bounds = array<i64: 1, 8, 32>}, {pipeline_mode = #tpu.pipeline_mode<synchronous>, transform_indices = @transform_11, window_bounds = array<i64: 1, 32>}, {pipeline_mode = #tpu.pipeline_mode<synchronous>, transform_indices = @transform_12, window_bounds = array<i64: 1, 32>}, {pipeline_mode = #tpu.pipeline_mode<synchronous>, transform_indices = @transform_13, window_bounds = array<i64: 1, 32>}, {transform_indices = @transform_14, window_bounds = array<i64: 1, 8, 32>}]} {
    %c0_i32 = arith.constant 0 : i32
    %0 = arith.cmpi eq, %arg1, %c0_i32 : i32
    %1 = arith.extui %0 : i1 to i32
    %c0_i32_0 = arith.constant 0 : i32
    %2 = arith.cmpi ne, %1, %c0_i32_0 : i32
    scf.if %2 {
      %cst_59 = arith.constant 0.000000e+00 : f32
      %145 = vector.broadcast %cst_59 : f32 to vector<8x32xf32>
      %c0_60 = arith.constant 0 : index
      %c0_61 = arith.constant 0 : index
      %146 = vector.load %arg17[%c0_60, %c0_61] : memref<8x32xf32, #tpu.memory_space<vmem>>, vector<8x32xf32>
      tpu.vector_store %arg17[%c0_60, %c0_61], %145 {strides = array<i32>} : memref<8x32xf32, #tpu.memory_space<vmem>>, vector<8x32xf32>,
    } else {
    }
    %c0 = arith.constant 0 : index
    %c0_1 = arith.constant 0 : index
    %c0_2 = arith.constant 0 : index
    %3 = vector.load %arg2[%c0, %c0_1, %c0_2] : memref<1x8x32xf32, #tpu.memory_space<vmem>>, vector<1x8x32xf32>
    %4 = vector.shape_cast %3 : vector<1x8x32xf32> to vector<8x32xf32>
    %5 = arith.truncf %4 : vector<8x32xf32> to vector<8x32xbf16>
    %c0_3 = arith.constant 0 : index
    %c0_4 = arith.constant 0 : index
    %c0_5 = arith.constant 0 : index
    %6 = vector.load %arg3[%c0_3, %c0_4, %c0_5] : memref<1x8x32xf32, #tpu.memory_space<vmem>>, vector<1x8x32xf32>
    %7 = vector.shape_cast %6 : vector<1x8x32xf32> to vector<8x32xf32>
    %8 = arith.truncf %7 : vector<8x32xf32> to vector<8x32xbf16>
    %c0_6 = arith.constant 0 : index
    %c0_7 = arith.constant 0 : index
    %c0_8 = arith.constant 0 : index
    %9 = vector.load %arg4[%c0_6, %c0_7, %c0_8] : memref<1x32x8xbf16, #tpu.memory_space<vmem>>, vector<1x32x8xbf16>
    %10 = vector.shape_cast %9 : vector<1x32x8xbf16> to vector<32x8xbf16>
    %cst = arith.constant dense<0.000000e+00> : vector<8x8xf32>
    %11 = tpu.matmul %5, %10, %cst {dimension_numbers = #tpu.dot_dimension_numbers<[1], [0], [0], [1], [0, 0, 1, 1], [], []>} : vector<8x32xbf16>, vector<32x8xbf16>, vector<8x8xf32> -> vector<8x8xf32>
    %c0_9 = arith.constant 0 : index
    %c0_10 = arith.constant 0 : index
    %c0_11 = arith.constant 0 : index
    %12 = vector.load %arg7[%c0_9, %c0_10, %c0_11] : memref<1x1x8xf32, #tpu.memory_space<vmem>>, vector<1x1x8xf32>
    %13 = vector.shape_cast %12 : vector<1x1x8xf32> to vector<1x8xf32>
    %14 = vector.broadcast %13 : vector<1x8xf32> to vector<8x8xf32>
    %15 = arith.addf %11, %14 : vector<8x8xf32>
    %cst_12 = arith.constant 0.353553385 : f32
    %16 = vector.broadcast %cst_12 : f32 to vector<8x8xf32>
    %17 = arith.mulf %15, %16 : vector<8x8xf32>
    %c0_13 = arith.constant 0 : index
    %c0_14 = arith.constant 0 : index
    %c0_15 = arith.constant 0 : index
    %18 = vector.load %arg5[%c0_13, %c0_14, %c0_15] : memref<1x32x8xbf16, #tpu.memory_space<vmem>>, vector<1x32x8xbf16>
    %19 = vector.shape_cast %18 : vector<1x32x8xbf16> to vector<32x8xbf16>
    %cst_16 = arith.constant dense<0.000000e+00> : vector<8x8xf32>
    %20 = tpu.matmul %8, %19, %cst_16 {dimension_numbers = #tpu.dot_dimension_numbers<[1], [0], [0], [1], [0, 0, 1, 1], [], []>} : vector<8x32xbf16>, vector<32x8xbf16>, vector<8x8xf32> -> vector<8x8xf32>
    %c0_17 = arith.constant 0 : index
    %c0_18 = arith.constant 0 : index
    %c0_19 = arith.constant 0 : index
    %21 = vector.load %arg8[%c0_17, %c0_18, %c0_19] : memref<1x1x8xf32, #tpu.memory_space<vmem>>, vector<1x1x8xf32>
    %22 = vector.shape_cast %21 : vector<1x1x8xf32> to vector<1x8xf32>
    %23 = vector.broadcast %22 : vector<1x8xf32> to vector<8x8xf32>
    %24 = arith.addf %20, %23 : vector<8x8xf32>
    %c0_20 = arith.constant 0 : index
    %c0_21 = arith.constant 0 : index
    %c0_22 = arith.constant 0 : index
    %25 = vector.load %arg6[%c0_20, %c0_21, %c0_22] : memref<1x32x8xbf16, #tpu.memory_space<vmem>>, vector<1x32x8xbf16>
    %26 = vector.shape_cast %25 : vector<1x32x8xbf16> to vector<32x8xbf16>
    %cst_23 = arith.constant dense<0.000000e+00> : vector<8x8xf32>
    %27 = tpu.matmul %8, %26, %cst_23 {dimension_numbers = #tpu.dot_dimension_numbers<[1], [0], [0], [1], [0, 0, 1, 1], [], []>} : vector<8x32xbf16>, vector<32x8xbf16>, vector<8x8xf32> -> vector<8x8xf32>
    %c0_24 = arith.constant 0 : index
    %c0_25 = arith.constant 0 : index
    %c0_26 = arith.constant 0 : index
    %28 = vector.load %arg9[%c0_24, %c0_25, %c0_26] : memref<1x1x8xf32, #tpu.memory_space<vmem>>, vector<1x1x8xf32>
    %29 = vector.shape_cast %28 : vector<1x1x8xf32> to vector<1x8xf32>
    %30 = vector.broadcast %29 : vector<1x8xf32> to vector<8x8xf32>
    %31 = arith.addf %27, %30 : vector<8x8xf32>
    %32 = arith.truncf %31 : vector<8x8xf32> to vector<8x8xbf16>
    %33 = arith.truncf %17 : vector<8x8xf32> to vector<8x8xbf16>
    %34 = arith.truncf %24 : vector<8x8xf32> to vector<8x8xbf16>
    %cst_27 = arith.constant dense<0.000000e+00> : vector<8x8xf32>
    %35 = tpu.matmul %33, %34, %cst_27 {dimension_numbers = #tpu.dot_dimension_numbers<[1], [1], [0], [0], [0, 0, 1, 0], [], []>} : vector<8x8xbf16>, vector<8x8xbf16>, vector<8x8xf32> -> vector<8x8xf32>
    %c0_28 = arith.constant 0 : index
    %c0_29 = arith.constant 0 : index
    %36 = vector.load %arg10[%c0_28, %c0_29] : memref<9x8xbf16, #tpu.memory_space<vmem>>, vector<9x8xbf16>
    %cst_30 = arith.constant dense<0.000000e+00> : vector<8x9xf32>
    %37 = tpu.matmul %33, %36, %cst_30 {dimension_numbers = #tpu.dot_dimension_numbers<[1], [1], [0], [0], [0, 0, 1, 0], [], []>} : vector<8x8xbf16>, vector<9x8xbf16>, vector<8x9xf32> -> vector<8x9xf32>
    %38 = tpu.iota {dimensions = array<i32: 0>} : vector<8x8xi32>
    %39 = tpu.iota {dimensions = array<i32: 1>} : vector<8x8xi32>
    %40 = arith.subi %39, %38 : vector<8x8xi32>
    %c-4_i32 = arith.constant -4 : i32
    %c4_i32 = arith.constant 4 : i32
    %41 = vector.broadcast %c-4_i32 : i32 to vector<8x8xi32>
    %42 = arith.maxsi %41, %40 : vector<8x8xi32>
    %43 = vector.broadcast %c4_i32 : i32 to vector<8x8xi32>
    %44 = arith.minsi %43, %42 : vector<8x8xi32>
    %c4_i32_31 = arith.constant 4 : i32
    %45 = vector.broadcast %c4_i32_31 : i32 to vector<8x8xi32>
    %46 = arith.addi %44, %45 : vector<8x8xi32>
    %c0_i32_32 = arith.constant 0 : i32
    %47 = vector.broadcast %c0_i32_32 : i32 to vector<8x8xi32>
    %48 = arith.cmpi eq, %46, %47 : vector<8x8xi32>
    %49 = vector.extract_strided_slice %37 {offsets = [0, 0], sizes = [8, 1], strides = [1, 1]} : vector<8x9xf32> to vector<8x1xf32>
    %cst_33 = arith.constant 0.000000e+00 : f32
    %50 = vector.shape_cast %49 : vector<8x1xf32> to vector<8x1xf32>
    %51 = vector.broadcast %50 : vector<8x1xf32> to vector<8x8xf32>
    %52 = vector.broadcast %cst_33 : f32 to vector<8x8xf32>
    %53 = arith.select %48, %51, %52 : vector<8x8xi1>, vector<8x8xf32>
    %54 = arith.addf %35, %53 : vector<8x8xf32>
    %c1_i32 = arith.constant 1 : i32
    %55 = vector.broadcast %c1_i32 : i32 to vector<8x8xi32>
    %56 = arith.cmpi eq, %46, %55 : vector<8x8xi32>
    %57 = vector.extract_strided_slice %37 {offsets = [0, 1], sizes = [8, 1], strides = [1, 1]} : vector<8x9xf32> to vector<8x1xf32>
    %cst_34 = arith.constant 0.000000e+00 : f32
    %58 = vector.shape_cast %57 : vector<8x1xf32> to vector<8x1xf32>
    %59 = vector.broadcast %58 : vector<8x1xf32> to vector<8x8xf32>
    %60 = vector.broadcast %cst_34 : f32 to vector<8x8xf32>
    %61 = arith.select %56, %59, %60 : vector<8x8xi1>, vector<8x8xf32>
    %62 = arith.addf %54, %61 : vector<8x8xf32>
    %c2_i32 = arith.constant 2 : i32
    %63 = vector.broadcast %c2_i32 : i32 to vector<8x8xi32>
    %64 = arith.cmpi eq, %46, %63 : vector<8x8xi32>
    %65 = vector.extract_strided_slice %37 {offsets = [0, 2], sizes = [8, 1], strides = [1, 1]} : vector<8x9xf32> to vector<8x1xf32>
    %cst_35 = arith.constant 0.000000e+00 : f32
    %66 = vector.shape_cast %65 : vector<8x1xf32> to vector<8x1xf32>
    %67 = vector.broadcast %66 : vector<8x1xf32> to vector<8x8xf32>
    %68 = vector.broadcast %cst_35 : f32 to vector<8x8xf32>
    %69 = arith.select %64, %67, %68 : vector<8x8xi1>, vector<8x8xf32>
    %70 = arith.addf %62, %69 : vector<8x8xf32>
    %c3_i32 = arith.constant 3 : i32
    %71 = vector.broadcast %c3_i32 : i32 to vector<8x8xi32>
    %72 = arith.cmpi eq, %46, %71 : vector<8x8xi32>
    %73 = vector.extract_strided_slice %37 {offsets = [0, 3], sizes = [8, 1], strides = [1, 1]} : vector<8x9xf32> to vector<8x1xf32>
    %cst_36 = arith.constant 0.000000e+00 : f32
    %74 = vector.shape_cast %73 : vector<8x1xf32> to vector<8x1xf32>
    %75 = vector.broadcast %74 : vector<8x1xf32> to vector<8x8xf32>
    %76 = vector.broadcast %cst_36 : f32 to vector<8x8xf32>
    %77 = arith.select %72, %75, %76 : vector<8x8xi1>, vector<8x8xf32>
    %78 = arith.addf %70, %77 : vector<8x8xf32>
    %c4_i32_37 = arith.constant 4 : i32
    %79 = vector.broadcast %c4_i32_37 : i32 to vector<8x8xi32>
    %80 = arith.cmpi eq, %46, %79 : vector<8x8xi32>
    %81 = vector.extract_strided_slice %37 {offsets = [0, 4], sizes = [8, 1], strides = [1, 1]} : vector<8x9xf32> to vector<8x1xf32>
    %cst_38 = arith.constant 0.000000e+00 : f32
    %82 = vector.shape_cast %81 : vector<8x1xf32> to vector<8x1xf32>
    %83 = vector.broadcast %82 : vector<8x1xf32> to vector<8x8xf32>
    %84 = vector.broadcast %cst_38 : f32 to vector<8x8xf32>
    %85 = arith.select %80, %83, %84 : vector<8x8xi1>, vector<8x8xf32>
    %86 = arith.addf %78, %85 : vector<8x8xf32>
    %c5_i32 = arith.constant 5 : i32
    %87 = vector.broadcast %c5_i32 : i32 to vector<8x8xi32>
    %88 = arith.cmpi eq, %46, %87 : vector<8x8xi32>
    %89 = vector.extract_strided_slice %37 {offsets = [0, 5], sizes = [8, 1], strides = [1, 1]} : vector<8x9xf32> to vector<8x1xf32>
    %cst_39 = arith.constant 0.000000e+00 : f32
    %90 = vector.shape_cast %89 : vector<8x1xf32> to vector<8x1xf32>
    %91 = vector.broadcast %90 : vector<8x1xf32> to vector<8x8xf32>
    %92 = vector.broadcast %cst_39 : f32 to vector<8x8xf32>
    %93 = arith.select %88, %91, %92 : vector<8x8xi1>, vector<8x8xf32>
    %94 = arith.addf %86, %93 : vector<8x8xf32>
    %c6_i32 = arith.constant 6 : i32
    %95 = vector.broadcast %c6_i32 : i32 to vector<8x8xi32>
    %96 = arith.cmpi eq, %46, %95 : vector<8x8xi32>
    %97 = vector.extract_strided_slice %37 {offsets = [0, 6], sizes = [8, 1], strides = [1, 1]} : vector<8x9xf32> to vector<8x1xf32>
    %cst_40 = arith.constant 0.000000e+00 : f32
    %98 = vector.shape_cast %97 : vector<8x1xf32> to vector<8x1xf32>
    %99 = vector.broadcast %98 : vector<8x1xf32> to vector<8x8xf32>
    %100 = vector.broadcast %cst_40 : f32 to vector<8x8xf32>
    %101 = arith.select %96, %99, %100 : vector<8x8xi1>, vector<8x8xf32>
    %102 = arith.addf %94, %101 : vector<8x8xf32>
    %c7_i32 = arith.constant 7 : i32
    %103 = vector.broadcast %c7_i32 : i32 to vector<8x8xi32>
    %104 = arith.cmpi eq, %46, %103 : vector<8x8xi32>
    %105 = vector.extract_strided_slice %37 {offsets = [0, 7], sizes = [8, 1], strides = [1, 1]} : vector<8x9xf32> to vector<8x1xf32>
    %cst_41 = arith.constant 0.000000e+00 : f32
    %106 = vector.shape_cast %105 : vector<8x1xf32> to vector<8x1xf32>
    %107 = vector.broadcast %106 : vector<8x1xf32> to vector<8x8xf32>
    %108 = vector.broadcast %cst_41 : f32 to vector<8x8xf32>
    %109 = arith.select %104, %107, %108 : vector<8x8xi1>, vector<8x8xf32>
    %110 = arith.addf %102, %109 : vector<8x8xf32>
    %c8_i32 = arith.constant 8 : i32
    %111 = vector.broadcast %c8_i32 : i32 to vector<8x8xi32>
    %112 = arith.cmpi eq, %46, %111 : vector<8x8xi32>
    %113 = vector.extract_strided_slice %37 {offsets = [0, 8], sizes = [8, 1], strides = [1, 1]} : vector<8x9xf32> to vector<8x1xf32>
    %cst_42 = arith.constant 0.000000e+00 : f32
    %114 = vector.shape_cast %113 : vector<8x1xf32> to vector<8x1xf32>
    %115 = vector.broadcast %114 : vector<8x1xf32> to vector<8x8xf32>
    %116 = vector.broadcast %cst_42 : f32 to vector<8x8xf32>
    %117 = arith.select %112, %115, %116 : vector<8x8xi1>, vector<8x8xf32>
    %118 = arith.addf %110, %117 : vector<8x8xf32>
    %c0_43 = arith.constant 0 : index
    %c0_44 = arith.constant 0 : index
    %c0_45 = arith.constant 0 : index
    %119 = vector.load %arg11[%c0_43, %c0_44, %c0_45] : memref<1x1x8xf32, #tpu.memory_space<vmem>>, vector<1x1x8xf32>
    %120 = vector.shape_cast %119 : vector<1x1x8xf32> to vector<1x8xf32>
    %121 = vector.broadcast %120 : vector<1x8xf32> to vector<8x8xf32>
    %122 = arith.addf %118, %121 : vector<8x8xf32>
    %cst_46 = arith.constant dense<0xFF800000> : vector<8xf32>
    %123 = vector.multi_reduction <maximumf>, %122, %cst_46 [1] : vector<8x8xf32> to vector<8xf32>
    %124 = vector.shape_cast %123 : vector<8xf32> to vector<8x1xf32>
    %125 = vector.broadcast %124 : vector<8x1xf32> to vector<8x8xf32>
    %126 = arith.subf %122, %125 : vector<8x8xf32>
    %127 = math.exp %126 : vector<8x8xf32>
    %cst_47 = arith.constant dense<0.000000e+00> : vector<8xf32>
    %128 = vector.multi_reduction <add>, %127, %cst_47 [1] : vector<8x8xf32> to vector<8xf32>
    %129 = vector.shape_cast %128 : vector<8xf32> to vector<8x1xf32>
    %130 = tpu.reciprocal %129 {approx = true} : vector<8x1xf32> -> vector<8x1xf32>
    %131 = vector.broadcast %130 : vector<8x1xf32> to vector<8x8xf32>
    %132 = arith.mulf %127, %131 : vector<8x8xf32>
    %133 = arith.truncf %132 : vector<8x8xf32> to vector<8x8xbf16>
    %cst_48 = arith.constant dense<0.000000e+00> : vector<8x8xf32>
    %134 = tpu.matmul %133, %32, %cst_48 {dimension_numbers = #tpu.dot_dimension_numbers<[1], [0], [0], [1], [0, 0, 1, 1], [], []>} : vector<8x8xbf16>, vector<8x8xbf16>, vector<8x8xf32> -> vector<8x8xf32>
    %c0_49 = arith.constant 0 : index
    %c0_50 = arith.constant 0 : index
    %135 = vector.load %arg17[%c0_49, %c0_50] : memref<8x32xf32, #tpu.memory_space<vmem>>, vector<8x32xf32>
    %136 = arith.truncf %134 : vector<8x8xf32> to vector<8x8xbf16>
    %c0_51 = arith.constant 0 : index
    %c0_52 = arith.constant 0 : index
    %c0_53 = arith.constant 0 : index
    %137 = vector.load %arg12[%c0_51, %c0_52, %c0_53] : memref<1x8x32xbf16, #tpu.memory_space<vmem>>, vector<1x8x32xbf16>
    %138 = vector.shape_cast %137 : vector<1x8x32xbf16> to vector<8x32xbf16>
    %cst_54 = arith.constant dense<0.000000e+00> : vector<8x32xf32>
    %139 = tpu.matmul %136, %138, %cst_54 {dimension_numbers = #tpu.dot_dimension_numbers<[1], [0], [0], [1], [0, 0, 1, 1], [], []>} : vector<8x8xbf16>, vector<8x32xbf16>, vector<8x32xf32> -> vector<8x32xf32>
    %140 = arith.addf %135, %139 : vector<8x32xf32>
    %c0_55 = arith.constant 0 : index
    %c0_56 = arith.constant 0 : index
    %141 = vector.load %arg17[%c0_55, %c0_56] : memref<8x32xf32, #tpu.memory_space<vmem>>, vector<8x32xf32>
    tpu.vector_store %arg17[%c0_55, %c0_56], %140 {strides = array<i32>} : memref<8x32xf32, #tpu.memory_space<vmem>>, vector<8x32xf32>,
    %c3_i32_57 = arith.constant 3 : i32
    %142 = arith.cmpi eq, %arg1, %c3_i32_57 : i32
    %143 = arith.extui %142 : i1 to i32
    %c0_i32_58 = arith.constant 0 : i32
    %144 = arith.cmpi ne, %143, %c0_i32_58 : i32
    scf.if %144 {
      %c0_59 = arith.constant 0 : index
      %c0_60 = arith.constant 0 : index
      %145 = vector.load %arg17[%c0_59, %c0_60] : memref<8x32xf32, #tpu.memory_space<vmem>>, vector<8x32xf32>
      %c0_61 = arith.constant 0 : index
      %c0_62 = arith.constant 0 : index
      %146 = vector.load %arg13[%c0_61, %c0_62] : memref<1x32xf32, #tpu.memory_space<vmem>>, vector<1x32xf32>
      %147 = vector.broadcast %146 : vector<1x32xf32> to vector<8x32xf32>
      %148 = arith.addf %145, %147 : vector<8x32xf32>
      %149 = arith.addf %148, %4 : vector<8x32xf32>
      %cst_63 = arith.constant dense<0.000000e+00> : vector<8xf32>
      %150 = vector.multi_reduction <add>, %149, %cst_63 [1] : vector<8x32xf32> to vector<8xf32>
      %151 = vector.shape_cast %150 : vector<8xf32> to vector<8x1xf32>
      %cst_64 = arith.constant 3.200000e+01 : f32
      %152 = vector.broadcast %cst_64 : f32 to vector<8x1xf32>
      %153 = arith.divf %151, %152 : vector<8x1xf32>
      %154 = vector.broadcast %153 : vector<8x1xf32> to vector<8x32xf32>
      %155 = arith.subf %149, %154 : vector<8x32xf32>
      %156 = arith.mulf %155, %155 : vector<8x32xf32>
      %cst_65 = arith.constant dense<0.000000e+00> : vector<8xf32>
      %157 = vector.multi_reduction <add>, %156, %cst_65 [1] : vector<8x32xf32> to vector<8xf32>
      %158 = vector.shape_cast %157 : vector<8xf32> to vector<8x1xf32>
      %cst_66 = arith.constant 3.200000e+01 : f32
      %159 = vector.broadcast %cst_66 : f32 to vector<8x1xf32>
      %160 = arith.divf %158, %159 : vector<8x1xf32>
      %161 = vector.broadcast %153 : vector<8x1xf32> to vector<8x32xf32>
      %162 = arith.subf %149, %161 : vector<8x32xf32>
      %cst_67 = arith.constant 9.99999974E-6 : f32
      %163 = vector.broadcast %cst_67 : f32 to vector<8x1xf32>
      %164 = arith.addf %160, %163 : vector<8x1xf32>
      %165 = math.rsqrt %164 : vector<8x1xf32>
      %166 = vector.broadcast %165 : vector<8x1xf32> to vector<8x32xf32>
      %167 = arith.mulf %162, %166 : vector<8x32xf32>
      %c0_68 = arith.constant 0 : index
      %c0_69 = arith.constant 0 : index
      %168 = vector.load %arg14[%c0_68, %c0_69] : memref<1x32xf32, #tpu.memory_space<vmem>>, vector<1x32xf32>
      %169 = vector.broadcast %168 : vector<1x32xf32> to vector<8x32xf32>
      %170 = arith.mulf %167, %169 : vector<8x32xf32>
      %c0_70 = arith.constant 0 : index
      %c0_71 = arith.constant 0 : index
      %171 = vector.load %arg15[%c0_70, %c0_71] : memref<1x32xf32, #tpu.memory_space<vmem>>, vector<1x32xf32>
      %172 = vector.broadcast %171 : vector<1x32xf32> to vector<8x32xf32>
      %173 = arith.addf %170, %172 : vector<8x32xf32>
      %c0_72 = arith.constant 0 : index
      %c0_73 = arith.constant 0 : index
      %c0_74 = arith.constant 0 : index
      %174 = vector.load %arg16[%c0_72, %c0_73, %c0_74] : memref<1x8x32xf32, #tpu.memory_space<vmem>>, vector<1x8x32xf32>
      %175 = vector.shape_cast %174 : vector<1x8x32xf32> to vector<8x32xf32>
      %176 = vector.shape_cast %173 : vector<8x32xf32> to vector<1x8x32xf32>
      tpu.vector_store %arg16[%c0_72, %c0_73, %c0_74], %176 {strides = array<i32>} : memref<1x8x32xf32, #tpu.memory_space<vmem>>, vector<1x8x32xf32>,
    } else {
    }
    return
  }
  func.func @transform_0(%arg0: i32, %arg1: i32) -> (i32, i32, i32) {
    %c0_i32 = arith.constant 0 : i32
    %c0_i32_0 = arith.constant 0 : i32
    %c0_i32_1 = arith.constant 0 : i32
    return %arg0, %c0_i32, %c0_i32_0 : i32, i32, i32
  }
  func.func @transform_1(%arg0: i32, %arg1: i32) -> (i32, i32, i32) {
    %c0_i32 = arith.constant 0 : i32
    %c0_i32_0 = arith.constant 0 : i32
    %c0_i32_1 = arith.constant 0 : i32
    return %arg0, %c0_i32, %c0_i32_0 : i32, i32, i32
  }
  func.func @transform_2(%arg0: i32, %arg1: i32) -> (i32, i32, i32) {
    %c0_i32 = arith.constant 0 : i32
    %c0_i32_0 = arith.constant 0 : i32
    %c0_i32_1 = arith.constant 0 : i32
    return %arg1, %c0_i32, %c0_i32_0 : i32, i32, i32
  }
  func.func @transform_3(%arg0: i32, %arg1: i32) -> (i32, i32, i32) {
    %c0_i32 = arith.constant 0 : i32
    %c0_i32_0 = arith.constant 0 : i32
    %c0_i32_1 = arith.constant 0 : i32
    return %arg1, %c0_i32, %c0_i32_0 : i32, i32, i32
  }
  func.func @transform_4(%arg0: i32, %arg1: i32) -> (i32, i32, i32) {
    %c0_i32 = arith.constant 0 : i32
    %c0_i32_0 = arith.constant 0 : i32
    %c0_i32_1 = arith.constant 0 : i32
    return %arg1, %c0_i32, %c0_i32_0 : i32, i32, i32
  }
  func.func @transform_5(%arg0: i32, %arg1: i32) -> (i32, i32, i32) {
    %c0_i32 = arith.constant 0 : i32
    %c0_i32_0 = arith.constant 0 : i32
    %c0_i32_1 = arith.constant 0 : i32
    return %arg1, %c0_i32, %c0_i32_0 : i32, i32, i32
  }
  func.func @transform_6(%arg0: i32, %arg1: i32) -> (i32, i32, i32) {
    %c0_i32 = arith.constant 0 : i32
    %c0_i32_0 = arith.constant 0 : i32
    %c0_i32_1 = arith.constant 0 : i32
    return %arg1, %c0_i32, %c0_i32_0 : i32, i32, i32
  }
  func.func @transform_7(%arg0: i32, %arg1: i32) -> (i32, i32, i32) {
    %c0_i32 = arith.constant 0 : i32
    %c0_i32_0 = arith.constant 0 : i32
    %c0_i32_1 = arith.constant 0 : i32
    return %arg1, %c0_i32, %c0_i32_0 : i32, i32, i32
  }
  func.func @transform_8(%arg0: i32, %arg1: i32) -> (i32, i32) {
    %c0_i32 = arith.constant 0 : i32
    %c0_i32_0 = arith.constant 0 : i32
    %c0_i32_1 = arith.constant 0 : i32
    return %c0_i32, %c0_i32_0 : i32, i32
  }
  func.func @transform_9(%arg0: i32, %arg1: i32) -> (i32, i32, i32) {
    %c0_i32 = arith.constant 0 : i32
    %c0_i32_0 = arith.constant 0 : i32
    %c0_i32_1 = arith.constant 0 : i32
    return %arg0, %c0_i32, %c0_i32_0 : i32, i32, i32
  }
  func.func @transform_10(%arg0: i32, %arg1: i32) -> (i32, i32, i32) {
    %c0_i32 = arith.constant 0 : i32
    %c0_i32_0 = arith.constant 0 : i32
    %c0_i32_1 = arith.constant 0 : i32
    return %arg1, %c0_i32, %c0_i32_0 : i32, i32, i32
  }
  func.func @transform_11(%arg0: i32, %arg1: i32) -> (i32, i32) {
    %c0_i32 = arith.constant 0 : i32
    %c0_i32_0 = arith.constant 0 : i32
    %c0_i32_1 = arith.constant 0 : i32
    return %c0_i32, %c0_i32_0 : i32, i32
  }
  func.func @transform_12(%arg0: i32, %arg1: i32) -> (i32, i32) {
    %c0_i32 = arith.constant 0 : i32
    %c0_i32_0 = arith.constant 0 : i32
    %c0_i32_1 = arith.constant 0 : i32
    return %c0_i32, %c0_i32_0 : i32, i32
  }
  func.func @transform_13(%arg0: i32, %arg1: i32) -> (i32, i32) {
    %c0_i32 = arith.constant 0 : i32
    %c0_i32_0 = arith.constant 0 : i32
    %c0_i32_1 = arith.constant 0 : i32
    return %c0_i32, %c0_i32_0 : i32, i32
  }
  func.func @transform_14(%arg0: i32, %arg1: i32) -> (i32, i32, i32) {
    %c0_i32 = arith.constant 0 : i32
    %c0_i32_0 = arith.constant 0 : i32
    %c0_i32_1 = arith.constant 0 : i32
    return %arg0, %c0_i32, %c0_i32_0 : i32, i32, i32
  }
}

module attributes {stable_mosaic.version = 11 : i64} {
  func.func @_ffn_res_ln_kernel(%arg0: i32, %arg1: i32, %arg2: memref<16x32xf32, #tpu.memory_space<vmem>>, %arg3: memref<32x64xbf16, #tpu.memory_space<vmem>>, %arg4: memref<1x64xf32, #tpu.memory_space<vmem>>, %arg5: memref<64x32xbf16, #tpu.memory_space<vmem>>, %arg6: memref<1x32xf32, #tpu.memory_space<vmem>>, %arg7: memref<1x32xf32, #tpu.memory_space<vmem>>, %arg8: memref<1x32xf32, #tpu.memory_space<vmem>>, %arg9: memref<16x32xf32, #tpu.memory_space<vmem>>, %arg10: memref<16x32xf32, #tpu.memory_space<vmem>>) attributes {dimension_semantics = [#tpu.dimension_semantics<parallel>, #tpu.dimension_semantics<arbitrary>], iteration_bounds = array<i64: 1, 1>, scalar_prefetch = 0 : i64, scratch_operands = 1 : i64, tpu.core_type = #tpu.core_type<tc>, window_params = [{transform_indices = @transform_0, window_bounds = array<i64: 16, 32>}, {transform_indices = @transform_1, window_bounds = array<i64: 32, 64>}, {transform_indices = @transform_2, window_bounds = array<i64: 1, 64>}, {transform_indices = @transform_3, window_bounds = array<i64: 64, 32>}, {pipeline_mode = #tpu.pipeline_mode<synchronous>, transform_indices = @transform_4, window_bounds = array<i64: 1, 32>}, {pipeline_mode = #tpu.pipeline_mode<synchronous>, transform_indices = @transform_5, window_bounds = array<i64: 1, 32>}, {pipeline_mode = #tpu.pipeline_mode<synchronous>, transform_indices = @transform_6, window_bounds = array<i64: 1, 32>}, {transform_indices = @transform_7, window_bounds = array<i64: 16, 32>}]} {
    %c0_i32 = arith.constant 0 : i32
    %0 = arith.cmpi eq, %arg1, %c0_i32 : i32
    %1 = arith.extui %0 : i1 to i32
    %c0_i32_0 = arith.constant 0 : i32
    %2 = arith.cmpi ne, %1, %c0_i32_0 : i32
    scf.if %2 {
      %cst_16 = arith.constant 0.000000e+00 : f32
      %21 = vector.broadcast %cst_16 : f32 to vector<16x32xf32>
      %c0_17 = arith.constant 0 : index
      %c0_18 = arith.constant 0 : index
      %22 = vector.load %arg10[%c0_17, %c0_18] : memref<16x32xf32, #tpu.memory_space<vmem>>, vector<16x32xf32>
      tpu.vector_store %arg10[%c0_17, %c0_18], %21 {strides = array<i32>} : memref<16x32xf32, #tpu.memory_space<vmem>>, vector<16x32xf32>,
    } else {
    }
    %c0 = arith.constant 0 : index
    %c0_1 = arith.constant 0 : index
    %3 = vector.load %arg2[%c0, %c0_1] : memref<16x32xf32, #tpu.memory_space<vmem>>, vector<16x32xf32>
    %4 = arith.truncf %3 : vector<16x32xf32> to vector<16x32xbf16>
    %c0_2 = arith.constant 0 : index
    %c0_3 = arith.constant 0 : index
    %5 = vector.load %arg3[%c0_2, %c0_3] : memref<32x64xbf16, #tpu.memory_space<vmem>>, vector<32x64xbf16>
    %cst = arith.constant dense<0.000000e+00> : vector<16x64xf32>
    %6 = tpu.matmul %4, %5, %cst {dimension_numbers = #tpu.dot_dimension_numbers<[1], [0], [0], [1], [0, 0, 1, 1], [], []>} : vector<16x32xbf16>, vector<32x64xbf16>, vector<16x64xf32> -> vector<16x64xf32>
    %c0_4 = arith.constant 0 : index
    %c0_5 = arith.constant 0 : index
    %7 = vector.load %arg4[%c0_4, %c0_5] : memref<1x64xf32, #tpu.memory_space<vmem>>, vector<1x64xf32>
    %8 = vector.broadcast %7 : vector<1x64xf32> to vector<16x64xf32>
    %9 = arith.addf %6, %8 : vector<16x64xf32>
    %cst_6 = arith.constant 0.000000e+00 : f32
    %10 = vector.broadcast %cst_6 : f32 to vector<16x64xf32>
    %11 = arith.maximumf %9, %10 : vector<16x64xf32>
    %c0_7 = arith.constant 0 : index
    %c0_8 = arith.constant 0 : index
    %12 = vector.load %arg10[%c0_7, %c0_8] : memref<16x32xf32, #tpu.memory_space<vmem>>, vector<16x32xf32>
    %13 = arith.truncf %11 : vector<16x64xf32> to vector<16x64xbf16>
    %c0_9 = arith.constant 0 : index
    %c0_10 = arith.constant 0 : index
    %14 = vector.load %arg5[%c0_9, %c0_10] : memref<64x32xbf16, #tpu.memory_space<vmem>>, vector<64x32xbf16>
    %cst_11 = arith.constant dense<0.000000e+00> : vector<16x32xf32>
    %15 = tpu.matmul %13, %14, %cst_11 {dimension_numbers = #tpu.dot_dimension_numbers<[1], [0], [0], [1], [0, 0, 1, 1], [], []>} : vector<16x64xbf16>, vector<64x32xbf16>, vector<16x32xf32> -> vector<16x32xf32>
    %16 = arith.addf %12, %15 : vector<16x32xf32>
    %c0_12 = arith.constant 0 : index
    %c0_13 = arith.constant 0 : index
    %17 = vector.load %arg10[%c0_12, %c0_13] : memref<16x32xf32, #tpu.memory_space<vmem>>, vector<16x32xf32>
    tpu.vector_store %arg10[%c0_12, %c0_13], %16 {strides = array<i32>} : memref<16x32xf32, #tpu.memory_space<vmem>>, vector<16x32xf32>,
    %c0_i32_14 = arith.constant 0 : i32
    %18 = arith.cmpi eq, %arg1, %c0_i32_14 : i32
    %19 = arith.extui %18 : i1 to i32
    %c0_i32_15 = arith.constant 0 : i32
    %20 = arith.cmpi ne, %19, %c0_i32_15 : i32
    scf.if %20 {
      %c0_16 = arith.constant 0 : index
      %c0_17 = arith.constant 0 : index
      %21 = vector.load %arg10[%c0_16, %c0_17] : memref<16x32xf32, #tpu.memory_space<vmem>>, vector<16x32xf32>
      %c0_18 = arith.constant 0 : index
      %c0_19 = arith.constant 0 : index
      %22 = vector.load %arg6[%c0_18, %c0_19] : memref<1x32xf32, #tpu.memory_space<vmem>>, vector<1x32xf32>
      %23 = vector.broadcast %22 : vector<1x32xf32> to vector<16x32xf32>
      %24 = arith.addf %21, %23 : vector<16x32xf32>
      %c0_20 = arith.constant 0 : index
      %c0_21 = arith.constant 0 : index
      %25 = vector.load %arg2[%c0_20, %c0_21] : memref<16x32xf32, #tpu.memory_space<vmem>>, vector<16x32xf32>
      %26 = arith.addf %24, %25 : vector<16x32xf32>
      %cst_22 = arith.constant dense<0.000000e+00> : vector<16xf32>
      %27 = vector.multi_reduction <add>, %26, %cst_22 [1] : vector<16x32xf32> to vector<16xf32>
      %28 = vector.shape_cast %27 : vector<16xf32> to vector<16x1xf32>
      %cst_23 = arith.constant 3.200000e+01 : f32
      %29 = vector.broadcast %cst_23 : f32 to vector<16x1xf32>
      %30 = arith.divf %28, %29 : vector<16x1xf32>
      %31 = vector.broadcast %30 : vector<16x1xf32> to vector<16x32xf32>
      %32 = arith.subf %26, %31 : vector<16x32xf32>
      %33 = arith.mulf %32, %32 : vector<16x32xf32>
      %cst_24 = arith.constant dense<0.000000e+00> : vector<16xf32>
      %34 = vector.multi_reduction <add>, %33, %cst_24 [1] : vector<16x32xf32> to vector<16xf32>
      %35 = vector.shape_cast %34 : vector<16xf32> to vector<16x1xf32>
      %cst_25 = arith.constant 3.200000e+01 : f32
      %36 = vector.broadcast %cst_25 : f32 to vector<16x1xf32>
      %37 = arith.divf %35, %36 : vector<16x1xf32>
      %38 = vector.broadcast %30 : vector<16x1xf32> to vector<16x32xf32>
      %39 = arith.subf %26, %38 : vector<16x32xf32>
      %cst_26 = arith.constant 9.99999974E-6 : f32
      %40 = vector.broadcast %cst_26 : f32 to vector<16x1xf32>
      %41 = arith.addf %37, %40 : vector<16x1xf32>
      %42 = math.rsqrt %41 : vector<16x1xf32>
      %43 = vector.broadcast %42 : vector<16x1xf32> to vector<16x32xf32>
      %44 = arith.mulf %39, %43 : vector<16x32xf32>
      %c0_27 = arith.constant 0 : index
      %c0_28 = arith.constant 0 : index
      %45 = vector.load %arg7[%c0_27, %c0_28] : memref<1x32xf32, #tpu.memory_space<vmem>>, vector<1x32xf32>
      %46 = vector.broadcast %45 : vector<1x32xf32> to vector<16x32xf32>
      %47 = arith.mulf %44, %46 : vector<16x32xf32>
      %c0_29 = arith.constant 0 : index
      %c0_30 = arith.constant 0 : index
      %48 = vector.load %arg8[%c0_29, %c0_30] : memref<1x32xf32, #tpu.memory_space<vmem>>, vector<1x32xf32>
      %49 = vector.broadcast %48 : vector<1x32xf32> to vector<16x32xf32>
      %50 = arith.addf %47, %49 : vector<16x32xf32>
      %c0_31 = arith.constant 0 : index
      %c0_32 = arith.constant 0 : index
      %51 = vector.load %arg9[%c0_31, %c0_32] : memref<16x32xf32, #tpu.memory_space<vmem>>, vector<16x32xf32>
      tpu.vector_store %arg9[%c0_31, %c0_32], %50 {strides = array<i32>} : memref<16x32xf32, #tpu.memory_space<vmem>>, vector<16x32xf32>,
    } else {
    }
    return
  }
  func.func @transform_0(%arg0: i32, %arg1: i32) -> (i32, i32) {
    %c0_i32 = arith.constant 0 : i32
    %c0_i32_0 = arith.constant 0 : i32
    return %arg0, %c0_i32 : i32, i32
  }
  func.func @transform_1(%arg0: i32, %arg1: i32) -> (i32, i32) {
    %c0_i32 = arith.constant 0 : i32
    %c0_i32_0 = arith.constant 0 : i32
    return %c0_i32, %arg1 : i32, i32
  }
  func.func @transform_2(%arg0: i32, %arg1: i32) -> (i32, i32) {
    %c0_i32 = arith.constant 0 : i32
    %c0_i32_0 = arith.constant 0 : i32
    return %c0_i32, %arg1 : i32, i32
  }
  func.func @transform_3(%arg0: i32, %arg1: i32) -> (i32, i32) {
    %c0_i32 = arith.constant 0 : i32
    %c0_i32_0 = arith.constant 0 : i32
    return %arg1, %c0_i32 : i32, i32
  }
  func.func @transform_4(%arg0: i32, %arg1: i32) -> (i32, i32) {
    %c0_i32 = arith.constant 0 : i32
    %c0_i32_0 = arith.constant 0 : i32
    %c0_i32_1 = arith.constant 0 : i32
    return %c0_i32, %c0_i32_0 : i32, i32
  }
  func.func @transform_5(%arg0: i32, %arg1: i32) -> (i32, i32) {
    %c0_i32 = arith.constant 0 : i32
    %c0_i32_0 = arith.constant 0 : i32
    %c0_i32_1 = arith.constant 0 : i32
    return %c0_i32, %c0_i32_0 : i32, i32
  }
  func.func @transform_6(%arg0: i32, %arg1: i32) -> (i32, i32) {
    %c0_i32 = arith.constant 0 : i32
    %c0_i32_0 = arith.constant 0 : i32
    %c0_i32_1 = arith.constant 0 : i32
    return %c0_i32, %c0_i32_0 : i32, i32
  }
  func.func @transform_7(%arg0: i32, %arg1: i32) -> (i32, i32) {
    %c0_i32 = arith.constant 0 : i32
    %c0_i32_0 = arith.constant 0 : i32
    return %arg0, %c0_i32 : i32, i32
  }
}

module attributes {stable_mosaic.version = 11 : i64} {
  func.func @_cross_attn_layer_kernel(%arg0: i32, %arg1: i32, %arg2: memref<1x8x32xf32, #tpu.memory_space<vmem>>, %arg3: memref<1x8x32xf32, #tpu.memory_space<vmem>>, %arg4: memref<1x32x8xbf16, #tpu.memory_space<vmem>>, %arg5: memref<1x32x8xbf16, #tpu.memory_space<vmem>>, %arg6: memref<1x32x8xbf16, #tpu.memory_space<vmem>>, %arg7: memref<1x1x8xf32, #tpu.memory_space<vmem>>, %arg8: memref<1x1x8xf32, #tpu.memory_space<vmem>>, %arg9: memref<1x1x8xf32, #tpu.memory_space<vmem>>, %arg10: memref<9x8xbf16, #tpu.memory_space<vmem>>, %arg11: memref<1x1x8xf32, #tpu.memory_space<vmem>>, %arg12: memref<1x8x32xbf16, #tpu.memory_space<vmem>>, %arg13: memref<1x32xf32, #tpu.memory_space<vmem>>, %arg14: memref<1x32xf32, #tpu.memory_space<vmem>>, %arg15: memref<1x32xf32, #tpu.memory_space<vmem>>, %arg16: memref<1x8x32xf32, #tpu.memory_space<vmem>>, %arg17: memref<1x1x8x8xf32, #tpu.memory_space<vmem>>, %arg18: memref<8x32xf32, #tpu.memory_space<vmem>>) attributes {dimension_semantics = [#tpu.dimension_semantics<parallel>, #tpu.dimension_semantics<arbitrary>], iteration_bounds = array<i64: 2, 4>, scalar_prefetch = 0 : i64, scratch_operands = 1 : i64, tpu.core_type = #tpu.core_type<tc>, window_params = [{transform_indices = @transform_0, window_bounds = array<i64: 1, 8, 32>}, {transform_indices = @transform_1, window_bounds = array<i64: 1, 8, 32>}, {transform_indices = @transform_2, window_bounds = array<i64: 1, 32, 8>}, {transform_indices = @transform_3, window_bounds = array<i64: 1, 32, 8>}, {transform_indices = @transform_4, window_bounds = array<i64: 1, 32, 8>}, {transform_indices = @transform_5, window_bounds = array<i64: 1, 1, 8>}, {transform_indices = @transform_6, window_bounds = array<i64: 1, 1, 8>}, {transform_indices = @transform_7, window_bounds = array<i64: 1, 1, 8>}, {pipeline_mode = #tpu.pipeline_mode<synchronous>, transform_indices = @transform_8, window_bounds = array<i64: 9, 8>}, {transform_indices = @transform_9, window_bounds = array<i64: 1, 1, 8>}, {transform_indices = @transform_10, window_bounds = array<i64: 1, 8, 32>}, {pipeline_mode = #tpu.pipeline_mode<synchronous>, transform_indices = @transform_11, window_bounds = array<i64: 1, 32>}, {pipeline_mode = #tpu.pipeline_mode<synchronous>, transform_indices = @transform_12, window_bounds = array<i64: 1, 32>}, {pipeline_mode = #tpu.pipeline_mode<synchronous>, transform_indices = @transform_13, window_bounds = array<i64: 1, 32>}, {transform_indices = @transform_14, window_bounds = array<i64: 1, 8, 32>}, {transform_indices = @transform_15, window_bounds = array<i64: 1, 1, 8, 8>}]} {
    %c0_i32 = arith.constant 0 : i32
    %0 = arith.cmpi eq, %arg1, %c0_i32 : i32
    %1 = arith.extui %0 : i1 to i32
    %c0_i32_0 = arith.constant 0 : i32
    %2 = arith.cmpi ne, %1, %c0_i32_0 : i32
    scf.if %2 {
      %cst_63 = arith.constant 0.000000e+00 : f32
      %147 = vector.broadcast %cst_63 : f32 to vector<8x32xf32>
      %c0_64 = arith.constant 0 : index
      %c0_65 = arith.constant 0 : index
      %148 = vector.load %arg18[%c0_64, %c0_65] : memref<8x32xf32, #tpu.memory_space<vmem>>, vector<8x32xf32>
      tpu.vector_store %arg18[%c0_64, %c0_65], %147 {strides = array<i32>} : memref<8x32xf32, #tpu.memory_space<vmem>>, vector<8x32xf32>,
    } else {
    }
    %c0 = arith.constant 0 : index
    %c0_1 = arith.constant 0 : index
    %c0_2 = arith.constant 0 : index
    %3 = vector.load %arg2[%c0, %c0_1, %c0_2] : memref<1x8x32xf32, #tpu.memory_space<vmem>>, vector<1x8x32xf32>
    %4 = vector.shape_cast %3 : vector<1x8x32xf32> to vector<8x32xf32>
    %5 = arith.truncf %4 : vector<8x32xf32> to vector<8x32xbf16>
    %c0_3 = arith.constant 0 : index
    %c0_4 = arith.constant 0 : index
    %c0_5 = arith.constant 0 : index
    %6 = vector.load %arg3[%c0_3, %c0_4, %c0_5] : memref<1x8x32xf32, #tpu.memory_space<vmem>>, vector<1x8x32xf32>
    %7 = vector.shape_cast %6 : vector<1x8x32xf32> to vector<8x32xf32>
    %8 = arith.truncf %7 : vector<8x32xf32> to vector<8x32xbf16>
    %c0_6 = arith.constant 0 : index
    %c0_7 = arith.constant 0 : index
    %c0_8 = arith.constant 0 : index
    %9 = vector.load %arg4[%c0_6, %c0_7, %c0_8] : memref<1x32x8xbf16, #tpu.memory_space<vmem>>, vector<1x32x8xbf16>
    %10 = vector.shape_cast %9 : vector<1x32x8xbf16> to vector<32x8xbf16>
    %cst = arith.constant dense<0.000000e+00> : vector<8x8xf32>
    %11 = tpu.matmul %5, %10, %cst {dimension_numbers = #tpu.dot_dimension_numbers<[1], [0], [0], [1], [0, 0, 1, 1], [], []>} : vector<8x32xbf16>, vector<32x8xbf16>, vector<8x8xf32> -> vector<8x8xf32>
    %c0_9 = arith.constant 0 : index
    %c0_10 = arith.constant 0 : index
    %c0_11 = arith.constant 0 : index
    %12 = vector.load %arg7[%c0_9, %c0_10, %c0_11] : memref<1x1x8xf32, #tpu.memory_space<vmem>>, vector<1x1x8xf32>
    %13 = vector.shape_cast %12 : vector<1x1x8xf32> to vector<1x8xf32>
    %14 = vector.broadcast %13 : vector<1x8xf32> to vector<8x8xf32>
    %15 = arith.addf %11, %14 : vector<8x8xf32>
    %cst_12 = arith.constant 0.353553385 : f32
    %16 = vector.broadcast %cst_12 : f32 to vector<8x8xf32>
    %17 = arith.mulf %15, %16 : vector<8x8xf32>
    %c0_13 = arith.constant 0 : index
    %c0_14 = arith.constant 0 : index
    %c0_15 = arith.constant 0 : index
    %18 = vector.load %arg5[%c0_13, %c0_14, %c0_15] : memref<1x32x8xbf16, #tpu.memory_space<vmem>>, vector<1x32x8xbf16>
    %19 = vector.shape_cast %18 : vector<1x32x8xbf16> to vector<32x8xbf16>
    %cst_16 = arith.constant dense<0.000000e+00> : vector<8x8xf32>
    %20 = tpu.matmul %8, %19, %cst_16 {dimension_numbers = #tpu.dot_dimension_numbers<[1], [0], [0], [1], [0, 0, 1, 1], [], []>} : vector<8x32xbf16>, vector<32x8xbf16>, vector<8x8xf32> -> vector<8x8xf32>
    %c0_17 = arith.constant 0 : index
    %c0_18 = arith.constant 0 : index
    %c0_19 = arith.constant 0 : index
    %21 = vector.load %arg8[%c0_17, %c0_18, %c0_19] : memref<1x1x8xf32, #tpu.memory_space<vmem>>, vector<1x1x8xf32>
    %22 = vector.shape_cast %21 : vector<1x1x8xf32> to vector<1x8xf32>
    %23 = vector.broadcast %22 : vector<1x8xf32> to vector<8x8xf32>
    %24 = arith.addf %20, %23 : vector<8x8xf32>
    %c0_20 = arith.constant 0 : index
    %c0_21 = arith.constant 0 : index
    %c0_22 = arith.constant 0 : index
    %25 = vector.load %arg6[%c0_20, %c0_21, %c0_22] : memref<1x32x8xbf16, #tpu.memory_space<vmem>>, vector<1x32x8xbf16>
    %26 = vector.shape_cast %25 : vector<1x32x8xbf16> to vector<32x8xbf16>
    %cst_23 = arith.constant dense<0.000000e+00> : vector<8x8xf32>
    %27 = tpu.matmul %8, %26, %cst_23 {dimension_numbers = #tpu.dot_dimension_numbers<[1], [0], [0], [1], [0, 0, 1, 1], [], []>} : vector<8x32xbf16>, vector<32x8xbf16>, vector<8x8xf32> -> vector<8x8xf32>
    %c0_24 = arith.constant 0 : index
    %c0_25 = arith.constant 0 : index
    %c0_26 = arith.constant 0 : index
    %28 = vector.load %arg9[%c0_24, %c0_25, %c0_26] : memref<1x1x8xf32, #tpu.memory_space<vmem>>, vector<1x1x8xf32>
    %29 = vector.shape_cast %28 : vector<1x1x8xf32> to vector<1x8xf32>
    %30 = vector.broadcast %29 : vector<1x8xf32> to vector<8x8xf32>
    %31 = arith.addf %27, %30 : vector<8x8xf32>
    %32 = arith.truncf %31 : vector<8x8xf32> to vector<8x8xbf16>
    %33 = arith.truncf %17 : vector<8x8xf32> to vector<8x8xbf16>
    %34 = arith.truncf %24 : vector<8x8xf32> to vector<8x8xbf16>
    %cst_27 = arith.constant dense<0.000000e+00> : vector<8x8xf32>
    %35 = tpu.matmul %33, %34, %cst_27 {dimension_numbers = #tpu.dot_dimension_numbers<[1], [1], [0], [0], [0, 0, 1, 0], [], []>} : vector<8x8xbf16>, vector<8x8xbf16>, vector<8x8xf32> -> vector<8x8xf32>
    %c0_28 = arith.constant 0 : index
    %c0_29 = arith.constant 0 : index
    %36 = vector.load %arg10[%c0_28, %c0_29] : memref<9x8xbf16, #tpu.memory_space<vmem>>, vector<9x8xbf16>
    %cst_30 = arith.constant dense<0.000000e+00> : vector<8x9xf32>
    %37 = tpu.matmul %33, %36, %cst_30 {dimension_numbers = #tpu.dot_dimension_numbers<[1], [1], [0], [0], [0, 0, 1, 0], [], []>} : vector<8x8xbf16>, vector<9x8xbf16>, vector<8x9xf32> -> vector<8x9xf32>
    %38 = tpu.iota {dimensions = array<i32: 0>} : vector<8x8xi32>
    %39 = tpu.iota {dimensions = array<i32: 1>} : vector<8x8xi32>
    %40 = arith.subi %39, %38 : vector<8x8xi32>
    %c-4_i32 = arith.constant -4 : i32
    %c4_i32 = arith.constant 4 : i32
    %41 = vector.broadcast %c-4_i32 : i32 to vector<8x8xi32>
    %42 = arith.maxsi %41, %40 : vector<8x8xi32>
    %43 = vector.broadcast %c4_i32 : i32 to vector<8x8xi32>
    %44 = arith.minsi %43, %42 : vector<8x8xi32>
    %c4_i32_31 = arith.constant 4 : i32
    %45 = vector.broadcast %c4_i32_31 : i32 to vector<8x8xi32>
    %46 = arith.addi %44, %45 : vector<8x8xi32>
    %c0_i32_32 = arith.constant 0 : i32
    %47 = vector.broadcast %c0_i32_32 : i32 to vector<8x8xi32>
    %48 = arith.cmpi eq, %46, %47 : vector<8x8xi32>
    %49 = vector.extract_strided_slice %37 {offsets = [0, 0], sizes = [8, 1], strides = [1, 1]} : vector<8x9xf32> to vector<8x1xf32>
    %cst_33 = arith.constant 0.000000e+00 : f32
    %50 = vector.shape_cast %49 : vector<8x1xf32> to vector<8x1xf32>
    %51 = vector.broadcast %50 : vector<8x1xf32> to vector<8x8xf32>
    %52 = vector.broadcast %cst_33 : f32 to vector<8x8xf32>
    %53 = arith.select %48, %51, %52 : vector<8x8xi1>, vector<8x8xf32>
    %54 = arith.addf %35, %53 : vector<8x8xf32>
    %c1_i32 = arith.constant 1 : i32
    %55 = vector.broadcast %c1_i32 : i32 to vector<8x8xi32>
    %56 = arith.cmpi eq, %46, %55 : vector<8x8xi32>
    %57 = vector.extract_strided_slice %37 {offsets = [0, 1], sizes = [8, 1], strides = [1, 1]} : vector<8x9xf32> to vector<8x1xf32>
    %cst_34 = arith.constant 0.000000e+00 : f32
    %58 = vector.shape_cast %57 : vector<8x1xf32> to vector<8x1xf32>
    %59 = vector.broadcast %58 : vector<8x1xf32> to vector<8x8xf32>
    %60 = vector.broadcast %cst_34 : f32 to vector<8x8xf32>
    %61 = arith.select %56, %59, %60 : vector<8x8xi1>, vector<8x8xf32>
    %62 = arith.addf %54, %61 : vector<8x8xf32>
    %c2_i32 = arith.constant 2 : i32
    %63 = vector.broadcast %c2_i32 : i32 to vector<8x8xi32>
    %64 = arith.cmpi eq, %46, %63 : vector<8x8xi32>
    %65 = vector.extract_strided_slice %37 {offsets = [0, 2], sizes = [8, 1], strides = [1, 1]} : vector<8x9xf32> to vector<8x1xf32>
    %cst_35 = arith.constant 0.000000e+00 : f32
    %66 = vector.shape_cast %65 : vector<8x1xf32> to vector<8x1xf32>
    %67 = vector.broadcast %66 : vector<8x1xf32> to vector<8x8xf32>
    %68 = vector.broadcast %cst_35 : f32 to vector<8x8xf32>
    %69 = arith.select %64, %67, %68 : vector<8x8xi1>, vector<8x8xf32>
    %70 = arith.addf %62, %69 : vector<8x8xf32>
    %c3_i32 = arith.constant 3 : i32
    %71 = vector.broadcast %c3_i32 : i32 to vector<8x8xi32>
    %72 = arith.cmpi eq, %46, %71 : vector<8x8xi32>
    %73 = vector.extract_strided_slice %37 {offsets = [0, 3], sizes = [8, 1], strides = [1, 1]} : vector<8x9xf32> to vector<8x1xf32>
    %cst_36 = arith.constant 0.000000e+00 : f32
    %74 = vector.shape_cast %73 : vector<8x1xf32> to vector<8x1xf32>
    %75 = vector.broadcast %74 : vector<8x1xf32> to vector<8x8xf32>
    %76 = vector.broadcast %cst_36 : f32 to vector<8x8xf32>
    %77 = arith.select %72, %75, %76 : vector<8x8xi1>, vector<8x8xf32>
    %78 = arith.addf %70, %77 : vector<8x8xf32>
    %c4_i32_37 = arith.constant 4 : i32
    %79 = vector.broadcast %c4_i32_37 : i32 to vector<8x8xi32>
    %80 = arith.cmpi eq, %46, %79 : vector<8x8xi32>
    %81 = vector.extract_strided_slice %37 {offsets = [0, 4], sizes = [8, 1], strides = [1, 1]} : vector<8x9xf32> to vector<8x1xf32>
    %cst_38 = arith.constant 0.000000e+00 : f32
    %82 = vector.shape_cast %81 : vector<8x1xf32> to vector<8x1xf32>
    %83 = vector.broadcast %82 : vector<8x1xf32> to vector<8x8xf32>
    %84 = vector.broadcast %cst_38 : f32 to vector<8x8xf32>
    %85 = arith.select %80, %83, %84 : vector<8x8xi1>, vector<8x8xf32>
    %86 = arith.addf %78, %85 : vector<8x8xf32>
    %c5_i32 = arith.constant 5 : i32
    %87 = vector.broadcast %c5_i32 : i32 to vector<8x8xi32>
    %88 = arith.cmpi eq, %46, %87 : vector<8x8xi32>
    %89 = vector.extract_strided_slice %37 {offsets = [0, 5], sizes = [8, 1], strides = [1, 1]} : vector<8x9xf32> to vector<8x1xf32>
    %cst_39 = arith.constant 0.000000e+00 : f32
    %90 = vector.shape_cast %89 : vector<8x1xf32> to vector<8x1xf32>
    %91 = vector.broadcast %90 : vector<8x1xf32> to vector<8x8xf32>
    %92 = vector.broadcast %cst_39 : f32 to vector<8x8xf32>
    %93 = arith.select %88, %91, %92 : vector<8x8xi1>, vector<8x8xf32>
    %94 = arith.addf %86, %93 : vector<8x8xf32>
    %c6_i32 = arith.constant 6 : i32
    %95 = vector.broadcast %c6_i32 : i32 to vector<8x8xi32>
    %96 = arith.cmpi eq, %46, %95 : vector<8x8xi32>
    %97 = vector.extract_strided_slice %37 {offsets = [0, 6], sizes = [8, 1], strides = [1, 1]} : vector<8x9xf32> to vector<8x1xf32>
    %cst_40 = arith.constant 0.000000e+00 : f32
    %98 = vector.shape_cast %97 : vector<8x1xf32> to vector<8x1xf32>
    %99 = vector.broadcast %98 : vector<8x1xf32> to vector<8x8xf32>
    %100 = vector.broadcast %cst_40 : f32 to vector<8x8xf32>
    %101 = arith.select %96, %99, %100 : vector<8x8xi1>, vector<8x8xf32>
    %102 = arith.addf %94, %101 : vector<8x8xf32>
    %c7_i32 = arith.constant 7 : i32
    %103 = vector.broadcast %c7_i32 : i32 to vector<8x8xi32>
    %104 = arith.cmpi eq, %46, %103 : vector<8x8xi32>
    %105 = vector.extract_strided_slice %37 {offsets = [0, 7], sizes = [8, 1], strides = [1, 1]} : vector<8x9xf32> to vector<8x1xf32>
    %cst_41 = arith.constant 0.000000e+00 : f32
    %106 = vector.shape_cast %105 : vector<8x1xf32> to vector<8x1xf32>
    %107 = vector.broadcast %106 : vector<8x1xf32> to vector<8x8xf32>
    %108 = vector.broadcast %cst_41 : f32 to vector<8x8xf32>
    %109 = arith.select %104, %107, %108 : vector<8x8xi1>, vector<8x8xf32>
    %110 = arith.addf %102, %109 : vector<8x8xf32>
    %c8_i32 = arith.constant 8 : i32
    %111 = vector.broadcast %c8_i32 : i32 to vector<8x8xi32>
    %112 = arith.cmpi eq, %46, %111 : vector<8x8xi32>
    %113 = vector.extract_strided_slice %37 {offsets = [0, 8], sizes = [8, 1], strides = [1, 1]} : vector<8x9xf32> to vector<8x1xf32>
    %cst_42 = arith.constant 0.000000e+00 : f32
    %114 = vector.shape_cast %113 : vector<8x1xf32> to vector<8x1xf32>
    %115 = vector.broadcast %114 : vector<8x1xf32> to vector<8x8xf32>
    %116 = vector.broadcast %cst_42 : f32 to vector<8x8xf32>
    %117 = arith.select %112, %115, %116 : vector<8x8xi1>, vector<8x8xf32>
    %118 = arith.addf %110, %117 : vector<8x8xf32>
    %c0_43 = arith.constant 0 : index
    %c0_44 = arith.constant 0 : index
    %c0_45 = arith.constant 0 : index
    %119 = vector.load %arg11[%c0_43, %c0_44, %c0_45] : memref<1x1x8xf32, #tpu.memory_space<vmem>>, vector<1x1x8xf32>
    %120 = vector.shape_cast %119 : vector<1x1x8xf32> to vector<1x8xf32>
    %121 = vector.broadcast %120 : vector<1x8xf32> to vector<8x8xf32>
    %122 = arith.addf %118, %121 : vector<8x8xf32>
    %cst_46 = arith.constant dense<0xFF800000> : vector<8xf32>
    %123 = vector.multi_reduction <maximumf>, %122, %cst_46 [1] : vector<8x8xf32> to vector<8xf32>
    %124 = vector.shape_cast %123 : vector<8xf32> to vector<8x1xf32>
    %125 = vector.broadcast %124 : vector<8x1xf32> to vector<8x8xf32>
    %126 = arith.subf %122, %125 : vector<8x8xf32>
    %127 = math.exp %126 : vector<8x8xf32>
    %cst_47 = arith.constant dense<0.000000e+00> : vector<8xf32>
    %128 = vector.multi_reduction <add>, %127, %cst_47 [1] : vector<8x8xf32> to vector<8xf32>
    %129 = vector.shape_cast %128 : vector<8xf32> to vector<8x1xf32>
    %130 = vector.broadcast %129 : vector<8x1xf32> to vector<8x8xf32>
    %131 = arith.divf %127, %130 : vector<8x8xf32>
    %c0_48 = arith.constant 0 : index
    %c0_49 = arith.constant 0 : index
    %c0_50 = arith.constant 0 : index
    %c0_51 = arith.constant 0 : index
    %132 = vector.load %arg17[%c0_48, %c0_49, %c0_50, %c0_51] : memref<1x1x8x8xf32, #tpu.memory_space<vmem>>, vector<1x1x8x8xf32>
    %133 = vector.shape_cast %132 : vector<1x1x8x8xf32> to vector<8x8xf32>
    %134 = vector.shape_cast %131 : vector<8x8xf32> to vector<1x1x8x8xf32>
    tpu.vector_store %arg17[%c0_48, %c0_49, %c0_50, %c0_51], %134 {strides = array<i32>} : memref<1x1x8x8xf32, #tpu.memory_space<vmem>>, vector<1x1x8x8xf32>,
    %135 = arith.truncf %131 : vector<8x8xf32> to vector<8x8xbf16>
    %cst_52 = arith.constant dense<0.000000e+00> : vector<8x8xf32>
    %136 = tpu.matmul %135, %32, %cst_52 {dimension_numbers = #tpu.dot_dimension_numbers<[1], [0], [0], [1], [0, 0, 1, 1], [], []>} : vector<8x8xbf16>, vector<8x8xbf16>, vector<8x8xf32> -> vector<8x8xf32>
    %c0_53 = arith.constant 0 : index
    %c0_54 = arith.constant 0 : index
    %137 = vector.load %arg18[%c0_53, %c0_54] : memref<8x32xf32, #tpu.memory_space<vmem>>, vector<8x32xf32>
    %138 = arith.truncf %136 : vector<8x8xf32> to vector<8x8xbf16>
    %c0_55 = arith.constant 0 : index
    %c0_56 = arith.constant 0 : index
    %c0_57 = arith.constant 0 : index
    %139 = vector.load %arg12[%c0_55, %c0_56, %c0_57] : memref<1x8x32xbf16, #tpu.memory_space<vmem>>, vector<1x8x32xbf16>
    %140 = vector.shape_cast %139 : vector<1x8x32xbf16> to vector<8x32xbf16>
    %cst_58 = arith.constant dense<0.000000e+00> : vector<8x32xf32>
    %141 = tpu.matmul %138, %140, %cst_58 {dimension_numbers = #tpu.dot_dimension_numbers<[1], [0], [0], [1], [0, 0, 1, 1], [], []>} : vector<8x8xbf16>, vector<8x32xbf16>, vector<8x32xf32> -> vector<8x32xf32>
    %142 = arith.addf %137, %141 : vector<8x32xf32>
    %c0_59 = arith.constant 0 : index
    %c0_60 = arith.constant 0 : index
    %143 = vector.load %arg18[%c0_59, %c0_60] : memref<8x32xf32, #tpu.memory_space<vmem>>, vector<8x32xf32>
    tpu.vector_store %arg18[%c0_59, %c0_60], %142 {strides = array<i32>} : memref<8x32xf32, #tpu.memory_space<vmem>>, vector<8x32xf32>,
    %c3_i32_61 = arith.constant 3 : i32
    %144 = arith.cmpi eq, %arg1, %c3_i32_61 : i32
    %145 = arith.extui %144 : i1 to i32
    %c0_i32_62 = arith.constant 0 : i32
    %146 = arith.cmpi ne, %145, %c0_i32_62 : i32
    scf.if %146 {
      %c0_63 = arith.constant 0 : index
      %c0_64 = arith.constant 0 : index
      %147 = vector.load %arg18[%c0_63, %c0_64] : memref<8x32xf32, #tpu.memory_space<vmem>>, vector<8x32xf32>
      %c0_65 = arith.constant 0 : index
      %c0_66 = arith.constant 0 : index
      %148 = vector.load %arg13[%c0_65, %c0_66] : memref<1x32xf32, #tpu.memory_space<vmem>>, vector<1x32xf32>
      %149 = vector.broadcast %148 : vector<1x32xf32> to vector<8x32xf32>
      %150 = arith.addf %147, %149 : vector<8x32xf32>
      %151 = arith.addf %150, %4 : vector<8x32xf32>
      %cst_67 = arith.constant dense<0.000000e+00> : vector<8xf32>
      %152 = vector.multi_reduction <add>, %151, %cst_67 [1] : vector<8x32xf32> to vector<8xf32>
      %153 = vector.shape_cast %152 : vector<8xf32> to vector<8x1xf32>
      %cst_68 = arith.constant 3.200000e+01 : f32
      %154 = vector.broadcast %cst_68 : f32 to vector<8x1xf32>
      %155 = arith.divf %153, %154 : vector<8x1xf32>
      %156 = vector.broadcast %155 : vector<8x1xf32> to vector<8x32xf32>
      %157 = arith.subf %151, %156 : vector<8x32xf32>
      %158 = arith.mulf %157, %157 : vector<8x32xf32>
      %cst_69 = arith.constant dense<0.000000e+00> : vector<8xf32>
      %159 = vector.multi_reduction <add>, %158, %cst_69 [1] : vector<8x32xf32> to vector<8xf32>
      %160 = vector.shape_cast %159 : vector<8xf32> to vector<8x1xf32>
      %cst_70 = arith.constant 3.200000e+01 : f32
      %161 = vector.broadcast %cst_70 : f32 to vector<8x1xf32>
      %162 = arith.divf %160, %161 : vector<8x1xf32>
      %163 = vector.broadcast %155 : vector<8x1xf32> to vector<8x32xf32>
      %164 = arith.subf %151, %163 : vector<8x32xf32>
      %cst_71 = arith.constant 9.99999974E-6 : f32
      %165 = vector.broadcast %cst_71 : f32 to vector<8x1xf32>
      %166 = arith.addf %162, %165 : vector<8x1xf32>
      %167 = math.rsqrt %166 : vector<8x1xf32>
      %168 = vector.broadcast %167 : vector<8x1xf32> to vector<8x32xf32>
      %169 = arith.mulf %164, %168 : vector<8x32xf32>
      %c0_72 = arith.constant 0 : index
      %c0_73 = arith.constant 0 : index
      %170 = vector.load %arg14[%c0_72, %c0_73] : memref<1x32xf32, #tpu.memory_space<vmem>>, vector<1x32xf32>
      %171 = vector.broadcast %170 : vector<1x32xf32> to vector<8x32xf32>
      %172 = arith.mulf %169, %171 : vector<8x32xf32>
      %c0_74 = arith.constant 0 : index
      %c0_75 = arith.constant 0 : index
      %173 = vector.load %arg15[%c0_74, %c0_75] : memref<1x32xf32, #tpu.memory_space<vmem>>, vector<1x32xf32>
      %174 = vector.broadcast %173 : vector<1x32xf32> to vector<8x32xf32>
      %175 = arith.addf %172, %174 : vector<8x32xf32>
      %c0_76 = arith.constant 0 : index
      %c0_77 = arith.constant 0 : index
      %c0_78 = arith.constant 0 : index
      %176 = vector.load %arg16[%c0_76, %c0_77, %c0_78] : memref<1x8x32xf32, #tpu.memory_space<vmem>>, vector<1x8x32xf32>
      %177 = vector.shape_cast %176 : vector<1x8x32xf32> to vector<8x32xf32>
      %178 = vector.shape_cast %175 : vector<8x32xf32> to vector<1x8x32xf32>
      tpu.vector_store %arg16[%c0_76, %c0_77, %c0_78], %178 {strides = array<i32>} : memref<1x8x32xf32, #tpu.memory_space<vmem>>, vector<1x8x32xf32>,
    } else {
    }
    return
  }
  func.func @transform_0(%arg0: i32, %arg1: i32) -> (i32, i32, i32) {
    %c0_i32 = arith.constant 0 : i32
    %c0_i32_0 = arith.constant 0 : i32
    %c0_i32_1 = arith.constant 0 : i32
    return %arg0, %c0_i32, %c0_i32_0 : i32, i32, i32
  }
  func.func @transform_1(%arg0: i32, %arg1: i32) -> (i32, i32, i32) {
    %c0_i32 = arith.constant 0 : i32
    %c0_i32_0 = arith.constant 0 : i32
    %c0_i32_1 = arith.constant 0 : i32
    return %arg0, %c0_i32, %c0_i32_0 : i32, i32, i32
  }
  func.func @transform_2(%arg0: i32, %arg1: i32) -> (i32, i32, i32) {
    %c0_i32 = arith.constant 0 : i32
    %c0_i32_0 = arith.constant 0 : i32
    %c0_i32_1 = arith.constant 0 : i32
    return %arg1, %c0_i32, %c0_i32_0 : i32, i32, i32
  }
  func.func @transform_3(%arg0: i32, %arg1: i32) -> (i32, i32, i32) {
    %c0_i32 = arith.constant 0 : i32
    %c0_i32_0 = arith.constant 0 : i32
    %c0_i32_1 = arith.constant 0 : i32
    return %arg1, %c0_i32, %c0_i32_0 : i32, i32, i32
  }
  func.func @transform_4(%arg0: i32, %arg1: i32) -> (i32, i32, i32) {
    %c0_i32 = arith.constant 0 : i32
    %c0_i32_0 = arith.constant 0 : i32
    %c0_i32_1 = arith.constant 0 : i32
    return %arg1, %c0_i32, %c0_i32_0 : i32, i32, i32
  }
  func.func @transform_5(%arg0: i32, %arg1: i32) -> (i32, i32, i32) {
    %c0_i32 = arith.constant 0 : i32
    %c0_i32_0 = arith.constant 0 : i32
    %c0_i32_1 = arith.constant 0 : i32
    return %arg1, %c0_i32, %c0_i32_0 : i32, i32, i32
  }
  func.func @transform_6(%arg0: i32, %arg1: i32) -> (i32, i32, i32) {
    %c0_i32 = arith.constant 0 : i32
    %c0_i32_0 = arith.constant 0 : i32
    %c0_i32_1 = arith.constant 0 : i32
    return %arg1, %c0_i32, %c0_i32_0 : i32, i32, i32
  }
  func.func @transform_7(%arg0: i32, %arg1: i32) -> (i32, i32, i32) {
    %c0_i32 = arith.constant 0 : i32
    %c0_i32_0 = arith.constant 0 : i32
    %c0_i32_1 = arith.constant 0 : i32
    return %arg1, %c0_i32, %c0_i32_0 : i32, i32, i32
  }
  func.func @transform_8(%arg0: i32, %arg1: i32) -> (i32, i32) {
    %c0_i32 = arith.constant 0 : i32
    %c0_i32_0 = arith.constant 0 : i32
    %c0_i32_1 = arith.constant 0 : i32
    return %c0_i32, %c0_i32_0 : i32, i32
  }
  func.func @transform_9(%arg0: i32, %arg1: i32) -> (i32, i32, i32) {
    %c0_i32 = arith.constant 0 : i32
    %c0_i32_0 = arith.constant 0 : i32
    %c0_i32_1 = arith.constant 0 : i32
    return %arg0, %c0_i32, %c0_i32_0 : i32, i32, i32
  }
  func.func @transform_10(%arg0: i32, %arg1: i32) -> (i32, i32, i32) {
    %c0_i32 = arith.constant 0 : i32
    %c0_i32_0 = arith.constant 0 : i32
    %c0_i32_1 = arith.constant 0 : i32
    return %arg1, %c0_i32, %c0_i32_0 : i32, i32, i32
  }
  func.func @transform_11(%arg0: i32, %arg1: i32) -> (i32, i32) {
    %c0_i32 = arith.constant 0 : i32
    %c0_i32_0 = arith.constant 0 : i32
    %c0_i32_1 = arith.constant 0 : i32
    return %c0_i32, %c0_i32_0 : i32, i32
  }
  func.func @transform_12(%arg0: i32, %arg1: i32) -> (i32, i32) {
    %c0_i32 = arith.constant 0 : i32
    %c0_i32_0 = arith.constant 0 : i32
    %c0_i32_1 = arith.constant 0 : i32
    return %c0_i32, %c0_i32_0 : i32, i32
  }
  func.func @transform_13(%arg0: i32, %arg1: i32) -> (i32, i32) {
    %c0_i32 = arith.constant 0 : i32
    %c0_i32_0 = arith.constant 0 : i32
    %c0_i32_1 = arith.constant 0 : i32
    return %c0_i32, %c0_i32_0 : i32, i32
  }
  func.func @transform_14(%arg0: i32, %arg1: i32) -> (i32, i32, i32) {
    %c0_i32 = arith.constant 0 : i32
    %c0_i32_0 = arith.constant 0 : i32
    %c0_i32_1 = arith.constant 0 : i32
    return %arg0, %c0_i32, %c0_i32_0 : i32, i32, i32
  }
  func.func @transform_15(%arg0: i32, %arg1: i32) -> (i32, i32, i32, i32) {
    %c0_i32 = arith.constant 0 : i32
    %c0_i32_0 = arith.constant 0 : i32
    %c0_i32_1 = arith.constant 0 : i32
    return %arg0, %arg1, %c0_i32, %c0_i32_0 : i32, i32, i32, i32
  }
}

</mosaic_0001>

<bundles_post_ra>
// kernel: decoder_stacks_forward.8
= control target key start
LH: loop header
LB: loop body
LE: loop exit
PB: predicated region body
PF: predicated region fallthrough
CT: control target
= control target key end

     0   :  { %12 = vsyncpa [#allocation4], 0  ;;  %s781_s0 = inlined_call_operand.hbm [shape: f32[16,32], index: 0, kind: input, shape index: {}]   ;;  %s782_s1 = inlined_call_operand.hbm [shape: bf16[32,64], index: 1, kind: input, shape index: {}]   ;;  %s783_s2 = inlined_call_operand.hbm [shape: f32[1,64], index: 2, kind: input, shape index: {}]   ;;  %s784_s3 = inlined_call_operand.hbm [shape: bf16[64,32], index: 3, kind: input, shape index: {}]   ;;  %s785_s4 = inlined_call_operand.hbm [shape: f32[1,32], index: 4, kind: input, shape index: {}]   ;;  %s786_s5 = inlined_call_operand.hbm [shape: f32[1,32], index: 5, kind: input, shape index: {}]   ;;  %s787_s6 = inlined_call_operand.hbm [shape: f32[1,32], index: 6, kind: input, shape index: {}]   ;;  %s788_s7 = inlined_call_operand.hbm [shape: f32[16,32], index: 7, kind: output, shape index: {}]  }
   0x1   :  { %13 = vsyncpa [#allocation7], 0 }
   0x2   :  { %14 = vsyncpa [#allocation10], 0 }
   0x3   :  { %15 = vsyncpa [#allocation13], 0 }
   0x4   :  { %16 = vsyncpa [#allocation5], 0  ;;  %s614_s24 = smov [#allocation6]   ;;  %s428_s28 = scalar_lea.hbm %s782_s1, 256 }
   0x5   :  { %s34_s25 = sshll.u32 %s614_s24, 4  ;;  %p429_p0 = scmp.ne.s32.totalorder %s782_s1, %s428_s28  ;;  %s35_s25 = int_to_ptr.vmem [resolvable:$true] %s34_s25 }
   0x6   :  { %p432_p1 = scmp.lt.u32.totalorder %s428_s28, %s782_s1 }
   0x8   :  { %p434_p2 = pnand %p432_p1, %p429_p0 }
   0xa   :  { %437 = shalt.err (!%p434_p2)
}
   0xb   :  { %s438_s10 = scalar_lea.vmem %s35_s25, 256  ;;  %p443_p4 = scmp.lt.s32.totalorder %s35_s25, %s35_s25 }
   0xc   :  { %p439_p3 = scmp.ne.s32.totalorder %s35_s25, %s438_s10  ;;  %p444_p5 = scmp.lt.s32.totalorder %s438_s10, %s438_s10 }
   0xe   :  { %p445_p6 = por %p444_p5, %p443_p4 }
  0x10   :  { %p446_p7 = pnand %p445_p6, %p439_p3 }
  0x12   :  { %449 = shalt.err (!%p446_p7)
}
  0x13   :  { %s615_s11 = smov 64   ;;  %s616_s12 = smov 4  }
  0x14   :  { %40 = dma.hbm_to_vmem [thread:$0]  %s782_s1, 256, %s35_s25, [#allocation7], %s615_s11, %s615_s11, %s616_s12  }
  0x15   :  { %s617_s15 = smov [#allocation9]   ;;  %s618_s17 = smov [#allocation12]  }
  0x16   :  { %s56_s16 = sshll.u32 %s617_s15, 4  ;;  %s79_s18 = sshll.u32 %s618_s17, 4  ;;  %s57_s16 = int_to_ptr.vmem [resolvable:$true] %s56_s16  ;;  %s80_s18 = int_to_ptr.vmem [resolvable:$true] %s79_s18 }
  0x17   :  { %s450_s21 = scalar_lea.hbm %s784_s3, 512 }
  0x18   :  { %p451_p8 = scmp.ne.s32.totalorder %s784_s3, %s450_s21  ;;  %p454_p9 = scmp.lt.u32.totalorder %s450_s21, %s784_s3 }
  0x1a   :  { %p456_p10 = pnand %p454_p9, %p451_p8 }
  0x1c   :  { %459 = shalt.err (!%p456_p10)
}
  0x1d   :  { %s460_s1 = scalar_lea.vmem %s57_s16, 512  ;;  %p465_p12 = scmp.lt.s32.totalorder %s57_s16, %s57_s16 }
  0x1e   :  { %p461_p11 = scmp.ne.s32.totalorder %s57_s16, %s460_s1  ;;  %p466_p13 = scmp.lt.s32.totalorder %s460_s1, %s460_s1 }
  0x20   :  { %p467_p0 = por %p466_p13, %p465_p12 }
  0x22   :  { %p468_p1 = pnand %p467_p0, %p461_p11 }
  0x24   :  { %471 = shalt.err (!%p468_p1)
}
  0x25   :  { %62 = dma.hbm_to_vmem [thread:$0]  %s784_s3, 512, %s57_s16, [#allocation10], %s615_s11, %s615_s11, %s616_s12  }
  0x26   :  { %s472_s30 = scalar_lea.hbm %s786_s5, 16 }
  0x27   :  { %p473_p2 = scmp.ne.s32.totalorder %s786_s5, %s472_s30  ;;  %p476_p3 = scmp.lt.u32.totalorder %s472_s30, %s786_s5 }
  0x29   :  { %p478_p4 = pnand %p476_p3, %p473_p2 }
  0x2b   :  { %481 = shalt.err (!%p478_p4)
}
  0x2c   :  { %s482_s14 = scalar_lea.vmem %s80_s18, 16  ;;  %s486_s15 = scalar_lea.vmem %s80_s18, 32 }
  0x2d   :  { %p483_p5 = scmp.ne.s32.totalorder %s80_s18, %s482_s14  ;;  %p487_p6 = scmp.lt.s32.totalorder %s80_s18, %s80_s18 }
  0x2e   :  { %p488_p7 = scmp.lt.s32.totalorder %s486_s15, %s482_s14 }
  0x30   :  { %p489_p8 = por %p488_p7, %p487_p6 }
  0x32   :  { %p490_p9 = pnand %p489_p8, %p483_p5 }
  0x34   :  { %493 = shalt.err (!%p490_p9)
}
  0x35   :  { %82 = dma.hbm_to_vmem [thread:$0]  %s786_s5, 16, %s80_s18, [#allocation13]  }
  0x36   :  { %s619_s12 = smov [#allocation3]   ;;  %s494_s20 = scalar_lea.hbm %s781_s0, 256 }
  0x37   :  { %s22_s16 = sshll.u32 %s619_s12, 4  ;;  %p495_p10 = scmp.ne.s32.totalorder %s781_s0, %s494_s20  ;;  %s23_s16 = int_to_ptr.vmem [resolvable:$true] %s22_s16 }
  0x38   :  { %p498_p11 = scmp.lt.u32.totalorder %s494_s20, %s781_s0 }
  0x3a   :  { %p500_p12 = pnand %p498_p11, %p495_p10 }
  0x3c   :  { %503 = shalt.err (!%p500_p12)
}
  0x3d   :  { %s504_s26 = scalar_lea.vmem %s23_s16, 256  ;;  %p509_p0 = scmp.lt.s32.totalorder %s23_s16, %s23_s16 }
  0x3e   :  { %p505_p13 = scmp.ne.s32.totalorder %s23_s16, %s504_s26  ;;  %p510_p1 = scmp.lt.s32.totalorder %s504_s26, %s504_s26 }
  0x40   :  { %p511_p2 = por %p510_p1, %p509_p0 }
  0x42   :  { %p512_p3 = pnand %p511_p2, %p505_p13 }
  0x44   :  { %515 = shalt.err (!%p512_p3)
}
  0x45   :  { %s620_s5 = smov 128   ;;  %s621_s18 = smov 8  }
  0x46   :  { %28 = dma.hbm_to_vmem [thread:$0]  %s781_s0, 256, %s23_s16, [#allocation4], %s620_s5, %s620_s5, %s621_s18  }
  0x47   :  { %s622_s27 = smov [#allocation8]   ;;  %s623_s29 = smov [#allocation11]  }
  0x48   :  { %s47_s28 = sshll.u32 %s622_s27, 4  ;;  %s69_s30 = sshll.u32 %s623_s29, 4  ;;  %s48_s28 = int_to_ptr.vmem [resolvable:$true] %s47_s28  ;;  %s70_s30 = int_to_ptr.vmem [resolvable:$true] %s69_s30 }
  0x49   :  { %s516_s10 = scalar_lea.hbm %s783_s2, 16 }
  0x4a   :  { %p517_p4 = scmp.ne.s32.totalorder %s783_s2, %s516_s10  ;;  %p520_p5 = scmp.lt.u32.totalorder %s516_s10, %s783_s2 }
  0x4c   :  { %p522_p6 = pnand %p520_p5, %p517_p4 }
  0x4e   :  { %525 = shalt.err (!%p522_p6)
}
  0x4f   :  { %s526_s0 = scalar_lea.vmem %s48_s28, 16  ;;  %s530_s11 = scalar_lea.vmem %s48_s28, 32 }
  0x50   :  { %p527_p7 = scmp.ne.s32.totalorder %s48_s28, %s526_s0  ;;  %p531_p8 = scmp.lt.s32.totalorder %s48_s28, %s48_s28 }
  0x51   :  { %p532_p9 = scmp.lt.s32.totalorder %s530_s11, %s526_s0 }
  0x53   :  { %p533_p10 = por %p532_p9, %p531_p8 }
  0x55   :  { %p534_p11 = pnand %p533_p10, %p527_p7 }
  0x57   :  { %537 = shalt.err (!%p534_p11)
}
  0x58   :  { %50 = dma.hbm_to_vmem [thread:$0]  %s783_s2, 16, %s48_s28, [#allocation7]  }
  0x59   :  { %s538_s20 = scalar_lea.hbm %s785_s4, 16 }
  0x5a   :  { %p539_p12 = scmp.ne.s32.totalorder %s785_s4, %s538_s20  ;;  %p542_p13 = scmp.lt.u32.totalorder %s538_s20, %s785_s4 }
  0x5c   :  { %p544_p0 = pnand %p542_p13, %p539_p12 }
  0x5e   :  { %547 = shalt.err (!%p544_p0)
}
  0x5f   :  { %s548_s26 = scalar_lea.vmem %s70_s30, 16  ;;  %s552_s1 = scalar_lea.vmem %s70_s30, 32 }
  0x60   :  { %p549_p1 = scmp.ne.s32.totalorder %s70_s30, %s548_s26  ;;  %p553_p2 = scmp.lt.s32.totalorder %s70_s30, %s70_s30 }
  0x61   :  { %p554_p3 = scmp.lt.s32.totalorder %s552_s1, %s548_s26 }
  0x63   :  { %p555_p4 = por %p554_p3, %p553_p2 }
  0x65   :  { %p556_p5 = pnand %p555_p4, %p549_p1 }
  0x67   :  { %559 = shalt.err (!%p556_p5)
}
  0x68   :  { %72 = dma.hbm_to_vmem [thread:$0]  %s785_s4, 16, %s70_s30, [#allocation10]  }
  0x69   :  { %s624_s27 = smov [#allocation14]   ;;  %s560_s9 = scalar_lea.hbm %s787_s6, 16 }
  0x6a   :  { %s89_s28 = sshll.u32 %s624_s27, 4  ;;  %p561_p6 = scmp.ne.s32.totalorder %s787_s6, %s560_s9  ;;  %s90_s28 = int_to_ptr.vmem [resolvable:$true] %s89_s28 }
  0x6b   :  { %p564_p7 = scmp.lt.u32.totalorder %s560_s9, %s787_s6 }
  0x6d   :  { %p566_p8 = pnand %p564_p7, %p561_p6 }
  0x6f   :  { %569 = shalt.err (!%p566_p8)
}
  0x70   :  { %s570_s3 = scalar_lea.vmem %s90_s28, 16  ;;  %s574_s4 = scalar_lea.vmem %s90_s28, 32 }
  0x71   :  { %p571_p9 = scmp.ne.s32.totalorder %s90_s28, %s570_s3  ;;  %p575_p10 = scmp.lt.s32.totalorder %s90_s28, %s90_s28 }
  0x72   :  { %p576_p11 = scmp.lt.s32.totalorder %s574_s4, %s570_s3 }
  0x74   :  { %p577_p12 = por %p576_p11, %p575_p10 }
  0x76   :  { %p578_p13 = pnand %p577_p12, %p571_p9 }
  0x78   :  { %581 = shalt.err (!%p578_p13)
}
  0x79   :  { %92 = dma.hbm_to_vmem [thread:$0]  %s787_s6, 16, %s90_s28, [#allocation13]  }
  0x7a   :  { %604 = dma.done.wait [#allocation4], 256  }
  0x7b   :  { %605 = vsyncadd [#allocation4], 4294967040 }
  0x7c   :  { %606 = dma.done.wait [#allocation7], 272  }
  0x7d   :  { %607 = vsyncadd [#allocation7], 4294967024 }
  0x7e   :  { %608 = dma.done.wait [#allocation10], 528  }
  0x7f   :  { %609 = vsyncadd [#allocation10], 4294966768 }
  0x80   :  { %610 = dma.done.wait [#allocation13], 32  }
  0x81   :  { %611 = vsyncadd [#allocation13], 4294967264  ;;  %vm119_vm0 = vcmask 261120   ;;  %v625_v0 = vmov 0.0   ;;  %vm626_vm1 = vmmov 0   ;;  %v418_v1 = vld [vmem:[#allocation6] sm:$0xff]  }
  0x82   :  { %384 = vmatprep.subr.bf16.mxu0 %v625_v0  ;;  %388 = vmatprep.mubr.msk.bf16.mxu0 %vm626_vm1, %v625_v0  ;;  %120 = vst.msk [vmem:[#allocation2] sm:$0xff] %vm119_vm0, %v625_v0  ;;  %121 = vst.msk [vmem:[#allocation2 + $0x8] sm:$0xff] %vm119_vm0, %v625_v0  ;;  %v419_v2 = vld [vmem:[#allocation6 + $0x8] sm:$0xff]   ;;  %v122_v3 = vld [vmem:[#allocation3] sm:$0xff]  ;;  %vm230_vm2 = vcmask 523264   ;;  %s627_s6 = smov [#allocation15]  }
  0x83   :  { %392 = vmatprep.subr.bf16.mxu1 %v625_v0  ;;  %400 = vmatprep.mubr.msk.bf16.mxu1 %vm626_vm1, %v625_v0  ;;  %v123_v4 = vld [vmem:[#allocation3 + $0x8] sm:$0xff]  ;;  %v422_v8 = vld [vmem:[#allocation9 + $0x10] sm:$0xff]   ;;  %v423_v9 = vld [vmem:[#allocation9 + $0x18] sm:$0xff]   ;;  %s349_s11 = sshll.u32 %s627_s6, 4  ;;  %s350_s11 = int_to_ptr.vmem [resolvable:$true] %s349_s11 }
  0x84   :  { %385 = vmatpush3.bf16.msra.mxu0 %v418_v1  ;;  %v420_v5 = vld [vmem:[#allocation9] sm:$0xff]   ;;  %v421_v6 = vld [vmem:[#allocation9 + $0x8] sm:$0xff]   ;;  %v124_v7 = vpack.c.bf16 %v123_v4, %v122_v3  ;;  %v364_v10 = vld [vmem:[#allocation8] ss:$0 sm:$0xff]  ;;  %s582_s12 = scalar_lea.vmem %s350_s11, 256  ;;  %p587_p1 = scmp.lt.s32.totalorder %s350_s11, %s350_s11 }
  0x85   :  { %386 = vmatprep.subr.bf16.mxu0 %v625_v0  ;;  %393 = vmatpush3.bf16.msra.mxu1 %v420_v5  ;;  %v373_v28 = vld [vmem:[#allocation11] ss:$0 sm:$0xff]  ;;  %v374_v54 = vld [vmem:[#allocation12] ss:$0 sm:$0xff]  ;;  %v375_v56 = vld [vmem:[#allocation14] ss:$0 sm:$0xff]  ;;  %p583_p0 = scmp.ne.s32.totalorder %s350_s11, %s582_s12  ;;  %p588_p2 = scmp.lt.s32.totalorder %s582_s12, %s582_s12 }
  0x86   :  { %394 = vmatprep.subr.bf16.mxu1 %v625_v0 }
  0x87   :  { %p589_p3 = por %p588_p2, %p587_p1 }
  0x88   :  { %387 = vmatpush3.bf16.msra.mxu0 %v419_v2 }
  0x89   :  { %395 = vmatpush3.bf16.msra.mxu1 %v421_v6  ;;  %v195_v20 = vld [vmem:[#allocation2] sm:$0xff]  ;;  %v196_v22 = vld [vmem:[#allocation2 + $0x8] sm:$0xff]  ;;  %p590_p4 = pnand %p589_p3, %p583_p0 }
  0x8a   :  { %396 = vmatprep.subr.bf16.mxu1 %v625_v0 }
  0x8b   :  { %389 = vmatmul.mubr.msk.bf16.vlgmr.msra.gmra.mrb[0].mxu0 %vm119_vm0, %v124_v7 }
  0x8d   :  { %397 = vmatpush3.bf16.msra.mxu1 %v422_v8 }
  0x8e   :  { %398 = vmatprep.subr.bf16.mxu1 %v625_v0 }
  0x91   :  { %399 = vmatpush3.bf16.msra.mxu1 %v423_v9 }
 0x15e   :  { %v186_v11 = vpop.f32.mrb[0].mxu0 }
 0x15f   :  { %v187_v12 = vadd.f32 %v364_v10, %v186_v11  ;;  %v390_v13 = vpop.f32.mrb[1].mxu0 }
 0x160   :  { %v189_v14 = vpop.f32.mrb[2].mxu0 }
 0x161   :  { %v190_v15 = vadd.f32 %v364_v10, %v189_v14  ;;  %v391_v16 = vpop.f32.mrb[3].mxu0  ;;  %v193_v17 = vmax.f32 %v187_v12, 0.0 }
 0x163   :  { %v194_v18 = vmax.f32 %v190_v15, 0.0 }
 0x165   :  { %v197_v19 = vpack.c.bf16 %v194_v18, %v193_v17 }
 0x167   :  { %401 = vmatmul.mubr.msk.bf16.vlgmr.msra.gmra.mrb[0].mxu1 %vm230_vm2, %v197_v19 }
 0x23a   :  { %v268_v21 = vpop.f32.mrb[0].mxu1 }
 0x23b   :  { %v275_v23 = vadd.f32 %v268_v21, %v195_v20  ;;  %v402_v24 = vpop.f32.mrb[1].mxu1 }
 0x23c   :  { %v271_v25 = vpop.f32.mrb[2].mxu1 }
 0x23d   :  { %277 = vst.msk [vmem:[#allocation2] sm:$0xff] %vm119_vm0, %v275_v23  ;;  %v276_v26 = vadd.f32 %v271_v25, %v196_v22  ;;  %v403_v27 = vpop.f32.mrb[3].mxu1 }
 0x23f   :  { %278 = vst.msk [vmem:[#allocation2 + $0x8] sm:$0xff] %vm119_vm0, %v276_v26 }
 0x244   :  { %v282_v29 = vld [vmem:[#allocation2] sm:$0xff] }
 0x245   :  { %v291_v30 = vadd.f32 %v373_v28, %v282_v29 }
 0x246   :  { %v283_v31 = vld [vmem:[#allocation2 + $0x8] sm:$0xff] }
 0x247   :  { %v295_v32 = vadd.f32 %v291_v30, %v122_v3  ;;  %v292_v33 = vadd.f32 %v373_v28, %v283_v31 }
 0x249   :  { %v297_v34 = vsel %vm119_vm0, %v295_v32, 0.0  ;;  %v296_v35 = vadd.f32 %v292_v33, %v123_v4 }
 0x24a   :  { %298 = vadd.xlane.f32.xlu0 %v297_v34 }
 0x24b   :  { %v300_v36 = vsel %vm119_vm0, %v296_v35, 0.0 }
 0x24e   :  { %301 = vadd.xlane.f32.xlu0 %v300_v36 }
 0x2d7   :  { %v299_v37 = vpop.xlane.xlu0 %298 }
 0x2d8   :  { %v304_v38 = vmul.f32 0.03125, %v299_v37 }
 0x2da   :  { %v306_v39 = vsub.f32 %v295_v32, %v304_v38 }
 0x2db   :  { %v302_v40 = vpop.xlane.xlu0 %301 }
 0x2dc   :  { %v305_v41 = vmul.f32 0.03125, %v302_v40  ;;  %v308_v42 = vmul.f32 %v306_v39, %v306_v39 }
 0x2de   :  { %v307_v43 = vsub.f32 %v296_v35, %v305_v41  ;;  %v310_v44 = vsel %vm119_vm0, %v308_v42, 0.0 }
 0x2df   :  { %311 = vadd.xlane.f32.xlu1 %v310_v44 }
 0x2e0   :  { %v309_v45 = vmul.f32 %v307_v43, %v307_v43 }
 0x2e2   :  { %v313_v46 = vsel %vm119_vm0, %v309_v45, 0.0 }
 0x2e3   :  { %314 = vadd.xlane.f32.xlu1 %v313_v46 }
 0x36c   :  { %v312_v47 = vpop.xlane.xlu1 %311 }
 0x36d   :  { %v316_v48 = vmul.f32 0.03125, %v312_v47 }
 0x36f   :  { %v318_v49 = vadd.f32 1e-05, %v316_v48 }
 0x370   :  { %v315_v50 = vpop.xlane.xlu1 %314 }
 0x371   :  { %424 = vrsqrt.f32 %v318_v49  ;;  %v317_v51 = vmul.f32 0.03125, %v315_v50 }
 0x373   :  { %v319_v52 = vadd.f32 1e-05, %v317_v51 }
 0x375   :  { %426 = vrsqrt.f32 %v319_v52 }
 0x37b   :  { %v425_v53 = vpop.eup %424 }
 0x37c   :  { %v322_v55 = vmul.f32 %v425_v53, %v306_v39 }
 0x37e   :  { %v331_v57 = vmul.f32 %v374_v54, %v322_v55 }
 0x37f   :  { %v427_v58 = vpop.eup %426 }
 0x380   :  { %v323_v59 = vmul.f32 %v427_v58, %v307_v43  ;;  %v340_v60 = vadd.f32 %v375_v56, %v331_v57 }
 0x382   :  { %v332_v61 = vmul.f32 %v374_v54, %v323_v59  ;;  %342 = vst.msk [vmem:[#allocation15] sm:$0xff] %vm119_vm0, %v340_v60 }
 0x384   :  { %v341_v62 = vadd.f32 %v375_v56, %v332_v61 }
 0x386   :  { %343 = vst.msk [vmem:[#allocation15 + $0x8] sm:$0xff] %vm119_vm0, %v341_v62 }
 0x387   :  { %593 = shalt.err (!%p590_p4)
}
 0x388   :  { %s594_s19 = scalar_lea.hbm %s788_s7, 256 }
 0x389   :  { %p595_p5 = scmp.ne.s32.totalorder %s788_s7, %s594_s19  ;;  %p598_p6 = scmp.lt.u32.totalorder %s594_s19, %s788_s7 }
 0x38b   :  { %p600_p7 = pnand %p598_p6, %p595_p5 }
 0x38d   :  { %603 = shalt.err (!%p600_p7)
}
 0x38e   :  { %355 = dma.vmem_to_hbm [thread:$0]  %s350_s11, 256, %s788_s7, [#allocation5], %s620_s5, %s620_s5, %s621_s18  }
 0x38f   :  { %612 = dma.done.wait [#allocation5], 256  }
 0x390   :  { %613 = vsyncadd [#allocation5], 4294967040 }
 0x391   :  { %359 = vsyncpa [#allocation4], 1 }
 0x392   :  { %360 = vsyncpa [#allocation7], 1 }
 0x393   :  { %361 = vsyncpa [#allocation10], 1 }
 0x394   :  { %362 = vsyncpa [#allocation13], 1 }
 0x395   :  { %363 = vsyncpa [#allocation5], 1 }

// kernel: decoder_stacks_forward.6
= control target key start
LH: loop header
LB: loop body
LE: loop exit
PB: predicated region body
PF: predicated region fallthrough
CT: control target
= control target key end

     0   :  { %s3160_s0 = inlined_call_operand.hbm [shape: f32[2,8,32], index: 0, kind: input, shape index: {}]   ;;  %s3161_s1 = inlined_call_operand.hbm [shape: bf16[4,32,8], index: 1, kind: input, shape index: {}]   ;;  %s3162_s2 = inlined_call_operand.hbm [shape: bf16[4,32,8], index: 2, kind: input, shape index: {}]   ;;  %s3163_s3 = inlined_call_operand.hbm [shape: bf16[4,32,8], index: 3, kind: input, shape index: {}]   ;;  %s3164_s4 = inlined_call_operand.hbm [shape: f32[4,1,8], index: 4, kind: input, shape index: {}]   ;;  %s3165_s5 = inlined_call_operand.hbm [shape: f32[4,1,8], index: 5, kind: input, shape index: {}]   ;;  %s3166_s6 = inlined_call_operand.hbm [shape: f32[4,1,8], index: 6, kind: input, shape index: {}]   ;;  %s3167_s7 = inlined_call_operand.hbm [shape: bf16[9,8], index: 7, kind: input, shape index: {}]   ;;  %s3168_s8 = inlined_call_operand.hbm [shape: bf16[4,8,32], index: 8, kind: input, shape index: {}]   ;;  %s3169_s9 = inlined_call_operand.hbm [shape: f32[1,32], index: 9, kind: input, shape index: {}]   ;;  %s3170_s10 = inlined_call_operand.hbm [shape: f32[1,32], index: 10, kind: input, shape index: {}]   ;;  %s3171_s11 = inlined_call_operand.hbm [shape: f32[1,32], index: 11, kind: input, shape index: {}]   ;;  %s3172_s12 = inlined_call_operand.hbm [shape: f32[2,8,32], index: 12, kind: output, shape index: {}]  }
   0x1   :  { %3216 = sst [smem:[#allocation49_spill]] %s3160_s0 }
   0x2   :  { %3217 = sst [smem:[#allocation50_spill]] %s3161_s1 }
   0x3   :  { %3218 = sst [smem:[#allocation51_spill]] %s3162_s2 }
   0x4   :  { %3219 = sst [smem:[#allocation52_spill]] %s3163_s3 }
   0x5   :  { %3220 = sst [smem:[#allocation53_spill]] %s3164_s4 }
   0x6   :  { %3221 = sst [smem:[#allocation54_spill]] %s3165_s5 }
   0x7   :  { %3222 = sst [smem:[#allocation55_spill]] %s3166_s6 }
   0x8   :  { %3223 = sst [smem:[#allocation56_spill]] %s3167_s7 }
   0x9   :  { %3224 = sst [smem:[#allocation57_spill]] %s3168_s8 }
   0xa   :  { %3225 = sst [smem:[#allocation58_spill]] %s3169_s9 }
   0xb   :  { %3226 = sst [smem:[#allocation59_spill]] %s3170_s10 }
   0xc   :  { %3227 = sst [smem:[#allocation60_spill]] %s3171_s11 }
   0xd   :  { %3228 = sst [smem:[#allocation61_spill]] %s3172_s12 }
   0xe   :  { %17 = vsyncpa [#allocation4], 0 }
   0xf   :  { %19 = vsyncpa [#allocation4 + $0x1], 0 }
  0x10   :  { %20 = vsyncpa [#allocation7], 0 }
  0x11   :  { %22 = vsyncpa [#allocation7 + $0x1], 0 }
  0x12   :  { %23 = vsyncpa [#allocation10], 0 }
  0x13   :  { %25 = vsyncpa [#allocation10 + $0x1], 0 }
  0x14   :  { %26 = vsyncpa [#allocation13], 0 }
  0x15   :  { %28 = vsyncpa [#allocation13 + $0x1], 0 }
  0x16   :  { %29 = vsyncpa [#allocation16], 0 }
  0x17   :  { %30 = vsyncpa [#allocation5], 0 }
  0x18   :  { %32 = vsyncpa [#allocation5 + $0x1], 0  ;;  %s2448_s21 = smov 0   ;;  %s2450_s22 = smov 0  }
  0x19   :  { %s2452_s23 = smov 0   ;;  %s2454_s24 = smov 0  }
  0x1a   :  { %s2456_s25 = smov 0   ;;  %s2458_s26 = smov 0  }
  0x1b   :  { %s2460_s27 = smov 0   ;;  %s2462_s28 = smov 0  }
  0x1c   :  { %s2464_s29 = smov 0   ;;  %s2466_s30 = smov 0  }
  0x1d   :  { %s2468_s13 = smov 0  }
  0x1e LB: > { %3229 = sst [smem:[#allocation32_spill]] %s2322_s22  ;;  %s2360_s14 = smov [#allocation18]   ;;  %s2358_s13 = sphi %s2468_s13, %s38_s13   ;;  %s2354_s30 = sphi %s2466_s30, %s3322_s30   ;;  %s2350_s29 = sphi %s2464_s29, %s3326_s29   ;;  %s2346_s28 = sphi %s2462_s28, %s3320_s28   ;;  %s2342_s27 = sphi %s2460_s27, %s3325_s27   ;;  %s2338_s26 = sphi %s2458_s26, %s3319_s26   ;;  %s2334_s25 = sphi %s2456_s25, %s3324_s25   ;;  %s2330_s24 = sphi %s2454_s24, %s3323_s24   ;;  %s2326_s23 = sphi %s2452_s23, %s3317_s23   ;;  %s2322_s22 = sphi %s2450_s22, %s3316_s22   ;;  %s2318_s21 = sphi %s2448_s21, %s3315_s21  }
  0x1f   : > { %3230 = sst [smem:[#allocation33_spill]] %s2326_s23  ;;  %s399_s15 = sshll.u32 %s2360_s14, 4  ;;  %s400_s15 = int_to_ptr.vmem [resolvable:$true] %s399_s15 }
  0x20   : > { %3231 = sst [smem:[#allocation34_spill]] %s2330_s24  ;;  %s2504_s16 = sadd.s32 4294967295, %s2358_s13  }
  0x21   : > { %3232 = sst [smem:[#allocation35_spill]] %s2338_s26  ;;  %p1518_p0 = scmp.ge.s32.totalorder %s2358_s13, 1 }
  0x22   : > { %3233 = sst [smem:[#allocation36_spill]] %s2342_s27  ;;  %p3178_p1 = scmp.eq.s32.totalorder %s2504_s16, 0 }
  0x23   : > { %3234 = sst [smem:[#allocation37_spill]] %s2346_s28  ;;  %p373_p2 = scmp.lt.s32.totalorder %s2358_s13, 9 }
  0x24   : > { %3235 = sst [smem:[#allocation38_spill]] %s2354_s30  ;;  %s2361_s18 = smov [#allocation19]  }
  0x25   : > { %3236 = sst [smem:[#allocation39_spill]] %s2358_s13  ;;  %p2509_p3 = pnand %p1518_p0, %p373_p2 }
  0x26   : > { %s410_s19 = sshll.u32 %s2361_s18, 4  ;;  %s2362_s20 = smov [#allocation20]   ;;  %s2515_s19 = int_to_ptr.vmem [resolvable:$true] %s410_s19 }
  0x27   : > { %s3237_s17 = scalar_select %p2509_p3, 1, 0 }
  0x28   : > { %p1679_p4 = pneg %p2509_p3  ;;  %s421_s14 = sshll.u32 %s2362_s20, 4  ;;  %s2523_s14 = int_to_ptr.vmem [resolvable:$true] %s421_s14 }
  0x29   : > { %3238 = sst [smem:[#allocation40_spill]] %s3237_s17 }
  0x2a   : > { %p2519_p5 = pnand %p1679_p4, %p3178_p1  ;;  %s3240_s9 = sld [smem:[#allocation58_spill]] }
  0x2c   : > { %s3239_s12 = scalar_select %p2519_p5, 1, 0 }
  0x2d   : > { %p2533_p7 = pneg %p2519_p5 }
  0x2f   : > { %s3241_s18 = scalar_select %p2533_p7, 1, 0 }
  0x30   : > { %s1852_s8 = scalar_lea.hbm %s3240_s9, 16 }
  0x31   : > { %p1853_p6 = scmp.ne.s32.totalorder %s3240_s9, %s1852_s8  ;;  %p1859_p10 = scmp.lt.u32.totalorder %s1852_s8, %s3240_s9 }
  0x33   : > { %p1855_p8 = pnand %p2533_p7, %p1853_p6 }
  0x35   : > { %p1856_p9 = pneg %p1855_p8 }
  0x37   : > { %p1861_p11 = pnand %p1859_p10, %p1856_p9 }
  0x39   : > { %1864 = shalt.err (!%p1861_p11)
}
  0x3a   : > { %s1865_s27 = scalar_lea.vmem %s400_s15, 16  ;;  %s1872_s6 = scalar_lea.vmem %s400_s15, 32 }
  0x3b   : > { %p1866_p12 = scmp.ne.s32.totalorder %s400_s15, %s1865_s27  ;;  %p1873_p2 = scmp.lt.s32.totalorder %s400_s15, %s400_s15 }
  0x3c   : > { %p1874_p4 = scmp.lt.s32.totalorder %s1872_s6, %s1865_s27 }
  0x3d   : > { %p1868_p13 = pnand %p1866_p12, %p2533_p7 }
  0x3e   : > { %p1875_p1 = por %p1874_p4, %p1873_p2 }
  0x3f   : > { %p1869_p0 = pneg %p1868_p13 }
  0x41   : > { %p1876_p3 = pnand %p1875_p1, %p1869_p0 }
  0x43   : > { %1879 = shalt.err (!%p1876_p3)
}
  0x44   : > { %1685 = dma.hbm_to_vmem [thread:$0]  (!%p2519_p5), %s3240_s9, 16, %s400_s15, [#allocation7]  }
  0x45   : > { %s3242_s10 = sld [smem:[#allocation59_spill]] }
  0x4b   : > { %s1880_s20 = scalar_lea.hbm %s3242_s10, 16 }
  0x4c   : > { %p1881_p6 = scmp.ne.s32.totalorder %s3242_s10, %s1880_s20  ;;  %p1887_p1 = scmp.lt.u32.totalorder %s1880_s20, %s3242_s10 }
  0x4e   : > { %p1883_p8 = pnand %p1881_p6, %p2533_p7 }
  0x50   : > { %p1884_p9 = pneg %p1883_p8 }
  0x52   : > { %p1889_p3 = pnand %p1887_p1, %p1884_p9 }
  0x54   : > { %1892 = shalt.err (!%p1889_p3)
}
  0x55   : > { %s1893_s15 = scalar_lea.vmem %s2515_s19, 16  ;;  %s1900_s2 = scalar_lea.vmem %s2515_s19, 32 }
  0x56   : > { %p1894_p10 = scmp.ne.s32.totalorder %s2515_s19, %s1893_s15  ;;  %p1901_p13 = scmp.lt.s32.totalorder %s2515_s19, %s2515_s19 }
  0x57   : > { %p1902_p0 = scmp.lt.s32.totalorder %s1900_s2, %s1893_s15 }
  0x58   : > { %p1896_p11 = pnand %p1894_p10, %p2533_p7 }
  0x59   : > { %p1903_p2 = por %p1902_p0, %p1901_p13 }
  0x5a   : > { %p1897_p12 = pneg %p1896_p11 }
  0x5c   : > { %p1904_p4 = pnand %p1903_p2, %p1897_p12 }
  0x5e   : > { %1907 = shalt.err (!%p1904_p4)
}
  0x5f   : > { %1688 = dma.hbm_to_vmem [thread:$0]  (!%p2519_p5), %s3242_s10, 16, %s2515_s19, [#allocation10]  }
  0x60   : > { %s3243_s11 = sld [smem:[#allocation60_spill]] }
  0x66   : > { %s1908_s8 = scalar_lea.hbm %s3243_s11, 16 }
  0x67   : > { %p1909_p6 = scmp.ne.s32.totalorder %s3243_s11, %s1908_s8  ;;  %p1915_p1 = scmp.lt.u32.totalorder %s1908_s8, %s3243_s11 }
  0x69   : > { %p1911_p8 = pnand %p1909_p6, %p2533_p7 }
  0x6b   : > { %p1912_p9 = pneg %p1911_p8 }
  0x6d   : > { %p1917_p3 = pnand %p1915_p1, %p1912_p9 }
  0x6f   : > { %1920 = shalt.err (!%p1917_p3)
}
  0x70   : > { %s1921_s19 = scalar_lea.vmem %s2523_s14, 16  ;;  %s1928_s2 = scalar_lea.vmem %s2523_s14, 32 }
  0x71   : > { %p1922_p10 = scmp.ne.s32.totalorder %s2523_s14, %s1921_s19  ;;  %p1929_p13 = scmp.lt.s32.totalorder %s2523_s14, %s2523_s14 }
  0x72   : > { %p1930_p0 = scmp.lt.s32.totalorder %s1928_s2, %s1921_s19 }
  0x73   : > { %p1924_p11 = pnand %p1922_p10, %p2533_p7 }
  0x74   : > { %p1931_p2 = por %p1930_p0, %p1929_p13 }
  0x75   : > { %p1925_p12 = pneg %p1924_p11 }
  0x77   : > { %p1932_p4 = pnand %p1931_p2, %p1925_p12 }
  0x79   : > { %1935 = shalt.err (!%p1932_p4)
}
  0x7a   : > { %1691 = dma.hbm_to_vmem [thread:$0]  (!%p2519_p5), %s3243_s11, 16, %s2523_s14, [#allocation13]  }
  0x7b   : > { %s1517_s17 = sadd.s32 4294967294, %s2358_s13   ;;  %s47_s4 = sadd.s32 1, %s2350_s29 }
  0x7c   : > { %s50_s8 = sadd.s32 1, %s2354_s30  ;;  %p48_p6 = scmp.ge.s32.totalorder %s47_s4, 4 }
  0x7d   : > { %s57_s20 = sadd.s32 1, %s2338_s26  ;;  %p3183_p8 = scmp.ne.s32.totalorder %s2338_s26, %s2334_s25 }
  0x7e   : > { %p65_p9 = scmp.eq.s32.totalorder %s2358_s13, 0  ;;  %s3328_s4 = smov (%p48_p6, %s47_s4), 0 }
  0x7f   : > { %3244 = sst [smem:[#allocation41_spill]] %s3328_s4  ;;  %s3330_s8 = smov (!%p48_p6, %s50_s8), %s2354_s30 }
  0x80   : > { %p2612_p1 = por %p65_p9, %p3183_p8  ;;  %p3182_p3 = scmp.ne.s32.totalorder %s2334_s25, %s2330_s24 }
  0x81   : > { %p52_p10 = scmp.ge.s32.totalorder %s3330_s8, 2  ;;  %s80_s27 = ssub.s32 %s2350_s29, %s3328_s4 }
  0x82   : > { %p3246_p11 = scmp.eq.s32.totalorder %s2504_s16, 0  ;;  %p81_p13 = scmp.eq.s32.totalorder %s80_s27, 0 }
  0x83   : > { %s3332_s8 = smov (%p52_p10, %s3330_s8), 0  ;;  %s83_s15 = sadd.s32 1, %s2326_s23 }
  0x84   : > { %p2625_p12 = por %p3246_p11, %p3182_p3  ;;  %3249 = sst [smem:[#allocation43_spill]] %s3332_s8 }
  0x85   : > { %p90_p0 = scmp.ne.s32.totalorder %s2326_s23, %s2322_s22  ;;  %s54_s19 = ssub.s32 %s2354_s30, %s3332_s8 }
  0x86   : > { %s3247_s6 = scalar_select %p2625_p12, 1, 0 }
  0x87   : > { %p96_p2 = scmp.ne.s32.totalorder %s2322_s22, %s2318_s21  ;;  %p55_p4 = scmp.eq.s32.totalorder %s54_s19, 0 }
  0x88   : > { %3248 = sst [smem:[#allocation42_spill]] %s3247_s6  ;;  %p2640_p6 = por %p90_p0, %p65_p9 }
  0x89   : > { %s2645_s7 = scalar_select %p81_p13, %s2326_s23, %s83_s15  }
  0x8a   : > { %s2648_s28 = scalar_select %p55_p4, %s2338_s26, %s57_s20  }
  0x8b   : > { %3251 = sst [smem:[#allocation44_spill]] %s2645_s7  ;;  %p3253_p10 = pmov %p3246_p11 }
  0x8c   : > { %3252 = sst [smem:[#allocation45_spill]] %s2648_s28  ;;  %p360_p3 = scmp.eq.s32.totalorder %s2504_s16, 7 }
  0x8d   : > { %p2652_p11 = por %p96_p2, %p3253_p10  ;;  %p366_p8 = scmp.eq.s32.totalorder %s1517_s17, 7 }
  0x8e   : > { %p3192_p12 = scmp.lt.s32.totalorder %s2358_s13, 8  ;;  %p3256_p5 = scmp.ne.s32.totalorder %s2338_s26, %s2334_s25 }
  0x8f   : > { %s3254_s27 = scalar_select %p2652_p11, 1, 0 }
  0x90   : > { %p2661_p7 = por %p360_p3, %p3256_p5  ;;  %s2666_s19 = sand.u32 1, %s2358_s13  }
  0x91   : > { %3255 = sst [smem:[#allocation46_spill]] %s3254_s27  ;;  %p3259_p9 = scmp.ne.s32.totalorder %s2334_s25, %s2330_s24 }
  0x92   : > { %s3257_s21 = scalar_select %p2661_p7, 1, 0 }
  0x93   : > { %p2671_p13 = por %p366_p8, %p3259_p9  ;;  %s434_s15 = sand.u32 1, %s2338_s26  }
  0x94   : > { %3258 = sst [smem:[#allocation47_spill]] %s3257_s21  ;;  %s1525_s9 = sshll.u32 %s2354_s30, 7 }
  0x95   : > { %s3260_s20 = scalar_select %p2671_p13, 1, 0 }
  0x96   : > { %s1524_s10 = sshll.u32 %s434_s15, 3  ;;  %s3262_s0 = sld [smem:[#allocation49_spill]] }
  0x97   : > { %3261 = sst [smem:[#allocation48_spill]] %s3260_s20  ;;  %p2686_p5 = pnand %p3192_p12, %p2612_p1 }
  0x98   : > { %s436_s28 = scalar_lea.vmem [#allocation3], %s1524_s10  ;;  %s3195_s15 = scalar_lea.sflag [#allocation4], %s2666_s19 }
  0x99   : > { %s443_s30 = sshll.u32 %s436_s28, 4  ;;  %p1938_p3 = pneg %p2686_p5  ;;  %s2690_s30 = int_to_ptr.vmem [resolvable:$true] %s443_s30 }
  0x9c   : > { %s2680_s17 = scalar_lea.hbm %s3262_s0, %s1525_s9  ;;  %s1941_s14 = scalar_lea.hbm %s3262_s0, 256 }
  0x9d   : > { %s1936_s11 = scalar_lea.hbm %s2680_s17, 128  ;;  %p1942_p1 = scmp.lt.u32.totalorder %s2680_s17, %s3262_s0 }
  0x9e   : > { %p1937_p8 = scmp.ne.s32.totalorder %s2680_s17, %s1936_s11  ;;  %p1943_p4 = scmp.lt.u32.totalorder %s1941_s14, %s1936_s11 }
  0x9f   : > { %p1945_p9 = scmp.lt.u32.totalorder %s1936_s11, %s2680_s17 }
  0xa0   : > { %p1939_p0 = pnand %p1938_p3, %p1937_p8  ;;  %p1944_p10 = por %p1943_p4, %p1942_p1 }
  0xa2   : > { %p1940_p2 = pneg %p1939_p0  ;;  %p1946_p12 = por %p1945_p9, %p1944_p10 }
  0xa4   : > { %p1947_p13 = pnand %p1946_p12, %p1940_p2 }
  0xa6   : > { %1950 = shalt.err (!%p1947_p13)
}
  0xa7   : > { %s1951_s10 = scalar_lea.vmem %s2690_s30, 128  ;;  %s2363_s28 = smov [#allocation3]  }
  0xa8   : > { %p1952_p8 = scmp.ne.s32.totalorder %s2690_s30, %s1951_s10  ;;  %s1956_s9 = sshll.u32 %s2363_s28, 4  ;;  %s1957_s9 = int_to_ptr.vmem [resolvable:$false] %s1956_s9 }
  0xa9   : > { %s1958_s26 = scalar_lea.vmem %s1957_s9, 256  ;;  %p1959_p11 = scmp.lt.s32.totalorder %s2690_s30, %s1957_s9 }
  0xaa   : > { %p1954_p0 = pnand %p1952_p8, %p1938_p3  ;;  %p1960_p1 = scmp.lt.s32.totalorder %s1958_s26, %s1951_s10 }
  0xac   : > { %p1955_p7 = pneg %p1954_p0  ;;  %p1961_p4 = por %p1960_p1, %p1959_p11 }
  0xae   : > { %p1962_p10 = pnand %p1961_p4, %p1955_p7 }
  0xb0   : > { %1965 = shalt.err (!%p1962_p10)
}
  0xb1   : > { %1695 = dma.hbm_to_vmem [thread:$0]  (!%p2686_p5), %s2680_s17, 128, %s2690_s30, %s3195_s15  }
  0xb2   : > { %p3264_p12 = scmp.lt.s32.totalorder %s2358_s13, 8  ;;  %s2729_s11 = sand.u32 1, %s2326_s23  }
  0xb3   : > { %s2732_s4 = sshll.u32 %s2729_s11, 4  ;;  %s2735_s8 = sshll.u32 %s2350_s29, 8 }
  0xb4   : > { %p2724_p13 = pnand %p3264_p12, %p2640_p6  ;;  %s3266_s1 = sld [smem:[#allocation50_spill]] }
  0xb5   : > { %s454_s2 = scalar_lea.vmem [#allocation6], %s2732_s4  ;;  %s3267_s3 = sld [smem:[#allocation52_spill]] }
  0xb6   : > { %s3265_s7 = scalar_select %p2724_p13, 1, 0 }
  0xb7   : > { %s461_s17 = sshll.u32 %s454_s2, 4  ;;  %s3208_s15 = scalar_lea.sflag [#allocation7], %s2666_s19  ;;  %s2744_s17 = int_to_ptr.vmem [resolvable:$true] %s461_s17 }
  0xb8   : > { %p2757_p6 = pneg %p2724_p13 }
  0xba   : > { %s2741_s30 = scalar_lea.hbm %s3266_s1, %s2735_s8  ;;  %s1971_s23 = scalar_lea.hbm %s3266_s1, 1024 }
  0xbb   : > { %s2750_s26 = scalar_lea.hbm %s3267_s3, %s2735_s8  ;;  %s1966_s0 = scalar_lea.hbm %s2741_s30, 256 }
  0xbc   : > { %p1967_p7 = scmp.ne.s32.totalorder %s2741_s30, %s1966_s0  ;;  %p1972_p3 = scmp.lt.u32.totalorder %s2741_s30, %s3266_s1 }
  0xbd   : > { %p1973_p2 = scmp.lt.u32.totalorder %s1971_s23, %s1966_s0  ;;  %p1975_p8 = scmp.lt.u32.totalorder %s1966_s0, %s2741_s30 }
  0xbe   : > { %p1969_p11 = pnand %p2757_p6, %p1967_p7 }
  0xbf   : > { %p1974_p9 = por %p1973_p2, %p1972_p3 }
  0xc0   : > { %p1970_p5 = pneg %p1969_p11 }
  0xc1   : > { %p1976_p0 = por %p1975_p8, %p1974_p9 }
  0xc3   : > { %p1977_p1 = pnand %p1976_p0, %p1970_p5 }
  0xc5   : > { %1980 = shalt.err (!%p1977_p1)
}
  0xc6   : > { %s1981_s9 = scalar_lea.vmem %s2744_s17, 256  ;;  %s2364_s10 = smov [#allocation6]  }
  0xc7   : > { %p1982_p4 = scmp.ne.s32.totalorder %s2744_s17, %s1981_s9  ;;  %s1986_s2 = sshll.u32 %s2364_s10, 4  ;;  %s1987_s2 = int_to_ptr.vmem [resolvable:$false] %s1986_s2 }
  0xc8   : > { %s1988_s20 = scalar_lea.vmem %s1987_s2, 512  ;;  %p1989_p7 = scmp.lt.s32.totalorder %s2744_s17, %s1987_s2 }
  0xc9   : > { %p1984_p10 = pnand %p1982_p4, %p2757_p6  ;;  %p1990_p11 = scmp.lt.s32.totalorder %s1988_s20, %s1981_s9 }
  0xcb   : > { %p1985_p12 = pneg %p1984_p10  ;;  %p1991_p3 = por %p1990_p11, %p1989_p7 }
  0xcd   : > { %p1992_p2 = pnand %p1991_p3, %p1985_p12 }
  0xcf   : > { %1995 = shalt.err (!%p1992_p2)
}
  0xd0   : > { %s3209_s0 = smov 64   ;;  %s3211_s23 = smov 4  }
  0xd1   : > { %1698 = dma.hbm_to_vmem [thread:$0]  (!%p2724_p13), %s2741_s30, 256, %s2744_s17, %s3208_s15, %s3209_s0, %s3209_s0, %s3211_s23  }
  0xd2   : > { %s496_s28 = scalar_lea.vmem [#allocation9], %s2732_s4  ;;  %s2787_s10 = sshll.u32 %s2350_s29, 4 }
  0xd3   : > { %s503_s9 = sshll.u32 %s496_s28, 4  ;;  %s3205_s2 = scalar_lea.sflag [#allocation10], %s2666_s19  ;;  %s2789_s9 = int_to_ptr.vmem [resolvable:$true] %s503_s9 }
  0xd4   : > { %s1996_s20 = scalar_lea.hbm %s2750_s26, 256  ;;  %s2001_s13 = scalar_lea.hbm %s3267_s3, 1024 }
  0xd5   : > { %p1997_p5 = scmp.ne.s32.totalorder %s2750_s26, %s1996_s20  ;;  %p2002_p0 = scmp.lt.u32.totalorder %s2750_s26, %s3267_s3 }
  0xd6   : > { %p2003_p1 = scmp.lt.u32.totalorder %s2001_s13, %s1996_s20  ;;  %p2005_p10 = scmp.lt.u32.totalorder %s1996_s20, %s2750_s26 }
  0xd7   : > { %p1999_p9 = pnand %p1997_p5, %p2757_p6 }
  0xd8   : > { %p2004_p4 = por %p2003_p1, %p2002_p0 }
  0xd9   : > { %p2000_p8 = pneg %p1999_p9 }
  0xda   : > { %p2006_p12 = por %p2005_p10, %p2004_p4 }
  0xdc   : > { %p2007_p7 = pnand %p2006_p12, %p2000_p8 }
  0xde   : > { %2010 = shalt.err (!%p2007_p7)
}
  0xdf   : > { %s2011_s30 = scalar_lea.vmem %s2789_s9, 256  ;;  %s2367_s1 = smov [#allocation9]  }
  0xe0   : > { %p2012_p11 = scmp.ne.s32.totalorder %s2789_s9, %s2011_s30  ;;  %s2016_s24 = sshll.u32 %s2367_s1, 4  ;;  %s2017_s24 = int_to_ptr.vmem [resolvable:$false] %s2016_s24 }
  0xe1   : > { %s2018_s27 = scalar_lea.vmem %s2017_s24, 512  ;;  %p2019_p5 = scmp.lt.s32.totalorder %s2789_s9, %s2017_s24 }
  0xe2   : > { %p2014_p3 = pnand %p2012_p11, %p2757_p6  ;;  %p2020_p9 = scmp.lt.s32.totalorder %s2018_s27, %s2011_s30 }
  0xe4   : > { %p2015_p2 = pneg %p2014_p3  ;;  %p2021_p0 = por %p2020_p9, %p2019_p5 }
  0xe6   : > { %p2022_p1 = pnand %p2021_p0, %p2015_p2 }
  0xe8   : > { %2025 = shalt.err (!%p2022_p1)
}
  0xe9   : > { %1704 = dma.hbm_to_vmem [thread:$0]  (!%p2724_p13), %s2750_s26, 256, %s2789_s9, %s3205_s2, %s3209_s0, %s3209_s0, %s3211_s23  }
  0xea   : > { %s3269_s5 = sld [smem:[#allocation54_spill]]  ;;  %s533_s28 = scalar_lea.vmem [#allocation12], %s2729_s11 }
  0xeb   : > { %s540_s20 = sshll.u32 %s533_s28, 4  ;;  %s531_s30 = scalar_lea.sflag [#allocation13], %s2666_s19  ;;  %s541_s20 = int_to_ptr.vmem [resolvable:$true] %s540_s20 }
  0xf0   : > { %s2822_s17 = scalar_lea.hbm %s3269_s5, %s2787_s10  ;;  %s2031_s9 = scalar_lea.hbm %s3269_s5, 64 }
  0xf1   : > { %s2026_s1 = scalar_lea.hbm %s2822_s17, 16  ;;  %p2032_p12 = scmp.lt.u32.totalorder %s2822_s17, %s3269_s5 }
  0xf2   : > { %p2027_p8 = scmp.ne.s32.totalorder %s2822_s17, %s2026_s1  ;;  %p2033_p7 = scmp.lt.u32.totalorder %s2031_s9, %s2026_s1 }
  0xf3   : > { %p2035_p3 = scmp.lt.u32.totalorder %s2026_s1, %s2822_s17 }
  0xf4   : > { %p2029_p4 = pnand %p2027_p8, %p2757_p6  ;;  %p2034_p11 = por %p2033_p7, %p2032_p12 }
  0xf6   : > { %p2030_p10 = pneg %p2029_p4  ;;  %p2036_p2 = por %p2035_p3, %p2034_p11 }
  0xf8   : > { %p2037_p5 = pnand %p2036_p2, %p2030_p10 }
  0xfa   : > { %2040 = shalt.err (!%p2037_p5)
}
  0xfb   : > { %s2041_s21 = scalar_lea.vmem %s541_s20, 16  ;;  %s2368_s28 = smov [#allocation12]  }
  0xfc   : > { %p2042_p9 = scmp.ne.s32.totalorder %s541_s20, %s2041_s21  ;;  %s2046_s2 = sshll.u32 %s2368_s28, 4  ;;  %s2047_s2 = int_to_ptr.vmem [resolvable:$false] %s2046_s2 }
  0xfd   : > { %s2048_s24 = scalar_lea.vmem %s2047_s2, 32  ;;  %p2049_p8 = scmp.lt.s32.totalorder %s541_s20, %s2047_s2 }
  0xfe   : > { %p2044_p0 = pnand %p2042_p9, %p2757_p6  ;;  %p2050_p4 = scmp.lt.s32.totalorder %s2048_s24, %s2041_s21 }
 0x100   : > { %p2045_p1 = pneg %p2044_p0  ;;  %p2051_p13 = por %p2050_p4, %p2049_p8 }
 0x102   : > { %p2052_p7 = pnand %p2051_p13, %p2045_p1 }
 0x104   : > { %2055 = shalt.err (!%p2052_p7)
}
 0x105   : > { %p3270_p12 = scmp.ne.s32.totalorder %s3265_s7, 0  ;;  %s2369_s1 = smov [#allocation15]  }
 0x106   : > { %s385_s26 = sshll.u32 %s2369_s1, 4  ;;  %s3271_s13 = sld [smem:[#allocation51_spill]]  ;;  %s386_s26 = int_to_ptr.vmem [resolvable:$true] %s385_s26 }
 0x107   : > { %1710 = dma.hbm_to_vmem [thread:$0]  (!%p3270_p12), %s2822_s17, 16, %s541_s20, %s531_s30  }
 0x108   : > { %s475_s2 = scalar_lea.vmem [#allocation8], %s2732_s4  ;;  %s3273_s23 = sld [smem:[#allocation56_spill]] }
 0x109   : > { %s482_s21 = sshll.u32 %s475_s2, 4  ;;  %p3275_p10 = scmp.ne.s32.totalorder %s3241_s18, 0  ;;  %s2873_s21 = int_to_ptr.vmem [resolvable:$true] %s482_s21 }
 0x10c   : > { %s3272_s15 = smov %s3271_s13  ;;  %s2849_s28 = scalar_lea.hbm %s3271_s13, %s2735_s8 }
 0x10e   : > { %s3274_s3 = smov %s3273_s23  ;;  %s2056_s5 = scalar_lea.hbm %s3273_s23, 128 }
 0x10f   : > { %p2057_p13 = scmp.ne.s32.totalorder %s3274_s3, %s2056_s5  ;;  %p2063_p2 = scmp.lt.u32.totalorder %s2056_s5, %s3274_s3 }
 0x111   : > { %p2059_p11 = pnand %p2057_p13, %p3275_p10 }
 0x113   : > { %p2060_p3 = pneg %p2059_p11 }
 0x115   : > { %p2065_p5 = pnand %p2063_p2, %p2060_p3 }
 0x117   : > { %2068 = shalt.err (!%p2065_p5)
}
 0x118   : > { %s2069_s8 = scalar_lea.vmem %s386_s26, 128  ;;  %p2077_p8 = scmp.lt.s32.totalorder %s386_s26, %s386_s26 }
 0x119   : > { %p2070_p9 = scmp.ne.s32.totalorder %s386_s26, %s2069_s8  ;;  %p2078_p4 = scmp.lt.s32.totalorder %s2069_s8, %s2069_s8 }
 0x11b   : > { %p2072_p0 = pnand %p2070_p9, %p3275_p10  ;;  %p2079_p7 = por %p2078_p4, %p2077_p8 }
 0x11d   : > { %p2073_p1 = pneg %p2072_p0 }
 0x11f   : > { %p2080_p12 = pnand %p2079_p7, %p2073_p1 }
 0x121   : > { %2083 = shalt.err (!%p2080_p12)
}
 0x122   : > { %p3276_p13 = scmp.ne.s32.totalorder %s3239_s12, 0  ;;  %s3277_s22 = smov 4  }
 0x123   : > { %s3278_s6 = smov 64   ;;  %s2084_s18 = scalar_lea.hbm %s2849_s28, 256 }
 0x124   : > { %1682 = dma.hbm_to_vmem [thread:$0]  (!%p3276_p13), %s3274_s3, 128, %s386_s26, [#allocation16], %s3278_s6, %s3278_s6, %s3277_s22  }
 0x125   : > { %p2085_p10 = scmp.ne.s32.totalorder %s2849_s28, %s2084_s18  ;;  %s2089_s23 = scalar_lea.hbm %s3272_s15, 1024 }
 0x126   : > { %p2090_p3 = scmp.lt.u32.totalorder %s2849_s28, %s3272_s15  ;;  %p2091_p2 = scmp.lt.u32.totalorder %s2089_s23, %s2084_s18 }
 0x127   : > { %p2087_p12 = pnand %p2085_p10, %p2757_p6  ;;  %p2093_p9 = scmp.lt.u32.totalorder %s2084_s18, %s2849_s28 }
 0x128   : > { %p2092_p5 = por %p2091_p2, %p2090_p3 }
 0x129   : > { %p2088_p11 = pneg %p2087_p12 }
 0x12a   : > { %p2094_p0 = por %p2093_p9, %p2092_p5 }
 0x12c   : > { %p2095_p1 = pnand %p2094_p0, %p2088_p11 }
 0x12e   : > { %2098 = shalt.err (!%p2095_p1)
}
 0x12f   : > { %s2099_s26 = scalar_lea.vmem %s2873_s21, 256  ;;  %s2370_s27 = smov [#allocation8]  }
 0x130   : > { %p2100_p8 = scmp.ne.s32.totalorder %s2873_s21, %s2099_s26  ;;  %s2104_s13 = sshll.u32 %s2370_s27, 4  ;;  %s2105_s13 = int_to_ptr.vmem [resolvable:$false] %s2104_s13 }
 0x131   : > { %s2106_s2 = scalar_lea.vmem %s2105_s13, 512  ;;  %p2107_p13 = scmp.lt.s32.totalorder %s2873_s21, %s2105_s13 }
 0x132   : > { %p2102_p4 = pnand %p2100_p8, %p2757_p6  ;;  %p2108_p10 = scmp.lt.s32.totalorder %s2106_s2, %s2099_s26 }
 0x134   : > { %p2103_p7 = pneg %p2102_p4  ;;  %p2109_p12 = por %p2108_p10, %p2107_p13 }
 0x136   : > { %p2110_p3 = pnand %p2109_p12, %p2103_p7 }
 0x138   : > { %2113 = shalt.err (!%p2110_p3)
}
 0x139   : > { %p3279_p11 = scmp.ne.s32.totalorder %s3265_s7, 0  ;;  %s3280_s24 = scalar_lea.sflag [#allocation7], %s2666_s19 }
 0x13a   : > { %s3281_s8 = sld [smem:[#allocation53_spill]]  ;;  %s516_s5 = scalar_lea.vmem [#allocation11], %s2729_s11 }
 0x13b   : > { %1701 = dma.hbm_to_vmem [thread:$0]  (!%p3279_p11), %s2849_s28, 256, %s2873_s21, %s3280_s24, %s3278_s6, %s3278_s6, %s3277_s22  }
 0x13c   : > { %s523_s18 = sshll.u32 %s516_s5, 4  ;;  %s524_s18 = int_to_ptr.vmem [resolvable:$true] %s523_s18 }
 0x140   : > { %s2905_s4 = scalar_lea.hbm %s3281_s8, %s2787_s10  ;;  %s2119_s28 = scalar_lea.hbm %s3281_s8, 64 }
 0x141   : > { %s2114_s12 = scalar_lea.hbm %s2905_s4, 16  ;;  %p2120_p0 = scmp.lt.u32.totalorder %s2905_s4, %s3281_s8 }
 0x142   : > { %p2115_p2 = scmp.ne.s32.totalorder %s2905_s4, %s2114_s12  ;;  %p2121_p1 = scmp.lt.u32.totalorder %s2119_s28, %s2114_s12 }
 0x143   : > { %p2123_p4 = scmp.lt.u32.totalorder %s2114_s12, %s2905_s4 }
 0x144   : > { %p2117_p5 = pnand %p2115_p2, %p2757_p6  ;;  %p2122_p8 = por %p2121_p1, %p2120_p0 }
 0x146   : > { %p2118_p9 = pneg %p2117_p5  ;;  %p2124_p7 = por %p2123_p4, %p2122_p8 }
 0x148   : > { %p2125_p13 = pnand %p2124_p7, %p2118_p9 }
 0x14a   : > { %2128 = shalt.err (!%p2125_p13)
}
 0x14b   : > { %s2129_s6 = scalar_lea.vmem %s524_s18, 16  ;;  %s2371_s1 = smov [#allocation11]  }
 0x14c   : > { %p2130_p10 = scmp.ne.s32.totalorder %s524_s18, %s2129_s6  ;;  %s2134_s9 = sshll.u32 %s2371_s1, 4  ;;  %s2135_s9 = int_to_ptr.vmem [resolvable:$false] %s2134_s9 }
 0x14d   : > { %s2136_s26 = scalar_lea.vmem %s2135_s9, 32  ;;  %p2137_p2 = scmp.lt.s32.totalorder %s524_s18, %s2135_s9 }
 0x14e   : > { %p2132_p12 = pnand %p2130_p10, %p2757_p6  ;;  %p2138_p5 = scmp.lt.s32.totalorder %s2136_s26, %s2129_s6 }
 0x150   : > { %p2133_p3 = pneg %p2132_p12  ;;  %p2139_p11 = por %p2138_p5, %p2137_p2 }
 0x152   : > { %p2140_p0 = pnand %p2139_p11, %p2133_p3 }
 0x154   : > { %2143 = shalt.err (!%p2140_p0)
}
 0x155   : > { %p3282_p1 = scmp.ne.s32.totalorder %s3265_s7, 0  ;;  %s3283_s27 = scalar_lea.sflag [#allocation10], %s2666_s19 }
 0x156   : > { %s3284_s24 = sld [smem:[#allocation55_spill]]  ;;  %s550_s5 = scalar_lea.vmem [#allocation14], %s2729_s11 }
 0x157   : > { %1707 = dma.hbm_to_vmem [thread:$0]  (!%p3282_p1), %s2905_s4, 16, %s524_s18, %s3283_s27  }
 0x158   : > { %s557_s12 = sshll.u32 %s550_s5, 4  ;;  %s1538_s0 = sshll.u32 %s2729_s11, 2  ;;  %s558_s12 = int_to_ptr.vmem [resolvable:$true] %s557_s12 }
 0x15c   : > { %s3285_s17 = smov %s3284_s24  ;;  %s2931_s20 = scalar_lea.hbm %s3284_s24, %s2787_s10 }
 0x15d   : > { %s2144_s23 = scalar_lea.hbm %s2931_s20, 16  ;;  %s2149_s18 = scalar_lea.hbm %s3285_s17, 64 }
 0x15e   : > { %p2145_p11 = scmp.ne.s32.totalorder %s2931_s20, %s2144_s23  ;;  %p2150_p4 = scmp.lt.u32.totalorder %s2931_s20, %s3285_s17 }
 0x15f   : > { %p2151_p7 = scmp.lt.u32.totalorder %s2149_s18, %s2144_s23  ;;  %p2153_p10 = scmp.lt.u32.totalorder %s2144_s23, %s2931_s20 }
 0x160   : > { %p2147_p9 = pnand %p2145_p11, %p2757_p6 }
 0x161   : > { %p2152_p13 = por %p2151_p7, %p2150_p4 }
 0x162   : > { %p2148_p8 = pneg %p2147_p9 }
 0x163   : > { %p2154_p12 = por %p2153_p10, %p2152_p13 }
 0x165   : > { %p2155_p3 = pnand %p2154_p12, %p2148_p8 }
 0x167   : > { %2158 = shalt.err (!%p2155_p3)
}
 0x168   : > { %s2159_s22 = scalar_lea.vmem %s558_s12, 16  ;;  %s2372_s6 = smov [#allocation14]  }
 0x169   : > { %p2160_p2 = scmp.ne.s32.totalorder %s558_s12, %s2159_s22  ;;  %s2164_s1 = sshll.u32 %s2372_s6, 4  ;;  %s2165_s1 = int_to_ptr.vmem [resolvable:$false] %s2164_s1 }
 0x16a   : > { %s2166_s9 = scalar_lea.vmem %s2165_s1, 32  ;;  %p2167_p11 = scmp.lt.s32.totalorder %s558_s12, %s2165_s1 }
 0x16b   : > { %p2162_p5 = pnand %p2160_p2, %p2757_p6  ;;  %p2168_p9 = scmp.lt.s32.totalorder %s2166_s9, %s2159_s22 }
 0x16d   : > { %p2163_p0 = pneg %p2162_p5  ;;  %p2169_p1 = por %p2168_p9, %p2167_p11 }
 0x16f   : > { %p2170_p4 = pnand %p2169_p1, %p2163_p0 }
 0x171   : > { %2173 = shalt.err (!%p2170_p4)
}
 0x172   : > { %p3286_p7 = scmp.ne.s32.totalorder %s3265_s7, 0  ;;  %s1539_s26 = sshll.u32 %s2350_s29, 6 }
 0x173   : > { %s3287_s2 = sld [smem:[#allocation57_spill]]  ;;  %s568_s5 = scalar_lea.vmem [#allocation17], %s1538_s0 }
 0x174   : > { %1713 = dma.hbm_to_vmem [thread:$0]  (!%p3286_p7), %s2931_s20, 16, %s558_s12, %s531_s30  }
 0x175   : > { %s575_s23 = sshll.u32 %s568_s5, 4  ;;  %s576_s23 = int_to_ptr.vmem [resolvable:$true] %s575_s23 }
 0x179   : > { %s2958_s24 = scalar_lea.hbm %s3287_s2, %s1539_s26  ;;  %s2179_s12 = scalar_lea.hbm %s3287_s2, 256 }
 0x17a   : > { %s2174_s28 = scalar_lea.hbm %s2958_s24, 64  ;;  %p2180_p10 = scmp.lt.u32.totalorder %s2958_s24, %s3287_s2 }
 0x17b   : > { %p2175_p1 = scmp.ne.s32.totalorder %s2958_s24, %s2174_s28  ;;  %p2181_p12 = scmp.lt.u32.totalorder %s2179_s12, %s2174_s28 }
 0x17c   : > { %p2183_p2 = scmp.lt.u32.totalorder %s2174_s28, %s2958_s24 }
 0x17d   : > { %p2177_p8 = pnand %p2175_p1, %p2757_p6  ;;  %p2182_p3 = por %p2181_p12, %p2180_p10 }
 0x17f   : > { %p2178_p13 = pneg %p2177_p8  ;;  %p2184_p5 = por %p2183_p2, %p2182_p3 }
 0x181   : > { %p2185_p0 = pnand %p2184_p5, %p2178_p13 }
 0x183   : > { %2188 = shalt.err (!%p2185_p0)
}
 0x184   : > { %s2189_s11 = scalar_lea.vmem %s576_s23, 64  ;;  %s2373_s0 = smov [#allocation17]  }
 0x185   : > { %p2190_p11 = scmp.ne.s32.totalorder %s576_s23, %s2189_s11  ;;  %s2194_s21 = sshll.u32 %s2373_s0, 4  ;;  %s2195_s21 = int_to_ptr.vmem [resolvable:$false] %s2194_s21 }
 0x186   : > { %s2196_s10 = scalar_lea.vmem %s2195_s21, 128  ;;  %p2197_p1 = scmp.lt.s32.totalorder %s576_s23, %s2195_s21 }
 0x187   : > { %p2192_p9 = pnand %p2190_p11, %p2757_p6  ;;  %p2198_p8 = scmp.lt.s32.totalorder %s2196_s10, %s2189_s11 }
 0x189   : > { %p2193_p4 = pneg %p2192_p9  ;;  %p2199_p7 = por %p2198_p8, %p2197_p1 }
 0x18b   : > { %p2200_p10 = pnand %p2199_p7, %p2193_p4 }
 0x18d   : > { %2203 = shalt.err (!%p2200_p10)
}
 0x18e   : > { %p3288_p12 = scmp.ne.s32.totalorder %s3265_s7, 0  ;;  %s3289_s22 = scalar_lea.sflag [#allocation4], %s2666_s19 }
 0x18f   : > { %s3290_s6 = sld [smem:[#allocation40_spill]] }
 0x190   : > { %1716 = dma.hbm_to_vmem [thread:$0]  (!%p3288_p12), %s2958_s24, 64, %s576_s23, %s3289_s22  }
 0x195   : > { %p3291_p13 = scmp.ne.s32.totalorder %s3290_s6, 0 }
 0x196   : > { %s3292_s14 = sld [smem:[#allocation42_spill]] (!%p3291_p13)  ;;  %s586_s1 = sand.u32 (!%p3291_p13), 1, %s2504_s16  }
 0x197   : > { %584 = sbr.rel (%p3291_p13) target bundleno = 2140 (0x85c), region = 68  ;;  %s588_s9 = sand.u32 (!%p3291_p13), 1, %s2334_s25  }
 0x198   : > { %s2987_s26 = sshll.u32 (!%p3291_p13), %s588_s9, 3  ;;  %s587_s27 = scalar_lea.sflag (!%p3291_p13), [#allocation4], %s586_s1 }
 0x199   : > { %s590_s13 = scalar_lea.vmem (!%p3291_p13), [#allocation3], %s2987_s26 }
 0x19c   : > { %p3293_p6 = scmp.ne.s32.totalorder (!%p3291_p13), %s3292_s14, 0 }
 0x19e   : > { %2277 = dma.done.wait (%p3293_p6), %s587_s27, 128  }
 0x19f   : > { %2279 = vsyncadd (%p3293_p6), %s587_s27, 4294967168  ;;  %s3294_s19 = sld [smem:[#allocation32_spill]]  ;;  %s3295_s7 = sld [smem:[#allocation46_spill]] }
 0x1a0   : > { %s596_s23 = scalar_lea.sflag [#allocation7], %s586_s1 }
 0x1a5   : > { %s2995_s24 = sand.u32 1, %s3294_s19   ;;  %p3296_p7 = scmp.ne.s32.totalorder %s3295_s7, 0 }
 0x1a6   : > { %s2998_s5 = sshll.u32 %s2995_s24, 4 }
 0x1a7   : > { %s599_s28 = scalar_lea.vmem [#allocation6], %s2998_s5 }
 0x1a8   : > { %2281 = dma.done.wait (%p3296_p7), %s596_s23, 512  }
 0x1a9   : > { %2283 = vsyncadd (%p3296_p7), %s596_s23, 4294966784  ;;  %s608_s30 = scalar_lea.vmem [#allocation8], %s2998_s5  ;;  %s614_s20 = scalar_lea.sflag [#allocation10], %s586_s1 }
 0x1aa   : > { %s617_s12 = scalar_lea.vmem [#allocation9], %s2998_s5 }
 0x1ab   : > { %2285 = dma.done.wait (%p3296_p7), %s614_s20, 272  }
 0x1ac   : > { %2287 = vsyncadd (%p3296_p7), %s614_s20, 4294967024  ;;  %s625_s4 = scalar_lea.vmem [#allocation11], %s2995_s24  ;;  %s631_s18 = scalar_lea.sflag [#allocation13], %s586_s1 }
 0x1ad   : > { %s633_s11 = scalar_lea.vmem [#allocation12], %s2995_s24 }
 0x1ae   : > { %2289 = dma.done.wait (%p3296_p7), %s631_s18, 32  }
 0x1af   : > { %2291 = vsyncadd (%p3296_p7), %s631_s18, 4294967264  ;;  %s641_s0 = scalar_lea.vmem [#allocation14], %s2995_s24  ;;  %p3297_p3 = scmp.eq.s32.totalorder %s2504_s16, 0 }
 0x1b1   : > { %2293 = dma.done.wait (%p3297_p3), [#allocation16], 128   ;;  %p3298_p2 = pmov %p3297_p3 }
 0x1b2   : > { %s1546_s21 = sshll.u32 %s2995_s24, 2 }
 0x1b3   : > { %2295 = vsyncadd (%p3298_p2), [#allocation16], 4294967168  ;;  %s3023_s10 = scalar_lea.vmem [#allocation17], %s1546_s21 }
 0x1b4   : > { %2297 = dma.done.wait (%p3296_p7), %s587_s27, 64  }
 0x1b5   : > { %2299 = vsyncadd (%p3296_p7), %s587_s27, 4294967232  ;;  %p3299_p5 = pmov %p3298_p2 }
 0x1b6   : > { %p3300_p0 = pmov %p3298_p2 }
 0x1b7   : > { %2301 = dma.done.wait (%p3299_p5), [#allocation7], 16  }
 0x1b8   : > { %2303 = vsyncadd (%p3300_p0), [#allocation7], 4294967280  ;;  %p3301_p11 = pmov %p3300_p0 }
 0x1b9   : > { %p3302_p9 = pmov %p3300_p0 }
 0x1ba   : > { %2305 = dma.done.wait (%p3301_p11), [#allocation10], 16  }
 0x1bb   : > { %2307 = vsyncadd (%p3302_p9), [#allocation10], 4294967280  ;;  %p3303_p4 = pmov %p3300_p0 }
 0x1bc   : > { %p3304_p1 = pmov %p3300_p0 }
 0x1bd   : > { %2309 = dma.done.wait (%p3303_p4), [#allocation13], 16  }
 0x1be   : > { %2311 = vsyncadd (%p3304_p1), [#allocation13], 4294967280  ;;  %s738_s22 = scalar_lea.vmem [#allocation21], %s2987_s26  ;;  %s3305_s6 = sld [smem:[#allocation36_spill]] }
 0x1c4   : > { %p1551_p8 = scmp.ne.s32.totalorder %s3305_s6, 0 }
 0x1c5   : > { %vm744_vm0 = vcmask (!%p1551_p8), 261120   ;;  %v2374_v0 = vmov (!%p1551_p8), 0.0  }
 0x1c6   : > { %743 = sbr.rel (%p1551_p8) target bundleno = 461 (0x1cd), region = 120  ;;  %745 = vst.msk [vmem:[#allocation2] sm:$0xff] (!%p1551_p8), %vm744_vm0, %v2374_v0 }
 0x1cd PF: > { %v1839_v1 = vld [vmem:[%s599_s28] sm:$0xff]   ;;  %v2375_v2 = vmov 0.0   ;;  %v1841_v4 = vld [vmem:[%s599_s28 + $0x8] sm:$0xff]   ;;  %vm2376_vm1 = vmmov 0   ;;  %vm771_vm2 = vcmask 261120   ;;  %vm952_vm3 = vcmask 64512  }
 0x1ce   : > { %1597 = vmatprep.subr.bf16.mxu0 %v2375_v2  ;;  %1605 = vmatprep.subr.bf16.mxu1 %v2375_v2  ;;  %v1840_v3 = vld [vmem:[%s608_s30] sm:$0xff]   ;;  %v1842_v5 = vld [vmem:[%s608_s30 + $0x8] sm:$0xff]   ;;  %v2377_v12 = vmov 2   ;;  %v2378_v13 = vmov 0   ;;  %vm1104_vm4 = vcmask 1043456   ;;  %v2379_v42 = vmov 3  }
 0x1cf   : > { %1598 = vmatpush3.bf16.msra.mxu0 %v1839_v1  ;;  %1601 = vmatprep.mubr.msk.bf16.mxu0 %vm2376_vm1, %v2375_v2  ;;  %v3055_v6 = vld [vmem:[%s590_s13] sm:$0xff]  ;;  %v1843_v8 = vld [vmem:[%s617_s12] sm:$0xff]   ;;  %v1552_v14 = vld [vmem:[%s625_s4] ss:$0 sm:$0xff]  ;;  %v2380_v43 = vmov 1   ;;  %v2381_v48 = vmov 4   ;;  %v999_v49 = vlaneseq }
 0x1d0   : > { %1606 = vmatpush3.bf16.msra.mxu1 %v1840_v3  ;;  %1599 = vmatprep.subr.bf16.mxu0 %v2375_v2  ;;  %v747_v7 = vpack.c.bf16 %v3055_v6, %v3055_v6  ;;  %v1845_v9 = vld [vmem:[#allocation15] sm:$0x1f]   ;;  %s3306_s16 = sld [smem:[#allocation36_spill]] }
 0x1d1   : > { %1607 = vmatprep.subr.bf16.mxu1 %v2375_v2  ;;  %1609 = vmatprep.mubr.msk.bf16.mxu1 %vm2376_vm1, %v2375_v2  ;;  %v1844_v10 = vld [vmem:[%s617_s12 + $0x8] sm:$0xff]   ;;  %v957_v11 = vsel %vm952_vm3, %v1845_v9, 0  ;;  %v1000_v50 = vshrl.u32 %v999_v49, 7  ;;  %v1002_v51 = vand.u32 127, %v999_v49 }
 0x1d2   : > { %1835 = vset.pattern.permute.xlu1 %v2377_v12  ;;  %1833 = vset.pattern.permute.xlu0 %v2378_v13  ;;  %v1556_v15 = vld [vmem:[%s633_s11] ss:$0 sm:$0xff] }
 0x1d3   : > { %1600 = vmatpush3.bf16.msra.mxu0 %v1841_v4  ;;  %v1560_v30 = vld [vmem:[%s641_s0] ss:$0 sm:$0xff]  ;;  %v1003_v52 = vsub.s32 %v1002_v51, %v1000_v50  ;;  %vm1087_vm12 = vcmp.gt.s32.totalorder %v1002_v51, %v1000_v50 }
 0x1d4   : > { %1608 = vmatpush3.bf16.msra.mxu1 %v1842_v5  ;;  %1613 = vmatprep.subr.bf16.mxu0 %v2375_v2 }
 0x1d5   : > { %1621 = vmatprep.subr.bf16.mxu1 %v2375_v2  ;;  %vm1004_vm5 = vcmp.gt.s32.totalorder %v1003_v52, 4294967292 }
 0x1d6   : > { %1602 = vmatmul.mubr.msk.bf16.vlgmr.msra.gmra.mrb[0].mxu0 %vm771_vm2, %v747_v7  ;;  %v1005_v53 = vsel %vm1004_vm5, %v1003_v52, 4294967292  ;;  %p1569_p10 = scmp.ne.s32.totalorder %s3306_s16, 3 }
 0x1d7   : > { %1610 = vmatmul.mubr.msk.bf16.vlgmr.msra.gmra.mrb[0].mxu1 %vm771_vm2, %v747_v7  ;;  %1614 = vmatpush3.bf16.msra.mxu0 %v1843_v8  ;;  %vm1006_vm6 = vcmp.lt.s32.totalorder %v1005_v53, 4 }
 0x1d8   : > { %1615 = vmatprep.subr.bf16.mxu0 %v2375_v2  ;;  %1617 = vmatprep.mubr.msk.bf16.mxu0 %vm2376_vm1, %v2375_v2  ;;  %v1007_v54 = vsel %vm1006_vm6, %v1005_v53, 4 }
 0x1d9   : > { %1623 = vmatprep.mubr.msk.bf16.mxu1 %vm2376_vm1, %v2375_v2  ;;  %v1008_v55 = vadd.s32 4, %v1007_v54 }
 0x1db   : > { %1616 = vmatpush3.bf16.msra.mxu0 %v1844_v10  ;;  %vm1009_vm7 = vcmp.eq.s32.totalorder %v1008_v55, 0  ;;  %vm1059_vm8 = vcmp.eq.s32.totalorder %v1008_v55, 1  ;;  %vm1066_vm9 = vcmp.eq.s32.totalorder %v1008_v55, 2  ;;  %vm1073_vm10 = vcmp.eq.s32.totalorder %v1008_v55, 3 }
 0x1dc   : > { %1627 = vmatprep.subr.bf16.mxu0 %v2375_v2  ;;  %vm1080_vm11 = vcmp.eq.s32.totalorder %v1008_v55, 4 }
 0x1dd   : > { %1622 = vmatpush3.bf16.xpose.msra.mxu1 %v957_v11 }
 0x1de   : > { %1618 = vmatmul.mubr.msk.bf16.vlgmr.msra.gmra.mrb[4].mxu0 %vm771_vm2, %v747_v7  ;;  %1633 = vmatprep.subr.bf16.mxu1 %v2375_v2 }
 0x1df   : > { %1629 = vmatprep.mubr.msk.bf16.mxu0 %vm2376_vm1, %v2375_v2 }
 0x2a9   : > { %v809_v16 = vpop.f32.mrb[0].mxu0 }
 0x2aa   : > { %v810_v17 = vadd.f32 %v1552_v14, %v809_v16  ;;  %v873_v18 = vpop.f32.mrb[0].mxu1  ;;  %v1603_v19 = vpop.f32.mrb[1].mxu0 }
 0x2ab   : > { %v874_v20 = vadd.f32 %v1556_v15, %v873_v18  ;;  %v812_v21 = vpop.f32.mrb[2].mxu0  ;;  %v1611_v22 = vpop.f32.mrb[1].mxu1  ;;  %v1150_v15 = vld [vmem:[%s3023_s10] sm:$0xf] }
 0x2ac   : > { %v815_v23 = vmul.f32 0.35355338, %v810_v17  ;;  %v1604_v24 = vpop.f32.mrb[3].mxu0  ;;  %v876_v25 = vpop.f32.mrb[2].mxu1  ;;  %v1155_v16 = vsel %vm1104_vm4, %v1150_v15, 0 }
 0x2ad   : > { %v944_v26 = vpack.c.bf16 %v874_v20, %v874_v20  ;;  %v1612_v27 = vpop.f32.mrb[3].mxu1 }
 0x2ae   : > { %v943_v28 = vpack.c.bf16 %v815_v23, %v815_v23 }
 0x2af   : > { %v1017_v29 = vsel %vm952_vm3, %v944_v26, 0  ;;  %v1148_v26 = vld [vmem:[#allocation2] sm:$0xff] }
 0x2b0   : > { %1628 = vmatpush3.bf16.xpose.msra.mxu0 %v1017_v29  ;;  %1624 = vmatmul.mubr.msk.bf16.vlgmr.msra.gmra.mrb[4].mxu1 %vm952_vm3, %v943_v28 }
 0x2b1   : > { %1635 = vmatprep.mubr.msk.bf16.mxu1 %vm2376_vm1, %v2375_v2  ;;  %1639 = vmatprep.subr.bf16.mxu0 %v2375_v2  ;;  %v936_v31 = vpop.f32.mrb[4].mxu0 }
 0x2b2   : > { %v937_v32 = vadd.f32 %v1560_v30, %v936_v31  ;;  %v1619_v33 = vpop.f32.mrb[5].mxu0 }
 0x2b3   : > { %v939_v34 = vpop.f32.mrb[6].mxu0  ;;  %v1570_v33 = vld [vmem:[#allocation18] ss:$0 sm:$0xff] (!%p1569_p10) }
 0x2b4   : > { %v942_v35 = vpack.c.bf16 %v937_v32, %v937_v32  ;;  %v1620_v36 = vpop.f32.mrb[7].mxu0 }
 0x2b6   : > { %v1106_v37 = vsel %vm1104_vm4, %v942_v35, 0 }
 0x2b7   : > { %1630 = vmatmul.mubr.msk.bf16.vlgmr.msra.gmra.mrb[8].mxu0 %vm952_vm3, %v943_v28  ;;  %1634 = vmatpush3.bf16.msra.mxu1 %v1106_v37 }
 0x2b8   : > { %1641 = vmatprep.mubr.msk.bf16.mxu0 %vm2376_vm1, %v2375_v2  ;;  %1640 = vmatpush3.bf16.msra.mxu0 %v1155_v16 }
 0x383   : > { %v993_v38 = vpop.f32.mrb[4].mxu1 }
 0x384   : > { %1068 = vperm.xlu1 %1835, %v993_v38   ;;  %1012 = vperm.xlu0 %1833, %v993_v38   ;;  %v1625_v39 = vpop.f32.mrb[5].mxu1 }
 0x385   : > { %v996_v40 = vpop.f32.mrb[6].mxu1 }
 0x386   : > { %v1626_v41 = vpop.f32.mrb[7].mxu1 }
 0x388   : > { %1836 = vset.pattern.permute.xlu1 %v2379_v42  ;;  %1834 = vset.pattern.permute.xlu0 %v2380_v43 }
 0x389   : > { %1075 = vperm.xlu1 %1836, %v993_v38   ;;  %1061 = vperm.xlu0 %1834, %v993_v38  }
 0x38a   : > { %v1053_v44 = vpop.f32.mrb[8].mxu0 }
 0x38b   : > { %v1631_v45 = vpop.f32.mrb[9].mxu0 }
 0x38c   : > { %v1056_v46 = vpop.f32.mrb[10].mxu0 }
 0x38d   : > { %v1632_v47 = vpop.f32.mrb[11].mxu0  ;;  %1837 = vset.pattern.permute.xlu1 %v2381_v48  ;;  %1838 = vset.pattern.permute.xlu0 %v2381_v48  ;;  %v1571_v46 = vld [vmem:[#allocation19] ss:$0 sm:$0xff] (!%p1569_p10)  ;;  %v1572_v48 = vld [vmem:[#allocation20] ss:$0 sm:$0xff] (!%p1569_p10) }
 0x38e   : > { %1082 = vperm.xlu1 %1837, %v993_v38  }
 0x403   : > { %v1069_v56 = vpop.permute.xlu1 %1068  ;;  %v1013_v57 = vpop.permute.xlu0 %1012 }
 0x404   : > { %v1015_v58 = vsel %vm1009_vm7, %v1013_v57, 0.0  ;;  %v1071_v0 = vsel %vm1066_vm9, %v1069_v56, 0.0 }
 0x405   : > { %v1054_v59 = vadd.f32 %v1053_v44, %v1015_v58 }
 0x408   : > { %v1076_v60 = vpop.permute.xlu1 %1075  ;;  %v1062_v61 = vpop.permute.xlu0 %1061 }
 0x409   : > { %v1064_v62 = vsel %vm1059_vm8, %v1062_v61, 0.0  ;;  %v1078_v2 = vsel %vm1073_vm10, %v1076_v60, 0.0 }
 0x40a   : > { %v1065_v63 = vadd.f32 %v1064_v62, %v1054_v59 }
 0x40c   : > { %v1072_v1 = vadd.f32 %v1071_v0, %v1065_v63 }
 0x40d   : > { %v1083_v3 = vpop.permute.xlu1 %1082 }
 0x40e   : > { %v1079_v4 = vadd.f32 %v1078_v2, %v1072_v1  ;;  %v1085_v5 = vsel %vm1080_vm11, %v1083_v3, 0.0 }
 0x410   : > { %v1086_v7 = vadd.f32 %v1085_v5, %v1079_v4 }
 0x412   : > { %v1088_v8 = vsel %vm1087_vm12, -1e+09, %v1086_v7 }
 0x413   : > { %v1089_v9 = vsel %vm952_vm3, %v1088_v8, -inf }
 0x414   : > { %1090 = vmax.xlane.f32.xlu0 %v1089_v9 }
 0x4a1   : > { %v1091_v10 = vpop.xlane.xlu0 %1090 }
 0x4a2   : > { %v1092_v11 = vsub.f32 %v1088_v8, %v1091_v10 }
 0x4a4   : > { %v1093_v12 = vmul.f32 1.442695, %v1092_v11 }
 0x4a6   : > { %1846 = vpow2.f32 %v1093_v12 }
 0x4b0   : > { %v1847_v13 = vpop.eup %1846 }
 0x4b1   : > { %v1095_v14 = vsel %vm952_vm3, %v1847_v13, 0.0 }
 0x4b2   : > { %1096 = vadd.xlane.f32.xlu1 %v1095_v14 }
 0x53f   : > { %v1097_v17 = vpop.xlane.xlu1 %1096 }
 0x540   : > { %1848 = vrcp.f32 %v1097_v17 }
 0x54a   : > { %v1849_v18 = vpop.eup %1848 }
 0x54b   : > { %v1099_v19 = vmul.f32 %v1849_v18, %v1847_v13 }
 0x54d   : > { %v1100_v20 = vpack.c.bf16 %v1099_v19, %v1099_v19 }
 0x54f   : > { %1636 = vmatmul.mubr.msk.bf16.vlgmr.msra.gmra.mrb[8].mxu1 %vm952_vm3, %v1100_v20 }
 0x622   : > { %v1142_v21 = vpop.f32.mrb[8].mxu1 }
 0x623   : > { %v1149_v22 = vpack.c.bf16 %v1142_v21, %v1142_v21  ;;  %v1637_v23 = vpop.f32.mrb[9].mxu1 }
 0x624   : > { %v1145_v24 = vpop.f32.mrb[10].mxu1 }
 0x625   : > { %v1638_v25 = vpop.f32.mrb[11].mxu1  ;;  %1642 = vmatmul.mubr.msk.bf16.vlgmr.msra.gmra.mrb[12].mxu0 %vm952_vm3, %v1149_v22 }
 0x6f5   : > { %1202 = sbr.rel (%p1569_p10) target bundleno = 2113 (0x841), region = 124 }
 0x6f8   : > { %v1191_v27 = vpop.f32.mrb[12].mxu0 }
 0x6f9   : > { %v1197_v28 = vadd.f32 %v1191_v27, %v1148_v26  ;;  %v1643_v29 = vpop.f32.mrb[13].mxu0 }
 0x6fa   : > { %v1194_v30 = vpop.f32.mrb[14].mxu0 }
 0x6fb   : > { %1198 = vst.msk [vmem:[#allocation2] sm:$0xff] %vm771_vm2, %v1197_v28  ;;  %v1644_v31 = vpop.f32.mrb[15].mxu0 }
 0x702   : > { %v1203_v32 = vld [vmem:[#allocation2] sm:$0xff] }
 0x703   : > { %v1211_v34 = vadd.f32 %v1570_v33, %v1203_v32 }
 0x705   : > { %v1212_v35 = vadd.f32 %v1211_v34, %v3055_v6 }
 0x707   : > { %v1213_v36 = vsel %vm771_vm2, %v1212_v35, 0.0 }
 0x708   : > { %1214 = vadd.xlane.f32.xlu0 %v1213_v36 }
 0x795   : > { %v1215_v37 = vpop.xlane.xlu0 %1214 }
 0x796   : > { %v1217_v38 = vmul.f32 0.03125, %v1215_v37 }
 0x798   : > { %v1218_v39 = vsub.f32 %v1212_v35, %v1217_v38 }
 0x79a   : > { %v1219_v40 = vmul.f32 %v1218_v39, %v1218_v39 }
 0x79c   : > { %v1220_v41 = vsel %vm771_vm2, %v1219_v40, 0.0 }
 0x79d   : > { %1221 = vadd.xlane.f32.xlu0 %v1220_v41 }
 0x82a   : > { %v1222_v42 = vpop.xlane.xlu0 %1221 }
 0x82b   : > { %v1223_v43 = vmul.f32 0.03125, %v1222_v42 }
 0x82d   : > { %v1224_v44 = vadd.f32 1e-05, %v1223_v43 }
 0x82f   : > { %1850 = vrsqrt.f32 %v1224_v44 }
 0x839   : > { %v1851_v45 = vpop.eup %1850 }
 0x83a   : > { %v1226_v47 = vmul.f32 %v1851_v45, %v1218_v39 }
 0x83c   : > { %v1234_v6 = vmul.f32 %v1571_v46, %v1226_v47 }
 0x83e   : > { %v1242_v49 = vadd.f32 %v1572_v48, %v1234_v6 }
 0x840   : > { %1243 = vst.msk [vmem:[%s738_s22] sm:$0xff] %vm771_vm2, %v1242_v49 }
 0x841 PF: > { %s3307_s14 = sld [smem:[#allocation37_spill]]  ;;  %s3308_s1 = sld [smem:[#allocation47_spill]] }
 0x842   : > { %s3309_s7 = sld [smem:[#allocation61_spill]]  ;;  %s1258_s5 = sshll.u32 %s738_s22, 4  ;;  %s1259_s5 = int_to_ptr.vmem [resolvable:$true] %s1258_s5 }
 0x843   : > { %s1245_s23 = scalar_lea.sflag [#allocation5], %s588_s9  ;;  %s2204_s28 = scalar_lea.vmem %s1259_s5, 128 }
 0x844   : > { %p2205_p12 = scmp.ne.s32.totalorder %s1259_s5, %s2204_s28  ;;  %s2382_s30 = smov [#allocation21]  }
 0x845   : > { %s2208_s20 = sshll.u32 %s2382_s30, 4  ;;  %s2209_s20 = int_to_ptr.vmem [resolvable:$false] %s2208_s20 }
 0x846   : > { %s2210_s12 = scalar_lea.vmem %s2209_s20, 256  ;;  %p2211_p3 = scmp.lt.s32.totalorder %s1259_s5, %s2209_s20 }
 0x847   : > { %s1574_s27 = sshll.u32 %s3307_s14, 7  ;;  %p3310_p13 = scmp.ne.s32.totalorder %s3308_s1, 0 }
 0x848   : > { %s3100_s24 = scalar_lea.hbm %s3309_s7, %s1574_s27  ;;  %p2212_p2 = scmp.lt.s32.totalorder %s2210_s12, %s2204_s28 }
 0x849   : > { %p2206_p6 = pnand %p2205_p12, %p3310_p13 }
 0x84a   : > { %p2213_p5 = por %p2212_p2, %p2211_p3 }
 0x84b   : > { %p2207_p7 = pneg %p2206_p6 }
 0x84d   : > { %p2214_p0 = pnand %p2213_p5, %p2207_p7 }
 0x84f   : > { %2217 = shalt.err (!%p2214_p0)
}
 0x850   : > { %s2218_s9 = scalar_lea.hbm %s3100_s24, 128  ;;  %s2222_s18 = scalar_lea.hbm %s3309_s7, 256 }
 0x851   : > { %p2219_p11 = scmp.ne.s32.totalorder %s3100_s24, %s2218_s9  ;;  %p2223_p1 = scmp.lt.u32.totalorder %s3100_s24, %s3309_s7 }
 0x852   : > { %p2224_p8 = scmp.lt.u32.totalorder %s2222_s18, %s2218_s9  ;;  %p2226_p12 = scmp.lt.u32.totalorder %s2218_s9, %s3100_s24 }
 0x853   : > { %p2220_p9 = pnand %p2219_p11, %p3310_p13 }
 0x854   : > { %p2225_p10 = por %p2224_p8, %p2223_p1 }
 0x855   : > { %p2221_p4 = pneg %p2220_p9 }
 0x856   : > { %p2227_p6 = por %p2226_p12, %p2225_p10 }
 0x858   : > { %p2228_p7 = pnand %p2227_p6, %p2221_p4 }
 0x85a   : > { %2231 = shalt.err (!%p2228_p7)
}
 0x85b   : > { %1677 = dma.vmem_to_hbm [thread:$0]  (%p3310_p13), %s1259_s5, 128, %s3100_s24, %s1245_s23  }
 0x85c PF: > { %s3311_s21 = sld [smem:[#allocation39_spill]]  ;;  %s3312_s10 = sld [smem:[#allocation34_spill]] }
 0x85d   : > { %s3313_s22 = sld [smem:[#allocation48_spill]] }
 0x862   : > { %p1730_p3 = scmp.ge.s32.totalorder %s3311_s21, 2  ;;  %s1270_s6 = sand.u32 1, %s3312_s10  }
 0x863   : > { %p3314_p2 = scmp.ne.s32.totalorder %s3313_s22, 0  ;;  %s1271_s16 = scalar_lea.sflag [#allocation5], %s1270_s6 }
 0x865   : > { %p1718_p5 = pnand %p1730_p3, %p3314_p2 }
 0x867   : > { %2313 = dma.done.wait (!%p1718_p5), %s1271_s16, 128  }
 0x868   : > { %2315 = vsyncadd (!%p1718_p5), %s1271_s16, 4294967168  ;;  %s38_s13 = sadd.s32 1, %s3311_s21   ;;  %s3315_s21 = sld [smem:[#allocation32_spill]] }
 0x869   : > { %p35_p0 = scmp.ge.s32.totalorder %s38_s13, 10   ;;  %s3316_s22 = sld [smem:[#allocation33_spill]] }
 0x86a   : > { %s3317_s23 = sld [smem:[#allocation44_spill]]  ;;  %s3318_s14 = sld [smem:[#allocation35_spill]] }
 0x86b   : > { %s3319_s26 = sld [smem:[#allocation45_spill]]  ;;  %s3320_s28 = sld [smem:[#allocation38_spill]] }
 0x86c   : > { %s3321_s1 = sld [smem:[#allocation41_spill]]  ;;  %s3322_s30 = sld [smem:[#allocation43_spill]] }
 0x86d   : > { %s3323_s24 = smov %s2334_s25  ;;  %s3325_s27 = smov %s2350_s29 }
 0x86e   :  { %37 = sbr.rel (!%p35_p0) target bundleno = 30 (0x1e), region = 220 }
 0x870   : > { %s3324_s25 = smov %s3318_s14 }
 0x872   : > { %s3326_s29 = smov %s3321_s1 }
 0x875   :  { %1276 = vsyncpa [#allocation4], 1 }
 0x876   :  { %1278 = vsyncpa [#allocation4 + $0x1], 1 }
 0x877   :  { %1279 = vsyncpa [#allocation7], 1 }
 0x878   :  { %1281 = vsyncpa [#allocation7 + $0x1], 1 }
 0x879   :  { %1282 = vsyncpa [#allocation10], 1 }
 0x87a   :  { %1284 = vsyncpa [#allocation10 + $0x1], 1 }
 0x87b   :  { %1285 = vsyncpa [#allocation13], 1 }
 0x87c   :  { %1287 = vsyncpa [#allocation13 + $0x1], 1 }
 0x87d   :  { %1288 = vsyncpa [#allocation16], 1 }
 0x87e   :  { %1289 = vsyncpa [#allocation5], 1 }
 0x87f   :  { %1291 = vsyncpa [#allocation5 + $0x1], 1 }

// kernel: decoder_stacks_forward.7
= control target key start
LH: loop header
LB: loop body
LE: loop exit
PB: predicated region body
PF: predicated region fallthrough
CT: control target
= control target key end

     0   :  { %s3557_s0 = inlined_call_operand.hbm [shape: f32[2,8,32], index: 0, kind: input, shape index: {}]   ;;  %s3558_s1 = inlined_call_operand.hbm [shape: f32[2,8,32], index: 1, kind: input, shape index: {}]   ;;  %s3559_s2 = inlined_call_operand.hbm [shape: bf16[4,32,8], index: 2, kind: input, shape index: {}]   ;;  %s3560_s3 = inlined_call_operand.hbm [shape: bf16[4,32,8], index: 3, kind: input, shape index: {}]   ;;  %s3561_s4 = inlined_call_operand.hbm [shape: bf16[4,32,8], index: 4, kind: input, shape index: {}]   ;;  %s3562_s5 = inlined_call_operand.hbm [shape: f32[4,1,8], index: 5, kind: input, shape index: {}]   ;;  %s3563_s6 = inlined_call_operand.hbm [shape: f32[4,1,8], index: 6, kind: input, shape index: {}]   ;;  %s3564_s7 = inlined_call_operand.hbm [shape: f32[4,1,8], index: 7, kind: input, shape index: {}]   ;;  %s3565_s8 = inlined_call_operand.hbm [shape: bf16[9,8], index: 8, kind: input, shape index: {}]   ;;  %s3566_s9 = inlined_call_operand.hbm [shape: f32[2,1,8], index: 9, kind: input, shape index: {}]   ;;  %s3567_s10 = inlined_call_operand.hbm [shape: bf16[4,8,32], index: 10, kind: input, shape index: {}]   ;;  %s3568_s11 = inlined_call_operand.hbm [shape: f32[1,32], index: 11, kind: input, shape index: {}]   ;;  %s3569_s12 = inlined_call_operand.hbm [shape: f32[1,32], index: 12, kind: input, shape index: {}]   ;;  %s3570_s13 = inlined_call_operand.hbm [shape: f32[1,32], index: 13, kind: input, shape index: {}]   ;;  %s3571_s14 = inlined_call_operand.hbm [shape: f32[2,8,32], index: 14, kind: output, shape index: {}]  }
   0x1   :  { %3625 = sst [smem:[#allocation56_spill]] %s3557_s0 }
   0x2   :  { %3626 = sst [smem:[#allocation57_spill]] %s3558_s1 }
   0x3   :  { %3627 = sst [smem:[#allocation58_spill]] %s3559_s2 }
   0x4   :  { %3628 = sst [smem:[#allocation59_spill]] %s3560_s3 }
   0x5   :  { %3629 = sst [smem:[#allocation60_spill]] %s3561_s4 }
   0x6   :  { %3630 = sst [smem:[#allocation61_spill]] %s3562_s5 }
   0x7   :  { %3631 = sst [smem:[#allocation62_spill]] %s3563_s6 }
   0x8   :  { %3632 = sst [smem:[#allocation63_spill]] %s3564_s7 }
   0x9   :  { %3633 = sst [smem:[#allocation64_spill]] %s3565_s8 }
   0xa   :  { %3634 = sst [smem:[#allocation65_spill]] %s3566_s9 }
   0xb   :  { %3635 = sst [smem:[#allocation66_spill]] %s3567_s10 }
   0xc   :  { %3636 = sst [smem:[#allocation67_spill]] %s3568_s11 }
   0xd   :  { %3637 = sst [smem:[#allocation68_spill]] %s3569_s12 }
   0xe   :  { %3638 = sst [smem:[#allocation69_spill]] %s3570_s13 }
   0xf   :  { %3639 = sst [smem:[#allocation70_spill]] %s3571_s14 }
  0x10   :  { %19 = vsyncpa [#allocation4], 0 }
  0x11   :  { %21 = vsyncpa [#allocation4 + $0x1], 0 }
  0x12   :  { %22 = vsyncpa [#allocation7], 0 }
  0x13   :  { %24 = vsyncpa [#allocation7 + $0x1], 0 }
  0x14   :  { %25 = vsyncpa [#allocation10], 0 }
  0x15   :  { %27 = vsyncpa [#allocation10 + $0x1], 0 }
  0x16   :  { %28 = vsyncpa [#allocation13], 0 }
  0x17   :  { %30 = vsyncpa [#allocation13 + $0x1], 0 }
  0x18   :  { %31 = vsyncpa [#allocation16], 0 }
  0x19   :  { %33 = vsyncpa [#allocation16 + $0x1], 0 }
  0x1a   :  { %34 = vsyncpa [#allocation19], 0 }
  0x1b   :  { %36 = vsyncpa [#allocation19 + $0x1], 0 }
  0x1c   :  { %37 = vsyncpa [#allocation22], 0 }
  0x1d   :  { %38 = vsyncpa [#allocation25], 0 }
  0x1e   :  { %39 = vsyncpa [#allocation5], 0 }
  0x1f   :  { %41 = vsyncpa [#allocation5 + $0x1], 0  ;;  %s2763_s29 = smov 0   ;;  %s2765_s30 = smov 0  }
  0x20   :  { %s2767_s15 = smov 0   ;;  %s2769_s16 = smov 0  }
  0x21   :  { %s2771_s17 = smov 0   ;;  %s2773_s18 = smov 0  }
  0x22   :  { %s2775_s19 = smov 0   ;;  %s2777_s20 = smov 0  }
  0x23   :  { %s2779_s21 = smov 0   ;;  %s2781_s22 = smov 0  }
  0x24   :  { %s2783_s23 = smov 0  }
  0x25 LB: > { %3640 = sst [smem:[#allocation39_spill]] %s2621_s30  ;;  %s2819_s24 = sadd.s32 4294967295, %s2657_s23   ;;  %s2657_s23 = sphi %s2783_s23, %s47_s23   ;;  %s2653_s22 = sphi %s2781_s22, %s3749_s22   ;;  %s2649_s21 = sphi %s2779_s21, %s3748_s21   ;;  %s2645_s20 = sphi %s2777_s20, %s3747_s20   ;;  %s2641_s19 = sphi %s2775_s19, %s3746_s19   ;;  %s2637_s18 = sphi %s2773_s18, %s3741_s18   ;;  %s2633_s17 = sphi %s2771_s17, %s3745_s17   ;;  %s2629_s16 = sphi %s2769_s16, %s3744_s16   ;;  %s2625_s15 = sphi %s2767_s15, %s3739_s15   ;;  %s2621_s30 = sphi %s2765_s30, %s3738_s30   ;;  %s2617_s29 = sphi %s2763_s29, %s3737_s29  }
  0x26   : > { %3641 = sst [smem:[#allocation40_spill]] %s2625_s15  ;;  %p1727_p0 = scmp.ge.s32.totalorder %s2657_s23, 1 }
  0x27   : > { %3642 = sst [smem:[#allocation41_spill]] %s2629_s16  ;;  %p3578_p1 = scmp.eq.s32.totalorder %s2819_s24, 0 }
  0x28   : > { %3643 = sst [smem:[#allocation42_spill]] %s2637_s18  ;;  %p434_p2 = scmp.lt.s32.totalorder %s2657_s23, 9 }
  0x29   : > { %3644 = sst [smem:[#allocation43_spill]] %s2641_s19  ;;  %s2659_s26 = smov [#allocation17]  }
  0x2a   : > { %3645 = sst [smem:[#allocation44_spill]] %s2645_s20  ;;  %p2824_p3 = pnand %p1727_p0, %p434_p2 }
  0x2b   : > { %3646 = sst [smem:[#allocation45_spill]] %s2657_s23  ;;  %s446_s27 = sshll.u32 %s2659_s26, 4  ;;  %s447_s27 = int_to_ptr.vmem [resolvable:$true] %s446_s27 }
  0x2c   : > { %3647 = sst [smem:[#allocation46_spill]] %s2819_s24  ;;  %p1897_p4 = pneg %p2824_p3 }
  0x2d   : > { %s3648_s25 = scalar_select %p2824_p3, 1, 0 }
  0x2e   : > { %p2832_p5 = pnand %p1897_p4, %p3578_p1  ;;  %s2660_s14 = smov [#allocation21]  }
  0x2f   : > { %3649 = sst [smem:[#allocation47_spill]] %s3648_s25  ;;  %s460_s20 = sshll.u32 %s2660_s14, 4  ;;  %s2836_s20 = int_to_ptr.vmem [resolvable:$true] %s460_s20 }
  0x30   : > { %s3650_s28 = scalar_select %p2832_p5, 1, 0 }
  0x31   : > { %s3651_s8 = sld [smem:[#allocation64_spill]]  ;;  %p2846_p7 = pneg %p2832_p5 }
  0x33   : > { %s3652_s26 = scalar_select %p2846_p7, 1, 0 }
  0x37   : > { %s2083_s7 = scalar_lea.hbm %s3651_s8, 128 }
  0x38   : > { %p2084_p6 = scmp.ne.s32.totalorder %s3651_s8, %s2083_s7  ;;  %p2090_p10 = scmp.lt.u32.totalorder %s2083_s7, %s3651_s8 }
  0x3a   : > { %p2086_p8 = pnand %p2846_p7, %p2084_p6 }
  0x3c   : > { %p2087_p9 = pneg %p2086_p8 }
  0x3e   : > { %p2092_p11 = pnand %p2090_p10, %p2087_p9 }
  0x40   : > { %2095 = shalt.err (!%p2092_p11)
}
  0x41   : > { %s2096_s10 = scalar_lea.vmem %s447_s27, 128  ;;  %p2104_p2 = scmp.lt.s32.totalorder %s447_s27, %s447_s27 }
  0x42   : > { %p2097_p12 = scmp.ne.s32.totalorder %s447_s27, %s2096_s10  ;;  %p2105_p4 = scmp.lt.s32.totalorder %s2096_s10, %s2096_s10 }
  0x44   : > { %p2099_p13 = pnand %p2097_p12, %p2846_p7  ;;  %p2106_p1 = por %p2105_p4, %p2104_p2 }
  0x46   : > { %p2100_p0 = pneg %p2099_p13 }
  0x48   : > { %p2107_p3 = pnand %p2106_p1, %p2100_p0 }
  0x4a   : > { %2110 = shalt.err (!%p2107_p3)
}
  0x4b   : > { %s3584_s4 = smov 64   ;;  %s3589_s6 = smov 4  }
  0x4c   : > { %1900 = dma.hbm_to_vmem [thread:$0]  (!%p2832_p5), %s3651_s8, 128, %s447_s27, [#allocation16], %s3584_s4, %s3584_s4, %s3589_s6  }
  0x4d   : > { %s3653_s11 = sld [smem:[#allocation67_spill]] }
  0x53   : > { %s2111_s2 = scalar_lea.hbm %s3653_s11, 16 }
  0x54   : > { %p2112_p1 = scmp.ne.s32.totalorder %s3653_s11, %s2111_s2  ;;  %p2118_p8 = scmp.lt.u32.totalorder %s2111_s2, %s3653_s11 }
  0x56   : > { %p2114_p3 = pnand %p2112_p1, %p2846_p7 }
  0x58   : > { %p2115_p6 = pneg %p2114_p3 }
  0x5a   : > { %p2120_p9 = pnand %p2118_p8, %p2115_p6 }
  0x5c   : > { %2123 = shalt.err (!%p2120_p9)
}
  0x5d   : > { %s2124_s27 = scalar_lea.vmem %s2836_s20, 16  ;;  %s2131_s0 = scalar_lea.vmem %s2836_s20, 32 }
  0x5e   : > { %p2125_p10 = scmp.ne.s32.totalorder %s2836_s20, %s2124_s27  ;;  %p2132_p13 = scmp.lt.s32.totalorder %s2836_s20, %s2836_s20 }
  0x5f   : > { %p2133_p0 = scmp.lt.s32.totalorder %s2131_s0, %s2124_s27 }
  0x60   : > { %p2127_p11 = pnand %p2125_p10, %p2846_p7 }
  0x61   : > { %p2134_p2 = por %p2133_p0, %p2132_p13 }
  0x62   : > { %p2128_p12 = pneg %p2127_p11 }
  0x64   : > { %p2135_p4 = pnand %p2134_p2, %p2128_p12 }
  0x66   : > { %2138 = shalt.err (!%p2135_p4)
}
  0x67   : > { %1903 = dma.hbm_to_vmem [thread:$0]  (!%p2832_p5), %s3653_s11, 16, %s2836_s20, [#allocation22]  }
  0x68   : > { %s1726_s13 = sadd.s32 4294967294, %s2657_s23   ;;  %s56_s7 = sadd.s32 1, %s2649_s21 }
  0x69   : > { %p57_p1 = scmp.ge.s32.totalorder %s56_s7, 4  ;;  %s59_s19 = sadd.s32 1, %s2653_s22 }
  0x6a   : > { %s66_s25 = sadd.s32 1, %s2637_s18  ;;  %p3587_p3 = scmp.ne.s32.totalorder %s2637_s18, %s2633_s17 }
  0x6b   : > { %s3751_s7 = smov (%p57_p1, %s56_s7), 0  ;;  %s3753_s19 = smov (!%p57_p1, %s59_s19), %s2653_s22 }
  0x6c   : > { %3654 = sst [smem:[#allocation48_spill]] %s3751_s7  ;;  %p74_p6 = scmp.eq.s32.totalorder %s2657_s23, 0 }
  0x6d   : > { %p3586_p8 = scmp.ne.s32.totalorder %s2633_s17, %s2629_s16  ;;  %p61_p9 = scmp.ge.s32.totalorder %s3753_s19, 2 }
  0x6e   : > { %s115_s20 = ssub.s32 %s2649_s21, %s3751_s7  ;;  %p2908_p10 = por %p74_p6, %p3587_p3 }
  0x6f   : > { %p3656_p11 = scmp.eq.s32.totalorder %s2819_s24, 0  ;;  %s3755_s19 = smov (%p61_p9, %s3753_s19), 0 }
  0x70   : > { %3659 = sst [smem:[#allocation50_spill]] %s3755_s19  ;;  %p116_p13 = scmp.eq.s32.totalorder %s115_s20, 0 }
  0x71   : > { %p2917_p12 = por %p3656_p11, %p3586_p8  ;;  %s118_s27 = sadd.s32 1, %s2625_s15 }
  0x72   : > { %s63_s0 = ssub.s32 %s2653_s22, %s3755_s19  ;;  %p125_p0 = scmp.ne.s32.totalorder %s2625_s15, %s2621_s30 }
  0x73   : > { %s3657_s10 = scalar_select %p2917_p12, 1, 0 }
  0x74   : > { %p64_p2 = scmp.eq.s32.totalorder %s63_s0, 0  ;;  %p131_p4 = scmp.ne.s32.totalorder %s2621_s30, %s2617_s29 }
  0x75   : > { %3658 = sst [smem:[#allocation49_spill]] %s3657_s10  ;;  %p2938_p1 = por %p125_p0, %p74_p6 }
  0x76   : > { %s2931_s2 = scalar_select %p116_p13, %s2625_s15, %s118_s27  }
  0x77   : > { %s2934_s12 = scalar_select %p64_p2, %s2637_s18, %s66_s25  }
  0x78   : > { %3660 = sst [smem:[#allocation51_spill]] %s2931_s2  ;;  %p3663_p9 = pmov %p3656_p11 }
  0x79   : > { %3661 = sst [smem:[#allocation52_spill]] %s2934_s12  ;;  %p421_p8 = scmp.eq.s32.totalorder %s2819_s24, 7 }
  0x7a   : > { %p2944_p11 = por %p131_p4, %p3663_p9  ;;  %p427_p3 = scmp.eq.s32.totalorder %s1726_s13, 7 }
  0x7b   : > { %p1949_p12 = scmp.lt.s32.totalorder %s2657_s23, 8  ;;  %s2951_s29 = sand.u32 1, %s2637_s18  }
  0x7c   : > { %s3664_s20 = scalar_select %p2944_p11, 1, 0 }
  0x7d   : > { %p3666_p13 = scmp.ne.s32.totalorder %s2637_s18, %s2633_s17  ;;  %p3669_p6 = scmp.ne.s32.totalorder %s2633_s17, %s2629_s16 }
  0x7e   : > { %3665 = sst [smem:[#allocation53_spill]] %s3664_s20  ;;  %s3595_s0 = sshll.u32 %s2951_s29, 3 }
  0x7f   : > { %p2956_p2 = por %p421_p8, %p3666_p13  ;;  %p2963_p0 = por %p427_p3, %p3669_p6 }
  0x80   : > { %s3594_s6 = sshll.u32 %s2653_s22, 7  ;;  %p2971_p4 = pnand %p1949_p12, %p2908_p10 }
  0x81   : > { %s3667_s25 = scalar_select %p2956_p2, 1, 0 }
  0x82   : > { %s3670_s27 = scalar_select %p2963_p0, 1, 0 }
  0x83   : > { %3668 = sst [smem:[#allocation54_spill]] %s3667_s25  ;;  %s2976_s8 = sand.u32 1, %s2657_s23  }
  0x84   : > { %3671 = sst [smem:[#allocation55_spill]] %s3670_s27  ;;  %s3673_s1 = sld [smem:[#allocation57_spill]] }
  0x85   : > { %s3672_s13 = scalar_select %p2971_p4, 1, 0 }
  0x86   : > { %s515_s14 = scalar_lea.vmem [#allocation6], %s3595_s0  ;;  %p2989_p3 = pnand %p1949_p12, %p2938_p1 }
  0x87   : > { %s522_s12 = sshll.u32 %s515_s14, 4  ;;  %s2996_s2 = sand.u32 1, %s2625_s15   ;;  %s2993_s12 = int_to_ptr.vmem [resolvable:$true] %s522_s12 }
  0x88   : > { %s3674_s18 = scalar_select %p2989_p3, 1, 0 }
  0x89   : > { %p3003_p10 = pneg %p2971_p4 }
  0x8a   : > { %s2983_s7 = scalar_lea.hbm %s3673_s1, %s3594_s6  ;;  %s2144_s0 = scalar_lea.hbm %s3673_s1, 256 }
  0x8b   : > { %s2139_s19 = scalar_lea.hbm %s2983_s7, 128  ;;  %p2145_p12 = scmp.lt.u32.totalorder %s2983_s7, %s3673_s1 }
  0x8c   : > { %p2140_p8 = scmp.ne.s32.totalorder %s2983_s7, %s2139_s19  ;;  %p2146_p1 = scmp.lt.u32.totalorder %s2144_s0, %s2139_s19 }
  0x8d   : > { %s3675_s6 = scalar_select %p3003_p10, 1, 0 }
  0x8e   : > { %p2142_p9 = pnand %p3003_p10, %p2140_p8  ;;  %p2147_p6 = por %p2146_p1, %p2145_p12 }
  0x8f   : > { %p2148_p0 = scmp.lt.u32.totalorder %s2139_s19, %s2983_s7 }
  0x90   : > { %p2143_p13 = pneg %p2142_p9 }
  0x91   : > { %p2149_p2 = por %p2148_p0, %p2147_p6 }
  0x93   : > { %p2150_p11 = pnand %p2149_p2, %p2143_p13 }
  0x95   : > { %2153 = shalt.err (!%p2150_p11)
}
  0x96   : > { %s2154_s11 = scalar_lea.vmem %s2993_s12, 128  ;;  %s2663_s4 = smov [#allocation6]  }
  0x97   : > { %p2155_p8 = scmp.ne.s32.totalorder %s2993_s12, %s2154_s11  ;;  %s2159_s14 = sshll.u32 %s2663_s4, 4  ;;  %s2160_s14 = int_to_ptr.vmem [resolvable:$false] %s2159_s14 }
  0x98   : > { %s2161_s16 = scalar_lea.vmem %s2160_s14, 256  ;;  %p2162_p7 = scmp.lt.s32.totalorder %s2993_s12, %s2160_s14 }
  0x99   : > { %p2157_p9 = pnand %p2155_p8, %p3003_p10  ;;  %p2163_p3 = scmp.lt.s32.totalorder %s2161_s16, %s2154_s11 }
  0x9b   : > { %p2158_p5 = pneg %p2157_p9  ;;  %p2164_p12 = por %p2163_p3, %p2162_p7 }
  0x9d   : > { %p2165_p1 = pnand %p2164_p12, %p2158_p5 }
  0x9f   : > { %2168 = shalt.err (!%p2165_p1)
}
  0xa0   : > { %s3676_s27 = scalar_lea.sflag [#allocation7], %s2976_s8  ;;  %s3029_s0 = sshll.u32 %s2996_s2, 4 }
  0xa1   : > { %1916 = dma.hbm_to_vmem [thread:$0]  (!%p2971_p4), %s2983_s7, 128, %s2993_s12, %s3676_s27  }
  0xa2   : > { %s3032_s19 = sshll.u32 %s2649_s21, 8  ;;  %s3677_s3 = sld [smem:[#allocation59_spill]] }
  0xa3   : > { %s554_s16 = scalar_lea.vmem [#allocation9], %s3029_s0  ;;  %p3678_p7 = scmp.ne.s32.totalorder %s3674_s18, 0 }
  0xa4   : > { %s561_s1 = sshll.u32 %s554_s16, 4  ;;  %s3041_s1 = int_to_ptr.vmem [resolvable:$true] %s561_s1 }
  0xa5   : > { %p3048_p11 = pneg %p3678_p7 }
  0xa7   : > { %s3679_s27 = scalar_select %p3048_p11, 1, 0 }
  0xa8   : > { %s3038_s14 = scalar_lea.hbm %s3677_s3, %s3032_s19  ;;  %s2174_s15 = scalar_lea.hbm %s3677_s3, 1024 }
  0xa9   : > { %s2169_s12 = scalar_lea.hbm %s3038_s14, 256  ;;  %p2175_p3 = scmp.lt.u32.totalorder %s3038_s14, %s3677_s3 }
  0xaa   : > { %p2170_p5 = scmp.ne.s32.totalorder %s3038_s14, %s2169_s12  ;;  %p2176_p13 = scmp.lt.u32.totalorder %s2174_s15, %s2169_s12 }
  0xab   : > { %p2178_p8 = scmp.lt.u32.totalorder %s2169_s12, %s3038_s14 }
  0xac   : > { %p2172_p2 = pnand %p3048_p11, %p2170_p5  ;;  %p2177_p6 = por %p2176_p13, %p2175_p3 }
  0xae   : > { %p2173_p0 = pneg %p2172_p2  ;;  %p2179_p9 = por %p2178_p8, %p2177_p6 }
  0xb0   : > { %p2180_p12 = pnand %p2179_p9, %p2173_p0 }
  0xb2   : > { %2183 = shalt.err (!%p2180_p12)
}
  0xb3   : > { %s2184_s7 = scalar_lea.vmem %s3041_s1, 256  ;;  %s2664_s11 = smov [#allocation9]  }
  0xb4   : > { %p2185_p1 = scmp.ne.s32.totalorder %s3041_s1, %s2184_s7  ;;  %s2189_s4 = sshll.u32 %s2664_s11, 4  ;;  %s2190_s4 = int_to_ptr.vmem [resolvable:$false] %s2189_s4 }
  0xb5   : > { %s2191_s23 = scalar_lea.vmem %s2190_s4, 512  ;;  %p2192_p4 = scmp.lt.s32.totalorder %s3041_s1, %s2190_s4 }
  0xb6   : > { %p2187_p5 = pnand %p2185_p1, %p3048_p11  ;;  %p2193_p10 = scmp.lt.s32.totalorder %s2191_s23, %s2184_s7 }
  0xb8   : > { %p2188_p2 = pneg %p2187_p5  ;;  %p2194_p3 = por %p2193_p10, %p2192_p4 }
  0xba   : > { %p2195_p13 = pnand %p2194_p3, %p2188_p2 }
  0xbc   : > { %2198 = shalt.err (!%p2195_p13)
}
  0xbd   : > { %s3680_s15 = smov 4   ;;  %s3681_s12 = smov 64  }
  0xbe   : > { %s3682_s16 = scalar_lea.sflag [#allocation10], %s2976_s8  ;;  %s3077_s11 = sshll.u32 %s2649_s21, 4 }
  0xbf   : > { %1922 = dma.hbm_to_vmem [thread:$0]  (!%p3678_p7), %s3038_s14, 256, %s3041_s1, %s3682_s16, %s3681_s12, %s3681_s12, %s3680_s15  }
  0xc0   : > { %s595_s7 = scalar_lea.vmem [#allocation12], %s2996_s2  ;;  %s3683_s5 = sld [smem:[#allocation61_spill]] }
  0xc1   : > { %s602_s4 = sshll.u32 %s595_s7, 4  ;;  %s603_s4 = int_to_ptr.vmem [resolvable:$true] %s602_s4 }
  0xc6   : > { %s3084_s25 = scalar_lea.hbm %s3683_s5, %s3077_s11  ;;  %s2204_s16 = scalar_lea.hbm %s3683_s5, 64 }
  0xc7   : > { %s2199_s30 = scalar_lea.hbm %s3084_s25, 16  ;;  %p2205_p6 = scmp.lt.u32.totalorder %s3084_s25, %s3683_s5 }
  0xc8   : > { %p2200_p4 = scmp.ne.s32.totalorder %s3084_s25, %s2199_s30  ;;  %p2206_p8 = scmp.lt.u32.totalorder %s2204_s16, %s2199_s30 }
  0xc9   : > { %p2208_p12 = scmp.lt.u32.totalorder %s2199_s30, %s3084_s25 }
  0xca   : > { %p2202_p10 = pnand %p2200_p4, %p3048_p11  ;;  %p2207_p9 = por %p2206_p8, %p2205_p6 }
  0xcc   : > { %p2203_p0 = pneg %p2202_p10  ;;  %p2209_p1 = por %p2208_p12, %p2207_p9 }
  0xce   : > { %p2210_p5 = pnand %p2209_p1, %p2203_p0 }
  0xd0   : > { %2213 = shalt.err (!%p2210_p5)
}
  0xd1   : > { %s2214_s3 = scalar_lea.vmem %s603_s4, 16  ;;  %s2665_s23 = smov [#allocation12]  }
  0xd2   : > { %p2215_p2 = scmp.ne.s32.totalorder %s603_s4, %s2214_s3  ;;  %s2219_s20 = sshll.u32 %s2665_s23, 4  ;;  %s2220_s20 = int_to_ptr.vmem [resolvable:$false] %s2219_s20 }
  0xd3   : > { %s2221_s1 = scalar_lea.vmem %s2220_s20, 32  ;;  %p2222_p4 = scmp.lt.s32.totalorder %s603_s4, %s2220_s20 }
  0xd4   : > { %p2217_p3 = pnand %p2215_p2, %p3048_p11  ;;  %p2223_p10 = scmp.lt.s32.totalorder %s2221_s1, %s2214_s3 }
  0xd6   : > { %p2218_p13 = pneg %p2217_p3  ;;  %p2224_p7 = por %p2223_p10, %p2222_p4 }
  0xd8   : > { %p2225_p6 = pnand %p2224_p7, %p2218_p13 }
  0xda   : > { %2228 = shalt.err (!%p2225_p6)
}
  0xdb   : > { %p3684_p8 = scmp.ne.s32.totalorder %s3674_s18, 0  ;;  %s3685_s30 = scalar_lea.sflag [#allocation13], %s2976_s8 }
  0xdc   : > { %s1749_s24 = sshll.u32 %s2653_s22, 4  ;;  %s646_s14 = scalar_lea.vmem [#allocation18], %s2951_s29 }
  0xdd   : > { %1928 = dma.hbm_to_vmem [thread:$0]  (!%p3684_p8), %s3084_s25, 16, %s603_s4, %s3685_s30  }
  0xde   : > { %s653_s16 = sshll.u32 %s646_s14, 4  ;;  %s3686_s9 = sld [smem:[#allocation65_spill]]  ;;  %s654_s16 = int_to_ptr.vmem [resolvable:$true] %s653_s16 }
  0xdf   : > { %s644_s3 = scalar_lea.sflag [#allocation19], %s2976_s8  ;;  %p3687_p0 = scmp.ne.s32.totalorder %s3675_s6, 0 }
  0xe4   : > { %s3111_s20 = scalar_lea.hbm %s3686_s9, %s1749_s24  ;;  %s2234_s30 = scalar_lea.hbm %s3686_s9, 32 }
  0xe5   : > { %s2229_s1 = scalar_lea.hbm %s3111_s20, 16  ;;  %p2235_p1 = scmp.lt.u32.totalorder %s3111_s20, %s3686_s9 }
  0xe6   : > { %p2230_p7 = scmp.ne.s32.totalorder %s3111_s20, %s2229_s1  ;;  %p2236_p5 = scmp.lt.u32.totalorder %s2234_s30, %s2229_s1 }
  0xe7   : > { %p2238_p3 = scmp.lt.u32.totalorder %s2229_s1, %s3111_s20 }
  0xe8   : > { %p2232_p9 = pnand %p2230_p7, %p3687_p0  ;;  %p2237_p2 = por %p2236_p5, %p2235_p1 }
  0xea   : > { %p2233_p12 = pneg %p2232_p9  ;;  %p2239_p13 = por %p2238_p3, %p2237_p2 }
  0xec   : > { %p2240_p4 = pnand %p2239_p13, %p2233_p12 }
  0xee   : > { %2243 = shalt.err (!%p2240_p4)
}
  0xef   : > { %s2244_s24 = scalar_lea.vmem %s654_s16, 16  ;;  %s2666_s7 = smov [#allocation18]  }
  0xf0   : > { %p2245_p10 = scmp.ne.s32.totalorder %s654_s16, %s2244_s24  ;;  %s2249_s23 = sshll.u32 %s2666_s7, 4  ;;  %s2250_s23 = int_to_ptr.vmem [resolvable:$false] %s2249_s23 }
  0xf1   : > { %s2251_s25 = scalar_lea.vmem %s2250_s23, 32  ;;  %p2252_p9 = scmp.lt.s32.totalorder %s654_s16, %s2250_s23 }
  0xf2   : > { %p2247_p6 = pnand %p2245_p10, %p3687_p0  ;;  %p2253_p8 = scmp.lt.s32.totalorder %s2251_s25, %s2244_s24 }
  0xf4   : > { %p2248_p7 = pneg %p2247_p6  ;;  %p2254_p11 = por %p2253_p8, %p2252_p9 }
  0xf6   : > { %p2255_p1 = pnand %p2254_p11, %p2248_p7 }
  0xf8   : > { %2258 = shalt.err (!%p2255_p1)
}
  0xf9   : > { %p3688_p5 = scmp.ne.s32.totalorder %s3672_s13, 0  ;;  %s2667_s5 = smov [#allocation23]  }
  0xfa   : > { %s471_s1 = sshll.u32 %s2667_s5, 4  ;;  %s2668_s4 = smov [#allocation24]   ;;  %s472_s1 = int_to_ptr.vmem [resolvable:$true] %s471_s1 }
  0xfb   : > { %1937 = dma.hbm_to_vmem [thread:$0]  (!%p3688_p5), %s3111_s20, 16, %s654_s16, %s644_s3  }
  0xfc   : > { %s482_s30 = sshll.u32 %s2668_s4, 4  ;;  %s3689_s24 = sld [smem:[#allocation68_spill]]  ;;  %s3133_s30 = int_to_ptr.vmem [resolvable:$true] %s482_s30 }
  0xfd   : > { %p3690_p8 = scmp.ne.s32.totalorder %s3652_s26, 0 }
 0x102   : > { %s2259_s23 = scalar_lea.hbm %s3689_s24, 16 }
 0x103   : > { %p2260_p11 = scmp.ne.s32.totalorder %s3689_s24, %s2259_s23  ;;  %p2266_p3 = scmp.lt.u32.totalorder %s2259_s23, %s3689_s24 }
 0x105   : > { %p2262_p12 = pnand %p2260_p11, %p3690_p8 }
 0x107   : > { %p2263_p2 = pneg %p2262_p12 }
 0x109   : > { %p2268_p13 = pnand %p2266_p3, %p2263_p2 }
 0x10b   : > { %2271 = shalt.err (!%p2268_p13)
}
 0x10c   : > { %s2272_s20 = scalar_lea.vmem %s472_s1, 16  ;;  %s2279_s5 = scalar_lea.vmem %s472_s1, 32 }
 0x10d   : > { %p2273_p4 = scmp.ne.s32.totalorder %s472_s1, %s2272_s20  ;;  %p2280_p7 = scmp.lt.s32.totalorder %s472_s1, %s472_s1 }
 0x10e   : > { %p2281_p9 = scmp.lt.s32.totalorder %s2279_s5, %s2272_s20 }
 0x10f   : > { %p2275_p10 = pnand %p2273_p4, %p3690_p8 }
 0x110   : > { %p2282_p1 = por %p2281_p9, %p2280_p7 }
 0x111   : > { %p2276_p6 = pneg %p2275_p10 }
 0x113   : > { %p2283_p5 = pnand %p2282_p1, %p2276_p6 }
 0x115   : > { %2286 = shalt.err (!%p2283_p5)
}
 0x116   : > { %p3691_p11 = scmp.ne.s32.totalorder %s3650_s28, 0  ;;  %s3692_s7 = sld [smem:[#allocation69_spill]] }
 0x118   : > { %1906 = dma.hbm_to_vmem [thread:$0]  (!%p3691_p11), %s3689_s24, 16, %s472_s1, [#allocation22]  }
 0x11c   : > { %s2287_s23 = scalar_lea.hbm %s3692_s7, 16 }
 0x11d   : > { %p2288_p12 = scmp.ne.s32.totalorder %s3692_s7, %s2287_s23  ;;  %p2294_p5 = scmp.lt.u32.totalorder %s2287_s23, %s3692_s7 }
 0x11f   : > { %p2290_p2 = pnand %p2288_p12, %p3690_p8 }
 0x121   : > { %p2291_p3 = pneg %p2290_p2 }
 0x123   : > { %p2296_p13 = pnand %p2294_p5, %p2291_p3 }
 0x125   : > { %2299 = shalt.err (!%p2296_p13)
}
 0x126   : > { %s2300_s1 = scalar_lea.vmem %s3133_s30, 16  ;;  %s2307_s9 = scalar_lea.vmem %s3133_s30, 32 }
 0x127   : > { %p2301_p4 = scmp.ne.s32.totalorder %s3133_s30, %s2300_s1  ;;  %p2308_p7 = scmp.lt.s32.totalorder %s3133_s30, %s3133_s30 }
 0x128   : > { %p2309_p9 = scmp.lt.s32.totalorder %s2307_s9, %s2300_s1 }
 0x129   : > { %p2303_p10 = pnand %p2301_p4, %p3690_p8 }
 0x12a   : > { %p2310_p1 = por %p2309_p9, %p2308_p7 }
 0x12b   : > { %p2304_p6 = pneg %p2303_p10 }
 0x12d   : > { %p2311_p12 = pnand %p2310_p1, %p2304_p6 }
 0x12f   : > { %2314 = shalt.err (!%p2311_p12)
}
 0x130   : > { %1909 = dma.hbm_to_vmem [thread:$0]  (!%p3691_p11), %s3692_s7, 16, %s3133_s30, [#allocation25]  }
 0x131   : > { %s3693_s26 = sshll.u32 %s2653_s22, 7  ;;  %s3694_s25 = sld [smem:[#allocation56_spill]] }
 0x132   : > { %s3695_s20 = sshll.u32 %s2951_s29, 3  ;;  %s494_s1 = scalar_lea.sflag [#allocation4], %s2951_s29 }
 0x133   : > { %s497_s28 = scalar_lea.vmem [#allocation3], %s3695_s20 }
 0x134   : > { %s504_s5 = sshll.u32 %s497_s28, 4  ;;  %s505_s5 = int_to_ptr.vmem [resolvable:$true] %s504_s5 }
 0x137   : > { %s3182_s16 = scalar_lea.hbm %s3694_s25, %s3693_s26  ;;  %s2320_s10 = scalar_lea.hbm %s3694_s25, 256 }
 0x138   : > { %s2315_s9 = scalar_lea.hbm %s3182_s16, 128  ;;  %p2321_p3 = scmp.lt.u32.totalorder %s3182_s16, %s3694_s25 }
 0x139   : > { %p2316_p8 = scmp.ne.s32.totalorder %s3182_s16, %s2315_s9  ;;  %p2322_p5 = scmp.lt.u32.totalorder %s2320_s10, %s2315_s9 }
 0x13a   : > { %p2324_p4 = scmp.lt.u32.totalorder %s2315_s9, %s3182_s16 }
 0x13b   : > { %p2318_p2 = pnand %p2316_p8, %p3687_p0  ;;  %p2323_p13 = por %p2322_p5, %p2321_p3 }
 0x13d   : > { %p2319_p11 = pneg %p2318_p2  ;;  %p2325_p10 = por %p2324_p4, %p2323_p13 }
 0x13f   : > { %p2326_p6 = pnand %p2325_p10, %p2319_p11 }
 0x141   : > { %2329 = shalt.err (!%p2326_p6)
}
 0x142   : > { %s2330_s29 = scalar_lea.vmem %s505_s5, 128  ;;  %s2669_s23 = smov [#allocation3]  }
 0x143   : > { %p2331_p7 = scmp.ne.s32.totalorder %s505_s5, %s2330_s29  ;;  %s2335_s20 = sshll.u32 %s2669_s23, 4  ;;  %s2336_s20 = int_to_ptr.vmem [resolvable:$false] %s2335_s20 }
 0x144   : > { %s2337_s28 = scalar_lea.vmem %s2336_s20, 256  ;;  %p2338_p12 = scmp.lt.s32.totalorder %s505_s5, %s2336_s20 }
 0x145   : > { %p2333_p9 = pnand %p2331_p7, %p3687_p0  ;;  %p2339_p8 = scmp.lt.s32.totalorder %s2337_s28, %s2330_s29 }
 0x147   : > { %p2334_p1 = pneg %p2333_p9  ;;  %p2340_p2 = por %p2339_p8, %p2338_p12 }
 0x149   : > { %p2341_p3 = pnand %p2340_p2, %p2334_p1 }
 0x14b   : > { %2344 = shalt.err (!%p2341_p3)
}
 0x14c   : > { %p3696_p5 = scmp.ne.s32.totalorder %s3672_s13, 0  ;;  %s3697_s30 = sld [smem:[#allocation58_spill]] }
 0x14d   : > { %s533_s26 = scalar_lea.vmem [#allocation8], %s3029_s0  ;;  %p3699_p11 = scmp.ne.s32.totalorder %s3679_s27, 0 }
 0x14e   : > { %1913 = dma.hbm_to_vmem [thread:$0]  (!%p3696_p5), %s3182_s16, 128, %s505_s5, %s494_s1  }
 0x14f   : > { %s540_s14 = sshll.u32 %s533_s26, 4  ;;  %s3211_s14 = int_to_ptr.vmem [resolvable:$true] %s540_s14 }
 0x152   : > { %s3698_s4 = smov %s3697_s30  ;;  %s3208_s10 = scalar_lea.hbm %s3697_s30, %s3032_s19 }
 0x153   : > { %s2345_s29 = scalar_lea.hbm %s3208_s10, 256  ;;  %s2350_s5 = scalar_lea.hbm %s3698_s4, 1024 }
 0x154   : > { %p2346_p0 = scmp.ne.s32.totalorder %s3208_s10, %s2345_s29  ;;  %p2351_p10 = scmp.lt.u32.totalorder %s3208_s10, %s3698_s4 }
 0x155   : > { %p2352_p6 = scmp.lt.u32.totalorder %s2350_s5, %s2345_s29  ;;  %p2354_p9 = scmp.lt.u32.totalorder %s2345_s29, %s3208_s10 }
 0x156   : > { %p2348_p13 = pnand %p2346_p0, %p3699_p11 }
 0x157   : > { %p2353_p7 = por %p2352_p6, %p2351_p10 }
 0x158   : > { %p2349_p4 = pneg %p2348_p13 }
 0x159   : > { %p2355_p1 = por %p2354_p9, %p2353_p7 }
 0x15b   : > { %p2356_p12 = pnand %p2355_p1, %p2349_p4 }
 0x15d   : > { %2359 = shalt.err (!%p2356_p12)
}
 0x15e   : > { %s2360_s20 = scalar_lea.vmem %s3211_s14, 256  ;;  %s2670_s28 = smov [#allocation8]  }
 0x15f   : > { %p2361_p8 = scmp.ne.s32.totalorder %s3211_s14, %s2360_s20  ;;  %s2365_s9 = sshll.u32 %s2670_s28, 4  ;;  %s2366_s9 = int_to_ptr.vmem [resolvable:$false] %s2365_s9 }
 0x160   : > { %s2367_s6 = scalar_lea.vmem %s2366_s9, 512  ;;  %p2368_p5 = scmp.lt.s32.totalorder %s3211_s14, %s2366_s9 }
 0x161   : > { %p2363_p2 = pnand %p2361_p8, %p3699_p11  ;;  %p2369_p0 = scmp.lt.s32.totalorder %s2367_s6, %s2360_s20 }
 0x163   : > { %p2364_p3 = pneg %p2363_p2  ;;  %p2370_p13 = por %p2369_p0, %p2368_p5 }
 0x165   : > { %p2371_p10 = pnand %p2370_p13, %p2364_p3 }
 0x167   : > { %2374 = shalt.err (!%p2371_p10)
}
 0x168   : > { %p3700_p4 = scmp.ne.s32.totalorder %s3674_s18, 0  ;;  %s3701_s30 = scalar_lea.sflag [#allocation7], %s2976_s8 }
 0x169   : > { %s3702_s13 = sld [smem:[#allocation60_spill]]  ;;  %s575_s5 = scalar_lea.vmem [#allocation11], %s3029_s0 }
 0x16a   : > { %1919 = dma.hbm_to_vmem [thread:$0]  (!%p3700_p4), %s3208_s10, 256, %s3211_s14, %s3701_s30, %s3681_s12, %s3681_s12, %s3680_s15  }
 0x16b   : > { %s582_s1 = sshll.u32 %s575_s5, 4  ;;  %s3246_s1 = int_to_ptr.vmem [resolvable:$true] %s582_s1 }
 0x16f   : > { %s3243_s16 = scalar_lea.hbm %s3702_s13, %s3032_s19  ;;  %s2380_s14 = scalar_lea.hbm %s3702_s13, 1024 }
 0x170   : > { %s2375_s23 = scalar_lea.hbm %s3243_s16, 256  ;;  %p2381_p1 = scmp.lt.u32.totalorder %s3243_s16, %s3702_s13 }
 0x171   : > { %p2376_p6 = scmp.ne.s32.totalorder %s3243_s16, %s2375_s23  ;;  %p2382_p12 = scmp.lt.u32.totalorder %s2380_s14, %s2375_s23 }
 0x172   : > { %p2384_p2 = scmp.lt.u32.totalorder %s2375_s23, %s3243_s16 }
 0x173   : > { %p2378_p7 = pnand %p2376_p6, %p3699_p11  ;;  %p2383_p8 = por %p2382_p12, %p2381_p1 }
 0x175   : > { %p2379_p9 = pneg %p2378_p7  ;;  %p2385_p3 = por %p2384_p2, %p2383_p8 }
 0x177   : > { %p2386_p5 = pnand %p2385_p3, %p2379_p9 }
 0x179   : > { %2389 = shalt.err (!%p2386_p5)
}
 0x17a   : > { %s2390_s0 = scalar_lea.vmem %s3246_s1, 256  ;;  %s2671_s9 = smov [#allocation11]  }
 0x17b   : > { %p2391_p0 = scmp.ne.s32.totalorder %s3246_s1, %s2390_s0  ;;  %s2395_s6 = sshll.u32 %s2671_s9, 4  ;;  %s2396_s6 = int_to_ptr.vmem [resolvable:$false] %s2395_s6 }
 0x17c   : > { %s2397_s30 = scalar_lea.vmem %s2396_s6, 512  ;;  %p2398_p6 = scmp.lt.s32.totalorder %s3246_s1, %s2396_s6 }
 0x17d   : > { %p2393_p13 = pnand %p2391_p0, %p3699_p11  ;;  %p2399_p7 = scmp.lt.s32.totalorder %s2397_s30, %s2390_s0 }
 0x17f   : > { %p2394_p10 = pneg %p2393_p13  ;;  %p2400_p1 = por %p2399_p7, %p2398_p6 }
 0x181   : > { %p2401_p12 = pnand %p2400_p1, %p2394_p10 }
 0x183   : > { %2404 = shalt.err (!%p2401_p12)
}
 0x184   : > { %s3703_s26 = scalar_lea.sflag [#allocation10], %s2976_s8  ;;  %s3704_s23 = sld [smem:[#allocation62_spill]] }
 0x185   : > { %1925 = dma.hbm_to_vmem [thread:$0]  (!%p3700_p4), %s3243_s16, 256, %s3246_s1, %s3703_s26, %s3681_s12, %s3681_s12, %s3680_s15  }
 0x186   : > { %s612_s14 = scalar_lea.vmem [#allocation14], %s2996_s2 }
 0x187   : > { %s619_s28 = sshll.u32 %s612_s14, 4  ;;  %s620_s28 = int_to_ptr.vmem [resolvable:$true] %s619_s28 }
 0x18a   : > { %s3705_s10 = smov %s3704_s23  ;;  %s3278_s20 = scalar_lea.hbm %s3704_s23, %s3077_s11 }
 0x18b   : > { %s2405_s19 = scalar_lea.hbm %s3278_s20, 16  ;;  %s2410_s15 = scalar_lea.hbm %s3705_s10, 64 }
 0x18c   : > { %p2406_p9 = scmp.ne.s32.totalorder %s3278_s20, %s2405_s19  ;;  %p2411_p3 = scmp.lt.u32.totalorder %s3278_s20, %s3705_s10 }
 0x18d   : > { %p2412_p5 = scmp.lt.u32.totalorder %s2410_s15, %s2405_s19  ;;  %p2414_p13 = scmp.lt.u32.totalorder %s2405_s19, %s3278_s20 }
 0x18e   : > { %p2408_p8 = pnand %p2406_p9, %p3699_p11 }
 0x18f   : > { %p2413_p0 = por %p2412_p5, %p2411_p3 }
 0x190   : > { %p2409_p2 = pneg %p2408_p8 }
 0x191   : > { %p2415_p10 = por %p2414_p13, %p2413_p0 }
 0x193   : > { %p2416_p6 = pnand %p2415_p10, %p2409_p2 }
 0x195   : > { %2419 = shalt.err (!%p2416_p6)
}
 0x196   : > { %s2420_s1 = scalar_lea.vmem %s620_s28, 16  ;;  %s2672_s6 = smov [#allocation14]  }
 0x197   : > { %p2421_p7 = scmp.ne.s32.totalorder %s620_s28, %s2420_s1  ;;  %s2425_s30 = sshll.u32 %s2672_s6, 4  ;;  %s2426_s30 = int_to_ptr.vmem [resolvable:$false] %s2425_s30 }
 0x198   : > { %s2427_s26 = scalar_lea.vmem %s2426_s30, 32  ;;  %p2428_p9 = scmp.lt.s32.totalorder %s620_s28, %s2426_s30 }
 0x199   : > { %p2423_p1 = pnand %p2421_p7, %p3699_p11  ;;  %p2429_p8 = scmp.lt.s32.totalorder %s2427_s26, %s2420_s1 }
 0x19b   : > { %p2424_p12 = pneg %p2423_p1  ;;  %p2430_p4 = por %p2429_p8, %p2428_p9 }
 0x19d   : > { %p2431_p3 = pnand %p2430_p4, %p2424_p12 }
 0x19f   : > { %2434 = shalt.err (!%p2431_p3)
}
 0x1a0   : > { %p3706_p5 = scmp.ne.s32.totalorder %s3674_s18, 0  ;;  %s3707_s29 = scalar_lea.sflag [#allocation13], %s2976_s8 }
 0x1a1   : > { %s3708_s14 = sld [smem:[#allocation63_spill]]  ;;  %s629_s0 = scalar_lea.vmem [#allocation15], %s2996_s2 }
 0x1a2   : > { %1931 = dma.hbm_to_vmem [thread:$0]  (!%p3706_p5), %s3278_s20, 16, %s620_s28, %s3707_s29  }
 0x1a3   : > { %s636_s9 = sshll.u32 %s629_s0, 4  ;;  %s1750_s15 = sshll.u32 %s2996_s2, 2  ;;  %s637_s9 = int_to_ptr.vmem [resolvable:$true] %s636_s9 }
 0x1a4   : > { %s627_s12 = scalar_lea.sflag [#allocation16], %s2976_s8 }
 0x1a7   : > { %s3304_s19 = scalar_lea.hbm %s3708_s14, %s3077_s11  ;;  %s2440_s1 = scalar_lea.hbm %s3708_s14, 64 }
 0x1a8   : > { %s2435_s16 = scalar_lea.hbm %s3304_s19, 16  ;;  %p2441_p13 = scmp.lt.u32.totalorder %s3304_s19, %s3708_s14 }
 0x1a9   : > { %p2436_p4 = scmp.ne.s32.totalorder %s3304_s19, %s2435_s16  ;;  %p2442_p10 = scmp.lt.u32.totalorder %s2440_s1, %s2435_s16 }
 0x1aa   : > { %p2444_p7 = scmp.lt.u32.totalorder %s2435_s16, %s3304_s19 }
 0x1ab   : > { %p2438_p2 = pnand %p2436_p4, %p3699_p11  ;;  %p2443_p6 = por %p2442_p10, %p2441_p13 }
 0x1ad   : > { %p2439_p0 = pneg %p2438_p2  ;;  %p2445_p1 = por %p2444_p7, %p2443_p6 }
 0x1af   : > { %p2446_p12 = pnand %p2445_p1, %p2439_p0 }
 0x1b1   : > { %2449 = shalt.err (!%p2446_p12)
}
 0x1b2   : > { %s2450_s30 = scalar_lea.vmem %s637_s9, 16  ;;  %s2673_s26 = smov [#allocation15]  }
 0x1b3   : > { %p2451_p9 = scmp.ne.s32.totalorder %s637_s9, %s2450_s30  ;;  %s2455_s29 = sshll.u32 %s2673_s26, 4  ;;  %s2456_s29 = int_to_ptr.vmem [resolvable:$false] %s2455_s29 }
 0x1b4   : > { %s2457_s5 = scalar_lea.vmem %s2456_s29, 32  ;;  %p2458_p4 = scmp.lt.s32.totalorder %s637_s9, %s2456_s29 }
 0x1b5   : > { %p2453_p8 = pnand %p2451_p9, %p3699_p11  ;;  %p2459_p2 = scmp.lt.s32.totalorder %s2457_s5, %s2450_s30 }
 0x1b7   : > { %p2454_p3 = pneg %p2453_p8  ;;  %p2460_p5 = por %p2459_p2, %p2458_p4 }
 0x1b9   : > { %p2461_p10 = pnand %p2460_p5, %p2454_p3 }
 0x1bb   : > { %2464 = shalt.err (!%p2461_p10)
}
 0x1bc   : > { %p3709_p13 = scmp.ne.s32.totalorder %s3674_s18, 0  ;;  %s1751_s23 = sshll.u32 %s2649_s21, 6 }
 0x1bd   : > { %s664_s0 = scalar_lea.vmem [#allocation20], %s1750_s15  ;;  %s3710_s1 = sld [smem:[#allocation66_spill]] }
 0x1be   : > { %1934 = dma.hbm_to_vmem [thread:$0]  (!%p3709_p13), %s3304_s19, 16, %s637_s9, %s627_s12  }
 0x1bf   : > { %s671_s16 = sshll.u32 %s664_s0, 4  ;;  %s672_s16 = int_to_ptr.vmem [resolvable:$true] %s671_s16 }
 0x1c3   : > { %s669_s11 = scalar_lea.hbm %s3710_s1, %s1751_s23  ;;  %s2470_s29 = scalar_lea.hbm %s3710_s1, 256 }
 0x1c4   : > { %s2465_s6 = scalar_lea.hbm %s669_s11, 64  ;;  %p2471_p7 = scmp.lt.u32.totalorder %s669_s11, %s3710_s1 }
 0x1c5   : > { %p2466_p0 = scmp.ne.s32.totalorder %s669_s11, %s2465_s6  ;;  %p2472_p1 = scmp.lt.u32.totalorder %s2470_s29, %s2465_s6 }
 0x1c6   : > { %p2474_p9 = scmp.lt.u32.totalorder %s2465_s6, %s669_s11 }
 0x1c7   : > { %p2468_p5 = pnand %p2466_p0, %p3699_p11  ;;  %p2473_p12 = por %p2472_p1, %p2471_p7 }
 0x1c9   : > { %p2469_p6 = pneg %p2468_p5  ;;  %p2475_p8 = por %p2474_p9, %p2473_p12 }
 0x1cb   : > { %p2476_p3 = pnand %p2475_p8, %p2469_p6 }
 0x1cd   : > { %2479 = shalt.err (!%p2476_p3)
}
 0x1ce   : > { %s2480_s2 = scalar_lea.vmem %s672_s16, 64  ;;  %s2674_s9 = smov [#allocation20]  }
 0x1cf   : > { %p2481_p4 = scmp.ne.s32.totalorder %s672_s16, %s2480_s2  ;;  %s2485_s15 = sshll.u32 %s2674_s9, 4  ;;  %s2486_s15 = int_to_ptr.vmem [resolvable:$false] %s2485_s15 }
 0x1d0   : > { %s2487_s12 = scalar_lea.vmem %s2486_s15, 128  ;;  %p2488_p0 = scmp.lt.s32.totalorder %s672_s16, %s2486_s15 }
 0x1d1   : > { %p2483_p2 = pnand %p2481_p4, %p3699_p11  ;;  %p2489_p5 = scmp.lt.s32.totalorder %s2487_s12, %s2480_s2 }
 0x1d3   : > { %p2484_p10 = pneg %p2483_p2  ;;  %p2490_p13 = por %p2489_p5, %p2488_p0 }
 0x1d5   : > { %p2491_p1 = pnand %p2490_p13, %p2484_p10 }
 0x1d7   : > { %2494 = shalt.err (!%p2491_p1)
}
 0x1d8   : > { %p3711_p7 = scmp.ne.s32.totalorder %s3674_s18, 0  ;;  %s3712_s23 = sld [smem:[#allocation47_spill]] }
 0x1da   : > { %1940 = dma.hbm_to_vmem [thread:$0]  (!%p3711_p7), %s669_s11, 64, %s672_s16, %s644_s3  }
 0x1de   : > { %p3713_p6 = scmp.ne.s32.totalorder %s3712_s23, 0 }
 0x1df   : > { %s3714_s27 = sld [smem:[#allocation49_spill]] (!%p3713_p6)  ;;  %s3349_s0 = sand.u32 (!%p3713_p6), 1, %s2633_s17  }
 0x1e0   : > { %680 = sbr.rel (%p3713_p6) target bundleno = 2236 (0x8bc), region = 76  ;;  %s3352_s20 = sshll.u32 (!%p3713_p6), %s3349_s0, 3 }
 0x1e1   : > { %s683_s28 = scalar_lea.sflag (!%p3713_p6), [#allocation4], %s3349_s0  ;;  %s686_s6 = scalar_lea.vmem (!%p3713_p6), [#allocation3], %s3352_s20 }
 0x1e5   : > { %p3715_p11 = scmp.ne.s32.totalorder (!%p3713_p6), %s3714_s27, 0 }
 0x1e7   : > { %2568 = dma.done.wait (%p3715_p11), %s683_s28, 128  }
 0x1e8   : > { %2570 = vsyncadd (%p3715_p11), %s683_s28, 4294967168  ;;  %s3716_s8 = sld [smem:[#allocation46_spill]]  ;;  %s695_s16 = scalar_lea.vmem [#allocation6], %s3352_s20 }
 0x1ee   : > { %s691_s18 = sand.u32 1, %s3716_s8  }
 0x1ef   : > { %s692_s3 = scalar_lea.sflag [#allocation7], %s691_s18 }
 0x1f0   : > { %2572 = dma.done.wait (%p3715_p11), %s692_s3, 128  }
 0x1f1   : > { %2574 = vsyncadd (%p3715_p11), %s692_s3, 4294967168  ;;  %s3717_s11 = sld [smem:[#allocation39_spill]]  ;;  %s3718_s30 = sld [smem:[#allocation53_spill]] }
 0x1f7   : > { %s3367_s26 = sand.u32 1, %s3717_s11   ;;  %p3719_p13 = scmp.ne.s32.totalorder %s3718_s30, 0 }
 0x1f8   : > { %s3370_s29 = sshll.u32 %s3367_s26, 4 }
 0x1f9   : > { %s704_s5 = scalar_lea.vmem [#allocation8], %s3370_s29 }
 0x1fa   : > { %2576 = dma.done.wait (%p3719_p13), %s692_s3, 256  }
 0x1fb   : > { %2578 = vsyncadd (%p3719_p13), %s692_s3, 4294967040  ;;  %s710_s19 = scalar_lea.sflag [#allocation10], %s691_s18  ;;  %s713_s2 = scalar_lea.vmem [#allocation9], %s3370_s29 }
 0x1fc   : > { %2580 = dma.done.wait (%p3719_p13), %s710_s19, 512  }
 0x1fd   : > { %2582 = vsyncadd (%p3719_p13), %s710_s19, 4294966784  ;;  %s722_s9 = scalar_lea.vmem [#allocation11], %s3370_s29  ;;  %s728_s15 = scalar_lea.sflag [#allocation13], %s691_s18 }
 0x1fe   : > { %s730_s12 = scalar_lea.vmem [#allocation12], %s3367_s26 }
 0x1ff   : > { %2584 = dma.done.wait (%p3719_p13), %s728_s15, 32  }
 0x200   : > { %2586 = vsyncadd (%p3719_p13), %s728_s15, 4294967264  ;;  %s738_s23 = scalar_lea.vmem [#allocation14], %s3367_s26  ;;  %s744_s28 = scalar_lea.sflag [#allocation16], %s691_s18 }
 0x201   : > { %2588 = dma.done.wait (%p3719_p13), %s744_s28, 16  }
 0x202   : > { %2590 = vsyncadd (%p3719_p13), %s744_s28, 4294967280  ;;  %p3720_p12 = scmp.eq.s32.totalorder %s3716_s8, 0 }
 0x204   : > { %2592 = dma.done.wait (%p3720_p12), [#allocation16], 128   ;;  %p3721_p9 = pmov %p3720_p12 }
 0x205   : > { %s756_s11 = scalar_lea.sflag [#allocation19], %s691_s18  ;;  %s758_s19 = scalar_lea.vmem [#allocation18], %s3349_s0 }
 0x206   : > { %2594 = vsyncadd (%p3721_p9), [#allocation16], 4294967168 }
 0x207   : > { %2596 = dma.done.wait (%p3715_p11), %s756_s11, 16  }
 0x208   : > { %2598 = vsyncadd (%p3715_p11), %s756_s11, 4294967280  ;;  %s1759_s15 = sshll.u32 %s3367_s26, 2 }
 0x209   : > { %s3404_s3 = scalar_lea.vmem [#allocation20], %s1759_s15 }
 0x20a   : > { %2600 = dma.done.wait (%p3719_p13), %s756_s11, 64  }
 0x20b   : > { %2602 = vsyncadd (%p3719_p13), %s756_s11, 4294967232  ;;  %p3722_p8 = pmov %p3721_p9 }
 0x20d   : > { %2604 = dma.done.wait (%p3722_p8), [#allocation22], 32   ;;  %p3723_p3 = pmov %p3722_p8 }
 0x20f   : > { %2606 = vsyncadd (%p3723_p3), [#allocation22], 4294967264  ;;  %p3724_p4 = pmov %p3723_p3 }
 0x210   : > { %p3725_p2 = pmov %p3723_p3 }
 0x211   : > { %2608 = dma.done.wait (%p3724_p4), [#allocation25], 16  }
 0x212   : > { %2610 = vsyncadd (%p3725_p2), [#allocation25], 4294967280  ;;  %s864_s27 = scalar_lea.vmem [#allocation26], %s3352_s20  ;;  %s3726_s18 = sld [smem:[#allocation43_spill]] }
 0x218   : > { %p1764_p10 = scmp.ne.s32.totalorder %s3726_s18, 0 }
 0x219   : > { %vm870_vm0 = vcmask (!%p1764_p10), 261120   ;;  %v2675_v0 = vmov (!%p1764_p10), 0.0  }
 0x21a   : > { %869 = sbr.rel (%p1764_p10) target bundleno = 545 (0x221), region = 136  ;;  %871 = vst.msk [vmem:[#allocation2] sm:$0xff] (!%p1764_p10), %vm870_vm0, %v2675_v0 }
 0x221 PF: > { %v2070_v1 = vld [vmem:[%s704_s5] sm:$0xff]   ;;  %v2676_v2 = vmov 0.0   ;;  %v2072_v4 = vld [vmem:[%s704_s5 + $0x8] sm:$0xff]   ;;  %vm2677_vm1 = vmmov 0   ;;  %vm899_vm2 = vcmask 261120   ;;  %vm1083_vm3 = vcmask 64512  }
 0x222   : > { %1811 = vmatprep.subr.bf16.mxu0 %v2676_v2  ;;  %1819 = vmatprep.subr.bf16.mxu1 %v2676_v2  ;;  %v2071_v3 = vld [vmem:[%s713_s2] sm:$0xff]   ;;  %v2073_v5 = vld [vmem:[%s713_s2 + $0x8] sm:$0xff]   ;;  %v2678_v14 = vmov 2   ;;  %v2679_v15 = vmov 0   ;;  %vm1269_vm4 = vcmask 1043456   ;;  %v2680_v44 = vmov 3  }
 0x223   : > { %1812 = vmatpush3.bf16.msra.mxu0 %v2070_v1  ;;  %1815 = vmatprep.mubr.msk.bf16.mxu0 %vm2677_vm1, %v2676_v2  ;;  %v3438_v6 = vld [vmem:[%s686_s6] sm:$0xff]  ;;  %v874_v7 = vld [vmem:[%s695_s16] sm:$0xff]  ;;  %s3727_s6 = scalar_lea.vmem [#allocation15], %s3367_s26  ;;  %v2681_v45 = vmov 1   ;;  %v2682_v50 = vmov 4   ;;  %v2683_v51 = vmov 5   ;;  %v1130_v55 = vlaneseq }
 0x224   : > { %1820 = vmatpush3.bf16.msra.mxu1 %v2071_v3  ;;  %1813 = vmatprep.subr.bf16.mxu0 %v2676_v2  ;;  %v873_v8 = vpack.c.bf16 %v3438_v6, %v3438_v6  ;;  %v875_v9 = vpack.c.bf16 %v874_v7, %v874_v7  ;;  %v2074_v10 = vld [vmem:[%s722_s9] sm:$0xff]   ;;  %v2075_v12 = vld [vmem:[%s722_s9 + $0x8] sm:$0xff]   ;;  %v2684_v52 = vmov 6   ;;  %v2685_v53 = vmov 8   ;;  %s3728_s8 = sld [smem:[#allocation43_spill]] }
 0x225   : > { %1821 = vmatprep.subr.bf16.mxu1 %v2676_v2  ;;  %1823 = vmatprep.mubr.msk.bf16.mxu1 %vm2677_vm1, %v2676_v2  ;;  %v2076_v11 = vld [vmem:[#allocation17] sm:$0x1f]   ;;  %v1765_v16 = vld [vmem:[%s730_s12] ss:$0 sm:$0xff]  ;;  %v2686_v54 = vmov 7   ;;  %v1131_v56 = vshrl.u32 %v1130_v55, 7 }
 0x226   : > { %v1088_v13 = vsel %vm1083_vm3, %v2076_v11, 0  ;;  %2063 = vset.pattern.permute.xlu1 %v2678_v14  ;;  %2061 = vset.pattern.permute.xlu0 %v2679_v15  ;;  %v1769_v17 = vld [vmem:[%s738_s23] ss:$0 sm:$0xff]  ;;  %v1133_v57 = vand.u32 127, %v1130_v55 }
 0x227   : > { %1814 = vmatpush3.bf16.msra.mxu0 %v2072_v4  ;;  %v1773_v32 = vld [vmem:[%s3727_s6] ss:$0 sm:$0xff] }
 0x228   : > { %1822 = vmatpush3.bf16.msra.mxu1 %v2073_v5  ;;  %1827 = vmatprep.subr.bf16.mxu0 %v2676_v2  ;;  %v1134_v58 = vsub.s32 %v1133_v57, %v1131_v56 }
 0x229   : > { %1835 = vmatprep.subr.bf16.mxu1 %v2676_v2 }
 0x22a   : > { %1816 = vmatmul.mubr.msk.bf16.vlgmr.msra.gmra.mrb[0].mxu0 %vm899_vm2, %v873_v8  ;;  %vm1135_vm5 = vcmp.gt.s32.totalorder %v1134_v58, 4294967292  ;;  %p1783_p0 = scmp.ne.s32.totalorder %s3728_s8, 3 }
 0x22b   : > { %1824 = vmatmul.mubr.msk.bf16.vlgmr.msra.gmra.mrb[0].mxu1 %vm899_vm2, %v875_v9  ;;  %1828 = vmatpush3.bf16.msra.mxu0 %v2074_v10  ;;  %v1136_v59 = vsel %vm1135_vm5, %v1134_v58, 4294967292 }
 0x22c   : > { %1829 = vmatprep.subr.bf16.mxu0 %v2676_v2  ;;  %1831 = vmatprep.mubr.msk.bf16.mxu0 %vm2677_vm1, %v2676_v2  ;;  %vm1137_vm6 = vcmp.lt.s32.totalorder %v1136_v59, 4 }
 0x22d   : > { %1837 = vmatprep.mubr.msk.bf16.mxu1 %vm2677_vm1, %v2676_v2  ;;  %v1138_v60 = vsel %vm1137_vm6, %v1136_v59, 4 }
 0x22e   : > { %v1139_v61 = vadd.s32 4, %v1138_v60 }
 0x22f   : > { %1830 = vmatpush3.bf16.msra.mxu0 %v2075_v12 }
 0x230   : > { %1841 = vmatprep.subr.bf16.mxu0 %v2676_v2  ;;  %vm1140_vm7 = vcmp.eq.s32.totalorder %v1139_v61, 0  ;;  %vm1190_vm8 = vcmp.eq.s32.totalorder %v1139_v61, 1  ;;  %vm1197_vm9 = vcmp.eq.s32.totalorder %v1139_v61, 2  ;;  %vm1204_vm10 = vcmp.eq.s32.totalorder %v1139_v61, 3 }
 0x231   : > { %1836 = vmatpush3.bf16.xpose.msra.mxu1 %v1088_v13  ;;  %vm1211_vm11 = vcmp.eq.s32.totalorder %v1139_v61, 4  ;;  %vm1218_vm12 = vcmp.eq.s32.totalorder %v1139_v61, 5  ;;  %vm1225_vm13 = vcmp.eq.s32.totalorder %v1139_v61, 6  ;;  %vm1232_vm14 = vcmp.eq.s32.totalorder %v1139_v61, 7 }
 0x232   : > { %1832 = vmatmul.mubr.msk.bf16.vlgmr.msra.gmra.mrb[4].mxu0 %vm899_vm2, %v875_v9  ;;  %1847 = vmatprep.subr.bf16.mxu1 %v2676_v2  ;;  %vm1239_vm15 = vcmp.eq.s32.totalorder %v1139_v61, 8 }
 0x233   : > { %1843 = vmatprep.mubr.msk.bf16.mxu0 %vm2677_vm1, %v2676_v2 }
 0x2fd   : > { %v937_v18 = vpop.f32.mrb[0].mxu0 }
 0x2fe   : > { %v938_v19 = vadd.f32 %v1765_v16, %v937_v18  ;;  %v1004_v20 = vpop.f32.mrb[0].mxu1  ;;  %v1817_v21 = vpop.f32.mrb[1].mxu0 }
 0x2ff   : > { %v1005_v22 = vadd.f32 %v1769_v17, %v1004_v20  ;;  %v940_v23 = vpop.f32.mrb[2].mxu0  ;;  %v1825_v24 = vpop.f32.mrb[1].mxu1 }
 0x300   : > { %v943_v25 = vmul.f32 0.35355338, %v938_v19  ;;  %v1818_v26 = vpop.f32.mrb[3].mxu0  ;;  %v1007_v27 = vpop.f32.mrb[2].mxu1 }
 0x301   : > { %v1075_v28 = vpack.c.bf16 %v1005_v22, %v1005_v22  ;;  %v1826_v29 = vpop.f32.mrb[3].mxu1 }
 0x302   : > { %v1074_v30 = vpack.c.bf16 %v943_v25, %v943_v25  ;;  %v1780_v25 = vld [vmem:[%s758_s19] ss:$0 sm:$0xff] }
 0x303   : > { %v1148_v31 = vsel %vm1083_vm3, %v1075_v28, 0 }
 0x304   : > { %1842 = vmatpush3.bf16.xpose.msra.mxu0 %v1148_v31  ;;  %1838 = vmatmul.mubr.msk.bf16.vlgmr.msra.gmra.mrb[4].mxu1 %vm1083_vm3, %v1074_v30 }
 0x305   : > { %1849 = vmatprep.mubr.msk.bf16.mxu1 %vm2677_vm1, %v2676_v2  ;;  %1853 = vmatprep.subr.bf16.mxu0 %v2676_v2  ;;  %v1067_v33 = vpop.f32.mrb[4].mxu0 }
 0x306   : > { %v1068_v34 = vadd.f32 %v1773_v32, %v1067_v33  ;;  %v1833_v35 = vpop.f32.mrb[5].mxu0 }
 0x307   : > { %v1070_v36 = vpop.f32.mrb[6].mxu0 }
 0x308   : > { %v1073_v37 = vpack.c.bf16 %v1068_v34, %v1068_v34  ;;  %v1834_v38 = vpop.f32.mrb[7].mxu0  ;;  %v1315_v34 = vld [vmem:[%s3404_s3] sm:$0xf] }
 0x309   : > { %v1320_v35 = vsel %vm1269_vm4, %v1315_v34, 0 }
 0x30a   : > { %v1271_v39 = vsel %vm1269_vm4, %v1073_v37, 0 }
 0x30b   : > { %1844 = vmatmul.mubr.msk.bf16.vlgmr.msra.gmra.mrb[8].mxu0 %vm1083_vm3, %v1074_v30  ;;  %1848 = vmatpush3.bf16.msra.mxu1 %v1271_v39 }
 0x30c   : > { %1855 = vmatprep.mubr.msk.bf16.mxu0 %vm2677_vm1, %v2676_v2  ;;  %1854 = vmatpush3.bf16.msra.mxu0 %v1320_v35 }
 0x3d7   : > { %v1124_v40 = vpop.f32.mrb[4].mxu1 }
 0x3d8   : > { %1199 = vperm.xlu1 %2063, %v1124_v40   ;;  %1143 = vperm.xlu0 %2061, %v1124_v40   ;;  %v1839_v41 = vpop.f32.mrb[5].mxu1 }
 0x3d9   : > { %v1127_v42 = vpop.f32.mrb[6].mxu1 }
 0x3da   : > { %v1840_v43 = vpop.f32.mrb[7].mxu1 }
 0x3dc   : > { %2064 = vset.pattern.permute.xlu1 %v2680_v44  ;;  %2062 = vset.pattern.permute.xlu0 %v2681_v45  ;;  %v1313_v45 = vld [vmem:[#allocation2] sm:$0xff] }
 0x3dd   : > { %1206 = vperm.xlu1 %2064, %v1124_v40   ;;  %1192 = vperm.xlu0 %2062, %v1124_v40  }
 0x3de   : > { %v1184_v46 = vpop.f32.mrb[8].mxu0 }
 0x3df   : > { %v1845_v47 = vpop.f32.mrb[9].mxu0 }
 0x3e0   : > { %v1187_v48 = vpop.f32.mrb[10].mxu0 }
 0x3e1   : > { %v1846_v49 = vpop.f32.mrb[11].mxu0  ;;  %2065 = vset.pattern.permute.xlu1 %v2682_v50  ;;  %2066 = vset.pattern.permute.xlu0 %v2683_v51 }
 0x3e2   : > { %1213 = vperm.xlu1 %2065, %v1124_v40   ;;  %1220 = vperm.xlu0 %2066, %v1124_v40  }
 0x3e6   : > { %2067 = vset.pattern.permute.xlu1 %v2684_v52  ;;  %2069 = vset.pattern.permute.xlu0 %v2685_v53  ;;  %v1784_v52 = vld [vmem:[#allocation21] ss:$0 sm:$0xff] (!%p1783_p0) }
 0x3e7   : > { %1227 = vperm.xlu1 %2067, %v1124_v40   ;;  %1241 = vperm.xlu0 %2069, %v1124_v40  }
 0x3eb   : > { %2068 = vset.pattern.permute.xlu1 %v2686_v54 }
 0x3ec   : > { %1234 = vperm.xlu1 %2068, %v1124_v40  }
 0x457   : > { %v1200_v62 = vpop.permute.xlu1 %1199  ;;  %v1144_v63 = vpop.permute.xlu0 %1143 }
 0x458   : > { %v1146_v0 = vsel %vm1140_vm7, %v1144_v63, 0.0  ;;  %v1202_v7 = vsel %vm1197_vm9, %v1200_v62, 0.0 }
 0x459   : > { %v1185_v1 = vadd.f32 %v1184_v46, %v1146_v0 }
 0x45c   : > { %v1207_v2 = vpop.permute.xlu1 %1206  ;;  %v1193_v3 = vpop.permute.xlu0 %1192 }
 0x45d   : > { %v1195_v4 = vsel %vm1190_vm8, %v1193_v3, 0.0  ;;  %v1209_v9 = vsel %vm1204_vm10, %v1207_v2, 0.0  ;;  %v1786_v3 = vld [vmem:[#allocation24] ss:$0 sm:$0xff] (!%p1783_p0) }
 0x45e   : > { %v1196_v5 = vadd.f32 %v1195_v4, %v1185_v1  ;;  %v1785_v1 = vld [vmem:[#allocation23] ss:$0 sm:$0xff] (!%p1783_p0) }
 0x460   : > { %v1203_v8 = vadd.f32 %v1202_v7, %v1196_v5 }
 0x461   : > { %v1214_v10 = vpop.permute.xlu1 %1213  ;;  %v1221_v13 = vpop.permute.xlu0 %1220 }
 0x462   : > { %v1210_v11 = vadd.f32 %v1209_v9, %v1203_v8  ;;  %v1216_v12 = vsel %vm1211_vm11, %v1214_v10, 0.0  ;;  %v1223_v15 = vsel %vm1218_vm12, %v1221_v13, 0.0 }
 0x464   : > { %v1217_v14 = vadd.f32 %v1216_v12, %v1210_v11 }
 0x466   : > { %v1228_v16 = vpop.permute.xlu1 %1227  ;;  %v1224_v17 = vadd.f32 %v1223_v15, %v1217_v14  ;;  %v1242_v20 = vpop.permute.xlu0 %1241 }
 0x467   : > { %v1230_v18 = vsel %vm1225_vm13, %v1228_v16, 0.0  ;;  %v1244_v24 = vsel %vm1239_vm15, %v1242_v20, 0.0 }
 0x468   : > { %v1231_v19 = vadd.f32 %v1230_v18, %v1224_v17 }
 0x46b   : > { %v1235_v21 = vpop.permute.xlu1 %1234 }
 0x46c   : > { %v1237_v22 = vsel %vm1232_vm14, %v1235_v21, 0.0 }
 0x46d   : > { %v1238_v23 = vadd.f32 %v1237_v22, %v1231_v19 }
 0x46f   : > { %v1245_v26 = vadd.f32 %v1244_v24, %v1238_v23 }
 0x471   : > { %v1253_v27 = vadd.f32 %v1780_v25, %v1245_v26 }
 0x473   : > { %v1254_v28 = vsel %vm1083_vm3, %v1253_v27, -inf }
 0x474   : > { %1255 = vmax.xlane.f32.xlu1 %v1254_v28 }
 0x501   : > { %v1256_v29 = vpop.xlane.xlu1 %1255 }
 0x502   : > { %v1257_v30 = vsub.f32 %v1253_v27, %v1256_v29 }
 0x504   : > { %v1258_v31 = vmul.f32 1.442695, %v1257_v30 }
 0x506   : > { %2077 = vpow2.f32 %v1258_v31 }
 0x510   : > { %v2078_v32 = vpop.eup %2077 }
 0x511   : > { %v1260_v33 = vsel %vm1083_vm3, %v2078_v32, 0.0 }
 0x512   : > { %1261 = vadd.xlane.f32.xlu0 %v1260_v33 }
 0x59f   : > { %v1262_v36 = vpop.xlane.xlu0 %1261 }
 0x5a0   : > { %2079 = vrcp.f32 %v1262_v36 }
 0x5aa   : > { %v2080_v37 = vpop.eup %2079 }
 0x5ab   : > { %v1264_v38 = vmul.f32 %v2080_v37, %v2078_v32 }
 0x5ad   : > { %v1265_v39 = vpack.c.bf16 %v1264_v38, %v1264_v38 }
 0x5af   : > { %1850 = vmatmul.mubr.msk.bf16.vlgmr.msra.gmra.mrb[8].mxu1 %vm1083_vm3, %v1265_v39 }
 0x682   : > { %v1307_v40 = vpop.f32.mrb[8].mxu1 }
 0x683   : > { %v1314_v41 = vpack.c.bf16 %v1307_v40, %v1307_v40  ;;  %v1851_v42 = vpop.f32.mrb[9].mxu1 }
 0x684   : > { %v1310_v43 = vpop.f32.mrb[10].mxu1 }
 0x685   : > { %v1852_v44 = vpop.f32.mrb[11].mxu1  ;;  %1856 = vmatmul.mubr.msk.bf16.vlgmr.msra.gmra.mrb[12].mxu0 %vm1083_vm3, %v1314_v41 }
 0x755   : > { %1367 = sbr.rel (%p1783_p0) target bundleno = 2209 (0x8a1), region = 140 }
 0x758   : > { %v1356_v46 = vpop.f32.mrb[12].mxu0 }
 0x759   : > { %v1362_v47 = vadd.f32 %v1356_v46, %v1313_v45  ;;  %v1857_v48 = vpop.f32.mrb[13].mxu0 }
 0x75a   : > { %v1359_v49 = vpop.f32.mrb[14].mxu0 }
 0x75b   : > { %1363 = vst.msk [vmem:[#allocation2] sm:$0xff] %vm899_vm2, %v1362_v47  ;;  %v1858_v50 = vpop.f32.mrb[15].mxu0 }
 0x762   : > { %v1368_v51 = vld [vmem:[#allocation2] sm:$0xff] }
 0x763   : > { %v1376_v53 = vadd.f32 %v1784_v52, %v1368_v51 }
 0x765   : > { %v1377_v54 = vadd.f32 %v1376_v53, %v3438_v6 }
 0x767   : > { %v1378_v55 = vsel %vm899_vm2, %v1377_v54, 0.0 }
 0x768   : > { %1379 = vadd.xlane.f32.xlu0 %v1378_v55 }
 0x7f5   : > { %v1380_v56 = vpop.xlane.xlu0 %1379 }
 0x7f6   : > { %v1382_v57 = vmul.f32 0.03125, %v1380_v56 }
 0x7f8   : > { %v1383_v58 = vsub.f32 %v1377_v54, %v1382_v57 }
 0x7fa   : > { %v1384_v59 = vmul.f32 %v1383_v58, %v1383_v58 }
 0x7fc   : > { %v1385_v60 = vsel %vm899_vm2, %v1384_v59, 0.0 }
 0x7fd   : > { %1386 = vadd.xlane.f32.xlu0 %v1385_v60 }
 0x88a   : > { %v1387_v61 = vpop.xlane.xlu0 %1386 }
 0x88b   : > { %v1388_v62 = vmul.f32 0.03125, %v1387_v61 }
 0x88d   : > { %v1389_v63 = vadd.f32 1e-05, %v1388_v62 }
 0x88f   : > { %2081 = vrsqrt.f32 %v1389_v63 }
 0x899   : > { %v2082_v0 = vpop.eup %2081 }
 0x89a   : > { %v1391_v2 = vmul.f32 %v2082_v0, %v1383_v58 }
 0x89c   : > { %v1399_v6 = vmul.f32 %v1785_v1, %v1391_v2 }
 0x89e   : > { %v1407_v4 = vadd.f32 %v1786_v3, %v1399_v6 }
 0x8a0   : > { %1408 = vst.msk [vmem:[%s864_s27] sm:$0xff] %vm899_vm2, %v1407_v4 }
 0x8a1 PF: > { %s3729_s16 = sld [smem:[#allocation44_spill]]  ;;  %s3730_s30 = sld [smem:[#allocation54_spill]] }
 0x8a2   : > { %s3731_s2 = sld [smem:[#allocation70_spill]]  ;;  %s1423_s12 = sshll.u32 %s864_s27, 4  ;;  %s1424_s12 = int_to_ptr.vmem [resolvable:$true] %s1423_s12 }
 0x8a3   : > { %s1410_s23 = scalar_lea.sflag [#allocation5], %s3349_s0  ;;  %s2495_s28 = scalar_lea.vmem %s1424_s12, 128 }
 0x8a4   : > { %p2496_p5 = scmp.ne.s32.totalorder %s1424_s12, %s2495_s28  ;;  %s2687_s3 = smov [#allocation26]  }
 0x8a5   : > { %s2499_s11 = sshll.u32 %s2687_s3, 4  ;;  %s2500_s11 = int_to_ptr.vmem [resolvable:$false] %s2499_s11 }
 0x8a6   : > { %s2501_s19 = scalar_lea.vmem %s2500_s11, 256  ;;  %p2502_p11 = scmp.lt.s32.totalorder %s1424_s12, %s2500_s11 }
 0x8a7   : > { %s1788_s26 = sshll.u32 %s3729_s16, 7  ;;  %p3732_p1 = scmp.ne.s32.totalorder %s3730_s30, 0 }
 0x8a8   : > { %s3498_s9 = scalar_lea.hbm %s3731_s2, %s1788_s26  ;;  %p2503_p13 = scmp.lt.s32.totalorder %s2501_s19, %s2495_s28 }
 0x8a9   : > { %p2497_p7 = pnand %p2496_p5, %p3732_p1 }
 0x8aa   : > { %p2504_p12 = por %p2503_p13, %p2502_p11 }
 0x8ab   : > { %p2498_p6 = pneg %p2497_p7 }
 0x8ad   : > { %p2505_p9 = pnand %p2504_p12, %p2498_p6 }
 0x8af   : > { %2508 = shalt.err (!%p2505_p9)
}
 0x8b0   : > { %s2509_s0 = scalar_lea.hbm %s3498_s9, 128  ;;  %s2513_s27 = scalar_lea.hbm %s3731_s2, 256 }
 0x8b1   : > { %p2510_p8 = scmp.ne.s32.totalorder %s3498_s9, %s2509_s0  ;;  %p2514_p2 = scmp.lt.u32.totalorder %s3498_s9, %s3731_s2 }
 0x8b2   : > { %p2515_p10 = scmp.lt.u32.totalorder %s2513_s27, %s2509_s0  ;;  %p2517_p5 = scmp.lt.u32.totalorder %s2509_s0, %s3498_s9 }
 0x8b3   : > { %p2511_p3 = pnand %p2510_p8, %p3732_p1 }
 0x8b4   : > { %p2516_p0 = por %p2515_p10, %p2514_p2 }
 0x8b5   : > { %p2512_p4 = pneg %p2511_p3 }
 0x8b6   : > { %p2518_p7 = por %p2517_p5, %p2516_p0 }
 0x8b8   : > { %p2519_p6 = pnand %p2518_p7, %p2512_p4 }
 0x8ba   : > { %2522 = shalt.err (!%p2519_p6)
}
 0x8bb   : > { %1895 = dma.vmem_to_hbm [thread:$0]  (%p3732_p1), %s1424_s12, 128, %s3498_s9, %s1410_s23  }
 0x8bc PF: > { %s3733_s8 = sld [smem:[#allocation45_spill]]  ;;  %s3734_s16 = sld [smem:[#allocation41_spill]] }
 0x8bd   : > { %s3735_s26 = sld [smem:[#allocation55_spill]] }
 0x8c2   : > { %p1954_p11 = scmp.ge.s32.totalorder %s3733_s8, 2  ;;  %s1435_s29 = sand.u32 1, %s3734_s16  }
 0x8c3   : > { %p3736_p13 = scmp.ne.s32.totalorder %s3735_s26, 0  ;;  %s1436_s5 = scalar_lea.sflag [#allocation5], %s1435_s29 }
 0x8c5   : > { %p1942_p12 = pnand %p1954_p11, %p3736_p13 }
 0x8c7   : > { %2612 = dma.done.wait (!%p1942_p12), %s1436_s5, 128  }
 0x8c8   : > { %2614 = vsyncadd (!%p1942_p12), %s1436_s5, 4294967168  ;;  %s47_s23 = sadd.s32 1, %s3733_s8   ;;  %s3737_s29 = sld [smem:[#allocation39_spill]] }
 0x8c9   : > { %p44_p9 = scmp.ge.s32.totalorder %s47_s23, 10   ;;  %s3738_s30 = sld [smem:[#allocation40_spill]] }
 0x8ca   : > { %s3739_s15 = sld [smem:[#allocation51_spill]]  ;;  %s3740_s28 = sld [smem:[#allocation42_spill]] }
 0x8cb   : > { %s3741_s18 = sld [smem:[#allocation52_spill]]  ;;  %s3742_s9 = sld [smem:[#allocation48_spill]] }
 0x8cc   : > { %s3743_s12 = sld [smem:[#allocation50_spill]]  ;;  %s3744_s16 = smov %s2633_s17 }
 0x8cd   : > { %s3746_s19 = smov %s2649_s21  ;;  %s3747_s20 = smov %s2653_s22 }
 0x8ce   :  { %46 = sbr.rel (!%p44_p9) target bundleno = 37 (0x25), region = 254 }
 0x8d0   : > { %s3745_s17 = smov %s3740_s28 }
 0x8d1   : > { %s3748_s21 = smov %s3742_s9 }
 0x8d2   : > { %s3749_s22 = smov %s3743_s12 }
 0x8d5   :  { %1441 = vsyncpa [#allocation4], 1 }
 0x8d6   :  { %1443 = vsyncpa [#allocation4 + $0x1], 1 }
 0x8d7   :  { %1444 = vsyncpa [#allocation7], 1 }
 0x8d8   :  { %1446 = vsyncpa [#allocation7 + $0x1], 1 }
 0x8d9   :  { %1447 = vsyncpa [#allocation10], 1 }
 0x8da   :  { %1449 = vsyncpa [#allocation10 + $0x1], 1 }
 0x8db   :  { %1450 = vsyncpa [#allocation13], 1 }
 0x8dc   :  { %1452 = vsyncpa [#allocation13 + $0x1], 1 }
 0x8dd   :  { %1453 = vsyncpa [#allocation16], 1 }
 0x8de   :  { %1455 = vsyncpa [#allocation16 + $0x1], 1 }
 0x8df   :  { %1456 = vsyncpa [#allocation19], 1 }
 0x8e0   :  { %1458 = vsyncpa [#allocation19 + $0x1], 1 }
 0x8e1   :  { %1459 = vsyncpa [#allocation22], 1 }
 0x8e2   :  { %1460 = vsyncpa [#allocation25], 1 }
 0x8e3   :  { %1461 = vsyncpa [#allocation5], 1 }
 0x8e4   :  { %1463 = vsyncpa [#allocation5 + $0x1], 1 }

// kernel: decoder_stacks_forward.10
= control target key start
LH: loop header
LB: loop body
LE: loop exit
PB: predicated region body
PF: predicated region fallthrough
CT: control target
= control target key end

     0   :  { %s3847_s0 = inlined_call_operand.hbm [shape: f32[2,8,32], index: 0, kind: input, shape index: {}]   ;;  %s3848_s1 = inlined_call_operand.hbm [shape: f32[2,8,32], index: 1, kind: input, shape index: {}]   ;;  %s3849_s2 = inlined_call_operand.hbm [shape: bf16[4,32,8], index: 2, kind: input, shape index: {}]   ;;  %s3850_s3 = inlined_call_operand.hbm [shape: bf16[4,32,8], index: 3, kind: input, shape index: {}]   ;;  %s3851_s4 = inlined_call_operand.hbm [shape: bf16[4,32,8], index: 4, kind: input, shape index: {}]   ;;  %s3852_s5 = inlined_call_operand.hbm [shape: f32[4,1,8], index: 5, kind: input, shape index: {}]   ;;  %s3853_s6 = inlined_call_operand.hbm [shape: f32[4,1,8], index: 6, kind: input, shape index: {}]   ;;  %s3854_s7 = inlined_call_operand.hbm [shape: f32[4,1,8], index: 7, kind: input, shape index: {}]   ;;  %s3855_s8 = inlined_call_operand.hbm [shape: bf16[9,8], index: 8, kind: input, shape index: {}]   ;;  %s3856_s9 = inlined_call_operand.hbm [shape: f32[2,1,8], index: 9, kind: input, shape index: {}]   ;;  %s3857_s10 = inlined_call_operand.hbm [shape: bf16[4,8,32], index: 10, kind: input, shape index: {}]   ;;  %s3858_s11 = inlined_call_operand.hbm [shape: f32[1,32], index: 11, kind: input, shape index: {}]   ;;  %s3859_s12 = inlined_call_operand.hbm [shape: f32[1,32], index: 12, kind: input, shape index: {}]   ;;  %s3860_s13 = inlined_call_operand.hbm [shape: f32[1,32], index: 13, kind: input, shape index: {}]   ;;  %s3861_s14 = inlined_call_operand.hbm [shape: f32[2,8,32], index: 14, kind: output, shape index: {0}]   ;;  %s3862_s15 = inlined_call_operand.hbm [shape: f32[2,4,8,8], index: 15, kind: output, shape index: {1}]  }
   0x1   :  { %3936 = sst [smem:[#allocation66_spill]] %s3847_s0 }
   0x2   :  { %3937 = sst [smem:[#allocation67_spill]] %s3848_s1 }
   0x3   :  { %3938 = sst [smem:[#allocation68_spill]] %s3849_s2 }
   0x4   :  { %3939 = sst [smem:[#allocation69_spill]] %s3850_s3 }
   0x5   :  { %3940 = sst [smem:[#allocation70_spill]] %s3851_s4 }
   0x6   :  { %3941 = sst [smem:[#allocation71_spill]] %s3852_s5 }
   0x7   :  { %3942 = sst [smem:[#allocation72_spill]] %s3853_s6 }
   0x8   :  { %3943 = sst [smem:[#allocation73_spill]] %s3854_s7 }
   0x9   :  { %3944 = sst [smem:[#allocation74_spill]] %s3855_s8 }
   0xa   :  { %3945 = sst [smem:[#allocation75_spill]] %s3856_s9 }
   0xb   :  { %3946 = sst [smem:[#allocation76_spill]] %s3857_s10 }
   0xc   :  { %3947 = sst [smem:[#allocation77_spill]] %s3858_s11 }
   0xd   :  { %3948 = sst [smem:[#allocation78_spill]] %s3859_s12 }
   0xe   :  { %3949 = sst [smem:[#allocation79_spill]] %s3860_s13 }
   0xf   :  { %3950 = sst [smem:[#allocation80_spill]] %s3861_s14 }
  0x10   :  { %3951 = sst [smem:[#allocation81_spill]] %s3862_s15 }
  0x11   :  { %21 = vsyncpa [#allocation4], 0 }
  0x12   :  { %23 = vsyncpa [#allocation4 + $0x1], 0 }
  0x13   :  { %24 = vsyncpa [#allocation7], 0 }
  0x14   :  { %26 = vsyncpa [#allocation7 + $0x1], 0 }
  0x15   :  { %27 = vsyncpa [#allocation10], 0 }
  0x16   :  { %29 = vsyncpa [#allocation10 + $0x1], 0 }
  0x17   :  { %30 = vsyncpa [#allocation13], 0 }
  0x18   :  { %32 = vsyncpa [#allocation13 + $0x1], 0 }
  0x19   :  { %33 = vsyncpa [#allocation16], 0 }
  0x1a   :  { %35 = vsyncpa [#allocation16 + $0x1], 0 }
  0x1b   :  { %36 = vsyncpa [#allocation19], 0 }
  0x1c   :  { %38 = vsyncpa [#allocation19 + $0x1], 0 }
  0x1d   :  { %39 = vsyncpa [#allocation22], 0 }
  0x1e   :  { %40 = vsyncpa [#allocation25], 0 }
  0x1f   :  { %41 = vsyncpa [#allocation5], 0 }
  0x20   :  { %43 = vsyncpa [#allocation5 + $0x1], 0 }
  0x21   :  { %44 = vsyncpa [#allocation28], 0 }
  0x22   :  { %46 = vsyncpa [#allocation28 + $0x1], 0  ;;  %s2953_s18 = smov 0   ;;  %s2955_s19 = smov 0  }
  0x23   :  { %s2957_s20 = smov 0   ;;  %s2959_s21 = smov 0  }
  0x24   :  { %s2961_s22 = smov 0   ;;  %s2963_s23 = smov 0  }
  0x25   :  { %s2965_s24 = smov 0   ;;  %s2967_s25 = smov 0  }
  0x26   :  { %s2969_s26 = smov 0   ;;  %s2971_s27 = smov 0  }
  0x27   :  { %s2973_s28 = smov 0   ;;  %s2975_s29 = smov 0  }
  0x28   :  { %s2977_s30 = smov 0   ;;  %s2979_s16 = smov 0  }
  0x29 LB: > { %3952 = sst [smem:[#allocation42_spill]] %s2789_s18  ;;  %s3024_s17 = sadd.s32 4294967295, %s2841_s16   ;;  %s2841_s16 = sphi %s2979_s16, %s52_s16   ;;  %s2837_s30 = sphi %s2977_s30, %s4087_s30   ;;  %s2833_s29 = sphi %s2975_s29, %s4086_s29   ;;  %s2829_s28 = sphi %s2973_s28, %s4085_s28   ;;  %s2825_s27 = sphi %s2971_s27, %s4084_s27   ;;  %s2821_s26 = sphi %s2969_s26, %s4081_s26   ;;  %s2817_s25 = sphi %s2967_s25, %s4080_s25   ;;  %s2813_s24 = sphi %s2965_s24, %s4079_s24   ;;  %s2809_s23 = sphi %s2963_s23, %s4078_s23   ;;  %s2805_s22 = sphi %s2961_s22, %s4077_s22   ;;  %s2801_s21 = sphi %s2959_s21, %s4076_s21   ;;  %s2797_s20 = sphi %s2957_s20, %s4075_s20   ;;  %s2793_s19 = sphi %s2955_s19, %s4074_s19   ;;  %s2789_s18 = sphi %s2953_s18, %s4073_s18  }
  0x2a   : > { %3953 = sst [smem:[#allocation43_spill]] %s2793_s19  ;;  %p1822_p0 = scmp.ge.s32.totalorder %s2841_s16, 1 }
  0x2b   : > { %3954 = sst [smem:[#allocation44_spill]] %s2797_s20  ;;  %p3874_p1 = scmp.eq.s32.totalorder %s3024_s17, 0 }
  0x2c   : > { %3955 = sst [smem:[#allocation45_spill]] %s2805_s22  ;;  %p467_p2 = scmp.lt.s32.totalorder %s2841_s16, 9 }
  0x2d   : > { %3956 = sst [smem:[#allocation46_spill]] %s2809_s23  ;;  %s2843_s14 = smov [#allocation17]  }
  0x2e   : > { %3957 = sst [smem:[#allocation47_spill]] %s2813_s24  ;;  %p3029_p3 = pnand %p1822_p0, %p467_p2 }
  0x2f   : > { %3958 = sst [smem:[#allocation48_spill]] %s2817_s25  ;;  %s2844_s10 = smov [#allocation21]  }
  0x30   : > { %3959 = sst [smem:[#allocation49_spill]] %s2821_s26  ;;  %p1998_p4 = pneg %p3029_p3 }
  0x31   : > { %3960 = sst [smem:[#allocation50_spill]] %s2825_s27  ;;  %s493_s7 = sshll.u32 %s2844_s10, 4  ;;  %s3041_s7 = int_to_ptr.vmem [resolvable:$true] %s493_s7 }
  0x32   : > { %3961 = sst [smem:[#allocation51_spill]] %s2829_s28  ;;  %s479_s28 = sshll.u32 %s2843_s14, 4  ;;  %s480_s28 = int_to_ptr.vmem [resolvable:$true] %s479_s28 }
  0x33   : > { %3962 = sst [smem:[#allocation52_spill]] %s2841_s16  ;;  %p3037_p5 = pnand %p1998_p4, %p3874_p1 }
  0x34   : > { %3963 = sst [smem:[#allocation53_spill]] %s3024_s17 }
  0x35   : > { %s3964_s15 = scalar_select %p3029_p3, 1, 0 }
  0x36   : > { %s3966_s27 = scalar_select %p3037_p5, 1, 0 }
  0x37   : > { %3965 = sst [smem:[#allocation54_spill]] %s3964_s15  ;;  %s3967_s8 = sld [smem:[#allocation74_spill]] }
  0x38   : > { %p3051_p7 = pneg %p3037_p5 }
  0x3a   : > { %s3968_s14 = scalar_select %p3051_p7, 1, 0 }
  0x3d   : > { %s2211_s2 = scalar_lea.hbm %s3967_s8, 128 }
  0x3e   : > { %p2212_p6 = scmp.ne.s32.totalorder %s3967_s8, %s2211_s2  ;;  %p2218_p10 = scmp.lt.u32.totalorder %s2211_s2, %s3967_s8 }
  0x40   : > { %p2214_p8 = pnand %p3051_p7, %p2212_p6 }
  0x42   : > { %p2215_p9 = pneg %p2214_p8 }
  0x44   : > { %p2220_p11 = pnand %p2218_p10, %p2215_p9 }
  0x46   : > { %2223 = shalt.err (!%p2220_p11)
}
  0x47   : > { %s2224_s4 = scalar_lea.vmem %s480_s28, 128  ;;  %p2232_p2 = scmp.lt.s32.totalorder %s480_s28, %s480_s28 }
  0x48   : > { %p2225_p12 = scmp.ne.s32.totalorder %s480_s28, %s2224_s4  ;;  %p2233_p4 = scmp.lt.s32.totalorder %s2224_s4, %s2224_s4 }
  0x4a   : > { %p2227_p13 = pnand %p2225_p12, %p3051_p7  ;;  %p2234_p1 = por %p2233_p4, %p2232_p2 }
  0x4c   : > { %p2228_p0 = pneg %p2227_p13 }
  0x4e   : > { %p2235_p3 = pnand %p2234_p1, %p2228_p0 }
  0x50   : > { %2238 = shalt.err (!%p2235_p3)
}
  0x51   : > { %s3880_s0 = smov 64   ;;  %s3882_s6 = smov 4  }
  0x52   : > { %2001 = dma.hbm_to_vmem [thread:$0]  (!%p3037_p5), %s3967_s8, 128, %s480_s28, [#allocation16], %s3880_s0, %s3880_s0, %s3882_s6  }
  0x53   : > { %s3969_s11 = sld [smem:[#allocation77_spill]] }
  0x59   : > { %s2239_s12 = scalar_lea.hbm %s3969_s11, 16 }
  0x5a   : > { %p2240_p1 = scmp.ne.s32.totalorder %s3969_s11, %s2239_s12  ;;  %p2246_p8 = scmp.lt.u32.totalorder %s2239_s12, %s3969_s11 }
  0x5c   : > { %p2242_p3 = pnand %p2240_p1, %p3051_p7 }
  0x5e   : > { %p2243_p6 = pneg %p2242_p3 }
  0x60   : > { %p2248_p9 = pnand %p2246_p8, %p2243_p6 }
  0x62   : > { %2251 = shalt.err (!%p2248_p9)
}
  0x63   : > { %s2252_s28 = scalar_lea.vmem %s3041_s7, 16  ;;  %s2259_s9 = scalar_lea.vmem %s3041_s7, 32 }
  0x64   : > { %p2253_p10 = scmp.ne.s32.totalorder %s3041_s7, %s2252_s28  ;;  %p2260_p13 = scmp.lt.s32.totalorder %s3041_s7, %s3041_s7 }
  0x65   : > { %p2261_p0 = scmp.lt.s32.totalorder %s2259_s9, %s2252_s28 }
  0x66   : > { %p2255_p11 = pnand %p2253_p10, %p3051_p7 }
  0x67   : > { %p2262_p2 = por %p2261_p0, %p2260_p13 }
  0x68   : > { %p2256_p12 = pneg %p2255_p11 }
  0x6a   : > { %p2263_p4 = pnand %p2262_p2, %p2256_p12 }
  0x6c   : > { %2266 = shalt.err (!%p2263_p4)
}
  0x6d   : > { %2004 = dma.hbm_to_vmem [thread:$0]  (!%p3037_p5), %s3969_s11, 16, %s3041_s7, [#allocation22]  }
  0x6e   : > { %s1821_s12 = sadd.s32 4294967294, %s2841_s16   ;;  %s61_s2 = sadd.s32 1, %s2833_s29 }
  0x6f   : > { %p62_p1 = scmp.ge.s32.totalorder %s61_s2, 4  ;;  %s64_s13 = sadd.s32 1, %s2837_s30 }
  0x70   : > { %s71_s15 = sadd.s32 1, %s2821_s26  ;;  %p3885_p3 = scmp.ne.s32.totalorder %s2821_s26, %s2817_s25 }
  0x71   : > { %s4089_s2 = smov (%p62_p1, %s61_s2), 0  ;;  %s4091_s13 = smov (!%p62_p1, %s64_s13), %s2837_s30 }
  0x72   : > { %3970 = sst [smem:[#allocation55_spill]] %s4089_s2  ;;  %p79_p6 = scmp.eq.s32.totalorder %s2841_s16, 0 }
  0x73   : > { %p3884_p8 = scmp.ne.s32.totalorder %s2817_s25, %s2813_s24  ;;  %p66_p9 = scmp.ge.s32.totalorder %s4091_s13, 2 }
  0x74   : > { %s120_s7 = ssub.s32 %s2833_s29, %s4089_s2  ;;  %p3113_p10 = por %p79_p6, %p3885_p3 }
  0x75   : > { %p3972_p11 = scmp.eq.s32.totalorder %s3024_s17, 0  ;;  %s4093_s13 = smov (%p66_p9, %s4091_s13), 0 }
  0x76   : > { %3975 = sst [smem:[#allocation57_spill]] %s4093_s13  ;;  %p121_p13 = scmp.eq.s32.totalorder %s120_s7, 0 }
  0x77   : > { %p3122_p12 = por %p3972_p11, %p3884_p8  ;;  %s123_s28 = sadd.s32 1, %s2809_s23 }
  0x78   : > { %s68_s9 = ssub.s32 %s2837_s30, %s4093_s13  ;;  %p130_p0 = scmp.ne.s32.totalorder %s2809_s23, %s2805_s22 }
  0x79   : > { %s3973_s4 = scalar_select %p3122_p12, 1, 0 }
  0x7a   : > { %p69_p2 = scmp.eq.s32.totalorder %s68_s9, 0  ;;  %p136_p4 = scmp.ne.s32.totalorder %s2805_s22, %s2801_s21 }
  0x7b   : > { %3974 = sst [smem:[#allocation56_spill]] %s3973_s4  ;;  %p3143_p1 = por %p130_p0, %p79_p6 }
  0x7c   : > { %s3136_s3 = scalar_select %p121_p13, %s2809_s23, %s123_s28  }
  0x7d   : > { %s3139_s5 = scalar_select %p69_p2, %s2821_s26, %s71_s15  }
  0x7e   : > { %3976 = sst [smem:[#allocation58_spill]] %s3136_s3  ;;  %p3979_p9 = pmov %p3972_p11 }
  0x7f   : > { %3977 = sst [smem:[#allocation59_spill]] %s3139_s5  ;;  %p426_p8 = scmp.eq.s32.totalorder %s3024_s17, 7 }
  0x80   : > { %p3149_p11 = por %p136_p4, %p3979_p9  ;;  %p432_p3 = scmp.eq.s32.totalorder %s1821_s12, 7 }
  0x81   : > { %s440_s21 = sor.u32 %s120_s7, %s68_s9  ;;  %s443_s15 = sadd.s32 1, %s2797_s20 }
  0x82   : > { %s3980_s6 = scalar_select %p3149_p11, 1, 0 }
  0x83   : > { %p3982_p13 = scmp.ne.s32.totalorder %s2821_s26, %s2817_s25  ;;  %p3985_p6 = scmp.ne.s32.totalorder %s2817_s25, %s2813_s24 }
  0x84   : > { %3981 = sst [smem:[#allocation60_spill]] %s3980_s6  ;;  %p441_p4 = scmp.eq.s32.totalorder %s440_s21, 0 }
  0x85   : > { %p3158_p2 = por %p426_p8, %p3982_p13  ;;  %p3165_p0 = por %p432_p3, %p3985_p6 }
  0x86   : > { %p453_p9 = scmp.ne.s32.totalorder %s2797_s20, %s2793_s19  ;;  %p459_p11 = scmp.ne.s32.totalorder %s2793_s19, %s2789_s18 }
  0x87   : > { %s3983_s28 = scalar_select %p3158_p2, 1, 0 }
  0x88   : > { %s3986_s8 = scalar_select %p3165_p0, 1, 0 }
  0x89   : > { %3984 = sst [smem:[#allocation61_spill]] %s3983_s28  ;;  %p2053_p12 = scmp.lt.s32.totalorder %s2841_s16, 8 }
  0x8a   : > { %3987 = sst [smem:[#allocation62_spill]] %s3986_s8  ;;  %p3177_p5 = por %p453_p9, %p426_p8 }
  0x8b   : > { %s3175_s12 = scalar_select %p441_p4, %s2797_s20, %s443_s15  }
  0x8c   : > { %s3989_s7 = scalar_select %p3177_p5, 1, 0 }
  0x8d   : > { %3988 = sst [smem:[#allocation63_spill]] %s3175_s12  ;;  %p3181_p13 = por %p459_p11, %p432_p3 }
  0x8e   : > { %3990 = sst [smem:[#allocation64_spill]] %s3989_s7  ;;  %s3186_s11 = sand.u32 1, %s2821_s26  }
  0x8f   : > { %s3991_s9 = scalar_select %p3181_p13, 1, 0 }
  0x90   : > { %s3896_s21 = sshll.u32 %s2837_s30, 7  ;;  %s3895_s13 = sshll.u32 %s3186_s11, 3 }
  0x91   : > { %3992 = sst [smem:[#allocation65_spill]] %s3991_s9  ;;  %p3194_p6 = pnand %p2053_p12, %p3113_p10 }
  0x92   : > { %s3199_s15 = sand.u32 1, %s2841_s16   ;;  %s3994_s1 = sld [smem:[#allocation67_spill]] }
  0x93   : > { %s3993_s2 = scalar_select %p3194_p6, 1, 0 }
  0x94   : > { %s548_s10 = scalar_lea.vmem [#allocation6], %s3895_s13  ;;  %p3216_p3 = pnand %p2053_p12, %p3143_p1 }
  0x95   : > { %s555_s12 = sshll.u32 %s548_s10, 4  ;;  %p3225_p10 = pneg %p3194_p6  ;;  %s3210_s12 = int_to_ptr.vmem [resolvable:$true] %s555_s12 }
  0x96   : > { %s3995_s20 = scalar_select %p3216_p3, 1, 0 }
  0x97   : > { %s3996_s5 = scalar_select %p3225_p10, 1, 0 }
  0x98   : > { %s3206_s26 = scalar_lea.hbm %s3994_s1, %s3896_s21  ;;  %s2272_s0 = scalar_lea.hbm %s3994_s1, 256 }
  0x99   : > { %s2267_s3 = scalar_lea.hbm %s3206_s26, 128  ;;  %p2273_p12 = scmp.lt.u32.totalorder %s3206_s26, %s3994_s1 }
  0x9a   : > { %p2268_p8 = scmp.ne.s32.totalorder %s3206_s26, %s2267_s3  ;;  %p2274_p1 = scmp.lt.u32.totalorder %s2272_s0, %s2267_s3 }
  0x9b   : > { %p2276_p13 = scmp.lt.u32.totalorder %s2267_s3, %s3206_s26 }
  0x9c   : > { %p2270_p11 = pnand %p3225_p10, %p2268_p8  ;;  %p2275_p9 = por %p2274_p1, %p2273_p12 }
  0x9e   : > { %p2271_p4 = pneg %p2270_p11  ;;  %p2277_p0 = por %p2276_p13, %p2275_p9 }
  0xa0   : > { %p2278_p5 = pnand %p2277_p0, %p2271_p4 }
  0xa2   : > { %2281 = shalt.err (!%p2278_p5)
}
  0xa3   : > { %s2282_s9 = scalar_lea.vmem %s3210_s12, 128  ;;  %s2847_s13 = smov [#allocation6]  }
  0xa4   : > { %p2283_p8 = scmp.ne.s32.totalorder %s3210_s12, %s2282_s9  ;;  %s2287_s10 = sshll.u32 %s2847_s13, 4  ;;  %s2288_s10 = int_to_ptr.vmem [resolvable:$false] %s2287_s10 }
  0xa5   : > { %s2289_s18 = scalar_lea.vmem %s2288_s10, 256  ;;  %p2290_p7 = scmp.lt.s32.totalorder %s3210_s12, %s2288_s10 }
  0xa6   : > { %p2285_p11 = pnand %p2283_p8, %p3225_p10  ;;  %p2291_p3 = scmp.lt.s32.totalorder %s2289_s18, %s2282_s9 }
  0xa8   : > { %p2286_p2 = pneg %p2285_p11  ;;  %p2292_p12 = por %p2291_p3, %p2290_p7 }
  0xaa   : > { %p2293_p1 = pnand %p2292_p12, %p2286_p2 }
  0xac   : > { %2296 = shalt.err (!%p2293_p1)
}
  0xad   : > { %s3997_s21 = scalar_lea.sflag [#allocation7], %s3199_s15  ;;  %s3251_s3 = sand.u32 1, %s2809_s23  }
  0xae   : > { %2017 = dma.hbm_to_vmem [thread:$0]  (!%p3194_p6), %s3206_s26, 128, %s3210_s12, %s3997_s21  }
  0xaf   : > { %s3254_s0 = sshll.u32 %s3251_s3, 4  ;;  %s3257_s9 = sshll.u32 %s2833_s29, 8 }
  0xb0   : > { %s3998_s18 = sld [smem:[#allocation69_spill]]  ;;  %s587_s24 = scalar_lea.vmem [#allocation9], %s3254_s0 }
  0xb1   : > { %s594_s26 = sshll.u32 %s587_s24, 4  ;;  %p4000_p7 = scmp.ne.s32.totalorder %s3995_s20, 0  ;;  %s3266_s26 = int_to_ptr.vmem [resolvable:$true] %s594_s26 }
  0xb3   : > { %p3273_p2 = pneg %p4000_p7 }
  0xb5   : > { %s4001_s23 = scalar_select %p3273_p2, 1, 0 }
  0xb6   : > { %s3999_s1 = smov %s3998_s18  ;;  %s3263_s8 = scalar_lea.hbm %s3998_s18, %s3257_s9 }
  0xb7   : > { %s2297_s21 = scalar_lea.hbm %s3263_s8, 256  ;;  %s2302_s18 = scalar_lea.hbm %s3999_s1, 1024 }
  0xb8   : > { %p2298_p5 = scmp.ne.s32.totalorder %s3263_s8, %s2297_s21  ;;  %p2303_p3 = scmp.lt.u32.totalorder %s3263_s8, %s3999_s1 }
  0xb9   : > { %p2304_p4 = scmp.lt.u32.totalorder %s2302_s18, %s2297_s21  ;;  %p2306_p8 = scmp.lt.u32.totalorder %s2297_s21, %s3263_s8 }
  0xba   : > { %p2300_p0 = pnand %p3273_p2, %p2298_p5 }
  0xbb   : > { %p2305_p9 = por %p2304_p4, %p2303_p3 }
  0xbc   : > { %p2301_p13 = pneg %p2300_p0 }
  0xbd   : > { %p2307_p11 = por %p2306_p8, %p2305_p9 }
  0xbf   : > { %p2308_p12 = pnand %p2307_p11, %p2301_p13 }
  0xc1   : > { %2311 = shalt.err (!%p2308_p12)
}
  0xc2   : > { %s2312_s12 = scalar_lea.vmem %s3266_s26, 256  ;;  %s2848_s13 = smov [#allocation9]  }
  0xc3   : > { %p2313_p1 = scmp.ne.s32.totalorder %s3266_s26, %s2312_s12  ;;  %s2317_s10 = sshll.u32 %s2848_s13, 4  ;;  %s2318_s10 = int_to_ptr.vmem [resolvable:$false] %s2317_s10 }
  0xc4   : > { %s2319_s16 = scalar_lea.vmem %s2318_s10, 512  ;;  %p2320_p6 = scmp.lt.s32.totalorder %s3266_s26, %s2318_s10 }
  0xc5   : > { %p2315_p5 = pnand %p2313_p1, %p3273_p2  ;;  %p2321_p10 = scmp.lt.s32.totalorder %s2319_s16, %s2312_s12 }
  0xc7   : > { %p2316_p0 = pneg %p2315_p5  ;;  %p2322_p3 = por %p2321_p10, %p2320_p6 }
  0xc9   : > { %p2323_p4 = pnand %p2322_p3, %p2316_p0 }
  0xcb   : > { %2326 = shalt.err (!%p2323_p4)
}
  0xcc   : > { %s4002_s21 = smov 4   ;;  %s4003_s18 = smov 64  }
  0xcd   : > { %s4004_s24 = scalar_lea.sflag [#allocation10], %s3199_s15  ;;  %s3302_s13 = sshll.u32 %s2833_s29, 4 }
  0xce   : > { %2023 = dma.hbm_to_vmem [thread:$0]  (!%p4000_p7), %s3263_s8, 256, %s3266_s26, %s4004_s24, %s4003_s18, %s4003_s18, %s4002_s21  }
  0xcf   : > { %s4005_s16 = sld [smem:[#allocation71_spill]]  ;;  %s628_s28 = scalar_lea.vmem [#allocation12], %s3251_s3 }
  0xd0   : > { %s635_s19 = sshll.u32 %s628_s28, 4  ;;  %s636_s19 = int_to_ptr.vmem [resolvable:$true] %s635_s19 }
  0xd5   : > { %s4006_s1 = smov %s4005_s16  ;;  %s3308_s7 = scalar_lea.hbm %s4005_s16, %s3302_s13 }
  0xd6   : > { %s2327_s22 = scalar_lea.hbm %s3308_s7, 16  ;;  %s2332_s24 = scalar_lea.hbm %s4006_s1, 64 }
  0xd7   : > { %p2328_p6 = scmp.ne.s32.totalorder %s3308_s7, %s2327_s22  ;;  %p2333_p9 = scmp.lt.u32.totalorder %s3308_s7, %s4006_s1 }
  0xd8   : > { %p2334_p8 = scmp.lt.u32.totalorder %s2332_s24, %s2327_s22  ;;  %p2336_p12 = scmp.lt.u32.totalorder %s2327_s22, %s3308_s7 }
  0xd9   : > { %p2330_p10 = pnand %p2328_p6, %p3273_p2 }
  0xda   : > { %p2335_p11 = por %p2334_p8, %p2333_p9 }
  0xdb   : > { %p2331_p13 = pneg %p2330_p10 }
  0xdc   : > { %p2337_p1 = por %p2336_p12, %p2335_p11 }
  0xde   : > { %p2338_p5 = pnand %p2337_p1, %p2331_p13 }
  0xe0   : > { %2341 = shalt.err (!%p2338_p5)
}
  0xe1   : > { %s2342_s28 = scalar_lea.vmem %s636_s19, 16  ;;  %s2849_s16 = smov [#allocation12]  }
  0xe2   : > { %p2343_p0 = scmp.ne.s32.totalorder %s636_s19, %s2342_s28  ;;  %s2347_s6 = sshll.u32 %s2849_s16, 4  ;;  %s2348_s6 = int_to_ptr.vmem [resolvable:$false] %s2347_s6 }
  0xe3   : > { %s2349_s8 = scalar_lea.vmem %s2348_s6, 32  ;;  %p2350_p6 = scmp.lt.s32.totalorder %s636_s19, %s2348_s6 }
  0xe4   : > { %p2345_p3 = pnand %p2343_p0, %p3273_p2  ;;  %p2351_p10 = scmp.lt.s32.totalorder %s2349_s8, %s2342_s28 }
  0xe6   : > { %p2346_p4 = pneg %p2345_p3  ;;  %p2352_p7 = por %p2351_p10, %p2350_p6 }
  0xe8   : > { %p2353_p8 = pnand %p2352_p7, %p2346_p4 }
  0xea   : > { %2356 = shalt.err (!%p2353_p8)
}
  0xeb   : > { %p4007_p9 = scmp.ne.s32.totalorder %s3995_s20, 0  ;;  %s4008_s22 = scalar_lea.sflag [#allocation13], %s3199_s15 }
  0xec   : > { %s1844_s26 = sshll.u32 %s2837_s30, 4  ;;  %s4009_s10 = sld [smem:[#allocation75_spill]] }
  0xed   : > { %2029 = dma.hbm_to_vmem [thread:$0]  (!%p4007_p9), %s3308_s7, 16, %s636_s19, %s4008_s22  }
  0xee   : > { %s679_s6 = scalar_lea.vmem [#allocation18], %s3186_s11  ;;  %p4010_p13 = scmp.ne.s32.totalorder %s3996_s5, 0 }
  0xef   : > { %s686_s28 = sshll.u32 %s679_s6, 4  ;;  %s687_s28 = int_to_ptr.vmem [resolvable:$true] %s686_s28 }
  0xf2   : > { %s3335_s16 = scalar_lea.hbm %s4009_s10, %s1844_s26  ;;  %s2362_s22 = scalar_lea.hbm %s4009_s10, 32 }
  0xf3   : > { %s2357_s1 = scalar_lea.hbm %s3335_s16, 16  ;;  %p2363_p1 = scmp.lt.u32.totalorder %s3335_s16, %s4009_s10 }
  0xf4   : > { %p2358_p7 = scmp.ne.s32.totalorder %s3335_s16, %s2357_s1  ;;  %p2364_p5 = scmp.lt.u32.totalorder %s2362_s22, %s2357_s1 }
  0xf5   : > { %p2366_p3 = scmp.lt.u32.totalorder %s2357_s1, %s3335_s16 }
  0xf6   : > { %p2360_p11 = pnand %p2358_p7, %p4010_p13  ;;  %p2365_p0 = por %p2364_p5, %p2363_p1 }
  0xf8   : > { %p2361_p12 = pneg %p2360_p11  ;;  %p2367_p4 = por %p2366_p3, %p2365_p0 }
  0xfa   : > { %p2368_p6 = pnand %p2367_p4, %p2361_p12 }
  0xfc   : > { %2371 = shalt.err (!%p2368_p6)
}
  0xfd   : > { %s2372_s12 = scalar_lea.vmem %s687_s28, 16  ;;  %s2850_s6 = smov [#allocation18]  }
  0xfe   : > { %p2373_p10 = scmp.ne.s32.totalorder %s687_s28, %s2372_s12  ;;  %s2377_s8 = sshll.u32 %s2850_s6, 4  ;;  %s2378_s8 = int_to_ptr.vmem [resolvable:$false] %s2377_s8 }
  0xff   : > { %s2379_s19 = scalar_lea.vmem %s2378_s8, 32  ;;  %p2380_p11 = scmp.lt.s32.totalorder %s687_s28, %s2378_s8 }
 0x100   : > { %p2375_p8 = pnand %p2373_p10, %p4010_p13  ;;  %p2381_p9 = scmp.lt.s32.totalorder %s2379_s19, %s2372_s12 }
 0x102   : > { %p2376_p7 = pneg %p2375_p8  ;;  %p2382_p2 = por %p2381_p9, %p2380_p11 }
 0x104   : > { %p2383_p1 = pnand %p2382_p2, %p2376_p7 }
 0x106   : > { %2386 = shalt.err (!%p2383_p1)
}
 0x107   : > { %p4011_p5 = scmp.ne.s32.totalorder %s3993_s2, 0  ;;  %s4012_s1 = scalar_lea.sflag [#allocation19], %s3199_s15 }
 0x108   : > { %s2851_s7 = smov [#allocation23]   ;;  %s2852_s24 = smov [#allocation24]  }
 0x109   : > { %2038 = dma.hbm_to_vmem [thread:$0]  (!%p4011_p5), %s3335_s16, 16, %s687_s28, %s4012_s1  }
 0x10a   : > { %s504_s22 = sshll.u32 %s2851_s7, 4  ;;  %s515_s26 = sshll.u32 %s2852_s24, 4  ;;  %s505_s22 = int_to_ptr.vmem [resolvable:$true] %s504_s22  ;;  %s516_s26 = int_to_ptr.vmem [resolvable:$true] %s515_s26 }
 0x10b   : > { %s4013_s17 = sld [smem:[#allocation78_spill]]  ;;  %p4014_p9 = scmp.ne.s32.totalorder %s3968_s14, 0 }
 0x111   : > { %s2387_s8 = scalar_lea.hbm %s4013_s17, 16 }
 0x112   : > { %p2388_p2 = scmp.ne.s32.totalorder %s4013_s17, %s2387_s8  ;;  %p2394_p3 = scmp.lt.u32.totalorder %s2387_s8, %s4013_s17 }
 0x114   : > { %p2390_p12 = pnand %p2388_p2, %p4014_p9 }
 0x116   : > { %p2391_p0 = pneg %p2390_p12 }
 0x118   : > { %p2396_p4 = pnand %p2394_p3, %p2391_p0 }
 0x11a   : > { %2399 = shalt.err (!%p2396_p4)
}
 0x11b   : > { %s2400_s16 = scalar_lea.vmem %s505_s22, 16  ;;  %s2407_s10 = scalar_lea.vmem %s505_s22, 32 }
 0x11c   : > { %p2401_p6 = scmp.ne.s32.totalorder %s505_s22, %s2400_s16  ;;  %p2408_p7 = scmp.lt.s32.totalorder %s505_s22, %s505_s22 }
 0x11d   : > { %p2409_p11 = scmp.lt.s32.totalorder %s2407_s10, %s2400_s16 }
 0x11e   : > { %p2403_p10 = pnand %p2401_p6, %p4014_p9 }
 0x11f   : > { %p2410_p1 = por %p2409_p11, %p2408_p7 }
 0x120   : > { %p2404_p8 = pneg %p2403_p10 }
 0x122   : > { %p2411_p5 = pnand %p2410_p1, %p2404_p8 }
 0x124   : > { %2414 = shalt.err (!%p2411_p5)
}
 0x125   : > { %p4015_p2 = scmp.ne.s32.totalorder %s3966_s27, 0  ;;  %s4016_s7 = sld [smem:[#allocation79_spill]] }
 0x127   : > { %2007 = dma.hbm_to_vmem [thread:$0]  (!%p4015_p2), %s4013_s17, 16, %s505_s22, [#allocation22]  }
 0x12b   : > { %s2415_s24 = scalar_lea.hbm %s4016_s7, 16 }
 0x12c   : > { %p2416_p12 = scmp.ne.s32.totalorder %s4016_s7, %s2415_s24  ;;  %p2422_p5 = scmp.lt.u32.totalorder %s2415_s24, %s4016_s7 }
 0x12e   : > { %p2418_p0 = pnand %p2416_p12, %p4014_p9 }
 0x130   : > { %p2419_p3 = pneg %p2418_p0 }
 0x132   : > { %p2424_p4 = pnand %p2422_p5, %p2419_p3 }
 0x134   : > { %2427 = shalt.err (!%p2424_p4)
}
 0x135   : > { %s2428_s16 = scalar_lea.vmem %s516_s26, 16  ;;  %s2435_s22 = scalar_lea.vmem %s516_s26, 32 }
 0x136   : > { %p2429_p6 = scmp.ne.s32.totalorder %s516_s26, %s2428_s16  ;;  %p2436_p7 = scmp.lt.s32.totalorder %s516_s26, %s516_s26 }
 0x137   : > { %p2437_p11 = scmp.lt.s32.totalorder %s2435_s22, %s2428_s16 }
 0x138   : > { %p2431_p10 = pnand %p2429_p6, %p4014_p9 }
 0x139   : > { %p2438_p1 = por %p2437_p11, %p2436_p7 }
 0x13a   : > { %p2432_p8 = pneg %p2431_p10 }
 0x13c   : > { %p2439_p13 = pnand %p2438_p1, %p2432_p8 }
 0x13e   : > { %2442 = shalt.err (!%p2439_p13)
}
 0x13f   : > { %2010 = dma.hbm_to_vmem [thread:$0]  (!%p4015_p2), %s4016_s7, 16, %s516_s26, [#allocation25]  }
 0x140   : > { %s4017_s14 = sshll.u32 %s2837_s30, 7  ;;  %s4018_s4 = sld [smem:[#allocation66_spill]] }
 0x141   : > { %s4019_s6 = sshll.u32 %s3186_s11, 3  ;;  %s4020_s16 = sld [smem:[#allocation68_spill]] }
 0x142   : > { %s530_s27 = scalar_lea.vmem [#allocation3], %s4019_s6  ;;  %s527_s26 = scalar_lea.sflag [#allocation4], %s3186_s11 }
 0x143   : > { %s537_s8 = sshll.u32 %s530_s27, 4  ;;  %p4022_p9 = scmp.ne.s32.totalorder %s3996_s5, 0  ;;  %s3403_s8 = int_to_ptr.vmem [resolvable:$true] %s537_s8 }
 0x146   : > { %s3399_s24 = scalar_lea.hbm %s4018_s4, %s4017_s14  ;;  %s2448_s25 = scalar_lea.hbm %s4018_s4, 256 }
 0x147   : > { %s4021_s10 = smov %s4020_s16  ;;  %s3409_s22 = scalar_lea.hbm %s4020_s16, %s3257_s9 }
 0x148   : > { %s2443_s28 = scalar_lea.hbm %s3399_s24, 128  ;;  %p2449_p0 = scmp.lt.u32.totalorder %s3399_s24, %s4018_s4 }
 0x149   : > { %p2444_p13 = scmp.ne.s32.totalorder %s3399_s24, %s2443_s28  ;;  %p2450_p3 = scmp.lt.u32.totalorder %s2448_s25, %s2443_s28 }
 0x14a   : > { %p2452_p4 = scmp.lt.u32.totalorder %s2443_s28, %s3399_s24 }
 0x14b   : > { %p2446_p2 = pnand %p2444_p13, %p4022_p9  ;;  %p2451_p5 = por %p2450_p3, %p2449_p0 }
 0x14d   : > { %p2447_p12 = pneg %p2446_p2  ;;  %p2453_p6 = por %p2452_p4, %p2451_p5 }
 0x14f   : > { %p2454_p10 = pnand %p2453_p6, %p2447_p12 }
 0x151   : > { %2457 = shalt.err (!%p2454_p10)
}
 0x152   : > { %s2458_s11 = scalar_lea.vmem %s3403_s8, 128  ;;  %s2853_s27 = smov [#allocation3]  }
 0x153   : > { %p2459_p8 = scmp.ne.s32.totalorder %s3403_s8, %s2458_s11  ;;  %s2463_s12 = sshll.u32 %s2853_s27, 4  ;;  %s2464_s12 = int_to_ptr.vmem [resolvable:$false] %s2463_s12 }
 0x154   : > { %s2465_s7 = scalar_lea.vmem %s2464_s12, 256  ;;  %p2466_p1 = scmp.lt.s32.totalorder %s3403_s8, %s2464_s12 }
 0x155   : > { %p2461_p7 = pnand %p2459_p8, %p4022_p9  ;;  %p2467_p13 = scmp.lt.s32.totalorder %s2465_s7, %s2458_s11 }
 0x157   : > { %p2462_p11 = pneg %p2461_p7  ;;  %p2468_p2 = por %p2467_p13, %p2466_p1 }
 0x159   : > { %p2469_p0 = pnand %p2468_p2, %p2462_p11 }
 0x15b   : > { %2472 = shalt.err (!%p2469_p0)
}
 0x15c   : > { %p4023_p12 = scmp.ne.s32.totalorder %s3993_s2, 0  ;;  %s566_s5 = scalar_lea.vmem [#allocation8], %s3254_s0 }
 0x15d   : > { %s573_s19 = sshll.u32 %s566_s5, 4  ;;  %s4024_s14 = sld [smem:[#allocation70_spill]]  ;;  %s3434_s19 = int_to_ptr.vmem [resolvable:$true] %s573_s19 }
 0x15e   : > { %2014 = dma.hbm_to_vmem [thread:$0]  (!%p4023_p12), %s3399_s24, 128, %s3403_s8, %s527_s26  }
 0x15f   : > { %s2473_s2 = scalar_lea.hbm %s3409_s22, 256  ;;  %p4025_p3 = scmp.ne.s32.totalorder %s4001_s23, 0 }
 0x160   : > { %p2474_p9 = scmp.ne.s32.totalorder %s3409_s22, %s2473_s2  ;;  %s2478_s11 = scalar_lea.hbm %s4021_s10, 1024 }
 0x161   : > { %p2479_p6 = scmp.lt.u32.totalorder %s3409_s22, %s4021_s10  ;;  %p2480_p10 = scmp.lt.u32.totalorder %s2478_s11, %s2473_s2 }
 0x162   : > { %p2476_p5 = pnand %p2474_p9, %p4025_p3  ;;  %p2482_p7 = scmp.lt.u32.totalorder %s2473_s2, %s3409_s22 }
 0x163   : > { %s3440_s1 = scalar_lea.hbm %s4024_s14, %s3257_s9  ;;  %p2481_p8 = por %p2480_p10, %p2479_p6 }
 0x164   : > { %p2477_p4 = pneg %p2476_p5 }
 0x165   : > { %p2483_p11 = por %p2482_p7, %p2481_p8 }
 0x167   : > { %p2484_p1 = pnand %p2483_p11, %p2477_p4 }
 0x169   : > { %2487 = shalt.err (!%p2484_p1)
}
 0x16a   : > { %s2488_s9 = scalar_lea.vmem %s3434_s19, 256  ;;  %s2854_s8 = smov [#allocation8]  }
 0x16b   : > { %p2489_p13 = scmp.ne.s32.totalorder %s3434_s19, %s2488_s9  ;;  %s2493_s26 = sshll.u32 %s2854_s8, 4  ;;  %s2494_s26 = int_to_ptr.vmem [resolvable:$false] %s2493_s26 }
 0x16c   : > { %s2495_s12 = scalar_lea.vmem %s2494_s26, 512  ;;  %p2496_p12 = scmp.lt.s32.totalorder %s3434_s19, %s2494_s26 }
 0x16d   : > { %p2491_p2 = pnand %p2489_p13, %p4025_p3  ;;  %p2497_p9 = scmp.lt.s32.totalorder %s2495_s12, %s2488_s9 }
 0x16f   : > { %p2492_p0 = pneg %p2491_p2  ;;  %p2498_p5 = por %p2497_p9, %p2496_p12 }
 0x171   : > { %p2499_p6 = pnand %p2498_p5, %p2492_p0 }
 0x173   : > { %2502 = shalt.err (!%p2499_p6)
}
 0x174   : > { %p4026_p4 = scmp.ne.s32.totalorder %s3995_s20, 0  ;;  %s4027_s7 = scalar_lea.sflag [#allocation7], %s3199_s15 }
 0x175   : > { %s608_s5 = scalar_lea.vmem [#allocation11], %s3254_s0  ;;  %s4028_s25 = sld [smem:[#allocation72_spill]] }
 0x176   : > { %2020 = dma.hbm_to_vmem [thread:$0]  (!%p4026_p4), %s3409_s22, 256, %s3434_s19, %s4027_s7, %s4003_s18, %s4003_s18, %s4002_s21  }
 0x177   : > { %s615_s16 = sshll.u32 %s608_s5, 4  ;;  %s2503_s27 = scalar_lea.hbm %s3440_s1, 256  ;;  %s3469_s16 = int_to_ptr.vmem [resolvable:$true] %s615_s16 }
 0x178   : > { %p2504_p10 = scmp.ne.s32.totalorder %s3440_s1, %s2503_s27  ;;  %s2508_s8 = scalar_lea.hbm %s4024_s14, 1024 }
 0x179   : > { %p2509_p11 = scmp.lt.u32.totalorder %s3440_s1, %s4024_s14  ;;  %p2510_p1 = scmp.lt.u32.totalorder %s2508_s8, %s2503_s27 }
 0x17a   : > { %p2506_p8 = pnand %p2504_p10, %p4025_p3  ;;  %p2512_p2 = scmp.lt.u32.totalorder %s2503_s27, %s3440_s1 }
 0x17b   : > { %s4029_s6 = smov %s4028_s25  ;;  %s3475_s11 = scalar_lea.hbm %s4028_s25, %s3302_s13 }
 0x17c   : > { %p2507_p7 = pneg %p2506_p8  ;;  %p2511_p13 = por %p2510_p1, %p2509_p11 }
 0x17e   : > { %p2513_p0 = por %p2512_p2, %p2511_p13 }
 0x180   : > { %p2514_p12 = pnand %p2513_p0, %p2507_p7 }
 0x182   : > { %2517 = shalt.err (!%p2514_p12)
}
 0x183   : > { %s2518_s0 = scalar_lea.vmem %s3469_s16, 256  ;;  %s2855_s19 = smov [#allocation11]  }
 0x184   : > { %p2519_p9 = scmp.ne.s32.totalorder %s3469_s16, %s2518_s0  ;;  %s2523_s12 = sshll.u32 %s2855_s19, 4  ;;  %s2524_s12 = int_to_ptr.vmem [resolvable:$false] %s2523_s12 }
 0x185   : > { %s2525_s7 = scalar_lea.vmem %s2524_s12, 512  ;;  %p2526_p10 = scmp.lt.s32.totalorder %s3469_s16, %s2524_s12 }
 0x186   : > { %p2521_p5 = pnand %p2519_p9, %p4025_p3  ;;  %p2527_p8 = scmp.lt.s32.totalorder %s2525_s7, %s2518_s0 }
 0x188   : > { %p2522_p6 = pneg %p2521_p5  ;;  %p2528_p11 = por %p2527_p8, %p2526_p10 }
 0x18a   : > { %p2529_p1 = pnand %p2528_p11, %p2522_p6 }
 0x18c   : > { %2532 = shalt.err (!%p2529_p1)
}
 0x18d   : > { %s4030_s5 = scalar_lea.sflag [#allocation10], %s3199_s15  ;;  %s645_s28 = scalar_lea.vmem [#allocation14], %s3251_s3 }
 0x18e   : > { %2026 = dma.hbm_to_vmem [thread:$0]  (!%p4026_p4), %s3440_s1, 256, %s3469_s16, %s4030_s5, %s4003_s18, %s4003_s18, %s4002_s21  }
 0x18f   : > { %s652_s2 = sshll.u32 %s645_s28, 4  ;;  %s2533_s25 = scalar_lea.hbm %s3475_s11, 16  ;;  %s653_s2 = int_to_ptr.vmem [resolvable:$true] %s652_s2 }
 0x190   : > { %p2534_p7 = scmp.ne.s32.totalorder %s3475_s11, %s2533_s25  ;;  %s2538_s9 = scalar_lea.hbm %s4029_s6, 64 }
 0x191   : > { %p2539_p0 = scmp.lt.u32.totalorder %s3475_s11, %s4029_s6  ;;  %p2540_p12 = scmp.lt.u32.totalorder %s2538_s9, %s2533_s25 }
 0x192   : > { %p2536_p13 = pnand %p2534_p7, %p4025_p3  ;;  %p2542_p5 = scmp.lt.u32.totalorder %s2533_s25, %s3475_s11 }
 0x193   : > { %p2541_p9 = por %p2540_p12, %p2539_p0 }
 0x194   : > { %p2537_p2 = pneg %p2536_p13 }
 0x195   : > { %p2543_p6 = por %p2542_p5, %p2541_p9 }
 0x197   : > { %p2544_p10 = pnand %p2543_p6, %p2537_p2 }
 0x199   : > { %2547 = shalt.err (!%p2544_p10)
}
 0x19a   : > { %s2548_s21 = scalar_lea.vmem %s653_s2, 16  ;;  %s2856_s18 = smov [#allocation14]  }
 0x19b   : > { %p2549_p8 = scmp.ne.s32.totalorder %s653_s2, %s2548_s21  ;;  %s2553_s1 = sshll.u32 %s2856_s18, 4  ;;  %s2554_s1 = int_to_ptr.vmem [resolvable:$false] %s2553_s1 }
 0x19c   : > { %s2555_s16 = scalar_lea.vmem %s2554_s1, 32  ;;  %p2556_p7 = scmp.lt.s32.totalorder %s653_s2, %s2554_s1 }
 0x19d   : > { %p2551_p11 = pnand %p2549_p8, %p4025_p3  ;;  %p2557_p13 = scmp.lt.s32.totalorder %s2555_s16, %s2548_s21 }
 0x19f   : > { %p2552_p1 = pneg %p2551_p11  ;;  %p2558_p4 = por %p2557_p13, %p2556_p7 }
 0x1a1   : > { %p2559_p0 = pnand %p2558_p4, %p2552_p1 }
 0x1a3   : > { %2562 = shalt.err (!%p2559_p0)
}
 0x1a4   : > { %p4031_p12 = scmp.ne.s32.totalorder %s3995_s20, 0  ;;  %s4032_s22 = scalar_lea.sflag [#allocation13], %s3199_s15 }
 0x1a5   : > { %s4033_s12 = sld [smem:[#allocation73_spill]]  ;;  %s662_s5 = scalar_lea.vmem [#allocation15], %s3251_s3 }
 0x1a6   : > { %2032 = dma.hbm_to_vmem [thread:$0]  (!%p4031_p12), %s3475_s11, 16, %s653_s2, %s4032_s22  }
 0x1a7   : > { %s669_s28 = sshll.u32 %s662_s5, 4  ;;  %s1845_s25 = sshll.u32 %s3251_s3, 2  ;;  %s3530_s28 = int_to_ptr.vmem [resolvable:$true] %s669_s28 }
 0x1a8   : > { %s660_s27 = scalar_lea.sflag [#allocation16], %s3199_s15 }
 0x1ab   : > { %s3527_s7 = scalar_lea.hbm %s4033_s12, %s3302_s13  ;;  %s2568_s13 = scalar_lea.hbm %s4033_s12, 64 }
 0x1ac   : > { %s2563_s24 = scalar_lea.hbm %s3527_s7, 16  ;;  %p2569_p5 = scmp.lt.u32.totalorder %s3527_s7, %s4033_s12 }
 0x1ad   : > { %p2564_p4 = scmp.ne.s32.totalorder %s3527_s7, %s2563_s24  ;;  %p2570_p6 = scmp.lt.u32.totalorder %s2568_s13, %s2563_s24 }
 0x1ae   : > { %p2572_p8 = scmp.lt.u32.totalorder %s2563_s24, %s3527_s7 }
 0x1af   : > { %p2566_p2 = pnand %p2564_p4, %p4025_p3  ;;  %p2571_p10 = por %p2570_p6, %p2569_p5 }
 0x1b1   : > { %p2567_p9 = pneg %p2566_p2  ;;  %p2573_p11 = por %p2572_p8, %p2571_p10 }
 0x1b3   : > { %p2574_p1 = pnand %p2573_p11, %p2567_p9 }
 0x1b5   : > { %2577 = shalt.err (!%p2574_p1)
}
 0x1b6   : > { %s2578_s26 = scalar_lea.vmem %s3530_s28, 16  ;;  %s2857_s21 = smov [#allocation15]  }
 0x1b7   : > { %p2579_p7 = scmp.ne.s32.totalorder %s3530_s28, %s2578_s26  ;;  %s2583_s18 = sshll.u32 %s2857_s21, 4  ;;  %s2584_s18 = int_to_ptr.vmem [resolvable:$false] %s2583_s18 }
 0x1b8   : > { %s2585_s1 = scalar_lea.vmem %s2584_s18, 32  ;;  %p2586_p4 = scmp.lt.s32.totalorder %s3530_s28, %s2584_s18 }
 0x1b9   : > { %p2581_p13 = pnand %p2579_p7, %p4025_p3  ;;  %p2587_p2 = scmp.lt.s32.totalorder %s2585_s1, %s2578_s26 }
 0x1bb   : > { %p2582_p0 = pneg %p2581_p13  ;;  %p2588_p5 = por %p2587_p2, %p2586_p4 }
 0x1bd   : > { %p2589_p6 = pnand %p2588_p5, %p2582_p0 }
 0x1bf   : > { %2592 = shalt.err (!%p2589_p6)
}
 0x1c0   : > { %2035 = dma.hbm_to_vmem [thread:$0]  (!%p4031_p12), %s3527_s7, 16, %s3530_s28, %s660_s27  }
 0x1c1   : > { %s1846_s16 = sshll.u32 %s2833_s29, 6  ;;  %s4034_s19 = sld [smem:[#allocation76_spill]] }
 0x1c2   : > { %s697_s11 = scalar_lea.vmem [#allocation20], %s1845_s25 }
 0x1c3   : > { %s704_s2 = sshll.u32 %s697_s11, 4  ;;  %s705_s2 = int_to_ptr.vmem [resolvable:$true] %s704_s2 }
 0x1c7   : > { %s4035_s5 = smov %s4034_s19  ;;  %s3559_s24 = scalar_lea.hbm %s4034_s19, %s1846_s16 }
 0x1c8   : > { %s2593_s13 = scalar_lea.hbm %s3559_s24, 64  ;;  %s2598_s27 = scalar_lea.hbm %s4035_s5, 256 }
 0x1c9   : > { %p2594_p9 = scmp.ne.s32.totalorder %s3559_s24, %s2593_s13  ;;  %p2599_p11 = scmp.lt.u32.totalorder %s3559_s24, %s4035_s5 }
 0x1ca   : > { %p2600_p1 = scmp.lt.u32.totalorder %s2598_s27, %s2593_s13  ;;  %p2602_p13 = scmp.lt.u32.totalorder %s2593_s13, %s3559_s24 }
 0x1cb   : > { %p2596_p10 = pnand %p2594_p9, %p4025_p3 }
 0x1cc   : > { %p2601_p7 = por %p2600_p1, %p2599_p11 }
 0x1cd   : > { %p2597_p8 = pneg %p2596_p10 }
 0x1ce   : > { %p2603_p0 = por %p2602_p13, %p2601_p7 }
 0x1d0   : > { %p2604_p4 = pnand %p2603_p0, %p2597_p8 }
 0x1d2   : > { %2607 = shalt.err (!%p2604_p4)
}
 0x1d3   : > { %s2608_s3 = scalar_lea.vmem %s705_s2, 64  ;;  %s2858_s25 = smov [#allocation20]  }
 0x1d4   : > { %p2609_p2 = scmp.ne.s32.totalorder %s705_s2, %s2608_s3  ;;  %s2613_s26 = sshll.u32 %s2858_s25, 4  ;;  %s2614_s26 = int_to_ptr.vmem [resolvable:$false] %s2613_s26 }
 0x1d5   : > { %s2615_s21 = scalar_lea.vmem %s2614_s26, 128  ;;  %p2616_p9 = scmp.lt.s32.totalorder %s705_s2, %s2614_s26 }
 0x1d6   : > { %p2611_p5 = pnand %p2609_p2, %p4025_p3  ;;  %p2617_p10 = scmp.lt.s32.totalorder %s2615_s21, %s2608_s3 }
 0x1d8   : > { %p2612_p6 = pneg %p2611_p5  ;;  %p2618_p12 = por %p2617_p10, %p2616_p9 }
 0x1da   : > { %p2619_p1 = pnand %p2618_p12, %p2612_p6 }
 0x1dc   : > { %2622 = shalt.err (!%p2619_p1)
}
 0x1dd   : > { %p4036_p11 = scmp.ne.s32.totalorder %s3995_s20, 0  ;;  %s4037_s18 = scalar_lea.sflag [#allocation19], %s3199_s15 }
 0x1de   : > { %s4038_s1 = sld [smem:[#allocation54_spill]] }
 0x1df   : > { %2041 = dma.hbm_to_vmem [thread:$0]  (!%p4036_p11), %s3559_s24, 64, %s705_s2, %s4037_s18  }
 0x1e4   : > { %p4039_p8 = scmp.ne.s32.totalorder %s4038_s1, 0 }
 0x1e5   : > { %s4040_s23 = sld [smem:[#allocation48_spill]] (!%p4039_p8)  ;;  %s4041_s16 = sld [smem:[#allocation56_spill]] (!%p4039_p8) }
 0x1e6   : > { %713 = sbr.rel (%p4039_p8) target bundleno = 2271 (0x8df), region = 76 }
 0x1eb   : > { %s3585_s22 = sand.u32 (!%p4039_p8), 1, %s4040_s23   ;;  %p4042_p3 = scmp.ne.s32.totalorder (!%p4039_p8), %s4041_s16, 0 }
 0x1ec   : > { %s3588_s0 = sshll.u32 (!%p4039_p8), %s3585_s22, 3  ;;  %s716_s19 = scalar_lea.sflag (!%p4039_p8), [#allocation4], %s3585_s22 }
 0x1ed   : > { %s719_s11 = scalar_lea.vmem [#allocation3], %s3588_s0 }
 0x1ee   : > { %2736 = dma.done.wait (%p4042_p3), %s716_s19, 128  }
 0x1ef   : > { %2738 = vsyncadd (%p4042_p3), %s716_s19, 4294967168  ;;  %s4043_s20 = sld [smem:[#allocation53_spill]]  ;;  %s728_s2 = scalar_lea.vmem [#allocation6], %s3588_s0 }
 0x1f5   : > { %s724_s15 = sand.u32 1, %s4043_s20  }
 0x1f6   : > { %s725_s24 = scalar_lea.sflag [#allocation7], %s724_s15 }
 0x1f7   : > { %2740 = dma.done.wait (%p4042_p3), %s725_s24, 128  }
 0x1f8   : > { %2742 = vsyncadd (%p4042_p3), %s725_s24, 4294967168  ;;  %s4044_s13 = sld [smem:[#allocation45_spill]]  ;;  %s4045_s7 = sld [smem:[#allocation60_spill]] }
 0x1fe   : > { %s3603_s28 = sand.u32 1, %s4044_s13   ;;  %p4046_p12 = scmp.ne.s32.totalorder %s4045_s7, 0 }
 0x1ff   : > { %s3606_s27 = sshll.u32 %s3603_s28, 4 }
 0x200   : > { %s737_s9 = scalar_lea.vmem [#allocation8], %s3606_s27 }
 0x201   : > { %2744 = dma.done.wait (%p4046_p12), %s725_s24, 256  }
 0x202   : > { %2746 = vsyncadd (%p4046_p12), %s725_s24, 4294967040  ;;  %s743_s8 = scalar_lea.sflag [#allocation10], %s724_s15  ;;  %s746_s3 = scalar_lea.vmem [#allocation9], %s3606_s27 }
 0x203   : > { %2748 = dma.done.wait (%p4046_p12), %s743_s8, 512  }
 0x204   : > { %2750 = vsyncadd (%p4046_p12), %s743_s8, 4294966784  ;;  %s755_s25 = scalar_lea.vmem [#allocation11], %s3606_s27  ;;  %s761_s26 = scalar_lea.sflag [#allocation13], %s724_s15 }
 0x205   : > { %s763_s21 = scalar_lea.vmem [#allocation12], %s3603_s28 }
 0x206   : > { %2752 = dma.done.wait (%p4046_p12), %s761_s26, 32  }
 0x207   : > { %2754 = vsyncadd (%p4046_p12), %s761_s26, 4294967264  ;;  %s771_s18 = scalar_lea.vmem [#allocation14], %s3603_s28  ;;  %s777_s1 = scalar_lea.sflag [#allocation16], %s724_s15 }
 0x208   : > { %s779_s23 = scalar_lea.vmem [#allocation15], %s3603_s28 }
 0x209   : > { %2756 = dma.done.wait (%p4046_p12), %s777_s1, 16  }
 0x20a   : > { %2758 = vsyncadd (%p4046_p12), %s777_s1, 4294967280  ;;  %p4047_p7 = scmp.eq.s32.totalorder %s4043_s20, 0 }
 0x20c   : > { %2760 = dma.done.wait (%p4047_p7), [#allocation16], 128   ;;  %p4048_p13 = pmov %p4047_p7 }
 0x20d   : > { %s789_s19 = scalar_lea.sflag [#allocation19], %s724_s15  ;;  %s791_s24 = scalar_lea.vmem [#allocation18], %s3585_s22 }
 0x20e   : > { %2762 = vsyncadd (%p4048_p13), [#allocation16], 4294967168 }
 0x20f   : > { %2764 = dma.done.wait (%p4042_p3), %s789_s19, 16  }
 0x210   : > { %2766 = vsyncadd (%p4042_p3), %s789_s19, 4294967280  ;;  %s1854_s13 = sshll.u32 %s3603_s28, 2 }
 0x211   : > { %s3640_s8 = scalar_lea.vmem [#allocation20], %s1854_s13 }
 0x212   : > { %2768 = dma.done.wait (%p4046_p12), %s789_s19, 64  }
 0x213   : > { %2770 = vsyncadd (%p4046_p12), %s789_s19, 4294967232  ;;  %p4049_p0 = pmov %p4047_p7 }
 0x215   : > { %2772 = dma.done.wait (%p4049_p0), [#allocation22], 32   ;;  %p4050_p4 = pmov %p4049_p0 }
 0x216   : > { %p4051_p2 = pmov %p4049_p0 }
 0x217   : > { %2774 = vsyncadd (%p4050_p4), [#allocation22], 4294967264 }
 0x218   : > { %2776 = dma.done.wait (%p4051_p2), [#allocation25], 16   ;;  %p4052_p5 = pmov %p4049_p0 }
 0x219   : > { %s4053_s16 = sld [smem:[#allocation43_spill]]  ;;  %s897_s7 = scalar_lea.vmem [#allocation26], %s3588_s0 }
 0x21a   : > { %2778 = vsyncadd (%p4052_p5), [#allocation25], 4294967280  ;;  %s4054_s19 = sld [smem:[#allocation50_spill]] }
 0x21f   : > { %s902_s15 = sand.u32 1, %s4053_s16  }
 0x220   : > { %s3657_s26 = sshll.u32 %s902_s15, 3  ;;  %p1860_p6 = scmp.ne.s32.totalorder %s4054_s19, 0 }
 0x221   : > { %s904_s1 = scalar_lea.vmem [#allocation27], %s3657_s26  ;;  %vm910_vm0 = vcmask (!%p1860_p6), 261120   ;;  %v2859_v0 = vmov (!%p1860_p6), 0.0  }
 0x222   : > { %909 = sbr.rel (%p1860_p6) target bundleno = 553 (0x229), region = 136  ;;  %911 = vst.msk [vmem:[#allocation2] sm:$0xff] (!%p1860_p6), %vm910_vm0, %v2859_v0 }
 0x229 PF: > { %v2198_v1 = vld [vmem:[%s737_s9] sm:$0xff]   ;;  %v2860_v2 = vmov 0.0   ;;  %v2200_v4 = vld [vmem:[%s737_s9 + $0x8] sm:$0xff]   ;;  %vm2861_vm1 = vmmov 0   ;;  %vm939_vm2 = vcmask 261120   ;;  %vm1123_vm3 = vcmask 64512  }
 0x22a   : > { %1910 = vmatprep.subr.bf16.mxu0 %v2860_v2  ;;  %1918 = vmatprep.subr.bf16.mxu1 %v2860_v2  ;;  %v2199_v3 = vld [vmem:[%s746_s3] sm:$0xff]   ;;  %v2201_v5 = vld [vmem:[%s746_s3 + $0x8] sm:$0xff]   ;;  %v2862_v14 = vmov 2   ;;  %v2863_v15 = vmov 0   ;;  %vm1310_vm4 = vcmask 1043456   ;;  %v2864_v44 = vmov 3  }
 0x22b   : > { %1911 = vmatpush3.bf16.msra.mxu0 %v2198_v1  ;;  %1914 = vmatprep.mubr.msk.bf16.mxu0 %vm2861_vm1, %v2860_v2  ;;  %v3680_v6 = vld [vmem:[%s719_s11] sm:$0xff]  ;;  %v914_v7 = vld [vmem:[%s728_s2] sm:$0xff]  ;;  %v2865_v45 = vmov 1   ;;  %v2866_v50 = vmov 4   ;;  %v2867_v51 = vmov 5   ;;  %v2868_v52 = vmov 6  }
 0x22c   : > { %1919 = vmatpush3.bf16.msra.mxu1 %v2199_v3  ;;  %1912 = vmatprep.subr.bf16.mxu0 %v2860_v2  ;;  %v913_v8 = vpack.c.bf16 %v3680_v6, %v3680_v6  ;;  %v915_v9 = vpack.c.bf16 %v914_v7, %v914_v7  ;;  %v2202_v10 = vld [vmem:[%s755_s25] sm:$0xff]   ;;  %v2203_v12 = vld [vmem:[%s755_s25 + $0x8] sm:$0xff]   ;;  %v2869_v53 = vmov 8   ;;  %v2870_v54 = vmov 7   ;;  %s4055_s11 = sld [smem:[#allocation50_spill]] }
 0x22d   : > { %1920 = vmatprep.subr.bf16.mxu1 %v2860_v2  ;;  %1922 = vmatprep.mubr.msk.bf16.mxu1 %vm2861_vm1, %v2860_v2  ;;  %v2204_v11 = vld [vmem:[#allocation17] sm:$0x1f]   ;;  %v1861_v16 = vld [vmem:[%s763_s21] ss:$0 sm:$0xff]  ;;  %v1170_v55 = vlaneseq }
 0x22e   : > { %v1128_v13 = vsel %vm1123_vm3, %v2204_v11, 0  ;;  %2191 = vset.pattern.permute.xlu1 %v2862_v14  ;;  %2189 = vset.pattern.permute.xlu0 %v2863_v15  ;;  %v1865_v17 = vld [vmem:[%s771_s18] ss:$0 sm:$0xff] }
 0x22f   : > { %1913 = vmatpush3.bf16.msra.mxu0 %v2200_v4  ;;  %v1869_v32 = vld [vmem:[%s779_s23] ss:$0 sm:$0xff]  ;;  %v1171_v56 = vshrl.u32 %v1170_v55, 7  ;;  %v1173_v57 = vand.u32 127, %v1170_v55 }
 0x230   : > { %1921 = vmatpush3.bf16.msra.mxu1 %v2201_v5  ;;  %1926 = vmatprep.subr.bf16.mxu0 %v2860_v2 }
 0x231   : > { %1934 = vmatprep.subr.bf16.mxu1 %v2860_v2  ;;  %v1174_v58 = vsub.s32 %v1173_v57, %v1171_v56 }
 0x232   : > { %1915 = vmatmul.mubr.msk.bf16.vlgmr.msra.gmra.mrb[0].mxu0 %vm939_vm2, %v913_v8  ;;  %p1879_p9 = scmp.ne.s32.totalorder %s4055_s11, 3 }
 0x233   : > { %1923 = vmatmul.mubr.msk.bf16.vlgmr.msra.gmra.mrb[0].mxu1 %vm939_vm2, %v915_v9  ;;  %1927 = vmatpush3.bf16.msra.mxu0 %v2202_v10  ;;  %vm1175_vm5 = vcmp.gt.s32.totalorder %v1174_v58, 4294967292 }
 0x234   : > { %1928 = vmatprep.subr.bf16.mxu0 %v2860_v2  ;;  %1930 = vmatprep.mubr.msk.bf16.mxu0 %vm2861_vm1, %v2860_v2  ;;  %v1176_v59 = vsel %vm1175_vm5, %v1174_v58, 4294967292 }
 0x235   : > { %1936 = vmatprep.mubr.msk.bf16.mxu1 %vm2861_vm1, %v2860_v2  ;;  %vm1177_vm6 = vcmp.lt.s32.totalorder %v1176_v59, 4 }
 0x236   : > { %v1178_v60 = vsel %vm1177_vm6, %v1176_v59, 4 }
 0x237   : > { %1929 = vmatpush3.bf16.msra.mxu0 %v2203_v12  ;;  %v1179_v61 = vadd.s32 4, %v1178_v60 }
 0x238   : > { %1940 = vmatprep.subr.bf16.mxu0 %v2860_v2 }
 0x239   : > { %1935 = vmatpush3.bf16.xpose.msra.mxu1 %v1128_v13  ;;  %vm1180_vm7 = vcmp.eq.s32.totalorder %v1179_v61, 0  ;;  %vm1230_vm8 = vcmp.eq.s32.totalorder %v1179_v61, 1  ;;  %vm1237_vm9 = vcmp.eq.s32.totalorder %v1179_v61, 2  ;;  %vm1244_vm10 = vcmp.eq.s32.totalorder %v1179_v61, 3 }
 0x23a   : > { %1931 = vmatmul.mubr.msk.bf16.vlgmr.msra.gmra.mrb[4].mxu0 %vm939_vm2, %v915_v9  ;;  %1946 = vmatprep.subr.bf16.mxu1 %v2860_v2  ;;  %vm1251_vm11 = vcmp.eq.s32.totalorder %v1179_v61, 4  ;;  %vm1258_vm12 = vcmp.eq.s32.totalorder %v1179_v61, 5  ;;  %vm1265_vm13 = vcmp.eq.s32.totalorder %v1179_v61, 6  ;;  %vm1272_vm14 = vcmp.eq.s32.totalorder %v1179_v61, 7 }
 0x23b   : > { %1942 = vmatprep.mubr.msk.bf16.mxu0 %vm2861_vm1, %v2860_v2  ;;  %vm1279_vm15 = vcmp.eq.s32.totalorder %v1179_v61, 8 }
 0x305   : > { %v977_v18 = vpop.f32.mrb[0].mxu0 }
 0x306   : > { %v978_v19 = vadd.f32 %v1861_v16, %v977_v18  ;;  %v1044_v20 = vpop.f32.mrb[0].mxu1  ;;  %v1916_v21 = vpop.f32.mrb[1].mxu0 }
 0x307   : > { %v1045_v22 = vadd.f32 %v1865_v17, %v1044_v20  ;;  %v980_v23 = vpop.f32.mrb[2].mxu0  ;;  %v1924_v24 = vpop.f32.mrb[1].mxu1 }
 0x308   : > { %v983_v25 = vmul.f32 0.35355338, %v978_v19  ;;  %v1917_v26 = vpop.f32.mrb[3].mxu0  ;;  %v1047_v27 = vpop.f32.mrb[2].mxu1 }
 0x309   : > { %v1115_v28 = vpack.c.bf16 %v1045_v22, %v1045_v22  ;;  %v1925_v29 = vpop.f32.mrb[3].mxu1 }
 0x30a   : > { %v1114_v30 = vpack.c.bf16 %v983_v25, %v983_v25  ;;  %v1876_v25 = vld [vmem:[%s791_s24] ss:$0 sm:$0xff] }
 0x30b   : > { %v1188_v31 = vsel %vm1123_vm3, %v1115_v28, 0 }
 0x30c   : > { %1941 = vmatpush3.bf16.xpose.msra.mxu0 %v1188_v31  ;;  %1937 = vmatmul.mubr.msk.bf16.vlgmr.msra.gmra.mrb[4].mxu1 %vm1123_vm3, %v1114_v30 }
 0x30d   : > { %1948 = vmatprep.mubr.msk.bf16.mxu1 %vm2861_vm1, %v2860_v2  ;;  %1952 = vmatprep.subr.bf16.mxu0 %v2860_v2  ;;  %v1107_v33 = vpop.f32.mrb[4].mxu0 }
 0x30e   : > { %v1108_v34 = vadd.f32 %v1869_v32, %v1107_v33  ;;  %v1932_v35 = vpop.f32.mrb[5].mxu0 }
 0x30f   : > { %v1110_v36 = vpop.f32.mrb[6].mxu0 }
 0x310   : > { %v1113_v37 = vpack.c.bf16 %v1108_v34, %v1108_v34  ;;  %v1933_v38 = vpop.f32.mrb[7].mxu0  ;;  %v1356_v34 = vld [vmem:[%s3640_s8] sm:$0xf] }
 0x311   : > { %v1361_v35 = vsel %vm1310_vm4, %v1356_v34, 0 }
 0x312   : > { %v1312_v39 = vsel %vm1310_vm4, %v1113_v37, 0 }
 0x313   : > { %1943 = vmatmul.mubr.msk.bf16.vlgmr.msra.gmra.mrb[8].mxu0 %vm1123_vm3, %v1114_v30  ;;  %1947 = vmatpush3.bf16.msra.mxu1 %v1312_v39 }
 0x314   : > { %1954 = vmatprep.mubr.msk.bf16.mxu0 %vm2861_vm1, %v2860_v2  ;;  %1953 = vmatpush3.bf16.msra.mxu0 %v1361_v35 }
 0x3df   : > { %v1164_v40 = vpop.f32.mrb[4].mxu1 }
 0x3e0   : > { %1239 = vperm.xlu1 %2191, %v1164_v40   ;;  %1183 = vperm.xlu0 %2189, %v1164_v40   ;;  %v1938_v41 = vpop.f32.mrb[5].mxu1 }
 0x3e1   : > { %v1167_v42 = vpop.f32.mrb[6].mxu1 }
 0x3e2   : > { %v1939_v43 = vpop.f32.mrb[7].mxu1 }
 0x3e4   : > { %2192 = vset.pattern.permute.xlu1 %v2864_v44  ;;  %2190 = vset.pattern.permute.xlu0 %v2865_v45  ;;  %v1354_v45 = vld [vmem:[#allocation2] sm:$0xff] }
 0x3e5   : > { %1246 = vperm.xlu1 %2192, %v1164_v40   ;;  %1232 = vperm.xlu0 %2190, %v1164_v40  }
 0x3e6   : > { %v1224_v46 = vpop.f32.mrb[8].mxu0 }
 0x3e7   : > { %v1944_v47 = vpop.f32.mrb[9].mxu0 }
 0x3e8   : > { %v1227_v48 = vpop.f32.mrb[10].mxu0 }
 0x3e9   : > { %v1945_v49 = vpop.f32.mrb[11].mxu0  ;;  %2193 = vset.pattern.permute.xlu1 %v2866_v50  ;;  %2194 = vset.pattern.permute.xlu0 %v2867_v51 }
 0x3ea   : > { %1253 = vperm.xlu1 %2193, %v1164_v40   ;;  %1260 = vperm.xlu0 %2194, %v1164_v40  }
 0x3ee   : > { %2195 = vset.pattern.permute.xlu1 %v2868_v52  ;;  %2197 = vset.pattern.permute.xlu0 %v2869_v53  ;;  %v1880_v52 = vld [vmem:[#allocation21] ss:$0 sm:$0xff] (!%p1879_p9) }
 0x3ef   : > { %1267 = vperm.xlu1 %2195, %v1164_v40   ;;  %1281 = vperm.xlu0 %2197, %v1164_v40  }
 0x3f3   : > { %2196 = vset.pattern.permute.xlu1 %v2870_v54 }
 0x3f4   : > { %1274 = vperm.xlu1 %2196, %v1164_v40  }
 0x45f   : > { %v1240_v62 = vpop.permute.xlu1 %1239  ;;  %v1184_v63 = vpop.permute.xlu0 %1183 }
 0x460   : > { %v1186_v0 = vsel %vm1180_vm7, %v1184_v63, 0.0  ;;  %v1242_v7 = vsel %vm1237_vm9, %v1240_v62, 0.0 }
 0x461   : > { %v1225_v1 = vadd.f32 %v1224_v46, %v1186_v0 }
 0x464   : > { %v1247_v2 = vpop.permute.xlu1 %1246  ;;  %v1233_v3 = vpop.permute.xlu0 %1232 }
 0x465   : > { %v1235_v4 = vsel %vm1230_vm8, %v1233_v3, 0.0  ;;  %v1249_v9 = vsel %vm1244_vm10, %v1247_v2, 0.0  ;;  %v1882_v3 = vld [vmem:[#allocation24] ss:$0 sm:$0xff] (!%p1879_p9) }
 0x466   : > { %v1236_v5 = vadd.f32 %v1235_v4, %v1225_v1  ;;  %v1881_v1 = vld [vmem:[#allocation23] ss:$0 sm:$0xff] (!%p1879_p9) }
 0x468   : > { %v1243_v8 = vadd.f32 %v1242_v7, %v1236_v5 }
 0x469   : > { %v1254_v10 = vpop.permute.xlu1 %1253  ;;  %v1261_v13 = vpop.permute.xlu0 %1260 }
 0x46a   : > { %v1250_v11 = vadd.f32 %v1249_v9, %v1243_v8  ;;  %v1256_v12 = vsel %vm1251_vm11, %v1254_v10, 0.0  ;;  %v1263_v15 = vsel %vm1258_vm12, %v1261_v13, 0.0 }
 0x46c   : > { %v1257_v14 = vadd.f32 %v1256_v12, %v1250_v11 }
 0x46e   : > { %v1268_v16 = vpop.permute.xlu1 %1267  ;;  %v1264_v17 = vadd.f32 %v1263_v15, %v1257_v14  ;;  %v1282_v20 = vpop.permute.xlu0 %1281 }
 0x46f   : > { %v1270_v18 = vsel %vm1265_vm13, %v1268_v16, 0.0  ;;  %v1284_v24 = vsel %vm1279_vm15, %v1282_v20, 0.0 }
 0x470   : > { %v1271_v19 = vadd.f32 %v1270_v18, %v1264_v17 }
 0x473   : > { %v1275_v21 = vpop.permute.xlu1 %1274 }
 0x474   : > { %v1277_v22 = vsel %vm1272_vm14, %v1275_v21, 0.0 }
 0x475   : > { %v1278_v23 = vadd.f32 %v1277_v22, %v1271_v19 }
 0x477   : > { %v1285_v26 = vadd.f32 %v1284_v24, %v1278_v23 }
 0x479   : > { %v1293_v27 = vadd.f32 %v1876_v25, %v1285_v26 }
 0x47b   : > { %v1294_v28 = vsel %vm1123_vm3, %v1293_v27, -inf }
 0x47c   : > { %1295 = vmax.xlane.f32.xlu1 %v1294_v28 }
 0x509   : > { %v1296_v29 = vpop.xlane.xlu1 %1295 }
 0x50a   : > { %v1297_v30 = vsub.f32 %v1293_v27, %v1296_v29 }
 0x50c   : > { %v1298_v31 = vmul.f32 1.442695, %v1297_v30 }
 0x50e   : > { %2205 = vpow2.f32 %v1298_v31 }
 0x518   : > { %v2206_v32 = vpop.eup %2205 }
 0x519   : > { %v1300_v33 = vsel %vm1123_vm3, %v2206_v32, 0.0 }
 0x51a   : > { %1301 = vadd.xlane.f32.xlu0 %v1300_v33 }
 0x5a7   : > { %v1302_v36 = vpop.xlane.xlu0 %1301 }
 0x5a8   : > { %2207 = vrcp.f32 %v1302_v36 }
 0x5b2   : > { %v2208_v37 = vpop.eup %2207 }
 0x5b3   : > { %v1304_v38 = vmul.f32 %v2208_v37, %v2206_v32 }
 0x5b5   : > { %1305 = vst.msk [vmem:[%s904_s1] sm:$0xff] %vm1123_vm3, %v1304_v38  ;;  %v1306_v39 = vpack.c.bf16 %v1304_v38, %v1304_v38 }
 0x5b7   : > { %1949 = vmatmul.mubr.msk.bf16.vlgmr.msra.gmra.mrb[8].mxu1 %vm1123_vm3, %v1306_v39 }
 0x68a   : > { %v1348_v40 = vpop.f32.mrb[8].mxu1 }
 0x68b   : > { %v1355_v41 = vpack.c.bf16 %v1348_v40, %v1348_v40  ;;  %v1950_v42 = vpop.f32.mrb[9].mxu1 }
 0x68c   : > { %v1351_v43 = vpop.f32.mrb[10].mxu1 }
 0x68d   : > { %v1951_v44 = vpop.f32.mrb[11].mxu1  ;;  %1955 = vmatmul.mubr.msk.bf16.vlgmr.msra.gmra.mrb[12].mxu0 %vm1123_vm3, %v1355_v41 }
 0x75d   : > { %1408 = sbr.rel (%p1879_p9) target bundleno = 2217 (0x8a9), region = 140 }
 0x760   : > { %v1397_v46 = vpop.f32.mrb[12].mxu0 }
 0x761   : > { %v1403_v47 = vadd.f32 %v1397_v46, %v1354_v45  ;;  %v1956_v48 = vpop.f32.mrb[13].mxu0 }
 0x762   : > { %v1400_v49 = vpop.f32.mrb[14].mxu0 }
 0x763   : > { %1404 = vst.msk [vmem:[#allocation2] sm:$0xff] %vm939_vm2, %v1403_v47  ;;  %v1957_v50 = vpop.f32.mrb[15].mxu0 }
 0x76a   : > { %v1409_v51 = vld [vmem:[#allocation2] sm:$0xff] }
 0x76b   : > { %v1417_v53 = vadd.f32 %v1880_v52, %v1409_v51 }
 0x76d   : > { %v1418_v54 = vadd.f32 %v1417_v53, %v3680_v6 }
 0x76f   : > { %v1419_v55 = vsel %vm939_vm2, %v1418_v54, 0.0 }
 0x770   : > { %1420 = vadd.xlane.f32.xlu0 %v1419_v55 }
 0x7fd   : > { %v1421_v56 = vpop.xlane.xlu0 %1420 }
 0x7fe   : > { %v1423_v57 = vmul.f32 0.03125, %v1421_v56 }
 0x800   : > { %v1424_v58 = vsub.f32 %v1418_v54, %v1423_v57 }
 0x802   : > { %v1425_v59 = vmul.f32 %v1424_v58, %v1424_v58 }
 0x804   : > { %v1426_v60 = vsel %vm939_vm2, %v1425_v59, 0.0 }
 0x805   : > { %1427 = vadd.xlane.f32.xlu0 %v1426_v60 }
 0x892   : > { %v1428_v61 = vpop.xlane.xlu0 %1427 }
 0x893   : > { %v1429_v62 = vmul.f32 0.03125, %v1428_v61 }
 0x895   : > { %v1430_v63 = vadd.f32 1e-05, %v1429_v62 }
 0x897   : > { %2209 = vrsqrt.f32 %v1430_v63 }
 0x8a1   : > { %v2210_v0 = vpop.eup %2209 }
 0x8a2   : > { %v1432_v2 = vmul.f32 %v2210_v0, %v1424_v58 }
 0x8a4   : > { %v1440_v6 = vmul.f32 %v1881_v1, %v1432_v2 }
 0x8a6   : > { %v1448_v4 = vadd.f32 %v1882_v3, %v1440_v6 }
 0x8a8   : > { %1449 = vst.msk [vmem:[%s897_s7] sm:$0xff] %vm939_vm2, %v1448_v4 }
 0x8a9 PF: > { %s4056_s20 = sld [smem:[#allocation51_spill]]  ;;  %s4057_s2 = sld [smem:[#allocation61_spill]] }
 0x8aa   : > { %s4058_s3 = sld [smem:[#allocation80_spill]]  ;;  %s1469_s21 = sshll.u32 %s897_s7, 4  ;;  %s1470_s21 = int_to_ptr.vmem [resolvable:$true] %s1469_s21 }
 0x8ab   : > { %s1451_s18 = scalar_lea.sflag [#allocation5], %s3585_s22  ;;  %s2623_s23 = scalar_lea.vmem %s1470_s21, 128 }
 0x8ac   : > { %p2624_p10 = scmp.ne.s32.totalorder %s1470_s21, %s2623_s23  ;;  %s2871_s24 = smov [#allocation26]  }
 0x8ad   : > { %s2627_s13 = sshll.u32 %s2871_s24, 4  ;;  %s2628_s13 = int_to_ptr.vmem [resolvable:$false] %s2627_s13 }
 0x8ae   : > { %s2629_s8 = scalar_lea.vmem %s2628_s13, 256  ;;  %p2630_p3 = scmp.lt.s32.totalorder %s1470_s21, %s2628_s13 }
 0x8af   : > { %s1885_s28 = sshll.u32 %s4056_s20, 7  ;;  %p4059_p1 = scmp.ne.s32.totalorder %s4057_s2, 0 }
 0x8b0   : > { %s3743_s25 = scalar_lea.hbm %s4058_s3, %s1885_s28  ;;  %p2631_p12 = scmp.lt.s32.totalorder %s2629_s8, %s2623_s23 }
 0x8b1   : > { %p2625_p11 = pnand %p2624_p10, %p4059_p1 }
 0x8b2   : > { %p2632_p7 = por %p2631_p12, %p2630_p3 }
 0x8b3   : > { %p2626_p8 = pneg %p2625_p11 }
 0x8b5   : > { %p2633_p13 = pnand %p2632_p7, %p2626_p8 }
 0x8b7   : > { %2636 = shalt.err (!%p2633_p13)
}
 0x8b8   : > { %s2637_s22 = scalar_lea.hbm %s3743_s25, 128  ;;  %s2641_s7 = scalar_lea.hbm %s4058_s3, 256 }
 0x8b9   : > { %p2638_p0 = scmp.ne.s32.totalorder %s3743_s25, %s2637_s22  ;;  %p2642_p5 = scmp.lt.u32.totalorder %s3743_s25, %s4058_s3 }
 0x8ba   : > { %p2643_p6 = scmp.lt.u32.totalorder %s2641_s7, %s2637_s22  ;;  %p2645_p10 = scmp.lt.u32.totalorder %s2637_s22, %s3743_s25 }
 0x8bb   : > { %p2639_p4 = pnand %p2638_p0, %p4059_p1 }
 0x8bc   : > { %p2644_p9 = por %p2643_p6, %p2642_p5 }
 0x8bd   : > { %p2640_p2 = pneg %p2639_p4 }
 0x8be   : > { %p2646_p11 = por %p2645_p10, %p2644_p9 }
 0x8c0   : > { %p2647_p8 = pnand %p2646_p11, %p2640_p2 }
 0x8c2   : > { %2650 = shalt.err (!%p2647_p8)
}
 0x8c3   : > { %s4060_s28 = sld [smem:[#allocation50_spill]]  ;;  %s4062_s9 = sld [smem:[#allocation64_spill]] }
 0x8c4   : > { %1994 = dma.vmem_to_hbm [thread:$0]  (%p4059_p1), %s1470_s21, 128, %s3743_s25, %s1451_s18  }
 0x8c5   : > { %s1886_s23 = sshll.u32 %s4056_s20, 2  ;;  %s1484_s24 = sshll.u32 %s904_s1, 4  ;;  %s3769_s24 = int_to_ptr.vmem [resolvable:$true] %s1484_s24 }
 0x8c6   : > { %s4063_s2 = sld [smem:[#allocation81_spill]]  ;;  %s1456_s7 = scalar_lea.sflag [#allocation28], %s902_s15 }
 0x8c7   : > { %s2651_s19 = scalar_lea.vmem %s3769_s24, 128  ;;  %s2872_s26 = smov [#allocation27]  }
 0x8c8   : > { %p2652_p3 = scmp.ne.s32.totalorder %s3769_s24, %s2651_s19  ;;  %s2655_s1 = sshll.u32 %s2872_s26, 4  ;;  %s2656_s1 = int_to_ptr.vmem [resolvable:$false] %s2655_s1 }
 0x8c9   : > { %s1480_s13 = sadd.s32 %s4060_s28, %s1886_s23  ;;  %p4064_p12 = scmp.ne.s32.totalorder %s4062_s9, 0 }
 0x8ca   : > { %s1887_s8 = sshll.u32 %s1480_s13, 7  ;;  %s2657_s20 = scalar_lea.vmem %s2656_s1, 256 }
 0x8cb   : > { %p2653_p1 = pnand %p2652_p3, %p4064_p12  ;;  %p2658_p13 = scmp.lt.s32.totalorder %s3769_s24, %s2656_s1 }
 0x8cc   : > { %s1482_s16 = scalar_lea.hbm %s4063_s2, %s1887_s8  ;;  %p2659_p0 = scmp.lt.s32.totalorder %s2657_s20, %s2651_s19 }
 0x8cd   : > { %p2654_p7 = pneg %p2653_p1 }
 0x8ce   : > { %p2660_p4 = por %p2659_p0, %p2658_p13 }
 0x8d0   : > { %p2661_p2 = pnand %p2660_p4, %p2654_p7 }
 0x8d2   : > { %2664 = shalt.err (!%p2661_p2)
}
 0x8d3   : > { %s2665_s25 = scalar_lea.hbm %s1482_s16, 128  ;;  %s2669_s18 = scalar_lea.hbm %s4063_s2, 1024 }
 0x8d4   : > { %p2666_p5 = scmp.ne.s32.totalorder %s1482_s16, %s2665_s25  ;;  %p2670_p10 = scmp.lt.u32.totalorder %s1482_s16, %s4063_s2 }
 0x8d5   : > { %p2671_p11 = scmp.lt.u32.totalorder %s2669_s18, %s2665_s25  ;;  %p2673_p3 = scmp.lt.u32.totalorder %s2665_s25, %s1482_s16 }
 0x8d6   : > { %p2667_p6 = pnand %p2666_p5, %p4064_p12 }
 0x8d7   : > { %p2672_p8 = por %p2671_p11, %p2670_p10 }
 0x8d8   : > { %p2668_p9 = pneg %p2667_p6 }
 0x8d9   : > { %p2674_p1 = por %p2673_p3, %p2672_p8 }
 0x8db   : > { %p2675_p7 = pnand %p2674_p1, %p2668_p9 }
 0x8dd   : > { %2678 = shalt.err (!%p2675_p7)
}
 0x8de   : > { %1995 = dma.vmem_to_hbm [thread:$0]  (%p4064_p12), %s3769_s24, 128, %s1482_s16, %s1456_s7  }
 0x8df PF: > { %s4065_s27 = sld [smem:[#allocation52_spill]]  ;;  %s4066_s23 = sld [smem:[#allocation47_spill]] }
 0x8e0   : > { %s4067_s13 = sld [smem:[#allocation62_spill]] }
 0x8e5   : > { %p2058_p13 = scmp.ge.s32.totalorder %s4065_s27, 2  ;;  %s1496_s8 = sand.u32 1, %s4066_s23  }
 0x8e6   : > { %p4068_p0 = scmp.ne.s32.totalorder %s4067_s13, 0  ;;  %s1497_s22 = scalar_lea.sflag [#allocation5], %s1496_s8 }
 0x8e8   : > { %p2043_p4 = pnand %p2058_p13, %p4068_p0 }
 0x8ea   : > { %2780 = dma.done.wait (!%p2043_p4), %s1497_s22, 128  }
 0x8eb   : > { %2782 = vsyncadd (!%p2043_p4), %s1497_s22, 4294967168  ;;  %s4069_s0 = sld [smem:[#allocation42_spill]]  ;;  %s4070_s19 = sld [smem:[#allocation65_spill]] }
 0x8f1   : > { %s1505_s26 = sand.u32 1, %s4069_s0   ;;  %p4071_p2 = scmp.ne.s32.totalorder %s4070_s19, 0 }
 0x8f2   : > { %s1506_s1 = scalar_lea.sflag [#allocation28], %s1505_s26 }
 0x8f3   : > { %p2046_p5 = pnand %p2058_p13, %p4071_p2 }
 0x8f5   : > { %2784 = dma.done.wait (!%p2046_p5), %s1506_s1, 128  }
 0x8f6   : > { %2786 = vsyncadd (!%p2046_p5), %s1506_s1, 4294967168  ;;  %s52_s16 = sadd.s32 1, %s4065_s27   ;;  %s4073_s18 = sld [smem:[#allocation43_spill]] }
 0x8f7   : > { %p3800_p12 = scmp.ge.s32.totalorder %s52_s16, 10   ;;  %s4074_s19 = sld [smem:[#allocation44_spill]] }
 0x8f8   : > { %s4075_s20 = sld [smem:[#allocation63_spill]]  ;;  %s4077_s22 = sld [smem:[#allocation46_spill]] }
 0x8f9   : > { %s4076_s21 = sld [smem:[#allocation45_spill]]  ;;  %s4078_s23 = sld [smem:[#allocation58_spill]] }
 0x8fa   : > { %s4079_s24 = sld [smem:[#allocation48_spill]]  ;;  %s4080_s25 = sld [smem:[#allocation49_spill]] }
 0x8fb   : > { %s4081_s26 = sld [smem:[#allocation59_spill]]  ;;  %s4082_s7 = sld [smem:[#allocation55_spill]] }
 0x8fc   : > { %s4083_s15 = sld [smem:[#allocation57_spill]]  ;;  %s4084_s27 = smov %s2833_s29 }
 0x8fd   : > { %s4085_s28 = smov %s2837_s30  ;;  %51 = sbr.rel (!%p3800_p12) target bundleno = 41 (0x29), region = 271 }
 0x901   : > { %s4086_s29 = smov %s4082_s7 }
 0x902   : > { %s4087_s30 = smov %s4083_s15 }
 0x904   :  { %1511 = vsyncpa [#allocation4], 1 }
 0x905   :  { %1513 = vsyncpa [#allocation4 + $0x1], 1 }
 0x906   :  { %1514 = vsyncpa [#allocation7], 1 }
 0x907   :  { %1516 = vsyncpa [#allocation7 + $0x1], 1 }
 0x908   :  { %1517 = vsyncpa [#allocation10], 1 }
 0x909   :  { %1519 = vsyncpa [#allocation10 + $0x1], 1 }
 0x90a   :  { %1520 = vsyncpa [#allocation13], 1 }
 0x90b   :  { %1522 = vsyncpa [#allocation13 + $0x1], 1 }
 0x90c   :  { %1523 = vsyncpa [#allocation16], 1 }
 0x90d   :  { %1525 = vsyncpa [#allocation16 + $0x1], 1 }
 0x90e   :  { %1526 = vsyncpa [#allocation19], 1 }
 0x90f   :  { %1528 = vsyncpa [#allocation19 + $0x1], 1 }
 0x910   :  { %1529 = vsyncpa [#allocation22], 1 }
 0x911   :  { %1530 = vsyncpa [#allocation25], 1 }
 0x912   :  { %1531 = vsyncpa [#allocation5], 1 }
 0x913   :  { %1533 = vsyncpa [#allocation5 + $0x1], 1 }
 0x914   :  { %1534 = vsyncpa [#allocation28], 1 }
 0x915   :  { %1536 = vsyncpa [#allocation28 + $0x1], 1 }

</bundles_post_ra>
